<compile_context>
chip_gen: v7x
topology: tpu7x:2x2x1
jax: 0.10.0
libtpu: 0.0.40
codegen_flags: <defaults>
</compile_context>

<pallas_src>
import functools

import jax
import jax.numpy as jnp
from jax import lax
from jax.experimental import pallas as pl
from jax.experimental.pallas import tpu as pltpu


def _bert_embeddings_kernel(ids_ref, gamma_ref, beta_ref, table_ref,
                            out_ref, emb_ref, sems, *, chunk, nbuf, eps):
    # ids_ref:   (N_pad,)          int32  SMEM (scalar prefetch)
    # gamma_ref: (1, H)            f32    VMEM
    # beta_ref:  (1, H)            f32    VMEM
    # table_ref: (V, H)                   HBM (memory_space=pl.ANY), row-gathered via DMA
    # out_ref:   (TILE, H)                VMEM output block
    # emb_ref:   (NBUF, CHUNK, H)         VMEM gather buffers (chunk multi-buffer)
    # sems:      (NBUF,)                  DMA semaphores (one per chunk buffer)
    tile, hidden = out_ref.shape
    n_chunks = tile // chunk
    vocab = table_ref.shape[0]
    n_ids = ids_ref.shape[0]
    base = pl.program_id(0) * tile

    def read_chunk_ids(c):
        # Scalar SMEM reads for one chunk; index clamped so speculative reads past the
        # padded ids array are safe, token clamped to the table (padding ids -> row 0).
        toks = []
        for r in range(chunk):
            idx = jnp.minimum(base + c * chunk + r, n_ids - 1)
            tok = ids_ref[idx]
            tok = jnp.minimum(jnp.maximum(tok, 0), vocab - 1)
            toks.append(tok)
        return toks

    def start_chunk(slot, toks):
        # Fully unrolled per-row DMA issue (keeps descriptor issue rate up).
        for r in range(chunk):
            pltpu.make_async_copy(
                table_ref.at[pl.ds(toks[r], 1)],        # (1, H) row in HBM
                emb_ref.at[slot, pl.ds(r, 1)],          # (1, H) row in chunk buffer
                sems.at[slot],
            ).start()

    def wait_chunk(slot):
        # One wait per started row copy, with identical (1, H) shape/dtype so the
        # semaphore decrement exactly matches each copy's increment (the src row
        # index itself is irrelevant to the wait amount).
        for r in range(chunk):
            pltpu.make_async_copy(
                table_ref.at[pl.ds(0, 1)],
                emb_ref.at[slot, pl.ds(r, 1)],
                sems.at[slot],
            ).wait()

    # ---- Prime NBUF chunks worth of row-gather DMAs. ----
    for b in range(nbuf):
        start_chunk(b, read_chunk_ids(b))

    # Hoist LN affine loads out of the chunk loop.
    gamma = gamma_ref[...]                                  # (1, H)
    beta = beta_ref[...]                                    # (1, H)
    inv_h = 1.0 / hidden

    # ---- Steady state: wait chunk c, LN + store it, refill its buffer. ----
    @pl.loop(0, n_chunks)
    def _(c):
        slot = c % nbuf
        # Hoist next chunk's SMEM id reads above the waits (.wait() breaks SMEM
        # sst->sld forwarding, so no scalar load should trail a wait).
        next_ids = read_chunk_ids(c + nbuf)

        wait_chunk(slot)

        # Interleaved LayerNorm on this chunk while the other chunks' DMAs fly.
        x = emb_ref[slot].astype(jnp.float32)               # (CHUNK, H)
        s1 = jnp.sum(x, axis=-1, keepdims=True)
        s2 = jnp.sum(x * x, axis=-1, keepdims=True)
        mean = s1 * inv_h
        var = s2 * inv_h - mean * mean                      # single-pass variance
        inv = lax.rsqrt(var + eps)
        scale = inv * gamma                                  # folded affine
        shift = beta - mean * scale
        off = pl.multiple_of(c * chunk, chunk)
        # Dropout: inference mode -> identity.
        out_ref[pl.ds(off, chunk), :] = (x * scale + shift).astype(out_ref.dtype)

        # Refill the just-freed buffer with chunk c + nbuf.
        @pl.when(c + nbuf < n_chunks)
        def _():
            start_chunk(slot, next_ids)


def bert_embeddings(input_ids, table, gamma, beta, *,
                    tile=512, chunk=16, nbuf=4):
    """input_ids: (B, S) int32; table: (V, H); gamma/beta: (H,) -> out (B, S, H)."""
    B, S = input_ids.shape
    V, H = table.shape
    N = B * S

    assert tile % chunk == 0, "tile must be a multiple of chunk"
    nbuf = max(1, min(nbuf, tile // chunk))

    # Pad the flattened token axis to a multiple of the tile (pad ids = 0, sliced off).
    n_tiles = pl.cdiv(N, tile)
    n_pad = n_tiles * tile
    ids_flat = input_ids.reshape(N).astype(jnp.int32)
    if n_pad != N:
        ids_flat = jnp.pad(ids_flat, (0, n_pad - N))

    gamma2 = gamma.reshape(1, H).astype(jnp.float32)
    beta2 = beta.reshape(1, H).astype(jnp.float32)

    kernel = functools.partial(_bert_embeddings_kernel,
                               chunk=chunk, nbuf=nbuf, eps=1e-6)

    out_flat = pl.pallas_call(
        kernel,
        out_shape=jax.ShapeDtypeStruct((n_pad, H), table.dtype),
        grid_spec=pltpu.PrefetchScalarGridSpec(
            num_scalar_prefetch=1,                           # ids -> SMEM
            grid=(n_tiles,),
            in_specs=[
                pl.BlockSpec((1, H), lambda i, ids: (0, 0)),  # LayerNorm gamma
                pl.BlockSpec((1, H), lambda i, ids: (0, 0)),  # LayerNorm beta
                pl.BlockSpec(memory_space=pl.ANY),            # table stays in HBM
            ],
            out_specs=pl.BlockSpec((tile, H), lambda i, ids: (i, 0)),
            scratch_shapes=[
                pltpu.VMEM((nbuf, chunk, H), table.dtype),    # chunk gather buffers
                pltpu.SemaphoreType.DMA((nbuf,)),
            ],
        ),
        compiler_params=pltpu.CompilerParams(
            dimension_semantics=("parallel",)),
    )(ids_flat, gamma2, beta2, table)

    return out_flat[:N].reshape(B, S, H)


def _reference(input_ids, table, gamma, beta):
    emb = table[input_ids]
    mu = emb.mean(-1, keepdims=True)
    var = ((emb - mu) ** 2).mean(-1, keepdims=True)
    return (emb - mu) / jnp.sqrt(var + 1e-6) * gamma + beta


if __name__ == "__main__":
    # Small, deterministic config consistent with the module's forward.
    VOCAB = 64
    HIDDEN = 128
    BATCH = 2
    SEQ = 8

    key = jax.random.PRNGKey(0)
    k_tbl, k_ids, k_ids2 = jax.random.split(key, 3)

    # nn.Embedding weight initialized with std=0.02 normal (as in __init__).
    table = 0.02 * jax.random.normal(k_tbl, (VOCAB, HIDDEN), dtype=jnp.float32)
    # nn.LayerNorm default init: gamma=1, beta=0.
    gamma = jnp.ones((HIDDEN,), dtype=jnp.float32)
    beta = jnp.zeros((HIDDEN,), dtype=jnp.float32)

    # Case 1: default large tile (single grid step).
    input_ids = jax.random.randint(k_ids, (BATCH, SEQ), 0, VOCAB, dtype=jnp.int32)
    out = jax.block_until_ready(bert_embeddings(input_ids, table, gamma, beta))
    ref = _reference(input_ids, table, gamma, beta)
    assert out.shape == (BATCH, SEQ, HIDDEN)
    assert jnp.allclose(out, ref, atol=1e-4, rtol=1e-4)

    # Case 2: multiple grid steps + padding (exercises the multi-tile path).
    SEQ2 = 100
    input_ids2 = jax.random.randint(k_ids2, (BATCH, SEQ2), 0, VOCAB, dtype=jnp.int32)
    out2 = jax.block_until_ready(
        bert_embeddings(input_ids2, table, gamma, beta, tile=128, chunk=16, nbuf=4))
    ref2 = _reference(input_ids2, table, gamma, beta)
    assert out2.shape == (BATCH, SEQ2, HIDDEN)
    assert jnp.allclose(out2, ref2, atol=1e-4, rtol=1e-4)

    print("KERNEL_OK")
</pallas_src>

<mosaic_0001>
module attributes {stable_mosaic.version = 11 : i64} {
  func.func @_bert_embeddings_kernel(%arg0: i32, %arg1: memref<512xi32, #tpu.memory_space<smem>>, %arg2: memref<1x128xf32, #tpu.memory_space<vmem>>, %arg3: memref<1x128xf32, #tpu.memory_space<vmem>>, %arg4: memref<64x128xf32, #tpu.memory_space<any>>, %arg5: memref<512x128xf32, #tpu.memory_space<vmem>>, %arg6: memref<4x16x128xf32, #tpu.memory_space<vmem>>, %arg7: memref<4x!tpu.dma_semaphore, #tpu.memory_space<semaphore_mem>>) attributes {dimension_semantics = [#tpu.dimension_semantics<parallel>], iteration_bounds = array<i64: 1>, scalar_prefetch = 1 : i64, scratch_operands = 2 : i64, tpu.core_type = #tpu.core_type<tc>, window_params = [{pipeline_mode = #tpu.pipeline_mode<synchronous>, transform_indices = @transform_0, window_bounds = array<i64: 1, 128>}, {pipeline_mode = #tpu.pipeline_mode<synchronous>, transform_indices = @transform_1, window_bounds = array<i64: 1, 128>}, {}, {transform_indices = @transform_3, window_bounds = array<i64: 512, 128>}]} {
    %c512_i32 = arith.constant 512 : i32
    %0 = arith.muli %arg0, %c512_i32 : i32
    %c0_i32 = arith.constant 0 : i32
    %1 = arith.addi %0, %c0_i32 : i32
    %c0_i32_0 = arith.constant 0 : i32
    %2 = arith.addi %1, %c0_i32_0 : i32
    %c511_i32 = arith.constant 511 : i32
    %3 = arith.minsi %2, %c511_i32 : i32
    %4 = arith.index_cast %3 : i32 to index
    %5 = memref.load %arg1[%4] : memref<512xi32, #tpu.memory_space<smem>>
    %c0_i32_1 = arith.constant 0 : i32
    %6 = arith.maxsi %5, %c0_i32_1 : i32
    %c63_i32 = arith.constant 63 : i32
    %7 = arith.minsi %6, %c63_i32 : i32
    %c0_i32_2 = arith.constant 0 : i32
    %8 = arith.addi %0, %c0_i32_2 : i32
    %c1_i32 = arith.constant 1 : i32
    %9 = arith.addi %8, %c1_i32 : i32
    %c511_i32_3 = arith.constant 511 : i32
    %10 = arith.minsi %9, %c511_i32_3 : i32
    %11 = arith.index_cast %10 : i32 to index
    %12 = memref.load %arg1[%11] : memref<512xi32, #tpu.memory_space<smem>>
    %c0_i32_4 = arith.constant 0 : i32
    %13 = arith.maxsi %12, %c0_i32_4 : i32
    %c63_i32_5 = arith.constant 63 : i32
    %14 = arith.minsi %13, %c63_i32_5 : i32
    %c0_i32_6 = arith.constant 0 : i32
    %15 = arith.addi %0, %c0_i32_6 : i32
    %c2_i32 = arith.constant 2 : i32
    %16 = arith.addi %15, %c2_i32 : i32
    %c511_i32_7 = arith.constant 511 : i32
    %17 = arith.minsi %16, %c511_i32_7 : i32
    %18 = arith.index_cast %17 : i32 to index
    %19 = memref.load %arg1[%18] : memref<512xi32, #tpu.memory_space<smem>>
    %c0_i32_8 = arith.constant 0 : i32
    %20 = arith.maxsi %19, %c0_i32_8 : i32
    %c63_i32_9 = arith.constant 63 : i32
    %21 = arith.minsi %20, %c63_i32_9 : i32
    %c0_i32_10 = arith.constant 0 : i32
    %22 = arith.addi %0, %c0_i32_10 : i32
    %c3_i32 = arith.constant 3 : i32
    %23 = arith.addi %22, %c3_i32 : i32
    %c511_i32_11 = arith.constant 511 : i32
    %24 = arith.minsi %23, %c511_i32_11 : i32
    %25 = arith.index_cast %24 : i32 to index
    %26 = memref.load %arg1[%25] : memref<512xi32, #tpu.memory_space<smem>>
    %c0_i32_12 = arith.constant 0 : i32
    %27 = arith.maxsi %26, %c0_i32_12 : i32
    %c63_i32_13 = arith.constant 63 : i32
    %28 = arith.minsi %27, %c63_i32_13 : i32
    %c0_i32_14 = arith.constant 0 : i32
    %29 = arith.addi %0, %c0_i32_14 : i32
    %c4_i32 = arith.constant 4 : i32
    %30 = arith.addi %29, %c4_i32 : i32
    %c511_i32_15 = arith.constant 511 : i32
    %31 = arith.minsi %30, %c511_i32_15 : i32
    %32 = arith.index_cast %31 : i32 to index
    %33 = memref.load %arg1[%32] : memref<512xi32, #tpu.memory_space<smem>>
    %c0_i32_16 = arith.constant 0 : i32
    %34 = arith.maxsi %33, %c0_i32_16 : i32
    %c63_i32_17 = arith.constant 63 : i32
    %35 = arith.minsi %34, %c63_i32_17 : i32
    %c0_i32_18 = arith.constant 0 : i32
    %36 = arith.addi %0, %c0_i32_18 : i32
    %c5_i32 = arith.constant 5 : i32
    %37 = arith.addi %36, %c5_i32 : i32
    %c511_i32_19 = arith.constant 511 : i32
    %38 = arith.minsi %37, %c511_i32_19 : i32
    %39 = arith.index_cast %38 : i32 to index
    %40 = memref.load %arg1[%39] : memref<512xi32, #tpu.memory_space<smem>>
    %c0_i32_20 = arith.constant 0 : i32
    %41 = arith.maxsi %40, %c0_i32_20 : i32
    %c63_i32_21 = arith.constant 63 : i32
    %42 = arith.minsi %41, %c63_i32_21 : i32
    %c0_i32_22 = arith.constant 0 : i32
    %43 = arith.addi %0, %c0_i32_22 : i32
    %c6_i32 = arith.constant 6 : i32
    %44 = arith.addi %43, %c6_i32 : i32
    %c511_i32_23 = arith.constant 511 : i32
    %45 = arith.minsi %44, %c511_i32_23 : i32
    %46 = arith.index_cast %45 : i32 to index
    %47 = memref.load %arg1[%46] : memref<512xi32, #tpu.memory_space<smem>>
    %c0_i32_24 = arith.constant 0 : i32
    %48 = arith.maxsi %47, %c0_i32_24 : i32
    %c63_i32_25 = arith.constant 63 : i32
    %49 = arith.minsi %48, %c63_i32_25 : i32
    %c0_i32_26 = arith.constant 0 : i32
    %50 = arith.addi %0, %c0_i32_26 : i32
    %c7_i32 = arith.constant 7 : i32
    %51 = arith.addi %50, %c7_i32 : i32
    %c511_i32_27 = arith.constant 511 : i32
    %52 = arith.minsi %51, %c511_i32_27 : i32
    %53 = arith.index_cast %52 : i32 to index
    %54 = memref.load %arg1[%53] : memref<512xi32, #tpu.memory_space<smem>>
    %c0_i32_28 = arith.constant 0 : i32
    %55 = arith.maxsi %54, %c0_i32_28 : i32
    %c63_i32_29 = arith.constant 63 : i32
    %56 = arith.minsi %55, %c63_i32_29 : i32
    %c0_i32_30 = arith.constant 0 : i32
    %57 = arith.addi %0, %c0_i32_30 : i32
    %c8_i32 = arith.constant 8 : i32
    %58 = arith.addi %57, %c8_i32 : i32
    %c511_i32_31 = arith.constant 511 : i32
    %59 = arith.minsi %58, %c511_i32_31 : i32
    %60 = arith.index_cast %59 : i32 to index
    %61 = memref.load %arg1[%60] : memref<512xi32, #tpu.memory_space<smem>>
    %c0_i32_32 = arith.constant 0 : i32
    %62 = arith.maxsi %61, %c0_i32_32 : i32
    %c63_i32_33 = arith.constant 63 : i32
    %63 = arith.minsi %62, %c63_i32_33 : i32
    %c0_i32_34 = arith.constant 0 : i32
    %64 = arith.addi %0, %c0_i32_34 : i32
    %c9_i32 = arith.constant 9 : i32
    %65 = arith.addi %64, %c9_i32 : i32
    %c511_i32_35 = arith.constant 511 : i32
    %66 = arith.minsi %65, %c511_i32_35 : i32
    %67 = arith.index_cast %66 : i32 to index
    %68 = memref.load %arg1[%67] : memref<512xi32, #tpu.memory_space<smem>>
    %c0_i32_36 = arith.constant 0 : i32
    %69 = arith.maxsi %68, %c0_i32_36 : i32
    %c63_i32_37 = arith.constant 63 : i32
    %70 = arith.minsi %69, %c63_i32_37 : i32
    %c0_i32_38 = arith.constant 0 : i32
    %71 = arith.addi %0, %c0_i32_38 : i32
    %c10_i32 = arith.constant 10 : i32
    %72 = arith.addi %71, %c10_i32 : i32
    %c511_i32_39 = arith.constant 511 : i32
    %73 = arith.minsi %72, %c511_i32_39 : i32
    %74 = arith.index_cast %73 : i32 to index
    %75 = memref.load %arg1[%74] : memref<512xi32, #tpu.memory_space<smem>>
    %c0_i32_40 = arith.constant 0 : i32
    %76 = arith.maxsi %75, %c0_i32_40 : i32
    %c63_i32_41 = arith.constant 63 : i32
    %77 = arith.minsi %76, %c63_i32_41 : i32
    %c0_i32_42 = arith.constant 0 : i32
    %78 = arith.addi %0, %c0_i32_42 : i32
    %c11_i32 = arith.constant 11 : i32
    %79 = arith.addi %78, %c11_i32 : i32
    %c511_i32_43 = arith.constant 511 : i32
    %80 = arith.minsi %79, %c511_i32_43 : i32
    %81 = arith.index_cast %80 : i32 to index
    %82 = memref.load %arg1[%81] : memref<512xi32, #tpu.memory_space<smem>>
    %c0_i32_44 = arith.constant 0 : i32
    %83 = arith.maxsi %82, %c0_i32_44 : i32
    %c63_i32_45 = arith.constant 63 : i32
    %84 = arith.minsi %83, %c63_i32_45 : i32
    %c0_i32_46 = arith.constant 0 : i32
    %85 = arith.addi %0, %c0_i32_46 : i32
    %c12_i32 = arith.constant 12 : i32
    %86 = arith.addi %85, %c12_i32 : i32
    %c511_i32_47 = arith.constant 511 : i32
    %87 = arith.minsi %86, %c511_i32_47 : i32
    %88 = arith.index_cast %87 : i32 to index
    %89 = memref.load %arg1[%88] : memref<512xi32, #tpu.memory_space<smem>>
    %c0_i32_48 = arith.constant 0 : i32
    %90 = arith.maxsi %89, %c0_i32_48 : i32
    %c63_i32_49 = arith.constant 63 : i32
    %91 = arith.minsi %90, %c63_i32_49 : i32
    %c0_i32_50 = arith.constant 0 : i32
    %92 = arith.addi %0, %c0_i32_50 : i32
    %c13_i32 = arith.constant 13 : i32
    %93 = arith.addi %92, %c13_i32 : i32
    %c511_i32_51 = arith.constant 511 : i32
    %94 = arith.minsi %93, %c511_i32_51 : i32
    %95 = arith.index_cast %94 : i32 to index
    %96 = memref.load %arg1[%95] : memref<512xi32, #tpu.memory_space<smem>>
    %c0_i32_52 = arith.constant 0 : i32
    %97 = arith.maxsi %96, %c0_i32_52 : i32
    %c63_i32_53 = arith.constant 63 : i32
    %98 = arith.minsi %97, %c63_i32_53 : i32
    %c0_i32_54 = arith.constant 0 : i32
    %99 = arith.addi %0, %c0_i32_54 : i32
    %c14_i32 = arith.constant 14 : i32
    %100 = arith.addi %99, %c14_i32 : i32
    %c511_i32_55 = arith.constant 511 : i32
    %101 = arith.minsi %100, %c511_i32_55 : i32
    %102 = arith.index_cast %101 : i32 to index
    %103 = memref.load %arg1[%102] : memref<512xi32, #tpu.memory_space<smem>>
    %c0_i32_56 = arith.constant 0 : i32
    %104 = arith.maxsi %103, %c0_i32_56 : i32
    %c63_i32_57 = arith.constant 63 : i32
    %105 = arith.minsi %104, %c63_i32_57 : i32
    %c0_i32_58 = arith.constant 0 : i32
    %106 = arith.addi %0, %c0_i32_58 : i32
    %c15_i32 = arith.constant 15 : i32
    %107 = arith.addi %106, %c15_i32 : i32
    %c511_i32_59 = arith.constant 511 : i32
    %108 = arith.minsi %107, %c511_i32_59 : i32
    %109 = arith.index_cast %108 : i32 to index
    %110 = memref.load %arg1[%109] : memref<512xi32, #tpu.memory_space<smem>>
    %c0_i32_60 = arith.constant 0 : i32
    %111 = arith.maxsi %110, %c0_i32_60 : i32
    %c63_i32_61 = arith.constant 63 : i32
    %112 = arith.minsi %111, %c63_i32_61 : i32
    %c0_i32_62 = arith.constant 0 : i32
    %c0_i32_63 = arith.constant 0 : i32
    %c0_i32_64 = arith.constant 0 : i32
    %113 = tpu.memref_slice %arg4[%7, %c0_i32_64] : memref<64x128xf32, #tpu.memory_space<any>> -> memref<1x128xf32, #tpu.memory_space<any>>
    %c0_i32_65 = arith.constant 0 : i32
    %c0_i32_66 = arith.constant 0 : i32
    %114 = tpu.memref_slice %arg6[%c0_i32_62, %c0_i32_65, %c0_i32_66] : memref<4x16x128xf32, #tpu.memory_space<vmem>> -> memref<1x1x128xf32, #tpu.memory_space<vmem>>
    %115 = tpu.memref_squeeze %114 : memref<1x1x128xf32, #tpu.memory_space<vmem>> -> memref<1x128xf32, #tpu.memory_space<vmem>>
    %116 = tpu.memref_slice %arg7[%c0_i32_63] : memref<4x!tpu.dma_semaphore, #tpu.memory_space<semaphore_mem>> -> memref<1x!tpu.dma_semaphore, #tpu.memory_space<semaphore_mem>>
    %117 = tpu.memref_squeeze %116 : memref<1x!tpu.dma_semaphore, #tpu.memory_space<semaphore_mem>> -> memref<!tpu.dma_semaphore, #tpu.memory_space<semaphore_mem>>
    tpu.enqueue_dma source(%113 : memref<1x128xf32, #tpu.memory_space<any>>) target(%115 : memref<1x128xf32, #tpu.memory_space<vmem>>) target_semaphore(%117 : memref<!tpu.dma_semaphore, #tpu.memory_space<semaphore_mem>>)
    %c0_i32_67 = arith.constant 0 : i32
    %c0_i32_68 = arith.constant 0 : i32
    %c0_i32_69 = arith.constant 0 : i32
    %118 = tpu.memref_slice %arg4[%14, %c0_i32_69] : memref<64x128xf32, #tpu.memory_space<any>> -> memref<1x128xf32, #tpu.memory_space<any>>
    %c1_i32_70 = arith.constant 1 : i32
    %c0_i32_71 = arith.constant 0 : i32
    %119 = tpu.memref_slice %arg6[%c0_i32_67, %c1_i32_70, %c0_i32_71] : memref<4x16x128xf32, #tpu.memory_space<vmem>> -> memref<1x1x128xf32, #tpu.memory_space<vmem>>
    %120 = tpu.memref_squeeze %119 : memref<1x1x128xf32, #tpu.memory_space<vmem>> -> memref<1x128xf32, #tpu.memory_space<vmem>>
    %121 = tpu.memref_slice %arg7[%c0_i32_68] : memref<4x!tpu.dma_semaphore, #tpu.memory_space<semaphore_mem>> -> memref<1x!tpu.dma_semaphore, #tpu.memory_space<semaphore_mem>>
    %122 = tpu.memref_squeeze %121 : memref<1x!tpu.dma_semaphore, #tpu.memory_space<semaphore_mem>> -> memref<!tpu.dma_semaphore, #tpu.memory_space<semaphore_mem>>
    tpu.enqueue_dma source(%118 : memref<1x128xf32, #tpu.memory_space<any>>) target(%120 : memref<1x128xf32, #tpu.memory_space<vmem>>) target_semaphore(%122 : memref<!tpu.dma_semaphore, #tpu.memory_space<semaphore_mem>>)
    %c0_i32_72 = arith.constant 0 : i32
    %c0_i32_73 = arith.constant 0 : i32
    %c0_i32_74 = arith.constant 0 : i32
    %123 = tpu.memref_slice %arg4[%21, %c0_i32_74] : memref<64x128xf32, #tpu.memory_space<any>> -> memref<1x128xf32, #tpu.memory_space<any>>
    %c2_i32_75 = arith.constant 2 : i32
    %c0_i32_76 = arith.constant 0 : i32
    %124 = tpu.memref_slice %arg6[%c0_i32_72, %c2_i32_75, %c0_i32_76] : memref<4x16x128xf32, #tpu.memory_space<vmem>> -> memref<1x1x128xf32, #tpu.memory_space<vmem>>
    %125 = tpu.memref_squeeze %124 : memref<1x1x128xf32, #tpu.memory_space<vmem>> -> memref<1x128xf32, #tpu.memory_space<vmem>>
    %126 = tpu.memref_slice %arg7[%c0_i32_73] : memref<4x!tpu.dma_semaphore, #tpu.memory_space<semaphore_mem>> -> memref<1x!tpu.dma_semaphore, #tpu.memory_space<semaphore_mem>>
    %127 = tpu.memref_squeeze %126 : memref<1x!tpu.dma_semaphore, #tpu.memory_space<semaphore_mem>> -> memref<!tpu.dma_semaphore, #tpu.memory_space<semaphore_mem>>
    tpu.enqueue_dma source(%123 : memref<1x128xf32, #tpu.memory_space<any>>) target(%125 : memref<1x128xf32, #tpu.memory_space<vmem>>) target_semaphore(%127 : memref<!tpu.dma_semaphore, #tpu.memory_space<semaphore_mem>>)
    %c0_i32_77 = arith.constant 0 : i32
    %c0_i32_78 = arith.constant 0 : i32
    %c0_i32_79 = arith.constant 0 : i32
    %128 = tpu.memref_slice %arg4[%28, %c0_i32_79] : memref<64x128xf32, #tpu.memory_space<any>> -> memref<1x128xf32, #tpu.memory_space<any>>
    %c3_i32_80 = arith.constant 3 : i32
    %c0_i32_81 = arith.constant 0 : i32
    %129 = tpu.memref_slice %arg6[%c0_i32_77, %c3_i32_80, %c0_i32_81] : memref<4x16x128xf32, #tpu.memory_space<vmem>> -> memref<1x1x128xf32, #tpu.memory_space<vmem>>
    %130 = tpu.memref_squeeze %129 : memref<1x1x128xf32, #tpu.memory_space<vmem>> -> memref<1x128xf32, #tpu.memory_space<vmem>>
    %131 = tpu.memref_slice %arg7[%c0_i32_78] : memref<4x!tpu.dma_semaphore, #tpu.memory_space<semaphore_mem>> -> memref<1x!tpu.dma_semaphore, #tpu.memory_space<semaphore_mem>>
    %132 = tpu.memref_squeeze %131 : memref<1x!tpu.dma_semaphore, #tpu.memory_space<semaphore_mem>> -> memref<!tpu.dma_semaphore, #tpu.memory_space<semaphore_mem>>
    tpu.enqueue_dma source(%128 : memref<1x128xf32, #tpu.memory_space<any>>) target(%130 : memref<1x128xf32, #tpu.memory_space<vmem>>) target_semaphore(%132 : memref<!tpu.dma_semaphore, #tpu.memory_space<semaphore_mem>>)
    %c0_i32_82 = arith.constant 0 : i32
    %c0_i32_83 = arith.constant 0 : i32
    %c0_i32_84 = arith.constant 0 : i32
    %133 = tpu.memref_slice %arg4[%35, %c0_i32_84] : memref<64x128xf32, #tpu.memory_space<any>> -> memref<1x128xf32, #tpu.memory_space<any>>
    %c4_i32_85 = arith.constant 4 : i32
    %c0_i32_86 = arith.constant 0 : i32
    %134 = tpu.memref_slice %arg6[%c0_i32_82, %c4_i32_85, %c0_i32_86] : memref<4x16x128xf32, #tpu.memory_space<vmem>> -> memref<1x1x128xf32, #tpu.memory_space<vmem>>
    %135 = tpu.memref_squeeze %134 : memref<1x1x128xf32, #tpu.memory_space<vmem>> -> memref<1x128xf32, #tpu.memory_space<vmem>>
    %136 = tpu.memref_slice %arg7[%c0_i32_83] : memref<4x!tpu.dma_semaphore, #tpu.memory_space<semaphore_mem>> -> memref<1x!tpu.dma_semaphore, #tpu.memory_space<semaphore_mem>>
    %137 = tpu.memref_squeeze %136 : memref<1x!tpu.dma_semaphore, #tpu.memory_space<semaphore_mem>> -> memref<!tpu.dma_semaphore, #tpu.memory_space<semaphore_mem>>
    tpu.enqueue_dma source(%133 : memref<1x128xf32, #tpu.memory_space<any>>) target(%135 : memref<1x128xf32, #tpu.memory_space<vmem>>) target_semaphore(%137 : memref<!tpu.dma_semaphore, #tpu.memory_space<semaphore_mem>>)
    %c0_i32_87 = arith.constant 0 : i32
    %c0_i32_88 = arith.constant 0 : i32
    %c0_i32_89 = arith.constant 0 : i32
    %138 = tpu.memref_slice %arg4[%42, %c0_i32_89] : memref<64x128xf32, #tpu.memory_space<any>> -> memref<1x128xf32, #tpu.memory_space<any>>
    %c5_i32_90 = arith.constant 5 : i32
    %c0_i32_91 = arith.constant 0 : i32
    %139 = tpu.memref_slice %arg6[%c0_i32_87, %c5_i32_90, %c0_i32_91] : memref<4x16x128xf32, #tpu.memory_space<vmem>> -> memref<1x1x128xf32, #tpu.memory_space<vmem>>
    %140 = tpu.memref_squeeze %139 : memref<1x1x128xf32, #tpu.memory_space<vmem>> -> memref<1x128xf32, #tpu.memory_space<vmem>>
    %141 = tpu.memref_slice %arg7[%c0_i32_88] : memref<4x!tpu.dma_semaphore, #tpu.memory_space<semaphore_mem>> -> memref<1x!tpu.dma_semaphore, #tpu.memory_space<semaphore_mem>>
    %142 = tpu.memref_squeeze %141 : memref<1x!tpu.dma_semaphore, #tpu.memory_space<semaphore_mem>> -> memref<!tpu.dma_semaphore, #tpu.memory_space<semaphore_mem>>
    tpu.enqueue_dma source(%138 : memref<1x128xf32, #tpu.memory_space<any>>) target(%140 : memref<1x128xf32, #tpu.memory_space<vmem>>) target_semaphore(%142 : memref<!tpu.dma_semaphore, #tpu.memory_space<semaphore_mem>>)
    %c0_i32_92 = arith.constant 0 : i32
    %c0_i32_93 = arith.constant 0 : i32
    %c0_i32_94 = arith.constant 0 : i32
    %143 = tpu.memref_slice %arg4[%49, %c0_i32_94] : memref<64x128xf32, #tpu.memory_space<any>> -> memref<1x128xf32, #tpu.memory_space<any>>
    %c6_i32_95 = arith.constant 6 : i32
    %c0_i32_96 = arith.constant 0 : i32
    %144 = tpu.memref_slice %arg6[%c0_i32_92, %c6_i32_95, %c0_i32_96] : memref<4x16x128xf32, #tpu.memory_space<vmem>> -> memref<1x1x128xf32, #tpu.memory_space<vmem>>
    %145 = tpu.memref_squeeze %144 : memref<1x1x128xf32, #tpu.memory_space<vmem>> -> memref<1x128xf32, #tpu.memory_space<vmem>>
    %146 = tpu.memref_slice %arg7[%c0_i32_93] : memref<4x!tpu.dma_semaphore, #tpu.memory_space<semaphore_mem>> -> memref<1x!tpu.dma_semaphore, #tpu.memory_space<semaphore_mem>>
    %147 = tpu.memref_squeeze %146 : memref<1x!tpu.dma_semaphore, #tpu.memory_space<semaphore_mem>> -> memref<!tpu.dma_semaphore, #tpu.memory_space<semaphore_mem>>
    tpu.enqueue_dma source(%143 : memref<1x128xf32, #tpu.memory_space<any>>) target(%145 : memref<1x128xf32, #tpu.memory_space<vmem>>) target_semaphore(%147 : memref<!tpu.dma_semaphore, #tpu.memory_space<semaphore_mem>>)
    %c0_i32_97 = arith.constant 0 : i32
    %c0_i32_98 = arith.constant 0 : i32
    %c0_i32_99 = arith.constant 0 : i32
    %148 = tpu.memref_slice %arg4[%56, %c0_i32_99] : memref<64x128xf32, #tpu.memory_space<any>> -> memref<1x128xf32, #tpu.memory_space<any>>
    %c7_i32_100 = arith.constant 7 : i32
    %c0_i32_101 = arith.constant 0 : i32
    %149 = tpu.memref_slice %arg6[%c0_i32_97, %c7_i32_100, %c0_i32_101] : memref<4x16x128xf32, #tpu.memory_space<vmem>> -> memref<1x1x128xf32, #tpu.memory_space<vmem>>
    %150 = tpu.memref_squeeze %149 : memref<1x1x128xf32, #tpu.memory_space<vmem>> -> memref<1x128xf32, #tpu.memory_space<vmem>>
    %151 = tpu.memref_slice %arg7[%c0_i32_98] : memref<4x!tpu.dma_semaphore, #tpu.memory_space<semaphore_mem>> -> memref<1x!tpu.dma_semaphore, #tpu.memory_space<semaphore_mem>>
    %152 = tpu.memref_squeeze %151 : memref<1x!tpu.dma_semaphore, #tpu.memory_space<semaphore_mem>> -> memref<!tpu.dma_semaphore, #tpu.memory_space<semaphore_mem>>
    tpu.enqueue_dma source(%148 : memref<1x128xf32, #tpu.memory_space<any>>) target(%150 : memref<1x128xf32, #tpu.memory_space<vmem>>) target_semaphore(%152 : memref<!tpu.dma_semaphore, #tpu.memory_space<semaphore_mem>>)
    %c0_i32_102 = arith.constant 0 : i32
    %c0_i32_103 = arith.constant 0 : i32
    %c0_i32_104 = arith.constant 0 : i32
    %153 = tpu.memref_slice %arg4[%63, %c0_i32_104] : memref<64x128xf32, #tpu.memory_space<any>> -> memref<1x128xf32, #tpu.memory_space<any>>
    %c8_i32_105 = arith.constant 8 : i32
    %c0_i32_106 = arith.constant 0 : i32
    %154 = tpu.memref_slice %arg6[%c0_i32_102, %c8_i32_105, %c0_i32_106] : memref<4x16x128xf32, #tpu.memory_space<vmem>> -> memref<1x1x128xf32, #tpu.memory_space<vmem>>
    %155 = tpu.memref_squeeze %154 : memref<1x1x128xf32, #tpu.memory_space<vmem>> -> memref<1x128xf32, #tpu.memory_space<vmem>>
    %156 = tpu.memref_slice %arg7[%c0_i32_103] : memref<4x!tpu.dma_semaphore, #tpu.memory_space<semaphore_mem>> -> memref<1x!tpu.dma_semaphore, #tpu.memory_space<semaphore_mem>>
    %157 = tpu.memref_squeeze %156 : memref<1x!tpu.dma_semaphore, #tpu.memory_space<semaphore_mem>> -> memref<!tpu.dma_semaphore, #tpu.memory_space<semaphore_mem>>
    tpu.enqueue_dma source(%153 : memref<1x128xf32, #tpu.memory_space<any>>) target(%155 : memref<1x128xf32, #tpu.memory_space<vmem>>) target_semaphore(%157 : memref<!tpu.dma_semaphore, #tpu.memory_space<semaphore_mem>>)
    %c0_i32_107 = arith.constant 0 : i32
    %c0_i32_108 = arith.constant 0 : i32
    %c0_i32_109 = arith.constant 0 : i32
    %158 = tpu.memref_slice %arg4[%70, %c0_i32_109] : memref<64x128xf32, #tpu.memory_space<any>> -> memref<1x128xf32, #tpu.memory_space<any>>
    %c9_i32_110 = arith.constant 9 : i32
    %c0_i32_111 = arith.constant 0 : i32
    %159 = tpu.memref_slice %arg6[%c0_i32_107, %c9_i32_110, %c0_i32_111] : memref<4x16x128xf32, #tpu.memory_space<vmem>> -> memref<1x1x128xf32, #tpu.memory_space<vmem>>
    %160 = tpu.memref_squeeze %159 : memref<1x1x128xf32, #tpu.memory_space<vmem>> -> memref<1x128xf32, #tpu.memory_space<vmem>>
    %161 = tpu.memref_slice %arg7[%c0_i32_108] : memref<4x!tpu.dma_semaphore, #tpu.memory_space<semaphore_mem>> -> memref<1x!tpu.dma_semaphore, #tpu.memory_space<semaphore_mem>>
    %162 = tpu.memref_squeeze %161 : memref<1x!tpu.dma_semaphore, #tpu.memory_space<semaphore_mem>> -> memref<!tpu.dma_semaphore, #tpu.memory_space<semaphore_mem>>
    tpu.enqueue_dma source(%158 : memref<1x128xf32, #tpu.memory_space<any>>) target(%160 : memref<1x128xf32, #tpu.memory_space<vmem>>) target_semaphore(%162 : memref<!tpu.dma_semaphore, #tpu.memory_space<semaphore_mem>>)
    %c0_i32_112 = arith.constant 0 : i32
    %c0_i32_113 = arith.constant 0 : i32
    %c0_i32_114 = arith.constant 0 : i32
    %163 = tpu.memref_slice %arg4[%77, %c0_i32_114] : memref<64x128xf32, #tpu.memory_space<any>> -> memref<1x128xf32, #tpu.memory_space<any>>
    %c10_i32_115 = arith.constant 10 : i32
    %c0_i32_116 = arith.constant 0 : i32
    %164 = tpu.memref_slice %arg6[%c0_i32_112, %c10_i32_115, %c0_i32_116] : memref<4x16x128xf32, #tpu.memory_space<vmem>> -> memref<1x1x128xf32, #tpu.memory_space<vmem>>
    %165 = tpu.memref_squeeze %164 : memref<1x1x128xf32, #tpu.memory_space<vmem>> -> memref<1x128xf32, #tpu.memory_space<vmem>>
    %166 = tpu.memref_slice %arg7[%c0_i32_113] : memref<4x!tpu.dma_semaphore, #tpu.memory_space<semaphore_mem>> -> memref<1x!tpu.dma_semaphore, #tpu.memory_space<semaphore_mem>>
    %167 = tpu.memref_squeeze %166 : memref<1x!tpu.dma_semaphore, #tpu.memory_space<semaphore_mem>> -> memref<!tpu.dma_semaphore, #tpu.memory_space<semaphore_mem>>
    tpu.enqueue_dma source(%163 : memref<1x128xf32, #tpu.memory_space<any>>) target(%165 : memref<1x128xf32, #tpu.memory_space<vmem>>) target_semaphore(%167 : memref<!tpu.dma_semaphore, #tpu.memory_space<semaphore_mem>>)
    %c0_i32_117 = arith.constant 0 : i32
    %c0_i32_118 = arith.constant 0 : i32
    %c0_i32_119 = arith.constant 0 : i32
    %168 = tpu.memref_slice %arg4[%84, %c0_i32_119] : memref<64x128xf32, #tpu.memory_space<any>> -> memref<1x128xf32, #tpu.memory_space<any>>
    %c11_i32_120 = arith.constant 11 : i32
    %c0_i32_121 = arith.constant 0 : i32
    %169 = tpu.memref_slice %arg6[%c0_i32_117, %c11_i32_120, %c0_i32_121] : memref<4x16x128xf32, #tpu.memory_space<vmem>> -> memref<1x1x128xf32, #tpu.memory_space<vmem>>
    %170 = tpu.memref_squeeze %169 : memref<1x1x128xf32, #tpu.memory_space<vmem>> -> memref<1x128xf32, #tpu.memory_space<vmem>>
    %171 = tpu.memref_slice %arg7[%c0_i32_118] : memref<4x!tpu.dma_semaphore, #tpu.memory_space<semaphore_mem>> -> memref<1x!tpu.dma_semaphore, #tpu.memory_space<semaphore_mem>>
    %172 = tpu.memref_squeeze %171 : memref<1x!tpu.dma_semaphore, #tpu.memory_space<semaphore_mem>> -> memref<!tpu.dma_semaphore, #tpu.memory_space<semaphore_mem>>
    tpu.enqueue_dma source(%168 : memref<1x128xf32, #tpu.memory_space<any>>) target(%170 : memref<1x128xf32, #tpu.memory_space<vmem>>) target_semaphore(%172 : memref<!tpu.dma_semaphore, #tpu.memory_space<semaphore_mem>>)
    %c0_i32_122 = arith.constant 0 : i32
    %c0_i32_123 = arith.constant 0 : i32
    %c0_i32_124 = arith.constant 0 : i32
    %173 = tpu.memref_slice %arg4[%91, %c0_i32_124] : memref<64x128xf32, #tpu.memory_space<any>> -> memref<1x128xf32, #tpu.memory_space<any>>
    %c12_i32_125 = arith.constant 12 : i32
    %c0_i32_126 = arith.constant 0 : i32
    %174 = tpu.memref_slice %arg6[%c0_i32_122, %c12_i32_125, %c0_i32_126] : memref<4x16x128xf32, #tpu.memory_space<vmem>> -> memref<1x1x128xf32, #tpu.memory_space<vmem>>
    %175 = tpu.memref_squeeze %174 : memref<1x1x128xf32, #tpu.memory_space<vmem>> -> memref<1x128xf32, #tpu.memory_space<vmem>>
    %176 = tpu.memref_slice %arg7[%c0_i32_123] : memref<4x!tpu.dma_semaphore, #tpu.memory_space<semaphore_mem>> -> memref<1x!tpu.dma_semaphore, #tpu.memory_space<semaphore_mem>>
    %177 = tpu.memref_squeeze %176 : memref<1x!tpu.dma_semaphore, #tpu.memory_space<semaphore_mem>> -> memref<!tpu.dma_semaphore, #tpu.memory_space<semaphore_mem>>
    tpu.enqueue_dma source(%173 : memref<1x128xf32, #tpu.memory_space<any>>) target(%175 : memref<1x128xf32, #tpu.memory_space<vmem>>) target_semaphore(%177 : memref<!tpu.dma_semaphore, #tpu.memory_space<semaphore_mem>>)
    %c0_i32_127 = arith.constant 0 : i32
    %c0_i32_128 = arith.constant 0 : i32
    %c0_i32_129 = arith.constant 0 : i32
    %178 = tpu.memref_slice %arg4[%98, %c0_i32_129] : memref<64x128xf32, #tpu.memory_space<any>> -> memref<1x128xf32, #tpu.memory_space<any>>
    %c13_i32_130 = arith.constant 13 : i32
    %c0_i32_131 = arith.constant 0 : i32
    %179 = tpu.memref_slice %arg6[%c0_i32_127, %c13_i32_130, %c0_i32_131] : memref<4x16x128xf32, #tpu.memory_space<vmem>> -> memref<1x1x128xf32, #tpu.memory_space<vmem>>
    %180 = tpu.memref_squeeze %179 : memref<1x1x128xf32, #tpu.memory_space<vmem>> -> memref<1x128xf32, #tpu.memory_space<vmem>>
    %181 = tpu.memref_slice %arg7[%c0_i32_128] : memref<4x!tpu.dma_semaphore, #tpu.memory_space<semaphore_mem>> -> memref<1x!tpu.dma_semaphore, #tpu.memory_space<semaphore_mem>>
    %182 = tpu.memref_squeeze %181 : memref<1x!tpu.dma_semaphore, #tpu.memory_space<semaphore_mem>> -> memref<!tpu.dma_semaphore, #tpu.memory_space<semaphore_mem>>
    tpu.enqueue_dma source(%178 : memref<1x128xf32, #tpu.memory_space<any>>) target(%180 : memref<1x128xf32, #tpu.memory_space<vmem>>) target_semaphore(%182 : memref<!tpu.dma_semaphore, #tpu.memory_space<semaphore_mem>>)
    %c0_i32_132 = arith.constant 0 : i32
    %c0_i32_133 = arith.constant 0 : i32
    %c0_i32_134 = arith.constant 0 : i32
    %183 = tpu.memref_slice %arg4[%105, %c0_i32_134] : memref<64x128xf32, #tpu.memory_space<any>> -> memref<1x128xf32, #tpu.memory_space<any>>
    %c14_i32_135 = arith.constant 14 : i32
    %c0_i32_136 = arith.constant 0 : i32
    %184 = tpu.memref_slice %arg6[%c0_i32_132, %c14_i32_135, %c0_i32_136] : memref<4x16x128xf32, #tpu.memory_space<vmem>> -> memref<1x1x128xf32, #tpu.memory_space<vmem>>
    %185 = tpu.memref_squeeze %184 : memref<1x1x128xf32, #tpu.memory_space<vmem>> -> memref<1x128xf32, #tpu.memory_space<vmem>>
    %186 = tpu.memref_slice %arg7[%c0_i32_133] : memref<4x!tpu.dma_semaphore, #tpu.memory_space<semaphore_mem>> -> memref<1x!tpu.dma_semaphore, #tpu.memory_space<semaphore_mem>>
    %187 = tpu.memref_squeeze %186 : memref<1x!tpu.dma_semaphore, #tpu.memory_space<semaphore_mem>> -> memref<!tpu.dma_semaphore, #tpu.memory_space<semaphore_mem>>
    tpu.enqueue_dma source(%183 : memref<1x128xf32, #tpu.memory_space<any>>) target(%185 : memref<1x128xf32, #tpu.memory_space<vmem>>) target_semaphore(%187 : memref<!tpu.dma_semaphore, #tpu.memory_space<semaphore_mem>>)
    %c0_i32_137 = arith.constant 0 : i32
    %c0_i32_138 = arith.constant 0 : i32
    %c0_i32_139 = arith.constant 0 : i32
    %188 = tpu.memref_slice %arg4[%112, %c0_i32_139] : memref<64x128xf32, #tpu.memory_space<any>> -> memref<1x128xf32, #tpu.memory_space<any>>
    %c15_i32_140 = arith.constant 15 : i32
    %c0_i32_141 = arith.constant 0 : i32
    %189 = tpu.memref_slice %arg6[%c0_i32_137, %c15_i32_140, %c0_i32_141] : memref<4x16x128xf32, #tpu.memory_space<vmem>> -> memref<1x1x128xf32, #tpu.memory_space<vmem>>
    %190 = tpu.memref_squeeze %189 : memref<1x1x128xf32, #tpu.memory_space<vmem>> -> memref<1x128xf32, #tpu.memory_space<vmem>>
    %191 = tpu.memref_slice %arg7[%c0_i32_138] : memref<4x!tpu.dma_semaphore, #tpu.memory_space<semaphore_mem>> -> memref<1x!tpu.dma_semaphore, #tpu.memory_space<semaphore_mem>>
    %192 = tpu.memref_squeeze %191 : memref<1x!tpu.dma_semaphore, #tpu.memory_space<semaphore_mem>> -> memref<!tpu.dma_semaphore, #tpu.memory_space<semaphore_mem>>
    tpu.enqueue_dma source(%188 : memref<1x128xf32, #tpu.memory_space<any>>) target(%190 : memref<1x128xf32, #tpu.memory_space<vmem>>) target_semaphore(%192 : memref<!tpu.dma_semaphore, #tpu.memory_space<semaphore_mem>>)
    %c16_i32 = arith.constant 16 : i32
    %193 = arith.addi %0, %c16_i32 : i32
    %c0_i32_142 = arith.constant 0 : i32
    %194 = arith.addi %193, %c0_i32_142 : i32
    %c511_i32_143 = arith.constant 511 : i32
    %195 = arith.minsi %194, %c511_i32_143 : i32
    %196 = arith.index_cast %195 : i32 to index
    %197 = memref.load %arg1[%196] : memref<512xi32, #tpu.memory_space<smem>>
    %c0_i32_144 = arith.constant 0 : i32
    %198 = arith.maxsi %197, %c0_i32_144 : i32
    %c63_i32_145 = arith.constant 63 : i32
    %199 = arith.minsi %198, %c63_i32_145 : i32
    %c16_i32_146 = arith.constant 16 : i32
    %200 = arith.addi %0, %c16_i32_146 : i32
    %c1_i32_147 = arith.constant 1 : i32
    %201 = arith.addi %200, %c1_i32_147 : i32
    %c511_i32_148 = arith.constant 511 : i32
    %202 = arith.minsi %201, %c511_i32_148 : i32
    %203 = arith.index_cast %202 : i32 to index
    %204 = memref.load %arg1[%203] : memref<512xi32, #tpu.memory_space<smem>>
    %c0_i32_149 = arith.constant 0 : i32
    %205 = arith.maxsi %204, %c0_i32_149 : i32
    %c63_i32_150 = arith.constant 63 : i32
    %206 = arith.minsi %205, %c63_i32_150 : i32
    %c16_i32_151 = arith.constant 16 : i32
    %207 = arith.addi %0, %c16_i32_151 : i32
    %c2_i32_152 = arith.constant 2 : i32
    %208 = arith.addi %207, %c2_i32_152 : i32
    %c511_i32_153 = arith.constant 511 : i32
    %209 = arith.minsi %208, %c511_i32_153 : i32
    %210 = arith.index_cast %209 : i32 to index
    %211 = memref.load %arg1[%210] : memref<512xi32, #tpu.memory_space<smem>>
    %c0_i32_154 = arith.constant 0 : i32
    %212 = arith.maxsi %211, %c0_i32_154 : i32
    %c63_i32_155 = arith.constant 63 : i32
    %213 = arith.minsi %212, %c63_i32_155 : i32
    %c16_i32_156 = arith.constant 16 : i32
    %214 = arith.addi %0, %c16_i32_156 : i32
    %c3_i32_157 = arith.constant 3 : i32
    %215 = arith.addi %214, %c3_i32_157 : i32
    %c511_i32_158 = arith.constant 511 : i32
    %216 = arith.minsi %215, %c511_i32_158 : i32
    %217 = arith.index_cast %216 : i32 to index
    %218 = memref.load %arg1[%217] : memref<512xi32, #tpu.memory_space<smem>>
    %c0_i32_159 = arith.constant 0 : i32
    %219 = arith.maxsi %218, %c0_i32_159 : i32
    %c63_i32_160 = arith.constant 63 : i32
    %220 = arith.minsi %219, %c63_i32_160 : i32
    %c16_i32_161 = arith.constant 16 : i32
    %221 = arith.addi %0, %c16_i32_161 : i32
    %c4_i32_162 = arith.constant 4 : i32
    %222 = arith.addi %221, %c4_i32_162 : i32
    %c511_i32_163 = arith.constant 511 : i32
    %223 = arith.minsi %222, %c511_i32_163 : i32
    %224 = arith.index_cast %223 : i32 to index
    %225 = memref.load %arg1[%224] : memref<512xi32, #tpu.memory_space<smem>>
    %c0_i32_164 = arith.constant 0 : i32
    %226 = arith.maxsi %225, %c0_i32_164 : i32
    %c63_i32_165 = arith.constant 63 : i32
    %227 = arith.minsi %226, %c63_i32_165 : i32
    %c16_i32_166 = arith.constant 16 : i32
    %228 = arith.addi %0, %c16_i32_166 : i32
    %c5_i32_167 = arith.constant 5 : i32
    %229 = arith.addi %228, %c5_i32_167 : i32
    %c511_i32_168 = arith.constant 511 : i32
    %230 = arith.minsi %229, %c511_i32_168 : i32
    %231 = arith.index_cast %230 : i32 to index
    %232 = memref.load %arg1[%231] : memref<512xi32, #tpu.memory_space<smem>>
    %c0_i32_169 = arith.constant 0 : i32
    %233 = arith.maxsi %232, %c0_i32_169 : i32
    %c63_i32_170 = arith.constant 63 : i32
    %234 = arith.minsi %233, %c63_i32_170 : i32
    %c16_i32_171 = arith.constant 16 : i32
    %235 = arith.addi %0, %c16_i32_171 : i32
    %c6_i32_172 = arith.constant 6 : i32
    %236 = arith.addi %235, %c6_i32_172 : i32
    %c511_i32_173 = arith.constant 511 : i32
    %237 = arith.minsi %236, %c511_i32_173 : i32
    %238 = arith.index_cast %237 : i32 to index
    %239 = memref.load %arg1[%238] : memref<512xi32, #tpu.memory_space<smem>>
    %c0_i32_174 = arith.constant 0 : i32
    %240 = arith.maxsi %239, %c0_i32_174 : i32
    %c63_i32_175 = arith.constant 63 : i32
    %241 = arith.minsi %240, %c63_i32_175 : i32
    %c16_i32_176 = arith.constant 16 : i32
    %242 = arith.addi %0, %c16_i32_176 : i32
    %c7_i32_177 = arith.constant 7 : i32
    %243 = arith.addi %242, %c7_i32_177 : i32
    %c511_i32_178 = arith.constant 511 : i32
    %244 = arith.minsi %243, %c511_i32_178 : i32
    %245 = arith.index_cast %244 : i32 to index
    %246 = memref.load %arg1[%245] : memref<512xi32, #tpu.memory_space<smem>>
    %c0_i32_179 = arith.constant 0 : i32
    %247 = arith.maxsi %246, %c0_i32_179 : i32
    %c63_i32_180 = arith.constant 63 : i32
    %248 = arith.minsi %247, %c63_i32_180 : i32
    %c16_i32_181 = arith.constant 16 : i32
    %249 = arith.addi %0, %c16_i32_181 : i32
    %c8_i32_182 = arith.constant 8 : i32
    %250 = arith.addi %249, %c8_i32_182 : i32
    %c511_i32_183 = arith.constant 511 : i32
    %251 = arith.minsi %250, %c511_i32_183 : i32
    %252 = arith.index_cast %251 : i32 to index
    %253 = memref.load %arg1[%252] : memref<512xi32, #tpu.memory_space<smem>>
    %c0_i32_184 = arith.constant 0 : i32
    %254 = arith.maxsi %253, %c0_i32_184 : i32
    %c63_i32_185 = arith.constant 63 : i32
    %255 = arith.minsi %254, %c63_i32_185 : i32
    %c16_i32_186 = arith.constant 16 : i32
    %256 = arith.addi %0, %c16_i32_186 : i32
    %c9_i32_187 = arith.constant 9 : i32
    %257 = arith.addi %256, %c9_i32_187 : i32
    %c511_i32_188 = arith.constant 511 : i32
    %258 = arith.minsi %257, %c511_i32_188 : i32
    %259 = arith.index_cast %258 : i32 to index
    %260 = memref.load %arg1[%259] : memref<512xi32, #tpu.memory_space<smem>>
    %c0_i32_189 = arith.constant 0 : i32
    %261 = arith.maxsi %260, %c0_i32_189 : i32
    %c63_i32_190 = arith.constant 63 : i32
    %262 = arith.minsi %261, %c63_i32_190 : i32
    %c16_i32_191 = arith.constant 16 : i32
    %263 = arith.addi %0, %c16_i32_191 : i32
    %c10_i32_192 = arith.constant 10 : i32
    %264 = arith.addi %263, %c10_i32_192 : i32
    %c511_i32_193 = arith.constant 511 : i32
    %265 = arith.minsi %264, %c511_i32_193 : i32
    %266 = arith.index_cast %265 : i32 to index
    %267 = memref.load %arg1[%266] : memref<512xi32, #tpu.memory_space<smem>>
    %c0_i32_194 = arith.constant 0 : i32
    %268 = arith.maxsi %267, %c0_i32_194 : i32
    %c63_i32_195 = arith.constant 63 : i32
    %269 = arith.minsi %268, %c63_i32_195 : i32
    %c16_i32_196 = arith.constant 16 : i32
    %270 = arith.addi %0, %c16_i32_196 : i32
    %c11_i32_197 = arith.constant 11 : i32
    %271 = arith.addi %270, %c11_i32_197 : i32
    %c511_i32_198 = arith.constant 511 : i32
    %272 = arith.minsi %271, %c511_i32_198 : i32
    %273 = arith.index_cast %272 : i32 to index
    %274 = memref.load %arg1[%273] : memref<512xi32, #tpu.memory_space<smem>>
    %c0_i32_199 = arith.constant 0 : i32
    %275 = arith.maxsi %274, %c0_i32_199 : i32
    %c63_i32_200 = arith.constant 63 : i32
    %276 = arith.minsi %275, %c63_i32_200 : i32
    %c16_i32_201 = arith.constant 16 : i32
    %277 = arith.addi %0, %c16_i32_201 : i32
    %c12_i32_202 = arith.constant 12 : i32
    %278 = arith.addi %277, %c12_i32_202 : i32
    %c511_i32_203 = arith.constant 511 : i32
    %279 = arith.minsi %278, %c511_i32_203 : i32
    %280 = arith.index_cast %279 : i32 to index
    %281 = memref.load %arg1[%280] : memref<512xi32, #tpu.memory_space<smem>>
    %c0_i32_204 = arith.constant 0 : i32
    %282 = arith.maxsi %281, %c0_i32_204 : i32
    %c63_i32_205 = arith.constant 63 : i32
    %283 = arith.minsi %282, %c63_i32_205 : i32
    %c16_i32_206 = arith.constant 16 : i32
    %284 = arith.addi %0, %c16_i32_206 : i32
    %c13_i32_207 = arith.constant 13 : i32
    %285 = arith.addi %284, %c13_i32_207 : i32
    %c511_i32_208 = arith.constant 511 : i32
    %286 = arith.minsi %285, %c511_i32_208 : i32
    %287 = arith.index_cast %286 : i32 to index
    %288 = memref.load %arg1[%287] : memref<512xi32, #tpu.memory_space<smem>>
    %c0_i32_209 = arith.constant 0 : i32
    %289 = arith.maxsi %288, %c0_i32_209 : i32
    %c63_i32_210 = arith.constant 63 : i32
    %290 = arith.minsi %289, %c63_i32_210 : i32
    %c16_i32_211 = arith.constant 16 : i32
    %291 = arith.addi %0, %c16_i32_211 : i32
    %c14_i32_212 = arith.constant 14 : i32
    %292 = arith.addi %291, %c14_i32_212 : i32
    %c511_i32_213 = arith.constant 511 : i32
    %293 = arith.minsi %292, %c511_i32_213 : i32
    %294 = arith.index_cast %293 : i32 to index
    %295 = memref.load %arg1[%294] : memref<512xi32, #tpu.memory_space<smem>>
    %c0_i32_214 = arith.constant 0 : i32
    %296 = arith.maxsi %295, %c0_i32_214 : i32
    %c63_i32_215 = arith.constant 63 : i32
    %297 = arith.minsi %296, %c63_i32_215 : i32
    %c16_i32_216 = arith.constant 16 : i32
    %298 = arith.addi %0, %c16_i32_216 : i32
    %c15_i32_217 = arith.constant 15 : i32
    %299 = arith.addi %298, %c15_i32_217 : i32
    %c511_i32_218 = arith.constant 511 : i32
    %300 = arith.minsi %299, %c511_i32_218 : i32
    %301 = arith.index_cast %300 : i32 to index
    %302 = memref.load %arg1[%301] : memref<512xi32, #tpu.memory_space<smem>>
    %c0_i32_219 = arith.constant 0 : i32
    %303 = arith.maxsi %302, %c0_i32_219 : i32
    %c63_i32_220 = arith.constant 63 : i32
    %304 = arith.minsi %303, %c63_i32_220 : i32
    %c1_i32_221 = arith.constant 1 : i32
    %c1_i32_222 = arith.constant 1 : i32
    %c0_i32_223 = arith.constant 0 : i32
    %305 = tpu.memref_slice %arg4[%199, %c0_i32_223] : memref<64x128xf32, #tpu.memory_space<any>> -> memref<1x128xf32, #tpu.memory_space<any>>
    %c0_i32_224 = arith.constant 0 : i32
    %c0_i32_225 = arith.constant 0 : i32
    %306 = tpu.memref_slice %arg6[%c1_i32_221, %c0_i32_224, %c0_i32_225] : memref<4x16x128xf32, #tpu.memory_space<vmem>> -> memref<1x1x128xf32, #tpu.memory_space<vmem>>
    %307 = tpu.memref_squeeze %306 : memref<1x1x128xf32, #tpu.memory_space<vmem>> -> memref<1x128xf32, #tpu.memory_space<vmem>>
    %308 = tpu.memref_slice %arg7[%c1_i32_222] : memref<4x!tpu.dma_semaphore, #tpu.memory_space<semaphore_mem>> -> memref<1x!tpu.dma_semaphore, #tpu.memory_space<semaphore_mem>>
    %309 = tpu.memref_squeeze %308 : memref<1x!tpu.dma_semaphore, #tpu.memory_space<semaphore_mem>> -> memref<!tpu.dma_semaphore, #tpu.memory_space<semaphore_mem>>
    tpu.enqueue_dma source(%305 : memref<1x128xf32, #tpu.memory_space<any>>) target(%307 : memref<1x128xf32, #tpu.memory_space<vmem>>) target_semaphore(%309 : memref<!tpu.dma_semaphore, #tpu.memory_space<semaphore_mem>>)
    %c1_i32_226 = arith.constant 1 : i32
    %c1_i32_227 = arith.constant 1 : i32
    %c0_i32_228 = arith.constant 0 : i32
    %310 = tpu.memref_slice %arg4[%206, %c0_i32_228] : memref<64x128xf32, #tpu.memory_space<any>> -> memref<1x128xf32, #tpu.memory_space<any>>
    %c1_i32_229 = arith.constant 1 : i32
    %c0_i32_230 = arith.constant 0 : i32
    %311 = tpu.memref_slice %arg6[%c1_i32_226, %c1_i32_229, %c0_i32_230] : memref<4x16x128xf32, #tpu.memory_space<vmem>> -> memref<1x1x128xf32, #tpu.memory_space<vmem>>
    %312 = tpu.memref_squeeze %311 : memref<1x1x128xf32, #tpu.memory_space<vmem>> -> memref<1x128xf32, #tpu.memory_space<vmem>>
    %313 = tpu.memref_slice %arg7[%c1_i32_227] : memref<4x!tpu.dma_semaphore, #tpu.memory_space<semaphore_mem>> -> memref<1x!tpu.dma_semaphore, #tpu.memory_space<semaphore_mem>>
    %314 = tpu.memref_squeeze %313 : memref<1x!tpu.dma_semaphore, #tpu.memory_space<semaphore_mem>> -> memref<!tpu.dma_semaphore, #tpu.memory_space<semaphore_mem>>
    tpu.enqueue_dma source(%310 : memref<1x128xf32, #tpu.memory_space<any>>) target(%312 : memref<1x128xf32, #tpu.memory_space<vmem>>) target_semaphore(%314 : memref<!tpu.dma_semaphore, #tpu.memory_space<semaphore_mem>>)
    %c1_i32_231 = arith.constant 1 : i32
    %c1_i32_232 = arith.constant 1 : i32
    %c0_i32_233 = arith.constant 0 : i32
    %315 = tpu.memref_slice %arg4[%213, %c0_i32_233] : memref<64x128xf32, #tpu.memory_space<any>> -> memref<1x128xf32, #tpu.memory_space<any>>
    %c2_i32_234 = arith.constant 2 : i32
    %c0_i32_235 = arith.constant 0 : i32
    %316 = tpu.memref_slice %arg6[%c1_i32_231, %c2_i32_234, %c0_i32_235] : memref<4x16x128xf32, #tpu.memory_space<vmem>> -> memref<1x1x128xf32, #tpu.memory_space<vmem>>
    %317 = tpu.memref_squeeze %316 : memref<1x1x128xf32, #tpu.memory_space<vmem>> -> memref<1x128xf32, #tpu.memory_space<vmem>>
    %318 = tpu.memref_slice %arg7[%c1_i32_232] : memref<4x!tpu.dma_semaphore, #tpu.memory_space<semaphore_mem>> -> memref<1x!tpu.dma_semaphore, #tpu.memory_space<semaphore_mem>>
    %319 = tpu.memref_squeeze %318 : memref<1x!tpu.dma_semaphore, #tpu.memory_space<semaphore_mem>> -> memref<!tpu.dma_semaphore, #tpu.memory_space<semaphore_mem>>
    tpu.enqueue_dma source(%315 : memref<1x128xf32, #tpu.memory_space<any>>) target(%317 : memref<1x128xf32, #tpu.memory_space<vmem>>) target_semaphore(%319 : memref<!tpu.dma_semaphore, #tpu.memory_space<semaphore_mem>>)
    %c1_i32_236 = arith.constant 1 : i32
    %c1_i32_237 = arith.constant 1 : i32
    %c0_i32_238 = arith.constant 0 : i32
    %320 = tpu.memref_slice %arg4[%220, %c0_i32_238] : memref<64x128xf32, #tpu.memory_space<any>> -> memref<1x128xf32, #tpu.memory_space<any>>
    %c3_i32_239 = arith.constant 3 : i32
    %c0_i32_240 = arith.constant 0 : i32
    %321 = tpu.memref_slice %arg6[%c1_i32_236, %c3_i32_239, %c0_i32_240] : memref<4x16x128xf32, #tpu.memory_space<vmem>> -> memref<1x1x128xf32, #tpu.memory_space<vmem>>
    %322 = tpu.memref_squeeze %321 : memref<1x1x128xf32, #tpu.memory_space<vmem>> -> memref<1x128xf32, #tpu.memory_space<vmem>>
    %323 = tpu.memref_slice %arg7[%c1_i32_237] : memref<4x!tpu.dma_semaphore, #tpu.memory_space<semaphore_mem>> -> memref<1x!tpu.dma_semaphore, #tpu.memory_space<semaphore_mem>>
    %324 = tpu.memref_squeeze %323 : memref<1x!tpu.dma_semaphore, #tpu.memory_space<semaphore_mem>> -> memref<!tpu.dma_semaphore, #tpu.memory_space<semaphore_mem>>
    tpu.enqueue_dma source(%320 : memref<1x128xf32, #tpu.memory_space<any>>) target(%322 : memref<1x128xf32, #tpu.memory_space<vmem>>) target_semaphore(%324 : memref<!tpu.dma_semaphore, #tpu.memory_space<semaphore_mem>>)
    %c1_i32_241 = arith.constant 1 : i32
    %c1_i32_242 = arith.constant 1 : i32
    %c0_i32_243 = arith.constant 0 : i32
    %325 = tpu.memref_slice %arg4[%227, %c0_i32_243] : memref<64x128xf32, #tpu.memory_space<any>> -> memref<1x128xf32, #tpu.memory_space<any>>
    %c4_i32_244 = arith.constant 4 : i32
    %c0_i32_245 = arith.constant 0 : i32
    %326 = tpu.memref_slice %arg6[%c1_i32_241, %c4_i32_244, %c0_i32_245] : memref<4x16x128xf32, #tpu.memory_space<vmem>> -> memref<1x1x128xf32, #tpu.memory_space<vmem>>
    %327 = tpu.memref_squeeze %326 : memref<1x1x128xf32, #tpu.memory_space<vmem>> -> memref<1x128xf32, #tpu.memory_space<vmem>>
    %328 = tpu.memref_slice %arg7[%c1_i32_242] : memref<4x!tpu.dma_semaphore, #tpu.memory_space<semaphore_mem>> -> memref<1x!tpu.dma_semaphore, #tpu.memory_space<semaphore_mem>>
    %329 = tpu.memref_squeeze %328 : memref<1x!tpu.dma_semaphore, #tpu.memory_space<semaphore_mem>> -> memref<!tpu.dma_semaphore, #tpu.memory_space<semaphore_mem>>
    tpu.enqueue_dma source(%325 : memref<1x128xf32, #tpu.memory_space<any>>) target(%327 : memref<1x128xf32, #tpu.memory_space<vmem>>) target_semaphore(%329 : memref<!tpu.dma_semaphore, #tpu.memory_space<semaphore_mem>>)
    %c1_i32_246 = arith.constant 1 : i32
    %c1_i32_247 = arith.constant 1 : i32
    %c0_i32_248 = arith.constant 0 : i32
    %330 = tpu.memref_slice %arg4[%234, %c0_i32_248] : memref<64x128xf32, #tpu.memory_space<any>> -> memref<1x128xf32, #tpu.memory_space<any>>
    %c5_i32_249 = arith.constant 5 : i32
    %c0_i32_250 = arith.constant 0 : i32
    %331 = tpu.memref_slice %arg6[%c1_i32_246, %c5_i32_249, %c0_i32_250] : memref<4x16x128xf32, #tpu.memory_space<vmem>> -> memref<1x1x128xf32, #tpu.memory_space<vmem>>
    %332 = tpu.memref_squeeze %331 : memref<1x1x128xf32, #tpu.memory_space<vmem>> -> memref<1x128xf32, #tpu.memory_space<vmem>>
    %333 = tpu.memref_slice %arg7[%c1_i32_247] : memref<4x!tpu.dma_semaphore, #tpu.memory_space<semaphore_mem>> -> memref<1x!tpu.dma_semaphore, #tpu.memory_space<semaphore_mem>>
    %334 = tpu.memref_squeeze %333 : memref<1x!tpu.dma_semaphore, #tpu.memory_space<semaphore_mem>> -> memref<!tpu.dma_semaphore, #tpu.memory_space<semaphore_mem>>
    tpu.enqueue_dma source(%330 : memref<1x128xf32, #tpu.memory_space<any>>) target(%332 : memref<1x128xf32, #tpu.memory_space<vmem>>) target_semaphore(%334 : memref<!tpu.dma_semaphore, #tpu.memory_space<semaphore_mem>>)
    %c1_i32_251 = arith.constant 1 : i32
    %c1_i32_252 = arith.constant 1 : i32
    %c0_i32_253 = arith.constant 0 : i32
    %335 = tpu.memref_slice %arg4[%241, %c0_i32_253] : memref<64x128xf32, #tpu.memory_space<any>> -> memref<1x128xf32, #tpu.memory_space<any>>
    %c6_i32_254 = arith.constant 6 : i32
    %c0_i32_255 = arith.constant 0 : i32
    %336 = tpu.memref_slice %arg6[%c1_i32_251, %c6_i32_254, %c0_i32_255] : memref<4x16x128xf32, #tpu.memory_space<vmem>> -> memref<1x1x128xf32, #tpu.memory_space<vmem>>
    %337 = tpu.memref_squeeze %336 : memref<1x1x128xf32, #tpu.memory_space<vmem>> -> memref<1x128xf32, #tpu.memory_space<vmem>>
    %338 = tpu.memref_slice %arg7[%c1_i32_252] : memref<4x!tpu.dma_semaphore, #tpu.memory_space<semaphore_mem>> -> memref<1x!tpu.dma_semaphore, #tpu.memory_space<semaphore_mem>>
    %339 = tpu.memref_squeeze %338 : memref<1x!tpu.dma_semaphore, #tpu.memory_space<semaphore_mem>> -> memref<!tpu.dma_semaphore, #tpu.memory_space<semaphore_mem>>
    tpu.enqueue_dma source(%335 : memref<1x128xf32, #tpu.memory_space<any>>) target(%337 : memref<1x128xf32, #tpu.memory_space<vmem>>) target_semaphore(%339 : memref<!tpu.dma_semaphore, #tpu.memory_space<semaphore_mem>>)
    %c1_i32_256 = arith.constant 1 : i32
    %c1_i32_257 = arith.constant 1 : i32
    %c0_i32_258 = arith.constant 0 : i32
    %340 = tpu.memref_slice %arg4[%248, %c0_i32_258] : memref<64x128xf32, #tpu.memory_space<any>> -> memref<1x128xf32, #tpu.memory_space<any>>
    %c7_i32_259 = arith.constant 7 : i32
    %c0_i32_260 = arith.constant 0 : i32
    %341 = tpu.memref_slice %arg6[%c1_i32_256, %c7_i32_259, %c0_i32_260] : memref<4x16x128xf32, #tpu.memory_space<vmem>> -> memref<1x1x128xf32, #tpu.memory_space<vmem>>
    %342 = tpu.memref_squeeze %341 : memref<1x1x128xf32, #tpu.memory_space<vmem>> -> memref<1x128xf32, #tpu.memory_space<vmem>>
    %343 = tpu.memref_slice %arg7[%c1_i32_257] : memref<4x!tpu.dma_semaphore, #tpu.memory_space<semaphore_mem>> -> memref<1x!tpu.dma_semaphore, #tpu.memory_space<semaphore_mem>>
    %344 = tpu.memref_squeeze %343 : memref<1x!tpu.dma_semaphore, #tpu.memory_space<semaphore_mem>> -> memref<!tpu.dma_semaphore, #tpu.memory_space<semaphore_mem>>
    tpu.enqueue_dma source(%340 : memref<1x128xf32, #tpu.memory_space<any>>) target(%342 : memref<1x128xf32, #tpu.memory_space<vmem>>) target_semaphore(%344 : memref<!tpu.dma_semaphore, #tpu.memory_space<semaphore_mem>>)
    %c1_i32_261 = arith.constant 1 : i32
    %c1_i32_262 = arith.constant 1 : i32
    %c0_i32_263 = arith.constant 0 : i32
    %345 = tpu.memref_slice %arg4[%255, %c0_i32_263] : memref<64x128xf32, #tpu.memory_space<any>> -> memref<1x128xf32, #tpu.memory_space<any>>
    %c8_i32_264 = arith.constant 8 : i32
    %c0_i32_265 = arith.constant 0 : i32
    %346 = tpu.memref_slice %arg6[%c1_i32_261, %c8_i32_264, %c0_i32_265] : memref<4x16x128xf32, #tpu.memory_space<vmem>> -> memref<1x1x128xf32, #tpu.memory_space<vmem>>
    %347 = tpu.memref_squeeze %346 : memref<1x1x128xf32, #tpu.memory_space<vmem>> -> memref<1x128xf32, #tpu.memory_space<vmem>>
    %348 = tpu.memref_slice %arg7[%c1_i32_262] : memref<4x!tpu.dma_semaphore, #tpu.memory_space<semaphore_mem>> -> memref<1x!tpu.dma_semaphore, #tpu.memory_space<semaphore_mem>>
    %349 = tpu.memref_squeeze %348 : memref<1x!tpu.dma_semaphore, #tpu.memory_space<semaphore_mem>> -> memref<!tpu.dma_semaphore, #tpu.memory_space<semaphore_mem>>
    tpu.enqueue_dma source(%345 : memref<1x128xf32, #tpu.memory_space<any>>) target(%347 : memref<1x128xf32, #tpu.memory_space<vmem>>) target_semaphore(%349 : memref<!tpu.dma_semaphore, #tpu.memory_space<semaphore_mem>>)
    %c1_i32_266 = arith.constant 1 : i32
    %c1_i32_267 = arith.constant 1 : i32
    %c0_i32_268 = arith.constant 0 : i32
    %350 = tpu.memref_slice %arg4[%262, %c0_i32_268] : memref<64x128xf32, #tpu.memory_space<any>> -> memref<1x128xf32, #tpu.memory_space<any>>
    %c9_i32_269 = arith.constant 9 : i32
    %c0_i32_270 = arith.constant 0 : i32
    %351 = tpu.memref_slice %arg6[%c1_i32_266, %c9_i32_269, %c0_i32_270] : memref<4x16x128xf32, #tpu.memory_space<vmem>> -> memref<1x1x128xf32, #tpu.memory_space<vmem>>
    %352 = tpu.memref_squeeze %351 : memref<1x1x128xf32, #tpu.memory_space<vmem>> -> memref<1x128xf32, #tpu.memory_space<vmem>>
    %353 = tpu.memref_slice %arg7[%c1_i32_267] : memref<4x!tpu.dma_semaphore, #tpu.memory_space<semaphore_mem>> -> memref<1x!tpu.dma_semaphore, #tpu.memory_space<semaphore_mem>>
    %354 = tpu.memref_squeeze %353 : memref<1x!tpu.dma_semaphore, #tpu.memory_space<semaphore_mem>> -> memref<!tpu.dma_semaphore, #tpu.memory_space<semaphore_mem>>
    tpu.enqueue_dma source(%350 : memref<1x128xf32, #tpu.memory_space<any>>) target(%352 : memref<1x128xf32, #tpu.memory_space<vmem>>) target_semaphore(%354 : memref<!tpu.dma_semaphore, #tpu.memory_space<semaphore_mem>>)
    %c1_i32_271 = arith.constant 1 : i32
    %c1_i32_272 = arith.constant 1 : i32
    %c0_i32_273 = arith.constant 0 : i32
    %355 = tpu.memref_slice %arg4[%269, %c0_i32_273] : memref<64x128xf32, #tpu.memory_space<any>> -> memref<1x128xf32, #tpu.memory_space<any>>
    %c10_i32_274 = arith.constant 10 : i32
    %c0_i32_275 = arith.constant 0 : i32
    %356 = tpu.memref_slice %arg6[%c1_i32_271, %c10_i32_274, %c0_i32_275] : memref<4x16x128xf32, #tpu.memory_space<vmem>> -> memref<1x1x128xf32, #tpu.memory_space<vmem>>
    %357 = tpu.memref_squeeze %356 : memref<1x1x128xf32, #tpu.memory_space<vmem>> -> memref<1x128xf32, #tpu.memory_space<vmem>>
    %358 = tpu.memref_slice %arg7[%c1_i32_272] : memref<4x!tpu.dma_semaphore, #tpu.memory_space<semaphore_mem>> -> memref<1x!tpu.dma_semaphore, #tpu.memory_space<semaphore_mem>>
    %359 = tpu.memref_squeeze %358 : memref<1x!tpu.dma_semaphore, #tpu.memory_space<semaphore_mem>> -> memref<!tpu.dma_semaphore, #tpu.memory_space<semaphore_mem>>
    tpu.enqueue_dma source(%355 : memref<1x128xf32, #tpu.memory_space<any>>) target(%357 : memref<1x128xf32, #tpu.memory_space<vmem>>) target_semaphore(%359 : memref<!tpu.dma_semaphore, #tpu.memory_space<semaphore_mem>>)
    %c1_i32_276 = arith.constant 1 : i32
    %c1_i32_277 = arith.constant 1 : i32
    %c0_i32_278 = arith.constant 0 : i32
    %360 = tpu.memref_slice %arg4[%276, %c0_i32_278] : memref<64x128xf32, #tpu.memory_space<any>> -> memref<1x128xf32, #tpu.memory_space<any>>
    %c11_i32_279 = arith.constant 11 : i32
    %c0_i32_280 = arith.constant 0 : i32
    %361 = tpu.memref_slice %arg6[%c1_i32_276, %c11_i32_279, %c0_i32_280] : memref<4x16x128xf32, #tpu.memory_space<vmem>> -> memref<1x1x128xf32, #tpu.memory_space<vmem>>
    %362 = tpu.memref_squeeze %361 : memref<1x1x128xf32, #tpu.memory_space<vmem>> -> memref<1x128xf32, #tpu.memory_space<vmem>>
    %363 = tpu.memref_slice %arg7[%c1_i32_277] : memref<4x!tpu.dma_semaphore, #tpu.memory_space<semaphore_mem>> -> memref<1x!tpu.dma_semaphore, #tpu.memory_space<semaphore_mem>>
    %364 = tpu.memref_squeeze %363 : memref<1x!tpu.dma_semaphore, #tpu.memory_space<semaphore_mem>> -> memref<!tpu.dma_semaphore, #tpu.memory_space<semaphore_mem>>
    tpu.enqueue_dma source(%360 : memref<1x128xf32, #tpu.memory_space<any>>) target(%362 : memref<1x128xf32, #tpu.memory_space<vmem>>) target_semaphore(%364 : memref<!tpu.dma_semaphore, #tpu.memory_space<semaphore_mem>>)
    %c1_i32_281 = arith.constant 1 : i32
    %c1_i32_282 = arith.constant 1 : i32
    %c0_i32_283 = arith.constant 0 : i32
    %365 = tpu.memref_slice %arg4[%283, %c0_i32_283] : memref<64x128xf32, #tpu.memory_space<any>> -> memref<1x128xf32, #tpu.memory_space<any>>
    %c12_i32_284 = arith.constant 12 : i32
    %c0_i32_285 = arith.constant 0 : i32
    %366 = tpu.memref_slice %arg6[%c1_i32_281, %c12_i32_284, %c0_i32_285] : memref<4x16x128xf32, #tpu.memory_space<vmem>> -> memref<1x1x128xf32, #tpu.memory_space<vmem>>
    %367 = tpu.memref_squeeze %366 : memref<1x1x128xf32, #tpu.memory_space<vmem>> -> memref<1x128xf32, #tpu.memory_space<vmem>>
    %368 = tpu.memref_slice %arg7[%c1_i32_282] : memref<4x!tpu.dma_semaphore, #tpu.memory_space<semaphore_mem>> -> memref<1x!tpu.dma_semaphore, #tpu.memory_space<semaphore_mem>>
    %369 = tpu.memref_squeeze %368 : memref<1x!tpu.dma_semaphore, #tpu.memory_space<semaphore_mem>> -> memref<!tpu.dma_semaphore, #tpu.memory_space<semaphore_mem>>
    tpu.enqueue_dma source(%365 : memref<1x128xf32, #tpu.memory_space<any>>) target(%367 : memref<1x128xf32, #tpu.memory_space<vmem>>) target_semaphore(%369 : memref<!tpu.dma_semaphore, #tpu.memory_space<semaphore_mem>>)
    %c1_i32_286 = arith.constant 1 : i32
    %c1_i32_287 = arith.constant 1 : i32
    %c0_i32_288 = arith.constant 0 : i32
    %370 = tpu.memref_slice %arg4[%290, %c0_i32_288] : memref<64x128xf32, #tpu.memory_space<any>> -> memref<1x128xf32, #tpu.memory_space<any>>
    %c13_i32_289 = arith.constant 13 : i32
    %c0_i32_290 = arith.constant 0 : i32
    %371 = tpu.memref_slice %arg6[%c1_i32_286, %c13_i32_289, %c0_i32_290] : memref<4x16x128xf32, #tpu.memory_space<vmem>> -> memref<1x1x128xf32, #tpu.memory_space<vmem>>
    %372 = tpu.memref_squeeze %371 : memref<1x1x128xf32, #tpu.memory_space<vmem>> -> memref<1x128xf32, #tpu.memory_space<vmem>>
    %373 = tpu.memref_slice %arg7[%c1_i32_287] : memref<4x!tpu.dma_semaphore, #tpu.memory_space<semaphore_mem>> -> memref<1x!tpu.dma_semaphore, #tpu.memory_space<semaphore_mem>>
    %374 = tpu.memref_squeeze %373 : memref<1x!tpu.dma_semaphore, #tpu.memory_space<semaphore_mem>> -> memref<!tpu.dma_semaphore, #tpu.memory_space<semaphore_mem>>
    tpu.enqueue_dma source(%370 : memref<1x128xf32, #tpu.memory_space<any>>) target(%372 : memref<1x128xf32, #tpu.memory_space<vmem>>) target_semaphore(%374 : memref<!tpu.dma_semaphore, #tpu.memory_space<semaphore_mem>>)
    %c1_i32_291 = arith.constant 1 : i32
    %c1_i32_292 = arith.constant 1 : i32
    %c0_i32_293 = arith.constant 0 : i32
    %375 = tpu.memref_slice %arg4[%297, %c0_i32_293] : memref<64x128xf32, #tpu.memory_space<any>> -> memref<1x128xf32, #tpu.memory_space<any>>
    %c14_i32_294 = arith.constant 14 : i32
    %c0_i32_295 = arith.constant 0 : i32
    %376 = tpu.memref_slice %arg6[%c1_i32_291, %c14_i32_294, %c0_i32_295] : memref<4x16x128xf32, #tpu.memory_space<vmem>> -> memref<1x1x128xf32, #tpu.memory_space<vmem>>
    %377 = tpu.memref_squeeze %376 : memref<1x1x128xf32, #tpu.memory_space<vmem>> -> memref<1x128xf32, #tpu.memory_space<vmem>>
    %378 = tpu.memref_slice %arg7[%c1_i32_292] : memref<4x!tpu.dma_semaphore, #tpu.memory_space<semaphore_mem>> -> memref<1x!tpu.dma_semaphore, #tpu.memory_space<semaphore_mem>>
    %379 = tpu.memref_squeeze %378 : memref<1x!tpu.dma_semaphore, #tpu.memory_space<semaphore_mem>> -> memref<!tpu.dma_semaphore, #tpu.memory_space<semaphore_mem>>
    tpu.enqueue_dma source(%375 : memref<1x128xf32, #tpu.memory_space<any>>) target(%377 : memref<1x128xf32, #tpu.memory_space<vmem>>) target_semaphore(%379 : memref<!tpu.dma_semaphore, #tpu.memory_space<semaphore_mem>>)
    %c1_i32_296 = arith.constant 1 : i32
    %c1_i32_297 = arith.constant 1 : i32
    %c0_i32_298 = arith.constant 0 : i32
    %380 = tpu.memref_slice %arg4[%304, %c0_i32_298] : memref<64x128xf32, #tpu.memory_space<any>> -> memref<1x128xf32, #tpu.memory_space<any>>
    %c15_i32_299 = arith.constant 15 : i32
    %c0_i32_300 = arith.constant 0 : i32
    %381 = tpu.memref_slice %arg6[%c1_i32_296, %c15_i32_299, %c0_i32_300] : memref<4x16x128xf32, #tpu.memory_space<vmem>> -> memref<1x1x128xf32, #tpu.memory_space<vmem>>
    %382 = tpu.memref_squeeze %381 : memref<1x1x128xf32, #tpu.memory_space<vmem>> -> memref<1x128xf32, #tpu.memory_space<vmem>>
    %383 = tpu.memref_slice %arg7[%c1_i32_297] : memref<4x!tpu.dma_semaphore, #tpu.memory_space<semaphore_mem>> -> memref<1x!tpu.dma_semaphore, #tpu.memory_space<semaphore_mem>>
    %384 = tpu.memref_squeeze %383 : memref<1x!tpu.dma_semaphore, #tpu.memory_space<semaphore_mem>> -> memref<!tpu.dma_semaphore, #tpu.memory_space<semaphore_mem>>
    tpu.enqueue_dma source(%380 : memref<1x128xf32, #tpu.memory_space<any>>) target(%382 : memref<1x128xf32, #tpu.memory_space<vmem>>) target_semaphore(%384 : memref<!tpu.dma_semaphore, #tpu.memory_space<semaphore_mem>>)
    %c32_i32 = arith.constant 32 : i32
    %385 = arith.addi %0, %c32_i32 : i32
    %c0_i32_301 = arith.constant 0 : i32
    %386 = arith.addi %385, %c0_i32_301 : i32
    %c511_i32_302 = arith.constant 511 : i32
    %387 = arith.minsi %386, %c511_i32_302 : i32
    %388 = arith.index_cast %387 : i32 to index
    %389 = memref.load %arg1[%388] : memref<512xi32, #tpu.memory_space<smem>>
    %c0_i32_303 = arith.constant 0 : i32
    %390 = arith.maxsi %389, %c0_i32_303 : i32
    %c63_i32_304 = arith.constant 63 : i32
    %391 = arith.minsi %390, %c63_i32_304 : i32
    %c32_i32_305 = arith.constant 32 : i32
    %392 = arith.addi %0, %c32_i32_305 : i32
    %c1_i32_306 = arith.constant 1 : i32
    %393 = arith.addi %392, %c1_i32_306 : i32
    %c511_i32_307 = arith.constant 511 : i32
    %394 = arith.minsi %393, %c511_i32_307 : i32
    %395 = arith.index_cast %394 : i32 to index
    %396 = memref.load %arg1[%395] : memref<512xi32, #tpu.memory_space<smem>>
    %c0_i32_308 = arith.constant 0 : i32
    %397 = arith.maxsi %396, %c0_i32_308 : i32
    %c63_i32_309 = arith.constant 63 : i32
    %398 = arith.minsi %397, %c63_i32_309 : i32
    %c32_i32_310 = arith.constant 32 : i32
    %399 = arith.addi %0, %c32_i32_310 : i32
    %c2_i32_311 = arith.constant 2 : i32
    %400 = arith.addi %399, %c2_i32_311 : i32
    %c511_i32_312 = arith.constant 511 : i32
    %401 = arith.minsi %400, %c511_i32_312 : i32
    %402 = arith.index_cast %401 : i32 to index
    %403 = memref.load %arg1[%402] : memref<512xi32, #tpu.memory_space<smem>>
    %c0_i32_313 = arith.constant 0 : i32
    %404 = arith.maxsi %403, %c0_i32_313 : i32
    %c63_i32_314 = arith.constant 63 : i32
    %405 = arith.minsi %404, %c63_i32_314 : i32
    %c32_i32_315 = arith.constant 32 : i32
    %406 = arith.addi %0, %c32_i32_315 : i32
    %c3_i32_316 = arith.constant 3 : i32
    %407 = arith.addi %406, %c3_i32_316 : i32
    %c511_i32_317 = arith.constant 511 : i32
    %408 = arith.minsi %407, %c511_i32_317 : i32
    %409 = arith.index_cast %408 : i32 to index
    %410 = memref.load %arg1[%409] : memref<512xi32, #tpu.memory_space<smem>>
    %c0_i32_318 = arith.constant 0 : i32
    %411 = arith.maxsi %410, %c0_i32_318 : i32
    %c63_i32_319 = arith.constant 63 : i32
    %412 = arith.minsi %411, %c63_i32_319 : i32
    %c32_i32_320 = arith.constant 32 : i32
    %413 = arith.addi %0, %c32_i32_320 : i32
    %c4_i32_321 = arith.constant 4 : i32
    %414 = arith.addi %413, %c4_i32_321 : i32
    %c511_i32_322 = arith.constant 511 : i32
    %415 = arith.minsi %414, %c511_i32_322 : i32
    %416 = arith.index_cast %415 : i32 to index
    %417 = memref.load %arg1[%416] : memref<512xi32, #tpu.memory_space<smem>>
    %c0_i32_323 = arith.constant 0 : i32
    %418 = arith.maxsi %417, %c0_i32_323 : i32
    %c63_i32_324 = arith.constant 63 : i32
    %419 = arith.minsi %418, %c63_i32_324 : i32
    %c32_i32_325 = arith.constant 32 : i32
    %420 = arith.addi %0, %c32_i32_325 : i32
    %c5_i32_326 = arith.constant 5 : i32
    %421 = arith.addi %420, %c5_i32_326 : i32
    %c511_i32_327 = arith.constant 511 : i32
    %422 = arith.minsi %421, %c511_i32_327 : i32
    %423 = arith.index_cast %422 : i32 to index
    %424 = memref.load %arg1[%423] : memref<512xi32, #tpu.memory_space<smem>>
    %c0_i32_328 = arith.constant 0 : i32
    %425 = arith.maxsi %424, %c0_i32_328 : i32
    %c63_i32_329 = arith.constant 63 : i32
    %426 = arith.minsi %425, %c63_i32_329 : i32
    %c32_i32_330 = arith.constant 32 : i32
    %427 = arith.addi %0, %c32_i32_330 : i32
    %c6_i32_331 = arith.constant 6 : i32
    %428 = arith.addi %427, %c6_i32_331 : i32
    %c511_i32_332 = arith.constant 511 : i32
    %429 = arith.minsi %428, %c511_i32_332 : i32
    %430 = arith.index_cast %429 : i32 to index
    %431 = memref.load %arg1[%430] : memref<512xi32, #tpu.memory_space<smem>>
    %c0_i32_333 = arith.constant 0 : i32
    %432 = arith.maxsi %431, %c0_i32_333 : i32
    %c63_i32_334 = arith.constant 63 : i32
    %433 = arith.minsi %432, %c63_i32_334 : i32
    %c32_i32_335 = arith.constant 32 : i32
    %434 = arith.addi %0, %c32_i32_335 : i32
    %c7_i32_336 = arith.constant 7 : i32
    %435 = arith.addi %434, %c7_i32_336 : i32
    %c511_i32_337 = arith.constant 511 : i32
    %436 = arith.minsi %435, %c511_i32_337 : i32
    %437 = arith.index_cast %436 : i32 to index
    %438 = memref.load %arg1[%437] : memref<512xi32, #tpu.memory_space<smem>>
    %c0_i32_338 = arith.constant 0 : i32
    %439 = arith.maxsi %438, %c0_i32_338 : i32
    %c63_i32_339 = arith.constant 63 : i32
    %440 = arith.minsi %439, %c63_i32_339 : i32
    %c32_i32_340 = arith.constant 32 : i32
    %441 = arith.addi %0, %c32_i32_340 : i32
    %c8_i32_341 = arith.constant 8 : i32
    %442 = arith.addi %441, %c8_i32_341 : i32
    %c511_i32_342 = arith.constant 511 : i32
    %443 = arith.minsi %442, %c511_i32_342 : i32
    %444 = arith.index_cast %443 : i32 to index
    %445 = memref.load %arg1[%444] : memref<512xi32, #tpu.memory_space<smem>>
    %c0_i32_343 = arith.constant 0 : i32
    %446 = arith.maxsi %445, %c0_i32_343 : i32
    %c63_i32_344 = arith.constant 63 : i32
    %447 = arith.minsi %446, %c63_i32_344 : i32
    %c32_i32_345 = arith.constant 32 : i32
    %448 = arith.addi %0, %c32_i32_345 : i32
    %c9_i32_346 = arith.constant 9 : i32
    %449 = arith.addi %448, %c9_i32_346 : i32
    %c511_i32_347 = arith.constant 511 : i32
    %450 = arith.minsi %449, %c511_i32_347 : i32
    %451 = arith.index_cast %450 : i32 to index
    %452 = memref.load %arg1[%451] : memref<512xi32, #tpu.memory_space<smem>>
    %c0_i32_348 = arith.constant 0 : i32
    %453 = arith.maxsi %452, %c0_i32_348 : i32
    %c63_i32_349 = arith.constant 63 : i32
    %454 = arith.minsi %453, %c63_i32_349 : i32
    %c32_i32_350 = arith.constant 32 : i32
    %455 = arith.addi %0, %c32_i32_350 : i32
    %c10_i32_351 = arith.constant 10 : i32
    %456 = arith.addi %455, %c10_i32_351 : i32
    %c511_i32_352 = arith.constant 511 : i32
    %457 = arith.minsi %456, %c511_i32_352 : i32
    %458 = arith.index_cast %457 : i32 to index
    %459 = memref.load %arg1[%458] : memref<512xi32, #tpu.memory_space<smem>>
    %c0_i32_353 = arith.constant 0 : i32
    %460 = arith.maxsi %459, %c0_i32_353 : i32
    %c63_i32_354 = arith.constant 63 : i32
    %461 = arith.minsi %460, %c63_i32_354 : i32
    %c32_i32_355 = arith.constant 32 : i32
    %462 = arith.addi %0, %c32_i32_355 : i32
    %c11_i32_356 = arith.constant 11 : i32
    %463 = arith.addi %462, %c11_i32_356 : i32
    %c511_i32_357 = arith.constant 511 : i32
    %464 = arith.minsi %463, %c511_i32_357 : i32
    %465 = arith.index_cast %464 : i32 to index
    %466 = memref.load %arg1[%465] : memref<512xi32, #tpu.memory_space<smem>>
    %c0_i32_358 = arith.constant 0 : i32
    %467 = arith.maxsi %466, %c0_i32_358 : i32
    %c63_i32_359 = arith.constant 63 : i32
    %468 = arith.minsi %467, %c63_i32_359 : i32
    %c32_i32_360 = arith.constant 32 : i32
    %469 = arith.addi %0, %c32_i32_360 : i32
    %c12_i32_361 = arith.constant 12 : i32
    %470 = arith.addi %469, %c12_i32_361 : i32
    %c511_i32_362 = arith.constant 511 : i32
    %471 = arith.minsi %470, %c511_i32_362 : i32
    %472 = arith.index_cast %471 : i32 to index
    %473 = memref.load %arg1[%472] : memref<512xi32, #tpu.memory_space<smem>>
    %c0_i32_363 = arith.constant 0 : i32
    %474 = arith.maxsi %473, %c0_i32_363 : i32
    %c63_i32_364 = arith.constant 63 : i32
    %475 = arith.minsi %474, %c63_i32_364 : i32
    %c32_i32_365 = arith.constant 32 : i32
    %476 = arith.addi %0, %c32_i32_365 : i32
    %c13_i32_366 = arith.constant 13 : i32
    %477 = arith.addi %476, %c13_i32_366 : i32
    %c511_i32_367 = arith.constant 511 : i32
    %478 = arith.minsi %477, %c511_i32_367 : i32
    %479 = arith.index_cast %478 : i32 to index
    %480 = memref.load %arg1[%479] : memref<512xi32, #tpu.memory_space<smem>>
    %c0_i32_368 = arith.constant 0 : i32
    %481 = arith.maxsi %480, %c0_i32_368 : i32
    %c63_i32_369 = arith.constant 63 : i32
    %482 = arith.minsi %481, %c63_i32_369 : i32
    %c32_i32_370 = arith.constant 32 : i32
    %483 = arith.addi %0, %c32_i32_370 : i32
    %c14_i32_371 = arith.constant 14 : i32
    %484 = arith.addi %483, %c14_i32_371 : i32
    %c511_i32_372 = arith.constant 511 : i32
    %485 = arith.minsi %484, %c511_i32_372 : i32
    %486 = arith.index_cast %485 : i32 to index
    %487 = memref.load %arg1[%486] : memref<512xi32, #tpu.memory_space<smem>>
    %c0_i32_373 = arith.constant 0 : i32
    %488 = arith.maxsi %487, %c0_i32_373 : i32
    %c63_i32_374 = arith.constant 63 : i32
    %489 = arith.minsi %488, %c63_i32_374 : i32
    %c32_i32_375 = arith.constant 32 : i32
    %490 = arith.addi %0, %c32_i32_375 : i32
    %c15_i32_376 = arith.constant 15 : i32
    %491 = arith.addi %490, %c15_i32_376 : i32
    %c511_i32_377 = arith.constant 511 : i32
    %492 = arith.minsi %491, %c511_i32_377 : i32
    %493 = arith.index_cast %492 : i32 to index
    %494 = memref.load %arg1[%493] : memref<512xi32, #tpu.memory_space<smem>>
    %c0_i32_378 = arith.constant 0 : i32
    %495 = arith.maxsi %494, %c0_i32_378 : i32
    %c63_i32_379 = arith.constant 63 : i32
    %496 = arith.minsi %495, %c63_i32_379 : i32
    %c2_i32_380 = arith.constant 2 : i32
    %c2_i32_381 = arith.constant 2 : i32
    %c0_i32_382 = arith.constant 0 : i32
    %497 = tpu.memref_slice %arg4[%391, %c0_i32_382] : memref<64x128xf32, #tpu.memory_space<any>> -> memref<1x128xf32, #tpu.memory_space<any>>
    %c0_i32_383 = arith.constant 0 : i32
    %c0_i32_384 = arith.constant 0 : i32
    %498 = tpu.memref_slice %arg6[%c2_i32_380, %c0_i32_383, %c0_i32_384] : memref<4x16x128xf32, #tpu.memory_space<vmem>> -> memref<1x1x128xf32, #tpu.memory_space<vmem>>
    %499 = tpu.memref_squeeze %498 : memref<1x1x128xf32, #tpu.memory_space<vmem>> -> memref<1x128xf32, #tpu.memory_space<vmem>>
    %500 = tpu.memref_slice %arg7[%c2_i32_381] : memref<4x!tpu.dma_semaphore, #tpu.memory_space<semaphore_mem>> -> memref<1x!tpu.dma_semaphore, #tpu.memory_space<semaphore_mem>>
    %501 = tpu.memref_squeeze %500 : memref<1x!tpu.dma_semaphore, #tpu.memory_space<semaphore_mem>> -> memref<!tpu.dma_semaphore, #tpu.memory_space<semaphore_mem>>
    tpu.enqueue_dma source(%497 : memref<1x128xf32, #tpu.memory_space<any>>) target(%499 : memref<1x128xf32, #tpu.memory_space<vmem>>) target_semaphore(%501 : memref<!tpu.dma_semaphore, #tpu.memory_space<semaphore_mem>>)
    %c2_i32_385 = arith.constant 2 : i32
    %c2_i32_386 = arith.constant 2 : i32
    %c0_i32_387 = arith.constant 0 : i32
    %502 = tpu.memref_slice %arg4[%398, %c0_i32_387] : memref<64x128xf32, #tpu.memory_space<any>> -> memref<1x128xf32, #tpu.memory_space<any>>
    %c1_i32_388 = arith.constant 1 : i32
    %c0_i32_389 = arith.constant 0 : i32
    %503 = tpu.memref_slice %arg6[%c2_i32_385, %c1_i32_388, %c0_i32_389] : memref<4x16x128xf32, #tpu.memory_space<vmem>> -> memref<1x1x128xf32, #tpu.memory_space<vmem>>
    %504 = tpu.memref_squeeze %503 : memref<1x1x128xf32, #tpu.memory_space<vmem>> -> memref<1x128xf32, #tpu.memory_space<vmem>>
    %505 = tpu.memref_slice %arg7[%c2_i32_386] : memref<4x!tpu.dma_semaphore, #tpu.memory_space<semaphore_mem>> -> memref<1x!tpu.dma_semaphore, #tpu.memory_space<semaphore_mem>>
    %506 = tpu.memref_squeeze %505 : memref<1x!tpu.dma_semaphore, #tpu.memory_space<semaphore_mem>> -> memref<!tpu.dma_semaphore, #tpu.memory_space<semaphore_mem>>
    tpu.enqueue_dma source(%502 : memref<1x128xf32, #tpu.memory_space<any>>) target(%504 : memref<1x128xf32, #tpu.memory_space<vmem>>) target_semaphore(%506 : memref<!tpu.dma_semaphore, #tpu.memory_space<semaphore_mem>>)
    %c2_i32_390 = arith.constant 2 : i32
    %c2_i32_391 = arith.constant 2 : i32
    %c0_i32_392 = arith.constant 0 : i32
    %507 = tpu.memref_slice %arg4[%405, %c0_i32_392] : memref<64x128xf32, #tpu.memory_space<any>> -> memref<1x128xf32, #tpu.memory_space<any>>
    %c2_i32_393 = arith.constant 2 : i32
    %c0_i32_394 = arith.constant 0 : i32
    %508 = tpu.memref_slice %arg6[%c2_i32_390, %c2_i32_393, %c0_i32_394] : memref<4x16x128xf32, #tpu.memory_space<vmem>> -> memref<1x1x128xf32, #tpu.memory_space<vmem>>
    %509 = tpu.memref_squeeze %508 : memref<1x1x128xf32, #tpu.memory_space<vmem>> -> memref<1x128xf32, #tpu.memory_space<vmem>>
    %510 = tpu.memref_slice %arg7[%c2_i32_391] : memref<4x!tpu.dma_semaphore, #tpu.memory_space<semaphore_mem>> -> memref<1x!tpu.dma_semaphore, #tpu.memory_space<semaphore_mem>>
    %511 = tpu.memref_squeeze %510 : memref<1x!tpu.dma_semaphore, #tpu.memory_space<semaphore_mem>> -> memref<!tpu.dma_semaphore, #tpu.memory_space<semaphore_mem>>
    tpu.enqueue_dma source(%507 : memref<1x128xf32, #tpu.memory_space<any>>) target(%509 : memref<1x128xf32, #tpu.memory_space<vmem>>) target_semaphore(%511 : memref<!tpu.dma_semaphore, #tpu.memory_space<semaphore_mem>>)
    %c2_i32_395 = arith.constant 2 : i32
    %c2_i32_396 = arith.constant 2 : i32
    %c0_i32_397 = arith.constant 0 : i32
    %512 = tpu.memref_slice %arg4[%412, %c0_i32_397] : memref<64x128xf32, #tpu.memory_space<any>> -> memref<1x128xf32, #tpu.memory_space<any>>
    %c3_i32_398 = arith.constant 3 : i32
    %c0_i32_399 = arith.constant 0 : i32
    %513 = tpu.memref_slice %arg6[%c2_i32_395, %c3_i32_398, %c0_i32_399] : memref<4x16x128xf32, #tpu.memory_space<vmem>> -> memref<1x1x128xf32, #tpu.memory_space<vmem>>
    %514 = tpu.memref_squeeze %513 : memref<1x1x128xf32, #tpu.memory_space<vmem>> -> memref<1x128xf32, #tpu.memory_space<vmem>>
    %515 = tpu.memref_slice %arg7[%c2_i32_396] : memref<4x!tpu.dma_semaphore, #tpu.memory_space<semaphore_mem>> -> memref<1x!tpu.dma_semaphore, #tpu.memory_space<semaphore_mem>>
    %516 = tpu.memref_squeeze %515 : memref<1x!tpu.dma_semaphore, #tpu.memory_space<semaphore_mem>> -> memref<!tpu.dma_semaphore, #tpu.memory_space<semaphore_mem>>
    tpu.enqueue_dma source(%512 : memref<1x128xf32, #tpu.memory_space<any>>) target(%514 : memref<1x128xf32, #tpu.memory_space<vmem>>) target_semaphore(%516 : memref<!tpu.dma_semaphore, #tpu.memory_space<semaphore_mem>>)
    %c2_i32_400 = arith.constant 2 : i32
    %c2_i32_401 = arith.constant 2 : i32
    %c0_i32_402 = arith.constant 0 : i32
    %517 = tpu.memref_slice %arg4[%419, %c0_i32_402] : memref<64x128xf32, #tpu.memory_space<any>> -> memref<1x128xf32, #tpu.memory_space<any>>
    %c4_i32_403 = arith.constant 4 : i32
    %c0_i32_404 = arith.constant 0 : i32
    %518 = tpu.memref_slice %arg6[%c2_i32_400, %c4_i32_403, %c0_i32_404] : memref<4x16x128xf32, #tpu.memory_space<vmem>> -> memref<1x1x128xf32, #tpu.memory_space<vmem>>
    %519 = tpu.memref_squeeze %518 : memref<1x1x128xf32, #tpu.memory_space<vmem>> -> memref<1x128xf32, #tpu.memory_space<vmem>>
    %520 = tpu.memref_slice %arg7[%c2_i32_401] : memref<4x!tpu.dma_semaphore, #tpu.memory_space<semaphore_mem>> -> memref<1x!tpu.dma_semaphore, #tpu.memory_space<semaphore_mem>>
    %521 = tpu.memref_squeeze %520 : memref<1x!tpu.dma_semaphore, #tpu.memory_space<semaphore_mem>> -> memref<!tpu.dma_semaphore, #tpu.memory_space<semaphore_mem>>
    tpu.enqueue_dma source(%517 : memref<1x128xf32, #tpu.memory_space<any>>) target(%519 : memref<1x128xf32, #tpu.memory_space<vmem>>) target_semaphore(%521 : memref<!tpu.dma_semaphore, #tpu.memory_space<semaphore_mem>>)
    %c2_i32_405 = arith.constant 2 : i32
    %c2_i32_406 = arith.constant 2 : i32
    %c0_i32_407 = arith.constant 0 : i32
    %522 = tpu.memref_slice %arg4[%426, %c0_i32_407] : memref<64x128xf32, #tpu.memory_space<any>> -> memref<1x128xf32, #tpu.memory_space<any>>
    %c5_i32_408 = arith.constant 5 : i32
    %c0_i32_409 = arith.constant 0 : i32
    %523 = tpu.memref_slice %arg6[%c2_i32_405, %c5_i32_408, %c0_i32_409] : memref<4x16x128xf32, #tpu.memory_space<vmem>> -> memref<1x1x128xf32, #tpu.memory_space<vmem>>
    %524 = tpu.memref_squeeze %523 : memref<1x1x128xf32, #tpu.memory_space<vmem>> -> memref<1x128xf32, #tpu.memory_space<vmem>>
    %525 = tpu.memref_slice %arg7[%c2_i32_406] : memref<4x!tpu.dma_semaphore, #tpu.memory_space<semaphore_mem>> -> memref<1x!tpu.dma_semaphore, #tpu.memory_space<semaphore_mem>>
    %526 = tpu.memref_squeeze %525 : memref<1x!tpu.dma_semaphore, #tpu.memory_space<semaphore_mem>> -> memref<!tpu.dma_semaphore, #tpu.memory_space<semaphore_mem>>
    tpu.enqueue_dma source(%522 : memref<1x128xf32, #tpu.memory_space<any>>) target(%524 : memref<1x128xf32, #tpu.memory_space<vmem>>) target_semaphore(%526 : memref<!tpu.dma_semaphore, #tpu.memory_space<semaphore_mem>>)
    %c2_i32_410 = arith.constant 2 : i32
    %c2_i32_411 = arith.constant 2 : i32
    %c0_i32_412 = arith.constant 0 : i32
    %527 = tpu.memref_slice %arg4[%433, %c0_i32_412] : memref<64x128xf32, #tpu.memory_space<any>> -> memref<1x128xf32, #tpu.memory_space<any>>
    %c6_i32_413 = arith.constant 6 : i32
    %c0_i32_414 = arith.constant 0 : i32
    %528 = tpu.memref_slice %arg6[%c2_i32_410, %c6_i32_413, %c0_i32_414] : memref<4x16x128xf32, #tpu.memory_space<vmem>> -> memref<1x1x128xf32, #tpu.memory_space<vmem>>
    %529 = tpu.memref_squeeze %528 : memref<1x1x128xf32, #tpu.memory_space<vmem>> -> memref<1x128xf32, #tpu.memory_space<vmem>>
    %530 = tpu.memref_slice %arg7[%c2_i32_411] : memref<4x!tpu.dma_semaphore, #tpu.memory_space<semaphore_mem>> -> memref<1x!tpu.dma_semaphore, #tpu.memory_space<semaphore_mem>>
    %531 = tpu.memref_squeeze %530 : memref<1x!tpu.dma_semaphore, #tpu.memory_space<semaphore_mem>> -> memref<!tpu.dma_semaphore, #tpu.memory_space<semaphore_mem>>
    tpu.enqueue_dma source(%527 : memref<1x128xf32, #tpu.memory_space<any>>) target(%529 : memref<1x128xf32, #tpu.memory_space<vmem>>) target_semaphore(%531 : memref<!tpu.dma_semaphore, #tpu.memory_space<semaphore_mem>>)
    %c2_i32_415 = arith.constant 2 : i32
    %c2_i32_416 = arith.constant 2 : i32
    %c0_i32_417 = arith.constant 0 : i32
    %532 = tpu.memref_slice %arg4[%440, %c0_i32_417] : memref<64x128xf32, #tpu.memory_space<any>> -> memref<1x128xf32, #tpu.memory_space<any>>
    %c7_i32_418 = arith.constant 7 : i32
    %c0_i32_419 = arith.constant 0 : i32
    %533 = tpu.memref_slice %arg6[%c2_i32_415, %c7_i32_418, %c0_i32_419] : memref<4x16x128xf32, #tpu.memory_space<vmem>> -> memref<1x1x128xf32, #tpu.memory_space<vmem>>
    %534 = tpu.memref_squeeze %533 : memref<1x1x128xf32, #tpu.memory_space<vmem>> -> memref<1x128xf32, #tpu.memory_space<vmem>>
    %535 = tpu.memref_slice %arg7[%c2_i32_416] : memref<4x!tpu.dma_semaphore, #tpu.memory_space<semaphore_mem>> -> memref<1x!tpu.dma_semaphore, #tpu.memory_space<semaphore_mem>>
    %536 = tpu.memref_squeeze %535 : memref<1x!tpu.dma_semaphore, #tpu.memory_space<semaphore_mem>> -> memref<!tpu.dma_semaphore, #tpu.memory_space<semaphore_mem>>
    tpu.enqueue_dma source(%532 : memref<1x128xf32, #tpu.memory_space<any>>) target(%534 : memref<1x128xf32, #tpu.memory_space<vmem>>) target_semaphore(%536 : memref<!tpu.dma_semaphore, #tpu.memory_space<semaphore_mem>>)
    %c2_i32_420 = arith.constant 2 : i32
    %c2_i32_421 = arith.constant 2 : i32
    %c0_i32_422 = arith.constant 0 : i32
    %537 = tpu.memref_slice %arg4[%447, %c0_i32_422] : memref<64x128xf32, #tpu.memory_space<any>> -> memref<1x128xf32, #tpu.memory_space<any>>
    %c8_i32_423 = arith.constant 8 : i32
    %c0_i32_424 = arith.constant 0 : i32
    %538 = tpu.memref_slice %arg6[%c2_i32_420, %c8_i32_423, %c0_i32_424] : memref<4x16x128xf32, #tpu.memory_space<vmem>> -> memref<1x1x128xf32, #tpu.memory_space<vmem>>
    %539 = tpu.memref_squeeze %538 : memref<1x1x128xf32, #tpu.memory_space<vmem>> -> memref<1x128xf32, #tpu.memory_space<vmem>>
    %540 = tpu.memref_slice %arg7[%c2_i32_421] : memref<4x!tpu.dma_semaphore, #tpu.memory_space<semaphore_mem>> -> memref<1x!tpu.dma_semaphore, #tpu.memory_space<semaphore_mem>>
    %541 = tpu.memref_squeeze %540 : memref<1x!tpu.dma_semaphore, #tpu.memory_space<semaphore_mem>> -> memref<!tpu.dma_semaphore, #tpu.memory_space<semaphore_mem>>
    tpu.enqueue_dma source(%537 : memref<1x128xf32, #tpu.memory_space<any>>) target(%539 : memref<1x128xf32, #tpu.memory_space<vmem>>) target_semaphore(%541 : memref<!tpu.dma_semaphore, #tpu.memory_space<semaphore_mem>>)
    %c2_i32_425 = arith.constant 2 : i32
    %c2_i32_426 = arith.constant 2 : i32
    %c0_i32_427 = arith.constant 0 : i32
    %542 = tpu.memref_slice %arg4[%454, %c0_i32_427] : memref<64x128xf32, #tpu.memory_space<any>> -> memref<1x128xf32, #tpu.memory_space<any>>
    %c9_i32_428 = arith.constant 9 : i32
    %c0_i32_429 = arith.constant 0 : i32
    %543 = tpu.memref_slice %arg6[%c2_i32_425, %c9_i32_428, %c0_i32_429] : memref<4x16x128xf32, #tpu.memory_space<vmem>> -> memref<1x1x128xf32, #tpu.memory_space<vmem>>
    %544 = tpu.memref_squeeze %543 : memref<1x1x128xf32, #tpu.memory_space<vmem>> -> memref<1x128xf32, #tpu.memory_space<vmem>>
    %545 = tpu.memref_slice %arg7[%c2_i32_426] : memref<4x!tpu.dma_semaphore, #tpu.memory_space<semaphore_mem>> -> memref<1x!tpu.dma_semaphore, #tpu.memory_space<semaphore_mem>>
    %546 = tpu.memref_squeeze %545 : memref<1x!tpu.dma_semaphore, #tpu.memory_space<semaphore_mem>> -> memref<!tpu.dma_semaphore, #tpu.memory_space<semaphore_mem>>
    tpu.enqueue_dma source(%542 : memref<1x128xf32, #tpu.memory_space<any>>) target(%544 : memref<1x128xf32, #tpu.memory_space<vmem>>) target_semaphore(%546 : memref<!tpu.dma_semaphore, #tpu.memory_space<semaphore_mem>>)
    %c2_i32_430 = arith.constant 2 : i32
    %c2_i32_431 = arith.constant 2 : i32
    %c0_i32_432 = arith.constant 0 : i32
    %547 = tpu.memref_slice %arg4[%461, %c0_i32_432] : memref<64x128xf32, #tpu.memory_space<any>> -> memref<1x128xf32, #tpu.memory_space<any>>
    %c10_i32_433 = arith.constant 10 : i32
    %c0_i32_434 = arith.constant 0 : i32
    %548 = tpu.memref_slice %arg6[%c2_i32_430, %c10_i32_433, %c0_i32_434] : memref<4x16x128xf32, #tpu.memory_space<vmem>> -> memref<1x1x128xf32, #tpu.memory_space<vmem>>
    %549 = tpu.memref_squeeze %548 : memref<1x1x128xf32, #tpu.memory_space<vmem>> -> memref<1x128xf32, #tpu.memory_space<vmem>>
    %550 = tpu.memref_slice %arg7[%c2_i32_431] : memref<4x!tpu.dma_semaphore, #tpu.memory_space<semaphore_mem>> -> memref<1x!tpu.dma_semaphore, #tpu.memory_space<semaphore_mem>>
    %551 = tpu.memref_squeeze %550 : memref<1x!tpu.dma_semaphore, #tpu.memory_space<semaphore_mem>> -> memref<!tpu.dma_semaphore, #tpu.memory_space<semaphore_mem>>
    tpu.enqueue_dma source(%547 : memref<1x128xf32, #tpu.memory_space<any>>) target(%549 : memref<1x128xf32, #tpu.memory_space<vmem>>) target_semaphore(%551 : memref<!tpu.dma_semaphore, #tpu.memory_space<semaphore_mem>>)
    %c2_i32_435 = arith.constant 2 : i32
    %c2_i32_436 = arith.constant 2 : i32
    %c0_i32_437 = arith.constant 0 : i32
    %552 = tpu.memref_slice %arg4[%468, %c0_i32_437] : memref<64x128xf32, #tpu.memory_space<any>> -> memref<1x128xf32, #tpu.memory_space<any>>
    %c11_i32_438 = arith.constant 11 : i32
    %c0_i32_439 = arith.constant 0 : i32
    %553 = tpu.memref_slice %arg6[%c2_i32_435, %c11_i32_438, %c0_i32_439] : memref<4x16x128xf32, #tpu.memory_space<vmem>> -> memref<1x1x128xf32, #tpu.memory_space<vmem>>
    %554 = tpu.memref_squeeze %553 : memref<1x1x128xf32, #tpu.memory_space<vmem>> -> memref<1x128xf32, #tpu.memory_space<vmem>>
    %555 = tpu.memref_slice %arg7[%c2_i32_436] : memref<4x!tpu.dma_semaphore, #tpu.memory_space<semaphore_mem>> -> memref<1x!tpu.dma_semaphore, #tpu.memory_space<semaphore_mem>>
    %556 = tpu.memref_squeeze %555 : memref<1x!tpu.dma_semaphore, #tpu.memory_space<semaphore_mem>> -> memref<!tpu.dma_semaphore, #tpu.memory_space<semaphore_mem>>
    tpu.enqueue_dma source(%552 : memref<1x128xf32, #tpu.memory_space<any>>) target(%554 : memref<1x128xf32, #tpu.memory_space<vmem>>) target_semaphore(%556 : memref<!tpu.dma_semaphore, #tpu.memory_space<semaphore_mem>>)
    %c2_i32_440 = arith.constant 2 : i32
    %c2_i32_441 = arith.constant 2 : i32
    %c0_i32_442 = arith.constant 0 : i32
    %557 = tpu.memref_slice %arg4[%475, %c0_i32_442] : memref<64x128xf32, #tpu.memory_space<any>> -> memref<1x128xf32, #tpu.memory_space<any>>
    %c12_i32_443 = arith.constant 12 : i32
    %c0_i32_444 = arith.constant 0 : i32
    %558 = tpu.memref_slice %arg6[%c2_i32_440, %c12_i32_443, %c0_i32_444] : memref<4x16x128xf32, #tpu.memory_space<vmem>> -> memref<1x1x128xf32, #tpu.memory_space<vmem>>
    %559 = tpu.memref_squeeze %558 : memref<1x1x128xf32, #tpu.memory_space<vmem>> -> memref<1x128xf32, #tpu.memory_space<vmem>>
    %560 = tpu.memref_slice %arg7[%c2_i32_441] : memref<4x!tpu.dma_semaphore, #tpu.memory_space<semaphore_mem>> -> memref<1x!tpu.dma_semaphore, #tpu.memory_space<semaphore_mem>>
    %561 = tpu.memref_squeeze %560 : memref<1x!tpu.dma_semaphore, #tpu.memory_space<semaphore_mem>> -> memref<!tpu.dma_semaphore, #tpu.memory_space<semaphore_mem>>
    tpu.enqueue_dma source(%557 : memref<1x128xf32, #tpu.memory_space<any>>) target(%559 : memref<1x128xf32, #tpu.memory_space<vmem>>) target_semaphore(%561 : memref<!tpu.dma_semaphore, #tpu.memory_space<semaphore_mem>>)
    %c2_i32_445 = arith.constant 2 : i32
    %c2_i32_446 = arith.constant 2 : i32
    %c0_i32_447 = arith.constant 0 : i32
    %562 = tpu.memref_slice %arg4[%482, %c0_i32_447] : memref<64x128xf32, #tpu.memory_space<any>> -> memref<1x128xf32, #tpu.memory_space<any>>
    %c13_i32_448 = arith.constant 13 : i32
    %c0_i32_449 = arith.constant 0 : i32
    %563 = tpu.memref_slice %arg6[%c2_i32_445, %c13_i32_448, %c0_i32_449] : memref<4x16x128xf32, #tpu.memory_space<vmem>> -> memref<1x1x128xf32, #tpu.memory_space<vmem>>
    %564 = tpu.memref_squeeze %563 : memref<1x1x128xf32, #tpu.memory_space<vmem>> -> memref<1x128xf32, #tpu.memory_space<vmem>>
    %565 = tpu.memref_slice %arg7[%c2_i32_446] : memref<4x!tpu.dma_semaphore, #tpu.memory_space<semaphore_mem>> -> memref<1x!tpu.dma_semaphore, #tpu.memory_space<semaphore_mem>>
    %566 = tpu.memref_squeeze %565 : memref<1x!tpu.dma_semaphore, #tpu.memory_space<semaphore_mem>> -> memref<!tpu.dma_semaphore, #tpu.memory_space<semaphore_mem>>
    tpu.enqueue_dma source(%562 : memref<1x128xf32, #tpu.memory_space<any>>) target(%564 : memref<1x128xf32, #tpu.memory_space<vmem>>) target_semaphore(%566 : memref<!tpu.dma_semaphore, #tpu.memory_space<semaphore_mem>>)
    %c2_i32_450 = arith.constant 2 : i32
    %c2_i32_451 = arith.constant 2 : i32
    %c0_i32_452 = arith.constant 0 : i32
    %567 = tpu.memref_slice %arg4[%489, %c0_i32_452] : memref<64x128xf32, #tpu.memory_space<any>> -> memref<1x128xf32, #tpu.memory_space<any>>
    %c14_i32_453 = arith.constant 14 : i32
    %c0_i32_454 = arith.constant 0 : i32
    %568 = tpu.memref_slice %arg6[%c2_i32_450, %c14_i32_453, %c0_i32_454] : memref<4x16x128xf32, #tpu.memory_space<vmem>> -> memref<1x1x128xf32, #tpu.memory_space<vmem>>
    %569 = tpu.memref_squeeze %568 : memref<1x1x128xf32, #tpu.memory_space<vmem>> -> memref<1x128xf32, #tpu.memory_space<vmem>>
    %570 = tpu.memref_slice %arg7[%c2_i32_451] : memref<4x!tpu.dma_semaphore, #tpu.memory_space<semaphore_mem>> -> memref<1x!tpu.dma_semaphore, #tpu.memory_space<semaphore_mem>>
    %571 = tpu.memref_squeeze %570 : memref<1x!tpu.dma_semaphore, #tpu.memory_space<semaphore_mem>> -> memref<!tpu.dma_semaphore, #tpu.memory_space<semaphore_mem>>
    tpu.enqueue_dma source(%567 : memref<1x128xf32, #tpu.memory_space<any>>) target(%569 : memref<1x128xf32, #tpu.memory_space<vmem>>) target_semaphore(%571 : memref<!tpu.dma_semaphore, #tpu.memory_space<semaphore_mem>>)
    %c2_i32_455 = arith.constant 2 : i32
    %c2_i32_456 = arith.constant 2 : i32
    %c0_i32_457 = arith.constant 0 : i32
    %572 = tpu.memref_slice %arg4[%496, %c0_i32_457] : memref<64x128xf32, #tpu.memory_space<any>> -> memref<1x128xf32, #tpu.memory_space<any>>
    %c15_i32_458 = arith.constant 15 : i32
    %c0_i32_459 = arith.constant 0 : i32
    %573 = tpu.memref_slice %arg6[%c2_i32_455, %c15_i32_458, %c0_i32_459] : memref<4x16x128xf32, #tpu.memory_space<vmem>> -> memref<1x1x128xf32, #tpu.memory_space<vmem>>
    %574 = tpu.memref_squeeze %573 : memref<1x1x128xf32, #tpu.memory_space<vmem>> -> memref<1x128xf32, #tpu.memory_space<vmem>>
    %575 = tpu.memref_slice %arg7[%c2_i32_456] : memref<4x!tpu.dma_semaphore, #tpu.memory_space<semaphore_mem>> -> memref<1x!tpu.dma_semaphore, #tpu.memory_space<semaphore_mem>>
    %576 = tpu.memref_squeeze %575 : memref<1x!tpu.dma_semaphore, #tpu.memory_space<semaphore_mem>> -> memref<!tpu.dma_semaphore, #tpu.memory_space<semaphore_mem>>
    tpu.enqueue_dma source(%572 : memref<1x128xf32, #tpu.memory_space<any>>) target(%574 : memref<1x128xf32, #tpu.memory_space<vmem>>) target_semaphore(%576 : memref<!tpu.dma_semaphore, #tpu.memory_space<semaphore_mem>>)
    %c48_i32 = arith.constant 48 : i32
    %577 = arith.addi %0, %c48_i32 : i32
    %c0_i32_460 = arith.constant 0 : i32
    %578 = arith.addi %577, %c0_i32_460 : i32
    %c511_i32_461 = arith.constant 511 : i32
    %579 = arith.minsi %578, %c511_i32_461 : i32
    %580 = arith.index_cast %579 : i32 to index
    %581 = memref.load %arg1[%580] : memref<512xi32, #tpu.memory_space<smem>>
    %c0_i32_462 = arith.constant 0 : i32
    %582 = arith.maxsi %581, %c0_i32_462 : i32
    %c63_i32_463 = arith.constant 63 : i32
    %583 = arith.minsi %582, %c63_i32_463 : i32
    %c48_i32_464 = arith.constant 48 : i32
    %584 = arith.addi %0, %c48_i32_464 : i32
    %c1_i32_465 = arith.constant 1 : i32
    %585 = arith.addi %584, %c1_i32_465 : i32
    %c511_i32_466 = arith.constant 511 : i32
    %586 = arith.minsi %585, %c511_i32_466 : i32
    %587 = arith.index_cast %586 : i32 to index
    %588 = memref.load %arg1[%587] : memref<512xi32, #tpu.memory_space<smem>>
    %c0_i32_467 = arith.constant 0 : i32
    %589 = arith.maxsi %588, %c0_i32_467 : i32
    %c63_i32_468 = arith.constant 63 : i32
    %590 = arith.minsi %589, %c63_i32_468 : i32
    %c48_i32_469 = arith.constant 48 : i32
    %591 = arith.addi %0, %c48_i32_469 : i32
    %c2_i32_470 = arith.constant 2 : i32
    %592 = arith.addi %591, %c2_i32_470 : i32
    %c511_i32_471 = arith.constant 511 : i32
    %593 = arith.minsi %592, %c511_i32_471 : i32
    %594 = arith.index_cast %593 : i32 to index
    %595 = memref.load %arg1[%594] : memref<512xi32, #tpu.memory_space<smem>>
    %c0_i32_472 = arith.constant 0 : i32
    %596 = arith.maxsi %595, %c0_i32_472 : i32
    %c63_i32_473 = arith.constant 63 : i32
    %597 = arith.minsi %596, %c63_i32_473 : i32
    %c48_i32_474 = arith.constant 48 : i32
    %598 = arith.addi %0, %c48_i32_474 : i32
    %c3_i32_475 = arith.constant 3 : i32
    %599 = arith.addi %598, %c3_i32_475 : i32
    %c511_i32_476 = arith.constant 511 : i32
    %600 = arith.minsi %599, %c511_i32_476 : i32
    %601 = arith.index_cast %600 : i32 to index
    %602 = memref.load %arg1[%601] : memref<512xi32, #tpu.memory_space<smem>>
    %c0_i32_477 = arith.constant 0 : i32
    %603 = arith.maxsi %602, %c0_i32_477 : i32
    %c63_i32_478 = arith.constant 63 : i32
    %604 = arith.minsi %603, %c63_i32_478 : i32
    %c48_i32_479 = arith.constant 48 : i32
    %605 = arith.addi %0, %c48_i32_479 : i32
    %c4_i32_480 = arith.constant 4 : i32
    %606 = arith.addi %605, %c4_i32_480 : i32
    %c511_i32_481 = arith.constant 511 : i32
    %607 = arith.minsi %606, %c511_i32_481 : i32
    %608 = arith.index_cast %607 : i32 to index
    %609 = memref.load %arg1[%608] : memref<512xi32, #tpu.memory_space<smem>>
    %c0_i32_482 = arith.constant 0 : i32
    %610 = arith.maxsi %609, %c0_i32_482 : i32
    %c63_i32_483 = arith.constant 63 : i32
    %611 = arith.minsi %610, %c63_i32_483 : i32
    %c48_i32_484 = arith.constant 48 : i32
    %612 = arith.addi %0, %c48_i32_484 : i32
    %c5_i32_485 = arith.constant 5 : i32
    %613 = arith.addi %612, %c5_i32_485 : i32
    %c511_i32_486 = arith.constant 511 : i32
    %614 = arith.minsi %613, %c511_i32_486 : i32
    %615 = arith.index_cast %614 : i32 to index
    %616 = memref.load %arg1[%615] : memref<512xi32, #tpu.memory_space<smem>>
    %c0_i32_487 = arith.constant 0 : i32
    %617 = arith.maxsi %616, %c0_i32_487 : i32
    %c63_i32_488 = arith.constant 63 : i32
    %618 = arith.minsi %617, %c63_i32_488 : i32
    %c48_i32_489 = arith.constant 48 : i32
    %619 = arith.addi %0, %c48_i32_489 : i32
    %c6_i32_490 = arith.constant 6 : i32
    %620 = arith.addi %619, %c6_i32_490 : i32
    %c511_i32_491 = arith.constant 511 : i32
    %621 = arith.minsi %620, %c511_i32_491 : i32
    %622 = arith.index_cast %621 : i32 to index
    %623 = memref.load %arg1[%622] : memref<512xi32, #tpu.memory_space<smem>>
    %c0_i32_492 = arith.constant 0 : i32
    %624 = arith.maxsi %623, %c0_i32_492 : i32
    %c63_i32_493 = arith.constant 63 : i32
    %625 = arith.minsi %624, %c63_i32_493 : i32
    %c48_i32_494 = arith.constant 48 : i32
    %626 = arith.addi %0, %c48_i32_494 : i32
    %c7_i32_495 = arith.constant 7 : i32
    %627 = arith.addi %626, %c7_i32_495 : i32
    %c511_i32_496 = arith.constant 511 : i32
    %628 = arith.minsi %627, %c511_i32_496 : i32
    %629 = arith.index_cast %628 : i32 to index
    %630 = memref.load %arg1[%629] : memref<512xi32, #tpu.memory_space<smem>>
    %c0_i32_497 = arith.constant 0 : i32
    %631 = arith.maxsi %630, %c0_i32_497 : i32
    %c63_i32_498 = arith.constant 63 : i32
    %632 = arith.minsi %631, %c63_i32_498 : i32
    %c48_i32_499 = arith.constant 48 : i32
    %633 = arith.addi %0, %c48_i32_499 : i32
    %c8_i32_500 = arith.constant 8 : i32
    %634 = arith.addi %633, %c8_i32_500 : i32
    %c511_i32_501 = arith.constant 511 : i32
    %635 = arith.minsi %634, %c511_i32_501 : i32
    %636 = arith.index_cast %635 : i32 to index
    %637 = memref.load %arg1[%636] : memref<512xi32, #tpu.memory_space<smem>>
    %c0_i32_502 = arith.constant 0 : i32
    %638 = arith.maxsi %637, %c0_i32_502 : i32
    %c63_i32_503 = arith.constant 63 : i32
    %639 = arith.minsi %638, %c63_i32_503 : i32
    %c48_i32_504 = arith.constant 48 : i32
    %640 = arith.addi %0, %c48_i32_504 : i32
    %c9_i32_505 = arith.constant 9 : i32
    %641 = arith.addi %640, %c9_i32_505 : i32
    %c511_i32_506 = arith.constant 511 : i32
    %642 = arith.minsi %641, %c511_i32_506 : i32
    %643 = arith.index_cast %642 : i32 to index
    %644 = memref.load %arg1[%643] : memref<512xi32, #tpu.memory_space<smem>>
    %c0_i32_507 = arith.constant 0 : i32
    %645 = arith.maxsi %644, %c0_i32_507 : i32
    %c63_i32_508 = arith.constant 63 : i32
    %646 = arith.minsi %645, %c63_i32_508 : i32
    %c48_i32_509 = arith.constant 48 : i32
    %647 = arith.addi %0, %c48_i32_509 : i32
    %c10_i32_510 = arith.constant 10 : i32
    %648 = arith.addi %647, %c10_i32_510 : i32
    %c511_i32_511 = arith.constant 511 : i32
    %649 = arith.minsi %648, %c511_i32_511 : i32
    %650 = arith.index_cast %649 : i32 to index
    %651 = memref.load %arg1[%650] : memref<512xi32, #tpu.memory_space<smem>>
    %c0_i32_512 = arith.constant 0 : i32
    %652 = arith.maxsi %651, %c0_i32_512 : i32
    %c63_i32_513 = arith.constant 63 : i32
    %653 = arith.minsi %652, %c63_i32_513 : i32
    %c48_i32_514 = arith.constant 48 : i32
    %654 = arith.addi %0, %c48_i32_514 : i32
    %c11_i32_515 = arith.constant 11 : i32
    %655 = arith.addi %654, %c11_i32_515 : i32
    %c511_i32_516 = arith.constant 511 : i32
    %656 = arith.minsi %655, %c511_i32_516 : i32
    %657 = arith.index_cast %656 : i32 to index
    %658 = memref.load %arg1[%657] : memref<512xi32, #tpu.memory_space<smem>>
    %c0_i32_517 = arith.constant 0 : i32
    %659 = arith.maxsi %658, %c0_i32_517 : i32
    %c63_i32_518 = arith.constant 63 : i32
    %660 = arith.minsi %659, %c63_i32_518 : i32
    %c48_i32_519 = arith.constant 48 : i32
    %661 = arith.addi %0, %c48_i32_519 : i32
    %c12_i32_520 = arith.constant 12 : i32
    %662 = arith.addi %661, %c12_i32_520 : i32
    %c511_i32_521 = arith.constant 511 : i32
    %663 = arith.minsi %662, %c511_i32_521 : i32
    %664 = arith.index_cast %663 : i32 to index
    %665 = memref.load %arg1[%664] : memref<512xi32, #tpu.memory_space<smem>>
    %c0_i32_522 = arith.constant 0 : i32
    %666 = arith.maxsi %665, %c0_i32_522 : i32
    %c63_i32_523 = arith.constant 63 : i32
    %667 = arith.minsi %666, %c63_i32_523 : i32
    %c48_i32_524 = arith.constant 48 : i32
    %668 = arith.addi %0, %c48_i32_524 : i32
    %c13_i32_525 = arith.constant 13 : i32
    %669 = arith.addi %668, %c13_i32_525 : i32
    %c511_i32_526 = arith.constant 511 : i32
    %670 = arith.minsi %669, %c511_i32_526 : i32
    %671 = arith.index_cast %670 : i32 to index
    %672 = memref.load %arg1[%671] : memref<512xi32, #tpu.memory_space<smem>>
    %c0_i32_527 = arith.constant 0 : i32
    %673 = arith.maxsi %672, %c0_i32_527 : i32
    %c63_i32_528 = arith.constant 63 : i32
    %674 = arith.minsi %673, %c63_i32_528 : i32
    %c48_i32_529 = arith.constant 48 : i32
    %675 = arith.addi %0, %c48_i32_529 : i32
    %c14_i32_530 = arith.constant 14 : i32
    %676 = arith.addi %675, %c14_i32_530 : i32
    %c511_i32_531 = arith.constant 511 : i32
    %677 = arith.minsi %676, %c511_i32_531 : i32
    %678 = arith.index_cast %677 : i32 to index
    %679 = memref.load %arg1[%678] : memref<512xi32, #tpu.memory_space<smem>>
    %c0_i32_532 = arith.constant 0 : i32
    %680 = arith.maxsi %679, %c0_i32_532 : i32
    %c63_i32_533 = arith.constant 63 : i32
    %681 = arith.minsi %680, %c63_i32_533 : i32
    %c48_i32_534 = arith.constant 48 : i32
    %682 = arith.addi %0, %c48_i32_534 : i32
    %c15_i32_535 = arith.constant 15 : i32
    %683 = arith.addi %682, %c15_i32_535 : i32
    %c511_i32_536 = arith.constant 511 : i32
    %684 = arith.minsi %683, %c511_i32_536 : i32
    %685 = arith.index_cast %684 : i32 to index
    %686 = memref.load %arg1[%685] : memref<512xi32, #tpu.memory_space<smem>>
    %c0_i32_537 = arith.constant 0 : i32
    %687 = arith.maxsi %686, %c0_i32_537 : i32
    %c63_i32_538 = arith.constant 63 : i32
    %688 = arith.minsi %687, %c63_i32_538 : i32
    %c3_i32_539 = arith.constant 3 : i32
    %c3_i32_540 = arith.constant 3 : i32
    %c0_i32_541 = arith.constant 0 : i32
    %689 = tpu.memref_slice %arg4[%583, %c0_i32_541] : memref<64x128xf32, #tpu.memory_space<any>> -> memref<1x128xf32, #tpu.memory_space<any>>
    %c0_i32_542 = arith.constant 0 : i32
    %c0_i32_543 = arith.constant 0 : i32
    %690 = tpu.memref_slice %arg6[%c3_i32_539, %c0_i32_542, %c0_i32_543] : memref<4x16x128xf32, #tpu.memory_space<vmem>> -> memref<1x1x128xf32, #tpu.memory_space<vmem>>
    %691 = tpu.memref_squeeze %690 : memref<1x1x128xf32, #tpu.memory_space<vmem>> -> memref<1x128xf32, #tpu.memory_space<vmem>>
    %692 = tpu.memref_slice %arg7[%c3_i32_540] : memref<4x!tpu.dma_semaphore, #tpu.memory_space<semaphore_mem>> -> memref<1x!tpu.dma_semaphore, #tpu.memory_space<semaphore_mem>>
    %693 = tpu.memref_squeeze %692 : memref<1x!tpu.dma_semaphore, #tpu.memory_space<semaphore_mem>> -> memref<!tpu.dma_semaphore, #tpu.memory_space<semaphore_mem>>
    tpu.enqueue_dma source(%689 : memref<1x128xf32, #tpu.memory_space<any>>) target(%691 : memref<1x128xf32, #tpu.memory_space<vmem>>) target_semaphore(%693 : memref<!tpu.dma_semaphore, #tpu.memory_space<semaphore_mem>>)
    %c3_i32_544 = arith.constant 3 : i32
    %c3_i32_545 = arith.constant 3 : i32
    %c0_i32_546 = arith.constant 0 : i32
    %694 = tpu.memref_slice %arg4[%590, %c0_i32_546] : memref<64x128xf32, #tpu.memory_space<any>> -> memref<1x128xf32, #tpu.memory_space<any>>
    %c1_i32_547 = arith.constant 1 : i32
    %c0_i32_548 = arith.constant 0 : i32
    %695 = tpu.memref_slice %arg6[%c3_i32_544, %c1_i32_547, %c0_i32_548] : memref<4x16x128xf32, #tpu.memory_space<vmem>> -> memref<1x1x128xf32, #tpu.memory_space<vmem>>
    %696 = tpu.memref_squeeze %695 : memref<1x1x128xf32, #tpu.memory_space<vmem>> -> memref<1x128xf32, #tpu.memory_space<vmem>>
    %697 = tpu.memref_slice %arg7[%c3_i32_545] : memref<4x!tpu.dma_semaphore, #tpu.memory_space<semaphore_mem>> -> memref<1x!tpu.dma_semaphore, #tpu.memory_space<semaphore_mem>>
    %698 = tpu.memref_squeeze %697 : memref<1x!tpu.dma_semaphore, #tpu.memory_space<semaphore_mem>> -> memref<!tpu.dma_semaphore, #tpu.memory_space<semaphore_mem>>
    tpu.enqueue_dma source(%694 : memref<1x128xf32, #tpu.memory_space<any>>) target(%696 : memref<1x128xf32, #tpu.memory_space<vmem>>) target_semaphore(%698 : memref<!tpu.dma_semaphore, #tpu.memory_space<semaphore_mem>>)
    %c3_i32_549 = arith.constant 3 : i32
    %c3_i32_550 = arith.constant 3 : i32
    %c0_i32_551 = arith.constant 0 : i32
    %699 = tpu.memref_slice %arg4[%597, %c0_i32_551] : memref<64x128xf32, #tpu.memory_space<any>> -> memref<1x128xf32, #tpu.memory_space<any>>
    %c2_i32_552 = arith.constant 2 : i32
    %c0_i32_553 = arith.constant 0 : i32
    %700 = tpu.memref_slice %arg6[%c3_i32_549, %c2_i32_552, %c0_i32_553] : memref<4x16x128xf32, #tpu.memory_space<vmem>> -> memref<1x1x128xf32, #tpu.memory_space<vmem>>
    %701 = tpu.memref_squeeze %700 : memref<1x1x128xf32, #tpu.memory_space<vmem>> -> memref<1x128xf32, #tpu.memory_space<vmem>>
    %702 = tpu.memref_slice %arg7[%c3_i32_550] : memref<4x!tpu.dma_semaphore, #tpu.memory_space<semaphore_mem>> -> memref<1x!tpu.dma_semaphore, #tpu.memory_space<semaphore_mem>>
    %703 = tpu.memref_squeeze %702 : memref<1x!tpu.dma_semaphore, #tpu.memory_space<semaphore_mem>> -> memref<!tpu.dma_semaphore, #tpu.memory_space<semaphore_mem>>
    tpu.enqueue_dma source(%699 : memref<1x128xf32, #tpu.memory_space<any>>) target(%701 : memref<1x128xf32, #tpu.memory_space<vmem>>) target_semaphore(%703 : memref<!tpu.dma_semaphore, #tpu.memory_space<semaphore_mem>>)
    %c3_i32_554 = arith.constant 3 : i32
    %c3_i32_555 = arith.constant 3 : i32
    %c0_i32_556 = arith.constant 0 : i32
    %704 = tpu.memref_slice %arg4[%604, %c0_i32_556] : memref<64x128xf32, #tpu.memory_space<any>> -> memref<1x128xf32, #tpu.memory_space<any>>
    %c3_i32_557 = arith.constant 3 : i32
    %c0_i32_558 = arith.constant 0 : i32
    %705 = tpu.memref_slice %arg6[%c3_i32_554, %c3_i32_557, %c0_i32_558] : memref<4x16x128xf32, #tpu.memory_space<vmem>> -> memref<1x1x128xf32, #tpu.memory_space<vmem>>
    %706 = tpu.memref_squeeze %705 : memref<1x1x128xf32, #tpu.memory_space<vmem>> -> memref<1x128xf32, #tpu.memory_space<vmem>>
    %707 = tpu.memref_slice %arg7[%c3_i32_555] : memref<4x!tpu.dma_semaphore, #tpu.memory_space<semaphore_mem>> -> memref<1x!tpu.dma_semaphore, #tpu.memory_space<semaphore_mem>>
    %708 = tpu.memref_squeeze %707 : memref<1x!tpu.dma_semaphore, #tpu.memory_space<semaphore_mem>> -> memref<!tpu.dma_semaphore, #tpu.memory_space<semaphore_mem>>
    tpu.enqueue_dma source(%704 : memref<1x128xf32, #tpu.memory_space<any>>) target(%706 : memref<1x128xf32, #tpu.memory_space<vmem>>) target_semaphore(%708 : memref<!tpu.dma_semaphore, #tpu.memory_space<semaphore_mem>>)
    %c3_i32_559 = arith.constant 3 : i32
    %c3_i32_560 = arith.constant 3 : i32
    %c0_i32_561 = arith.constant 0 : i32
    %709 = tpu.memref_slice %arg4[%611, %c0_i32_561] : memref<64x128xf32, #tpu.memory_space<any>> -> memref<1x128xf32, #tpu.memory_space<any>>
    %c4_i32_562 = arith.constant 4 : i32
    %c0_i32_563 = arith.constant 0 : i32
    %710 = tpu.memref_slice %arg6[%c3_i32_559, %c4_i32_562, %c0_i32_563] : memref<4x16x128xf32, #tpu.memory_space<vmem>> -> memref<1x1x128xf32, #tpu.memory_space<vmem>>
    %711 = tpu.memref_squeeze %710 : memref<1x1x128xf32, #tpu.memory_space<vmem>> -> memref<1x128xf32, #tpu.memory_space<vmem>>
    %712 = tpu.memref_slice %arg7[%c3_i32_560] : memref<4x!tpu.dma_semaphore, #tpu.memory_space<semaphore_mem>> -> memref<1x!tpu.dma_semaphore, #tpu.memory_space<semaphore_mem>>
    %713 = tpu.memref_squeeze %712 : memref<1x!tpu.dma_semaphore, #tpu.memory_space<semaphore_mem>> -> memref<!tpu.dma_semaphore, #tpu.memory_space<semaphore_mem>>
    tpu.enqueue_dma source(%709 : memref<1x128xf32, #tpu.memory_space<any>>) target(%711 : memref<1x128xf32, #tpu.memory_space<vmem>>) target_semaphore(%713 : memref<!tpu.dma_semaphore, #tpu.memory_space<semaphore_mem>>)
    %c3_i32_564 = arith.constant 3 : i32
    %c3_i32_565 = arith.constant 3 : i32
    %c0_i32_566 = arith.constant 0 : i32
    %714 = tpu.memref_slice %arg4[%618, %c0_i32_566] : memref<64x128xf32, #tpu.memory_space<any>> -> memref<1x128xf32, #tpu.memory_space<any>>
    %c5_i32_567 = arith.constant 5 : i32
    %c0_i32_568 = arith.constant 0 : i32
    %715 = tpu.memref_slice %arg6[%c3_i32_564, %c5_i32_567, %c0_i32_568] : memref<4x16x128xf32, #tpu.memory_space<vmem>> -> memref<1x1x128xf32, #tpu.memory_space<vmem>>
    %716 = tpu.memref_squeeze %715 : memref<1x1x128xf32, #tpu.memory_space<vmem>> -> memref<1x128xf32, #tpu.memory_space<vmem>>
    %717 = tpu.memref_slice %arg7[%c3_i32_565] : memref<4x!tpu.dma_semaphore, #tpu.memory_space<semaphore_mem>> -> memref<1x!tpu.dma_semaphore, #tpu.memory_space<semaphore_mem>>
    %718 = tpu.memref_squeeze %717 : memref<1x!tpu.dma_semaphore, #tpu.memory_space<semaphore_mem>> -> memref<!tpu.dma_semaphore, #tpu.memory_space<semaphore_mem>>
    tpu.enqueue_dma source(%714 : memref<1x128xf32, #tpu.memory_space<any>>) target(%716 : memref<1x128xf32, #tpu.memory_space<vmem>>) target_semaphore(%718 : memref<!tpu.dma_semaphore, #tpu.memory_space<semaphore_mem>>)
    %c3_i32_569 = arith.constant 3 : i32
    %c3_i32_570 = arith.constant 3 : i32
    %c0_i32_571 = arith.constant 0 : i32
    %719 = tpu.memref_slice %arg4[%625, %c0_i32_571] : memref<64x128xf32, #tpu.memory_space<any>> -> memref<1x128xf32, #tpu.memory_space<any>>
    %c6_i32_572 = arith.constant 6 : i32
    %c0_i32_573 = arith.constant 0 : i32
    %720 = tpu.memref_slice %arg6[%c3_i32_569, %c6_i32_572, %c0_i32_573] : memref<4x16x128xf32, #tpu.memory_space<vmem>> -> memref<1x1x128xf32, #tpu.memory_space<vmem>>
    %721 = tpu.memref_squeeze %720 : memref<1x1x128xf32, #tpu.memory_space<vmem>> -> memref<1x128xf32, #tpu.memory_space<vmem>>
    %722 = tpu.memref_slice %arg7[%c3_i32_570] : memref<4x!tpu.dma_semaphore, #tpu.memory_space<semaphore_mem>> -> memref<1x!tpu.dma_semaphore, #tpu.memory_space<semaphore_mem>>
    %723 = tpu.memref_squeeze %722 : memref<1x!tpu.dma_semaphore, #tpu.memory_space<semaphore_mem>> -> memref<!tpu.dma_semaphore, #tpu.memory_space<semaphore_mem>>
    tpu.enqueue_dma source(%719 : memref<1x128xf32, #tpu.memory_space<any>>) target(%721 : memref<1x128xf32, #tpu.memory_space<vmem>>) target_semaphore(%723 : memref<!tpu.dma_semaphore, #tpu.memory_space<semaphore_mem>>)
    %c3_i32_574 = arith.constant 3 : i32
    %c3_i32_575 = arith.constant 3 : i32
    %c0_i32_576 = arith.constant 0 : i32
    %724 = tpu.memref_slice %arg4[%632, %c0_i32_576] : memref<64x128xf32, #tpu.memory_space<any>> -> memref<1x128xf32, #tpu.memory_space<any>>
    %c7_i32_577 = arith.constant 7 : i32
    %c0_i32_578 = arith.constant 0 : i32
    %725 = tpu.memref_slice %arg6[%c3_i32_574, %c7_i32_577, %c0_i32_578] : memref<4x16x128xf32, #tpu.memory_space<vmem>> -> memref<1x1x128xf32, #tpu.memory_space<vmem>>
    %726 = tpu.memref_squeeze %725 : memref<1x1x128xf32, #tpu.memory_space<vmem>> -> memref<1x128xf32, #tpu.memory_space<vmem>>
    %727 = tpu.memref_slice %arg7[%c3_i32_575] : memref<4x!tpu.dma_semaphore, #tpu.memory_space<semaphore_mem>> -> memref<1x!tpu.dma_semaphore, #tpu.memory_space<semaphore_mem>>
    %728 = tpu.memref_squeeze %727 : memref<1x!tpu.dma_semaphore, #tpu.memory_space<semaphore_mem>> -> memref<!tpu.dma_semaphore, #tpu.memory_space<semaphore_mem>>
    tpu.enqueue_dma source(%724 : memref<1x128xf32, #tpu.memory_space<any>>) target(%726 : memref<1x128xf32, #tpu.memory_space<vmem>>) target_semaphore(%728 : memref<!tpu.dma_semaphore, #tpu.memory_space<semaphore_mem>>)
    %c3_i32_579 = arith.constant 3 : i32
    %c3_i32_580 = arith.constant 3 : i32
    %c0_i32_581 = arith.constant 0 : i32
    %729 = tpu.memref_slice %arg4[%639, %c0_i32_581] : memref<64x128xf32, #tpu.memory_space<any>> -> memref<1x128xf32, #tpu.memory_space<any>>
    %c8_i32_582 = arith.constant 8 : i32
    %c0_i32_583 = arith.constant 0 : i32
    %730 = tpu.memref_slice %arg6[%c3_i32_579, %c8_i32_582, %c0_i32_583] : memref<4x16x128xf32, #tpu.memory_space<vmem>> -> memref<1x1x128xf32, #tpu.memory_space<vmem>>
    %731 = tpu.memref_squeeze %730 : memref<1x1x128xf32, #tpu.memory_space<vmem>> -> memref<1x128xf32, #tpu.memory_space<vmem>>
    %732 = tpu.memref_slice %arg7[%c3_i32_580] : memref<4x!tpu.dma_semaphore, #tpu.memory_space<semaphore_mem>> -> memref<1x!tpu.dma_semaphore, #tpu.memory_space<semaphore_mem>>
    %733 = tpu.memref_squeeze %732 : memref<1x!tpu.dma_semaphore, #tpu.memory_space<semaphore_mem>> -> memref<!tpu.dma_semaphore, #tpu.memory_space<semaphore_mem>>
    tpu.enqueue_dma source(%729 : memref<1x128xf32, #tpu.memory_space<any>>) target(%731 : memref<1x128xf32, #tpu.memory_space<vmem>>) target_semaphore(%733 : memref<!tpu.dma_semaphore, #tpu.memory_space<semaphore_mem>>)
    %c3_i32_584 = arith.constant 3 : i32
    %c3_i32_585 = arith.constant 3 : i32
    %c0_i32_586 = arith.constant 0 : i32
    %734 = tpu.memref_slice %arg4[%646, %c0_i32_586] : memref<64x128xf32, #tpu.memory_space<any>> -> memref<1x128xf32, #tpu.memory_space<any>>
    %c9_i32_587 = arith.constant 9 : i32
    %c0_i32_588 = arith.constant 0 : i32
    %735 = tpu.memref_slice %arg6[%c3_i32_584, %c9_i32_587, %c0_i32_588] : memref<4x16x128xf32, #tpu.memory_space<vmem>> -> memref<1x1x128xf32, #tpu.memory_space<vmem>>
    %736 = tpu.memref_squeeze %735 : memref<1x1x128xf32, #tpu.memory_space<vmem>> -> memref<1x128xf32, #tpu.memory_space<vmem>>
    %737 = tpu.memref_slice %arg7[%c3_i32_585] : memref<4x!tpu.dma_semaphore, #tpu.memory_space<semaphore_mem>> -> memref<1x!tpu.dma_semaphore, #tpu.memory_space<semaphore_mem>>
    %738 = tpu.memref_squeeze %737 : memref<1x!tpu.dma_semaphore, #tpu.memory_space<semaphore_mem>> -> memref<!tpu.dma_semaphore, #tpu.memory_space<semaphore_mem>>
    tpu.enqueue_dma source(%734 : memref<1x128xf32, #tpu.memory_space<any>>) target(%736 : memref<1x128xf32, #tpu.memory_space<vmem>>) target_semaphore(%738 : memref<!tpu.dma_semaphore, #tpu.memory_space<semaphore_mem>>)
    %c3_i32_589 = arith.constant 3 : i32
    %c3_i32_590 = arith.constant 3 : i32
    %c0_i32_591 = arith.constant 0 : i32
    %739 = tpu.memref_slice %arg4[%653, %c0_i32_591] : memref<64x128xf32, #tpu.memory_space<any>> -> memref<1x128xf32, #tpu.memory_space<any>>
    %c10_i32_592 = arith.constant 10 : i32
    %c0_i32_593 = arith.constant 0 : i32
    %740 = tpu.memref_slice %arg6[%c3_i32_589, %c10_i32_592, %c0_i32_593] : memref<4x16x128xf32, #tpu.memory_space<vmem>> -> memref<1x1x128xf32, #tpu.memory_space<vmem>>
    %741 = tpu.memref_squeeze %740 : memref<1x1x128xf32, #tpu.memory_space<vmem>> -> memref<1x128xf32, #tpu.memory_space<vmem>>
    %742 = tpu.memref_slice %arg7[%c3_i32_590] : memref<4x!tpu.dma_semaphore, #tpu.memory_space<semaphore_mem>> -> memref<1x!tpu.dma_semaphore, #tpu.memory_space<semaphore_mem>>
    %743 = tpu.memref_squeeze %742 : memref<1x!tpu.dma_semaphore, #tpu.memory_space<semaphore_mem>> -> memref<!tpu.dma_semaphore, #tpu.memory_space<semaphore_mem>>
    tpu.enqueue_dma source(%739 : memref<1x128xf32, #tpu.memory_space<any>>) target(%741 : memref<1x128xf32, #tpu.memory_space<vmem>>) target_semaphore(%743 : memref<!tpu.dma_semaphore, #tpu.memory_space<semaphore_mem>>)
    %c3_i32_594 = arith.constant 3 : i32
    %c3_i32_595 = arith.constant 3 : i32
    %c0_i32_596 = arith.constant 0 : i32
    %744 = tpu.memref_slice %arg4[%660, %c0_i32_596] : memref<64x128xf32, #tpu.memory_space<any>> -> memref<1x128xf32, #tpu.memory_space<any>>
    %c11_i32_597 = arith.constant 11 : i32
    %c0_i32_598 = arith.constant 0 : i32
    %745 = tpu.memref_slice %arg6[%c3_i32_594, %c11_i32_597, %c0_i32_598] : memref<4x16x128xf32, #tpu.memory_space<vmem>> -> memref<1x1x128xf32, #tpu.memory_space<vmem>>
    %746 = tpu.memref_squeeze %745 : memref<1x1x128xf32, #tpu.memory_space<vmem>> -> memref<1x128xf32, #tpu.memory_space<vmem>>
    %747 = tpu.memref_slice %arg7[%c3_i32_595] : memref<4x!tpu.dma_semaphore, #tpu.memory_space<semaphore_mem>> -> memref<1x!tpu.dma_semaphore, #tpu.memory_space<semaphore_mem>>
    %748 = tpu.memref_squeeze %747 : memref<1x!tpu.dma_semaphore, #tpu.memory_space<semaphore_mem>> -> memref<!tpu.dma_semaphore, #tpu.memory_space<semaphore_mem>>
    tpu.enqueue_dma source(%744 : memref<1x128xf32, #tpu.memory_space<any>>) target(%746 : memref<1x128xf32, #tpu.memory_space<vmem>>) target_semaphore(%748 : memref<!tpu.dma_semaphore, #tpu.memory_space<semaphore_mem>>)
    %c3_i32_599 = arith.constant 3 : i32
    %c3_i32_600 = arith.constant 3 : i32
    %c0_i32_601 = arith.constant 0 : i32
    %749 = tpu.memref_slice %arg4[%667, %c0_i32_601] : memref<64x128xf32, #tpu.memory_space<any>> -> memref<1x128xf32, #tpu.memory_space<any>>
    %c12_i32_602 = arith.constant 12 : i32
    %c0_i32_603 = arith.constant 0 : i32
    %750 = tpu.memref_slice %arg6[%c3_i32_599, %c12_i32_602, %c0_i32_603] : memref<4x16x128xf32, #tpu.memory_space<vmem>> -> memref<1x1x128xf32, #tpu.memory_space<vmem>>
    %751 = tpu.memref_squeeze %750 : memref<1x1x128xf32, #tpu.memory_space<vmem>> -> memref<1x128xf32, #tpu.memory_space<vmem>>
    %752 = tpu.memref_slice %arg7[%c3_i32_600] : memref<4x!tpu.dma_semaphore, #tpu.memory_space<semaphore_mem>> -> memref<1x!tpu.dma_semaphore, #tpu.memory_space<semaphore_mem>>
    %753 = tpu.memref_squeeze %752 : memref<1x!tpu.dma_semaphore, #tpu.memory_space<semaphore_mem>> -> memref<!tpu.dma_semaphore, #tpu.memory_space<semaphore_mem>>
    tpu.enqueue_dma source(%749 : memref<1x128xf32, #tpu.memory_space<any>>) target(%751 : memref<1x128xf32, #tpu.memory_space<vmem>>) target_semaphore(%753 : memref<!tpu.dma_semaphore, #tpu.memory_space<semaphore_mem>>)
    %c3_i32_604 = arith.constant 3 : i32
    %c3_i32_605 = arith.constant 3 : i32
    %c0_i32_606 = arith.constant 0 : i32
    %754 = tpu.memref_slice %arg4[%674, %c0_i32_606] : memref<64x128xf32, #tpu.memory_space<any>> -> memref<1x128xf32, #tpu.memory_space<any>>
    %c13_i32_607 = arith.constant 13 : i32
    %c0_i32_608 = arith.constant 0 : i32
    %755 = tpu.memref_slice %arg6[%c3_i32_604, %c13_i32_607, %c0_i32_608] : memref<4x16x128xf32, #tpu.memory_space<vmem>> -> memref<1x1x128xf32, #tpu.memory_space<vmem>>
    %756 = tpu.memref_squeeze %755 : memref<1x1x128xf32, #tpu.memory_space<vmem>> -> memref<1x128xf32, #tpu.memory_space<vmem>>
    %757 = tpu.memref_slice %arg7[%c3_i32_605] : memref<4x!tpu.dma_semaphore, #tpu.memory_space<semaphore_mem>> -> memref<1x!tpu.dma_semaphore, #tpu.memory_space<semaphore_mem>>
    %758 = tpu.memref_squeeze %757 : memref<1x!tpu.dma_semaphore, #tpu.memory_space<semaphore_mem>> -> memref<!tpu.dma_semaphore, #tpu.memory_space<semaphore_mem>>
    tpu.enqueue_dma source(%754 : memref<1x128xf32, #tpu.memory_space<any>>) target(%756 : memref<1x128xf32, #tpu.memory_space<vmem>>) target_semaphore(%758 : memref<!tpu.dma_semaphore, #tpu.memory_space<semaphore_mem>>)
    %c3_i32_609 = arith.constant 3 : i32
    %c3_i32_610 = arith.constant 3 : i32
    %c0_i32_611 = arith.constant 0 : i32
    %759 = tpu.memref_slice %arg4[%681, %c0_i32_611] : memref<64x128xf32, #tpu.memory_space<any>> -> memref<1x128xf32, #tpu.memory_space<any>>
    %c14_i32_612 = arith.constant 14 : i32
    %c0_i32_613 = arith.constant 0 : i32
    %760 = tpu.memref_slice %arg6[%c3_i32_609, %c14_i32_612, %c0_i32_613] : memref<4x16x128xf32, #tpu.memory_space<vmem>> -> memref<1x1x128xf32, #tpu.memory_space<vmem>>
    %761 = tpu.memref_squeeze %760 : memref<1x1x128xf32, #tpu.memory_space<vmem>> -> memref<1x128xf32, #tpu.memory_space<vmem>>
    %762 = tpu.memref_slice %arg7[%c3_i32_610] : memref<4x!tpu.dma_semaphore, #tpu.memory_space<semaphore_mem>> -> memref<1x!tpu.dma_semaphore, #tpu.memory_space<semaphore_mem>>
    %763 = tpu.memref_squeeze %762 : memref<1x!tpu.dma_semaphore, #tpu.memory_space<semaphore_mem>> -> memref<!tpu.dma_semaphore, #tpu.memory_space<semaphore_mem>>
    tpu.enqueue_dma source(%759 : memref<1x128xf32, #tpu.memory_space<any>>) target(%761 : memref<1x128xf32, #tpu.memory_space<vmem>>) target_semaphore(%763 : memref<!tpu.dma_semaphore, #tpu.memory_space<semaphore_mem>>)
    %c3_i32_614 = arith.constant 3 : i32
    %c3_i32_615 = arith.constant 3 : i32
    %c0_i32_616 = arith.constant 0 : i32
    %764 = tpu.memref_slice %arg4[%688, %c0_i32_616] : memref<64x128xf32, #tpu.memory_space<any>> -> memref<1x128xf32, #tpu.memory_space<any>>
    %c15_i32_617 = arith.constant 15 : i32
    %c0_i32_618 = arith.constant 0 : i32
    %765 = tpu.memref_slice %arg6[%c3_i32_614, %c15_i32_617, %c0_i32_618] : memref<4x16x128xf32, #tpu.memory_space<vmem>> -> memref<1x1x128xf32, #tpu.memory_space<vmem>>
    %766 = tpu.memref_squeeze %765 : memref<1x1x128xf32, #tpu.memory_space<vmem>> -> memref<1x128xf32, #tpu.memory_space<vmem>>
    %767 = tpu.memref_slice %arg7[%c3_i32_615] : memref<4x!tpu.dma_semaphore, #tpu.memory_space<semaphore_mem>> -> memref<1x!tpu.dma_semaphore, #tpu.memory_space<semaphore_mem>>
    %768 = tpu.memref_squeeze %767 : memref<1x!tpu.dma_semaphore, #tpu.memory_space<semaphore_mem>> -> memref<!tpu.dma_semaphore, #tpu.memory_space<semaphore_mem>>
    tpu.enqueue_dma source(%764 : memref<1x128xf32, #tpu.memory_space<any>>) target(%766 : memref<1x128xf32, #tpu.memory_space<vmem>>) target_semaphore(%768 : memref<!tpu.dma_semaphore, #tpu.memory_space<semaphore_mem>>)
    %c0 = arith.constant 0 : index
    %c0_619 = arith.constant 0 : index
    %769 = vector.load %arg2[%c0, %c0_619] : memref<1x128xf32, #tpu.memory_space<vmem>>, vector<1x128xf32>
    %c0_620 = arith.constant 0 : index
    %c0_621 = arith.constant 0 : index
    %770 = vector.load %arg3[%c0_620, %c0_621] : memref<1x128xf32, #tpu.memory_space<vmem>>, vector<1x128xf32>
    %c0_i32_622 = arith.constant 0 : i32
    %c32_i32_623 = arith.constant 32 : i32
    %771 = arith.addi %c0_i32_622, %c32_i32_623 : i32
    %c1_i32_624 = arith.constant 1 : i32
    scf.for %arg8 = %c0_i32_622 to %771 step %c1_i32_624  : i32 {
      %c1_i32_626 = arith.constant 1 : i32
      %772 = arith.muli %arg8, %c1_i32_626 : i32
      %c0_i32_627 = arith.constant 0 : i32
      %773 = arith.addi %c0_i32_627, %772 : i32
      %c4_i32_628 = arith.constant 4 : i32
      %c0_i32_629 = arith.constant 0 : i32
      %774 = arith.cmpi eq, %c4_i32_628, %c0_i32_629 : i32
      %c1_i32_630 = arith.constant 1 : i32
      %775 = arith.select %774, %c1_i32_630, %c4_i32_628 : i32
      %776 = arith.remsi %773, %775 : i32
      %c0_i32_631 = arith.constant 0 : i32
      %777 = arith.cmpi ne, %776, %c0_i32_631 : i32
      %c0_i32_632 = arith.constant 0 : i32
      %778 = arith.cmpi slt, %776, %c0_i32_632 : i32
      %c0_i32_633 = arith.constant 0 : i32
      %779 = arith.cmpi slt, %775, %c0_i32_633 : i32
      %780 = arith.xori %778, %779 : i1
      %781 = arith.andi %780, %777 : i1
      %782 = arith.addi %776, %775 : i32
      %783 = arith.select %781, %782, %776 : i32
      %c4_i32_634 = arith.constant 4 : i32
      %784 = arith.addi %773, %c4_i32_634 : i32
      %c16_i32_635 = arith.constant 16 : i32
      %785 = arith.muli %784, %c16_i32_635 : i32
      %786 = arith.addi %0, %785 : i32
      %c0_i32_636 = arith.constant 0 : i32
      %787 = arith.addi %786, %c0_i32_636 : i32
      %c511_i32_637 = arith.constant 511 : i32
      %788 = arith.minsi %787, %c511_i32_637 : i32
      %789 = arith.index_cast %788 : i32 to index
      %790 = memref.load %arg1[%789] : memref<512xi32, #tpu.memory_space<smem>>
      %c0_i32_638 = arith.constant 0 : i32
      %791 = arith.maxsi %790, %c0_i32_638 : i32
      %c63_i32_639 = arith.constant 63 : i32
      %792 = arith.minsi %791, %c63_i32_639 : i32
      %c16_i32_640 = arith.constant 16 : i32
      %793 = arith.muli %784, %c16_i32_640 : i32
      %794 = arith.addi %0, %793 : i32
      %c1_i32_641 = arith.constant 1 : i32
      %795 = arith.addi %794, %c1_i32_641 : i32
      %c511_i32_642 = arith.constant 511 : i32
      %796 = arith.minsi %795, %c511_i32_642 : i32
      %797 = arith.index_cast %796 : i32 to index
      %798 = memref.load %arg1[%797] : memref<512xi32, #tpu.memory_space<smem>>
      %c0_i32_643 = arith.constant 0 : i32
      %799 = arith.maxsi %798, %c0_i32_643 : i32
      %c63_i32_644 = arith.constant 63 : i32
      %800 = arith.minsi %799, %c63_i32_644 : i32
      %c16_i32_645 = arith.constant 16 : i32
      %801 = arith.muli %784, %c16_i32_645 : i32
      %802 = arith.addi %0, %801 : i32
      %c2_i32_646 = arith.constant 2 : i32
      %803 = arith.addi %802, %c2_i32_646 : i32
      %c511_i32_647 = arith.constant 511 : i32
      %804 = arith.minsi %803, %c511_i32_647 : i32
      %805 = arith.index_cast %804 : i32 to index
      %806 = memref.load %arg1[%805] : memref<512xi32, #tpu.memory_space<smem>>
      %c0_i32_648 = arith.constant 0 : i32
      %807 = arith.maxsi %806, %c0_i32_648 : i32
      %c63_i32_649 = arith.constant 63 : i32
      %808 = arith.minsi %807, %c63_i32_649 : i32
      %c16_i32_650 = arith.constant 16 : i32
      %809 = arith.muli %784, %c16_i32_650 : i32
      %810 = arith.addi %0, %809 : i32
      %c3_i32_651 = arith.constant 3 : i32
      %811 = arith.addi %810, %c3_i32_651 : i32
      %c511_i32_652 = arith.constant 511 : i32
      %812 = arith.minsi %811, %c511_i32_652 : i32
      %813 = arith.index_cast %812 : i32 to index
      %814 = memref.load %arg1[%813] : memref<512xi32, #tpu.memory_space<smem>>
      %c0_i32_653 = arith.constant 0 : i32
      %815 = arith.maxsi %814, %c0_i32_653 : i32
      %c63_i32_654 = arith.constant 63 : i32
      %816 = arith.minsi %815, %c63_i32_654 : i32
      %c16_i32_655 = arith.constant 16 : i32
      %817 = arith.muli %784, %c16_i32_655 : i32
      %818 = arith.addi %0, %817 : i32
      %c4_i32_656 = arith.constant 4 : i32
      %819 = arith.addi %818, %c4_i32_656 : i32
      %c511_i32_657 = arith.constant 511 : i32
      %820 = arith.minsi %819, %c511_i32_657 : i32
      %821 = arith.index_cast %820 : i32 to index
      %822 = memref.load %arg1[%821] : memref<512xi32, #tpu.memory_space<smem>>
      %c0_i32_658 = arith.constant 0 : i32
      %823 = arith.maxsi %822, %c0_i32_658 : i32
      %c63_i32_659 = arith.constant 63 : i32
      %824 = arith.minsi %823, %c63_i32_659 : i32
      %c16_i32_660 = arith.constant 16 : i32
      %825 = arith.muli %784, %c16_i32_660 : i32
      %826 = arith.addi %0, %825 : i32
      %c5_i32_661 = arith.constant 5 : i32
      %827 = arith.addi %826, %c5_i32_661 : i32
      %c511_i32_662 = arith.constant 511 : i32
      %828 = arith.minsi %827, %c511_i32_662 : i32
      %829 = arith.index_cast %828 : i32 to index
      %830 = memref.load %arg1[%829] : memref<512xi32, #tpu.memory_space<smem>>
      %c0_i32_663 = arith.constant 0 : i32
      %831 = arith.maxsi %830, %c0_i32_663 : i32
      %c63_i32_664 = arith.constant 63 : i32
      %832 = arith.minsi %831, %c63_i32_664 : i32
      %c16_i32_665 = arith.constant 16 : i32
      %833 = arith.muli %784, %c16_i32_665 : i32
      %834 = arith.addi %0, %833 : i32
      %c6_i32_666 = arith.constant 6 : i32
      %835 = arith.addi %834, %c6_i32_666 : i32
      %c511_i32_667 = arith.constant 511 : i32
      %836 = arith.minsi %835, %c511_i32_667 : i32
      %837 = arith.index_cast %836 : i32 to index
      %838 = memref.load %arg1[%837] : memref<512xi32, #tpu.memory_space<smem>>
      %c0_i32_668 = arith.constant 0 : i32
      %839 = arith.maxsi %838, %c0_i32_668 : i32
      %c63_i32_669 = arith.constant 63 : i32
      %840 = arith.minsi %839, %c63_i32_669 : i32
      %c16_i32_670 = arith.constant 16 : i32
      %841 = arith.muli %784, %c16_i32_670 : i32
      %842 = arith.addi %0, %841 : i32
      %c7_i32_671 = arith.constant 7 : i32
      %843 = arith.addi %842, %c7_i32_671 : i32
      %c511_i32_672 = arith.constant 511 : i32
      %844 = arith.minsi %843, %c511_i32_672 : i32
      %845 = arith.index_cast %844 : i32 to index
      %846 = memref.load %arg1[%845] : memref<512xi32, #tpu.memory_space<smem>>
      %c0_i32_673 = arith.constant 0 : i32
      %847 = arith.maxsi %846, %c0_i32_673 : i32
      %c63_i32_674 = arith.constant 63 : i32
      %848 = arith.minsi %847, %c63_i32_674 : i32
      %c16_i32_675 = arith.constant 16 : i32
      %849 = arith.muli %784, %c16_i32_675 : i32
      %850 = arith.addi %0, %849 : i32
      %c8_i32_676 = arith.constant 8 : i32
      %851 = arith.addi %850, %c8_i32_676 : i32
      %c511_i32_677 = arith.constant 511 : i32
      %852 = arith.minsi %851, %c511_i32_677 : i32
      %853 = arith.index_cast %852 : i32 to index
      %854 = memref.load %arg1[%853] : memref<512xi32, #tpu.memory_space<smem>>
      %c0_i32_678 = arith.constant 0 : i32
      %855 = arith.maxsi %854, %c0_i32_678 : i32
      %c63_i32_679 = arith.constant 63 : i32
      %856 = arith.minsi %855, %c63_i32_679 : i32
      %c16_i32_680 = arith.constant 16 : i32
      %857 = arith.muli %784, %c16_i32_680 : i32
      %858 = arith.addi %0, %857 : i32
      %c9_i32_681 = arith.constant 9 : i32
      %859 = arith.addi %858, %c9_i32_681 : i32
      %c511_i32_682 = arith.constant 511 : i32
      %860 = arith.minsi %859, %c511_i32_682 : i32
      %861 = arith.index_cast %860 : i32 to index
      %862 = memref.load %arg1[%861] : memref<512xi32, #tpu.memory_space<smem>>
      %c0_i32_683 = arith.constant 0 : i32
      %863 = arith.maxsi %862, %c0_i32_683 : i32
      %c63_i32_684 = arith.constant 63 : i32
      %864 = arith.minsi %863, %c63_i32_684 : i32
      %c16_i32_685 = arith.constant 16 : i32
      %865 = arith.muli %784, %c16_i32_685 : i32
      %866 = arith.addi %0, %865 : i32
      %c10_i32_686 = arith.constant 10 : i32
      %867 = arith.addi %866, %c10_i32_686 : i32
      %c511_i32_687 = arith.constant 511 : i32
      %868 = arith.minsi %867, %c511_i32_687 : i32
      %869 = arith.index_cast %868 : i32 to index
      %870 = memref.load %arg1[%869] : memref<512xi32, #tpu.memory_space<smem>>
      %c0_i32_688 = arith.constant 0 : i32
      %871 = arith.maxsi %870, %c0_i32_688 : i32
      %c63_i32_689 = arith.constant 63 : i32
      %872 = arith.minsi %871, %c63_i32_689 : i32
      %c16_i32_690 = arith.constant 16 : i32
      %873 = arith.muli %784, %c16_i32_690 : i32
      %874 = arith.addi %0, %873 : i32
      %c11_i32_691 = arith.constant 11 : i32
      %875 = arith.addi %874, %c11_i32_691 : i32
      %c511_i32_692 = arith.constant 511 : i32
      %876 = arith.minsi %875, %c511_i32_692 : i32
      %877 = arith.index_cast %876 : i32 to index
      %878 = memref.load %arg1[%877] : memref<512xi32, #tpu.memory_space<smem>>
      %c0_i32_693 = arith.constant 0 : i32
      %879 = arith.maxsi %878, %c0_i32_693 : i32
      %c63_i32_694 = arith.constant 63 : i32
      %880 = arith.minsi %879, %c63_i32_694 : i32
      %c16_i32_695 = arith.constant 16 : i32
      %881 = arith.muli %784, %c16_i32_695 : i32
      %882 = arith.addi %0, %881 : i32
      %c12_i32_696 = arith.constant 12 : i32
      %883 = arith.addi %882, %c12_i32_696 : i32
      %c511_i32_697 = arith.constant 511 : i32
      %884 = arith.minsi %883, %c511_i32_697 : i32
      %885 = arith.index_cast %884 : i32 to index
      %886 = memref.load %arg1[%885] : memref<512xi32, #tpu.memory_space<smem>>
      %c0_i32_698 = arith.constant 0 : i32
      %887 = arith.maxsi %886, %c0_i32_698 : i32
      %c63_i32_699 = arith.constant 63 : i32
      %888 = arith.minsi %887, %c63_i32_699 : i32
      %c16_i32_700 = arith.constant 16 : i32
      %889 = arith.muli %784, %c16_i32_700 : i32
      %890 = arith.addi %0, %889 : i32
      %c13_i32_701 = arith.constant 13 : i32
      %891 = arith.addi %890, %c13_i32_701 : i32
      %c511_i32_702 = arith.constant 511 : i32
      %892 = arith.minsi %891, %c511_i32_702 : i32
      %893 = arith.index_cast %892 : i32 to index
      %894 = memref.load %arg1[%893] : memref<512xi32, #tpu.memory_space<smem>>
      %c0_i32_703 = arith.constant 0 : i32
      %895 = arith.maxsi %894, %c0_i32_703 : i32
      %c63_i32_704 = arith.constant 63 : i32
      %896 = arith.minsi %895, %c63_i32_704 : i32
      %c16_i32_705 = arith.constant 16 : i32
      %897 = arith.muli %784, %c16_i32_705 : i32
      %898 = arith.addi %0, %897 : i32
      %c14_i32_706 = arith.constant 14 : i32
      %899 = arith.addi %898, %c14_i32_706 : i32
      %c511_i32_707 = arith.constant 511 : i32
      %900 = arith.minsi %899, %c511_i32_707 : i32
      %901 = arith.index_cast %900 : i32 to index
      %902 = memref.load %arg1[%901] : memref<512xi32, #tpu.memory_space<smem>>
      %c0_i32_708 = arith.constant 0 : i32
      %903 = arith.maxsi %902, %c0_i32_708 : i32
      %c63_i32_709 = arith.constant 63 : i32
      %904 = arith.minsi %903, %c63_i32_709 : i32
      %c16_i32_710 = arith.constant 16 : i32
      %905 = arith.muli %784, %c16_i32_710 : i32
      %906 = arith.addi %0, %905 : i32
      %c15_i32_711 = arith.constant 15 : i32
      %907 = arith.addi %906, %c15_i32_711 : i32
      %c511_i32_712 = arith.constant 511 : i32
      %908 = arith.minsi %907, %c511_i32_712 : i32
      %909 = arith.index_cast %908 : i32 to index
      %910 = memref.load %arg1[%909] : memref<512xi32, #tpu.memory_space<smem>>
      %c0_i32_713 = arith.constant 0 : i32
      %911 = arith.maxsi %910, %c0_i32_713 : i32
      %c63_i32_714 = arith.constant 63 : i32
      %912 = arith.minsi %911, %c63_i32_714 : i32
      %c0_i32_715 = arith.constant 0 : i32
      %c0_i32_716 = arith.constant 0 : i32
      %913 = tpu.memref_slice %arg4[%c0_i32_715, %c0_i32_716] : memref<64x128xf32, #tpu.memory_space<any>> -> memref<1x128xf32, #tpu.memory_space<any>>
      %c0_i32_717 = arith.constant 0 : i32
      %c0_i32_718 = arith.constant 0 : i32
      %914 = tpu.memref_slice %arg6[%783, %c0_i32_717, %c0_i32_718] : memref<4x16x128xf32, #tpu.memory_space<vmem>> -> memref<1x1x128xf32, #tpu.memory_space<vmem>>
      %915 = tpu.memref_squeeze %914 : memref<1x1x128xf32, #tpu.memory_space<vmem>> -> memref<1x128xf32, #tpu.memory_space<vmem>>
      %916 = tpu.memref_slice %arg7[%783] : memref<4x!tpu.dma_semaphore, #tpu.memory_space<semaphore_mem>> -> memref<1x!tpu.dma_semaphore, #tpu.memory_space<semaphore_mem>>
      %917 = tpu.memref_squeeze %916 : memref<1x!tpu.dma_semaphore, #tpu.memory_space<semaphore_mem>> -> memref<!tpu.dma_semaphore, #tpu.memory_space<semaphore_mem>>
      tpu.wait_dma2 semaphore(%917 : memref<!tpu.dma_semaphore, #tpu.memory_space<semaphore_mem>>) src(%913 : memref<1x128xf32, #tpu.memory_space<any>>) dst(%915 : memref<1x128xf32, #tpu.memory_space<vmem>>)
      %c0_i32_719 = arith.constant 0 : i32
      %c0_i32_720 = arith.constant 0 : i32
      %918 = tpu.memref_slice %arg4[%c0_i32_719, %c0_i32_720] : memref<64x128xf32, #tpu.memory_space<any>> -> memref<1x128xf32, #tpu.memory_space<any>>
      %c1_i32_721 = arith.constant 1 : i32
      %c0_i32_722 = arith.constant 0 : i32
      %919 = tpu.memref_slice %arg6[%783, %c1_i32_721, %c0_i32_722] : memref<4x16x128xf32, #tpu.memory_space<vmem>> -> memref<1x1x128xf32, #tpu.memory_space<vmem>>
      %920 = tpu.memref_squeeze %919 : memref<1x1x128xf32, #tpu.memory_space<vmem>> -> memref<1x128xf32, #tpu.memory_space<vmem>>
      %921 = tpu.memref_slice %arg7[%783] : memref<4x!tpu.dma_semaphore, #tpu.memory_space<semaphore_mem>> -> memref<1x!tpu.dma_semaphore, #tpu.memory_space<semaphore_mem>>
      %922 = tpu.memref_squeeze %921 : memref<1x!tpu.dma_semaphore, #tpu.memory_space<semaphore_mem>> -> memref<!tpu.dma_semaphore, #tpu.memory_space<semaphore_mem>>
      tpu.wait_dma2 semaphore(%922 : memref<!tpu.dma_semaphore, #tpu.memory_space<semaphore_mem>>) src(%918 : memref<1x128xf32, #tpu.memory_space<any>>) dst(%920 : memref<1x128xf32, #tpu.memory_space<vmem>>)
      %c0_i32_723 = arith.constant 0 : i32
      %c0_i32_724 = arith.constant 0 : i32
      %923 = tpu.memref_slice %arg4[%c0_i32_723, %c0_i32_724] : memref<64x128xf32, #tpu.memory_space<any>> -> memref<1x128xf32, #tpu.memory_space<any>>
      %c2_i32_725 = arith.constant 2 : i32
      %c0_i32_726 = arith.constant 0 : i32
      %924 = tpu.memref_slice %arg6[%783, %c2_i32_725, %c0_i32_726] : memref<4x16x128xf32, #tpu.memory_space<vmem>> -> memref<1x1x128xf32, #tpu.memory_space<vmem>>
      %925 = tpu.memref_squeeze %924 : memref<1x1x128xf32, #tpu.memory_space<vmem>> -> memref<1x128xf32, #tpu.memory_space<vmem>>
      %926 = tpu.memref_slice %arg7[%783] : memref<4x!tpu.dma_semaphore, #tpu.memory_space<semaphore_mem>> -> memref<1x!tpu.dma_semaphore, #tpu.memory_space<semaphore_mem>>
      %927 = tpu.memref_squeeze %926 : memref<1x!tpu.dma_semaphore, #tpu.memory_space<semaphore_mem>> -> memref<!tpu.dma_semaphore, #tpu.memory_space<semaphore_mem>>
      tpu.wait_dma2 semaphore(%927 : memref<!tpu.dma_semaphore, #tpu.memory_space<semaphore_mem>>) src(%923 : memref<1x128xf32, #tpu.memory_space<any>>) dst(%925 : memref<1x128xf32, #tpu.memory_space<vmem>>)
      %c0_i32_727 = arith.constant 0 : i32
      %c0_i32_728 = arith.constant 0 : i32
      %928 = tpu.memref_slice %arg4[%c0_i32_727, %c0_i32_728] : memref<64x128xf32, #tpu.memory_space<any>> -> memref<1x128xf32, #tpu.memory_space<any>>
      %c3_i32_729 = arith.constant 3 : i32
      %c0_i32_730 = arith.constant 0 : i32
      %929 = tpu.memref_slice %arg6[%783, %c3_i32_729, %c0_i32_730] : memref<4x16x128xf32, #tpu.memory_space<vmem>> -> memref<1x1x128xf32, #tpu.memory_space<vmem>>
      %930 = tpu.memref_squeeze %929 : memref<1x1x128xf32, #tpu.memory_space<vmem>> -> memref<1x128xf32, #tpu.memory_space<vmem>>
      %931 = tpu.memref_slice %arg7[%783] : memref<4x!tpu.dma_semaphore, #tpu.memory_space<semaphore_mem>> -> memref<1x!tpu.dma_semaphore, #tpu.memory_space<semaphore_mem>>
      %932 = tpu.memref_squeeze %931 : memref<1x!tpu.dma_semaphore, #tpu.memory_space<semaphore_mem>> -> memref<!tpu.dma_semaphore, #tpu.memory_space<semaphore_mem>>
      tpu.wait_dma2 semaphore(%932 : memref<!tpu.dma_semaphore, #tpu.memory_space<semaphore_mem>>) src(%928 : memref<1x128xf32, #tpu.memory_space<any>>) dst(%930 : memref<1x128xf32, #tpu.memory_space<vmem>>)
      %c0_i32_731 = arith.constant 0 : i32
      %c0_i32_732 = arith.constant 0 : i32
      %933 = tpu.memref_slice %arg4[%c0_i32_731, %c0_i32_732] : memref<64x128xf32, #tpu.memory_space<any>> -> memref<1x128xf32, #tpu.memory_space<any>>
      %c4_i32_733 = arith.constant 4 : i32
      %c0_i32_734 = arith.constant 0 : i32
      %934 = tpu.memref_slice %arg6[%783, %c4_i32_733, %c0_i32_734] : memref<4x16x128xf32, #tpu.memory_space<vmem>> -> memref<1x1x128xf32, #tpu.memory_space<vmem>>
      %935 = tpu.memref_squeeze %934 : memref<1x1x128xf32, #tpu.memory_space<vmem>> -> memref<1x128xf32, #tpu.memory_space<vmem>>
      %936 = tpu.memref_slice %arg7[%783] : memref<4x!tpu.dma_semaphore, #tpu.memory_space<semaphore_mem>> -> memref<1x!tpu.dma_semaphore, #tpu.memory_space<semaphore_mem>>
      %937 = tpu.memref_squeeze %936 : memref<1x!tpu.dma_semaphore, #tpu.memory_space<semaphore_mem>> -> memref<!tpu.dma_semaphore, #tpu.memory_space<semaphore_mem>>
      tpu.wait_dma2 semaphore(%937 : memref<!tpu.dma_semaphore, #tpu.memory_space<semaphore_mem>>) src(%933 : memref<1x128xf32, #tpu.memory_space<any>>) dst(%935 : memref<1x128xf32, #tpu.memory_space<vmem>>)
      %c0_i32_735 = arith.constant 0 : i32
      %c0_i32_736 = arith.constant 0 : i32
      %938 = tpu.memref_slice %arg4[%c0_i32_735, %c0_i32_736] : memref<64x128xf32, #tpu.memory_space<any>> -> memref<1x128xf32, #tpu.memory_space<any>>
      %c5_i32_737 = arith.constant 5 : i32
      %c0_i32_738 = arith.constant 0 : i32
      %939 = tpu.memref_slice %arg6[%783, %c5_i32_737, %c0_i32_738] : memref<4x16x128xf32, #tpu.memory_space<vmem>> -> memref<1x1x128xf32, #tpu.memory_space<vmem>>
      %940 = tpu.memref_squeeze %939 : memref<1x1x128xf32, #tpu.memory_space<vmem>> -> memref<1x128xf32, #tpu.memory_space<vmem>>
      %941 = tpu.memref_slice %arg7[%783] : memref<4x!tpu.dma_semaphore, #tpu.memory_space<semaphore_mem>> -> memref<1x!tpu.dma_semaphore, #tpu.memory_space<semaphore_mem>>
      %942 = tpu.memref_squeeze %941 : memref<1x!tpu.dma_semaphore, #tpu.memory_space<semaphore_mem>> -> memref<!tpu.dma_semaphore, #tpu.memory_space<semaphore_mem>>
      tpu.wait_dma2 semaphore(%942 : memref<!tpu.dma_semaphore, #tpu.memory_space<semaphore_mem>>) src(%938 : memref<1x128xf32, #tpu.memory_space<any>>) dst(%940 : memref<1x128xf32, #tpu.memory_space<vmem>>)
      %c0_i32_739 = arith.constant 0 : i32
      %c0_i32_740 = arith.constant 0 : i32
      %943 = tpu.memref_slice %arg4[%c0_i32_739, %c0_i32_740] : memref<64x128xf32, #tpu.memory_space<any>> -> memref<1x128xf32, #tpu.memory_space<any>>
      %c6_i32_741 = arith.constant 6 : i32
      %c0_i32_742 = arith.constant 0 : i32
      %944 = tpu.memref_slice %arg6[%783, %c6_i32_741, %c0_i32_742] : memref<4x16x128xf32, #tpu.memory_space<vmem>> -> memref<1x1x128xf32, #tpu.memory_space<vmem>>
      %945 = tpu.memref_squeeze %944 : memref<1x1x128xf32, #tpu.memory_space<vmem>> -> memref<1x128xf32, #tpu.memory_space<vmem>>
      %946 = tpu.memref_slice %arg7[%783] : memref<4x!tpu.dma_semaphore, #tpu.memory_space<semaphore_mem>> -> memref<1x!tpu.dma_semaphore, #tpu.memory_space<semaphore_mem>>
      %947 = tpu.memref_squeeze %946 : memref<1x!tpu.dma_semaphore, #tpu.memory_space<semaphore_mem>> -> memref<!tpu.dma_semaphore, #tpu.memory_space<semaphore_mem>>
      tpu.wait_dma2 semaphore(%947 : memref<!tpu.dma_semaphore, #tpu.memory_space<semaphore_mem>>) src(%943 : memref<1x128xf32, #tpu.memory_space<any>>) dst(%945 : memref<1x128xf32, #tpu.memory_space<vmem>>)
      %c0_i32_743 = arith.constant 0 : i32
      %c0_i32_744 = arith.constant 0 : i32
      %948 = tpu.memref_slice %arg4[%c0_i32_743, %c0_i32_744] : memref<64x128xf32, #tpu.memory_space<any>> -> memref<1x128xf32, #tpu.memory_space<any>>
      %c7_i32_745 = arith.constant 7 : i32
      %c0_i32_746 = arith.constant 0 : i32
      %949 = tpu.memref_slice %arg6[%783, %c7_i32_745, %c0_i32_746] : memref<4x16x128xf32, #tpu.memory_space<vmem>> -> memref<1x1x128xf32, #tpu.memory_space<vmem>>
      %950 = tpu.memref_squeeze %949 : memref<1x1x128xf32, #tpu.memory_space<vmem>> -> memref<1x128xf32, #tpu.memory_space<vmem>>
      %951 = tpu.memref_slice %arg7[%783] : memref<4x!tpu.dma_semaphore, #tpu.memory_space<semaphore_mem>> -> memref<1x!tpu.dma_semaphore, #tpu.memory_space<semaphore_mem>>
      %952 = tpu.memref_squeeze %951 : memref<1x!tpu.dma_semaphore, #tpu.memory_space<semaphore_mem>> -> memref<!tpu.dma_semaphore, #tpu.memory_space<semaphore_mem>>
      tpu.wait_dma2 semaphore(%952 : memref<!tpu.dma_semaphore, #tpu.memory_space<semaphore_mem>>) src(%948 : memref<1x128xf32, #tpu.memory_space<any>>) dst(%950 : memref<1x128xf32, #tpu.memory_space<vmem>>)
      %c0_i32_747 = arith.constant 0 : i32
      %c0_i32_748 = arith.constant 0 : i32
      %953 = tpu.memref_slice %arg4[%c0_i32_747, %c0_i32_748] : memref<64x128xf32, #tpu.memory_space<any>> -> memref<1x128xf32, #tpu.memory_space<any>>
      %c8_i32_749 = arith.constant 8 : i32
      %c0_i32_750 = arith.constant 0 : i32
      %954 = tpu.memref_slice %arg6[%783, %c8_i32_749, %c0_i32_750] : memref<4x16x128xf32, #tpu.memory_space<vmem>> -> memref<1x1x128xf32, #tpu.memory_space<vmem>>
      %955 = tpu.memref_squeeze %954 : memref<1x1x128xf32, #tpu.memory_space<vmem>> -> memref<1x128xf32, #tpu.memory_space<vmem>>
      %956 = tpu.memref_slice %arg7[%783] : memref<4x!tpu.dma_semaphore, #tpu.memory_space<semaphore_mem>> -> memref<1x!tpu.dma_semaphore, #tpu.memory_space<semaphore_mem>>
      %957 = tpu.memref_squeeze %956 : memref<1x!tpu.dma_semaphore, #tpu.memory_space<semaphore_mem>> -> memref<!tpu.dma_semaphore, #tpu.memory_space<semaphore_mem>>
      tpu.wait_dma2 semaphore(%957 : memref<!tpu.dma_semaphore, #tpu.memory_space<semaphore_mem>>) src(%953 : memref<1x128xf32, #tpu.memory_space<any>>) dst(%955 : memref<1x128xf32, #tpu.memory_space<vmem>>)
      %c0_i32_751 = arith.constant 0 : i32
      %c0_i32_752 = arith.constant 0 : i32
      %958 = tpu.memref_slice %arg4[%c0_i32_751, %c0_i32_752] : memref<64x128xf32, #tpu.memory_space<any>> -> memref<1x128xf32, #tpu.memory_space<any>>
      %c9_i32_753 = arith.constant 9 : i32
      %c0_i32_754 = arith.constant 0 : i32
      %959 = tpu.memref_slice %arg6[%783, %c9_i32_753, %c0_i32_754] : memref<4x16x128xf32, #tpu.memory_space<vmem>> -> memref<1x1x128xf32, #tpu.memory_space<vmem>>
      %960 = tpu.memref_squeeze %959 : memref<1x1x128xf32, #tpu.memory_space<vmem>> -> memref<1x128xf32, #tpu.memory_space<vmem>>
      %961 = tpu.memref_slice %arg7[%783] : memref<4x!tpu.dma_semaphore, #tpu.memory_space<semaphore_mem>> -> memref<1x!tpu.dma_semaphore, #tpu.memory_space<semaphore_mem>>
      %962 = tpu.memref_squeeze %961 : memref<1x!tpu.dma_semaphore, #tpu.memory_space<semaphore_mem>> -> memref<!tpu.dma_semaphore, #tpu.memory_space<semaphore_mem>>
      tpu.wait_dma2 semaphore(%962 : memref<!tpu.dma_semaphore, #tpu.memory_space<semaphore_mem>>) src(%958 : memref<1x128xf32, #tpu.memory_space<any>>) dst(%960 : memref<1x128xf32, #tpu.memory_space<vmem>>)
      %c0_i32_755 = arith.constant 0 : i32
      %c0_i32_756 = arith.constant 0 : i32
      %963 = tpu.memref_slice %arg4[%c0_i32_755, %c0_i32_756] : memref<64x128xf32, #tpu.memory_space<any>> -> memref<1x128xf32, #tpu.memory_space<any>>
      %c10_i32_757 = arith.constant 10 : i32
      %c0_i32_758 = arith.constant 0 : i32
      %964 = tpu.memref_slice %arg6[%783, %c10_i32_757, %c0_i32_758] : memref<4x16x128xf32, #tpu.memory_space<vmem>> -> memref<1x1x128xf32, #tpu.memory_space<vmem>>
      %965 = tpu.memref_squeeze %964 : memref<1x1x128xf32, #tpu.memory_space<vmem>> -> memref<1x128xf32, #tpu.memory_space<vmem>>
      %966 = tpu.memref_slice %arg7[%783] : memref<4x!tpu.dma_semaphore, #tpu.memory_space<semaphore_mem>> -> memref<1x!tpu.dma_semaphore, #tpu.memory_space<semaphore_mem>>
      %967 = tpu.memref_squeeze %966 : memref<1x!tpu.dma_semaphore, #tpu.memory_space<semaphore_mem>> -> memref<!tpu.dma_semaphore, #tpu.memory_space<semaphore_mem>>
      tpu.wait_dma2 semaphore(%967 : memref<!tpu.dma_semaphore, #tpu.memory_space<semaphore_mem>>) src(%963 : memref<1x128xf32, #tpu.memory_space<any>>) dst(%965 : memref<1x128xf32, #tpu.memory_space<vmem>>)
      %c0_i32_759 = arith.constant 0 : i32
      %c0_i32_760 = arith.constant 0 : i32
      %968 = tpu.memref_slice %arg4[%c0_i32_759, %c0_i32_760] : memref<64x128xf32, #tpu.memory_space<any>> -> memref<1x128xf32, #tpu.memory_space<any>>
      %c11_i32_761 = arith.constant 11 : i32
      %c0_i32_762 = arith.constant 0 : i32
      %969 = tpu.memref_slice %arg6[%783, %c11_i32_761, %c0_i32_762] : memref<4x16x128xf32, #tpu.memory_space<vmem>> -> memref<1x1x128xf32, #tpu.memory_space<vmem>>
      %970 = tpu.memref_squeeze %969 : memref<1x1x128xf32, #tpu.memory_space<vmem>> -> memref<1x128xf32, #tpu.memory_space<vmem>>
      %971 = tpu.memref_slice %arg7[%783] : memref<4x!tpu.dma_semaphore, #tpu.memory_space<semaphore_mem>> -> memref<1x!tpu.dma_semaphore, #tpu.memory_space<semaphore_mem>>
      %972 = tpu.memref_squeeze %971 : memref<1x!tpu.dma_semaphore, #tpu.memory_space<semaphore_mem>> -> memref<!tpu.dma_semaphore, #tpu.memory_space<semaphore_mem>>
      tpu.wait_dma2 semaphore(%972 : memref<!tpu.dma_semaphore, #tpu.memory_space<semaphore_mem>>) src(%968 : memref<1x128xf32, #tpu.memory_space<any>>) dst(%970 : memref<1x128xf32, #tpu.memory_space<vmem>>)
      %c0_i32_763 = arith.constant 0 : i32
      %c0_i32_764 = arith.constant 0 : i32
      %973 = tpu.memref_slice %arg4[%c0_i32_763, %c0_i32_764] : memref<64x128xf32, #tpu.memory_space<any>> -> memref<1x128xf32, #tpu.memory_space<any>>
      %c12_i32_765 = arith.constant 12 : i32
      %c0_i32_766 = arith.constant 0 : i32
      %974 = tpu.memref_slice %arg6[%783, %c12_i32_765, %c0_i32_766] : memref<4x16x128xf32, #tpu.memory_space<vmem>> -> memref<1x1x128xf32, #tpu.memory_space<vmem>>
      %975 = tpu.memref_squeeze %974 : memref<1x1x128xf32, #tpu.memory_space<vmem>> -> memref<1x128xf32, #tpu.memory_space<vmem>>
      %976 = tpu.memref_slice %arg7[%783] : memref<4x!tpu.dma_semaphore, #tpu.memory_space<semaphore_mem>> -> memref<1x!tpu.dma_semaphore, #tpu.memory_space<semaphore_mem>>
      %977 = tpu.memref_squeeze %976 : memref<1x!tpu.dma_semaphore, #tpu.memory_space<semaphore_mem>> -> memref<!tpu.dma_semaphore, #tpu.memory_space<semaphore_mem>>
      tpu.wait_dma2 semaphore(%977 : memref<!tpu.dma_semaphore, #tpu.memory_space<semaphore_mem>>) src(%973 : memref<1x128xf32, #tpu.memory_space<any>>) dst(%975 : memref<1x128xf32, #tpu.memory_space<vmem>>)
      %c0_i32_767 = arith.constant 0 : i32
      %c0_i32_768 = arith.constant 0 : i32
      %978 = tpu.memref_slice %arg4[%c0_i32_767, %c0_i32_768] : memref<64x128xf32, #tpu.memory_space<any>> -> memref<1x128xf32, #tpu.memory_space<any>>
      %c13_i32_769 = arith.constant 13 : i32
      %c0_i32_770 = arith.constant 0 : i32
      %979 = tpu.memref_slice %arg6[%783, %c13_i32_769, %c0_i32_770] : memref<4x16x128xf32, #tpu.memory_space<vmem>> -> memref<1x1x128xf32, #tpu.memory_space<vmem>>
      %980 = tpu.memref_squeeze %979 : memref<1x1x128xf32, #tpu.memory_space<vmem>> -> memref<1x128xf32, #tpu.memory_space<vmem>>
      %981 = tpu.memref_slice %arg7[%783] : memref<4x!tpu.dma_semaphore, #tpu.memory_space<semaphore_mem>> -> memref<1x!tpu.dma_semaphore, #tpu.memory_space<semaphore_mem>>
      %982 = tpu.memref_squeeze %981 : memref<1x!tpu.dma_semaphore, #tpu.memory_space<semaphore_mem>> -> memref<!tpu.dma_semaphore, #tpu.memory_space<semaphore_mem>>
      tpu.wait_dma2 semaphore(%982 : memref<!tpu.dma_semaphore, #tpu.memory_space<semaphore_mem>>) src(%978 : memref<1x128xf32, #tpu.memory_space<any>>) dst(%980 : memref<1x128xf32, #tpu.memory_space<vmem>>)
      %c0_i32_771 = arith.constant 0 : i32
      %c0_i32_772 = arith.constant 0 : i32
      %983 = tpu.memref_slice %arg4[%c0_i32_771, %c0_i32_772] : memref<64x128xf32, #tpu.memory_space<any>> -> memref<1x128xf32, #tpu.memory_space<any>>
      %c14_i32_773 = arith.constant 14 : i32
      %c0_i32_774 = arith.constant 0 : i32
      %984 = tpu.memref_slice %arg6[%783, %c14_i32_773, %c0_i32_774] : memref<4x16x128xf32, #tpu.memory_space<vmem>> -> memref<1x1x128xf32, #tpu.memory_space<vmem>>
      %985 = tpu.memref_squeeze %984 : memref<1x1x128xf32, #tpu.memory_space<vmem>> -> memref<1x128xf32, #tpu.memory_space<vmem>>
      %986 = tpu.memref_slice %arg7[%783] : memref<4x!tpu.dma_semaphore, #tpu.memory_space<semaphore_mem>> -> memref<1x!tpu.dma_semaphore, #tpu.memory_space<semaphore_mem>>
      %987 = tpu.memref_squeeze %986 : memref<1x!tpu.dma_semaphore, #tpu.memory_space<semaphore_mem>> -> memref<!tpu.dma_semaphore, #tpu.memory_space<semaphore_mem>>
      tpu.wait_dma2 semaphore(%987 : memref<!tpu.dma_semaphore, #tpu.memory_space<semaphore_mem>>) src(%983 : memref<1x128xf32, #tpu.memory_space<any>>) dst(%985 : memref<1x128xf32, #tpu.memory_space<vmem>>)
      %c0_i32_775 = arith.constant 0 : i32
      %c0_i32_776 = arith.constant 0 : i32
      %988 = tpu.memref_slice %arg4[%c0_i32_775, %c0_i32_776] : memref<64x128xf32, #tpu.memory_space<any>> -> memref<1x128xf32, #tpu.memory_space<any>>
      %c15_i32_777 = arith.constant 15 : i32
      %c0_i32_778 = arith.constant 0 : i32
      %989 = tpu.memref_slice %arg6[%783, %c15_i32_777, %c0_i32_778] : memref<4x16x128xf32, #tpu.memory_space<vmem>> -> memref<1x1x128xf32, #tpu.memory_space<vmem>>
      %990 = tpu.memref_squeeze %989 : memref<1x1x128xf32, #tpu.memory_space<vmem>> -> memref<1x128xf32, #tpu.memory_space<vmem>>
      %991 = tpu.memref_slice %arg7[%783] : memref<4x!tpu.dma_semaphore, #tpu.memory_space<semaphore_mem>> -> memref<1x!tpu.dma_semaphore, #tpu.memory_space<semaphore_mem>>
      %992 = tpu.memref_squeeze %991 : memref<1x!tpu.dma_semaphore, #tpu.memory_space<semaphore_mem>> -> memref<!tpu.dma_semaphore, #tpu.memory_space<semaphore_mem>>
      tpu.wait_dma2 semaphore(%992 : memref<!tpu.dma_semaphore, #tpu.memory_space<semaphore_mem>>) src(%988 : memref<1x128xf32, #tpu.memory_space<any>>) dst(%990 : memref<1x128xf32, #tpu.memory_space<vmem>>)
      %993 = arith.index_cast %783 : i32 to index
      %c0_779 = arith.constant 0 : index
      %c0_780 = arith.constant 0 : index
      %994 = vector.load %arg6[%993, %c0_779, %c0_780] : memref<4x16x128xf32, #tpu.memory_space<vmem>>, vector<1x16x128xf32>
      %995 = vector.shape_cast %994 : vector<1x16x128xf32> to vector<16x128xf32>
      %cst = arith.constant dense<0.000000e+00> : vector<16xf32>
      %996 = vector.multi_reduction <add>, %995, %cst [1] : vector<16x128xf32> to vector<16xf32>
      %997 = vector.shape_cast %996 : vector<16xf32> to vector<16x1xf32>
      %998 = arith.mulf %995, %995 : vector<16x128xf32>
      %cst_781 = arith.constant dense<0.000000e+00> : vector<16xf32>
      %999 = vector.multi_reduction <add>, %998, %cst_781 [1] : vector<16x128xf32> to vector<16xf32>
      %1000 = vector.shape_cast %999 : vector<16xf32> to vector<16x1xf32>
      %cst_782 = arith.constant 7.812500e-03 : f32
      %1001 = vector.broadcast %cst_782 : f32 to vector<16x1xf32>
      %1002 = arith.mulf %997, %1001 : vector<16x1xf32>
      %cst_783 = arith.constant 7.812500e-03 : f32
      %1003 = vector.broadcast %cst_783 : f32 to vector<16x1xf32>
      %1004 = arith.mulf %1000, %1003 : vector<16x1xf32>
      %1005 = arith.mulf %1002, %1002 : vector<16x1xf32>
      %1006 = arith.subf %1004, %1005 : vector<16x1xf32>
      %cst_784 = arith.constant 9.99999997E-7 : f32
      %1007 = vector.broadcast %cst_784 : f32 to vector<16x1xf32>
      %1008 = arith.addf %1006, %1007 : vector<16x1xf32>
      %1009 = math.rsqrt %1008 : vector<16x1xf32>
      %1010 = vector.broadcast %1009 : vector<16x1xf32> to vector<16x128xf32>
      %1011 = vector.broadcast %769 : vector<1x128xf32> to vector<16x128xf32>
      %1012 = arith.mulf %1010, %1011 : vector<16x128xf32>
      %1013 = vector.broadcast %1002 : vector<16x1xf32> to vector<16x128xf32>
      %1014 = arith.mulf %1013, %1012 : vector<16x128xf32>
      %1015 = vector.broadcast %770 : vector<1x128xf32> to vector<16x128xf32>
      %1016 = arith.subf %1015, %1014 : vector<16x128xf32>
      %c16_i32_785 = arith.constant 16 : i32
      %1017 = arith.muli %773, %c16_i32_785 : i32
      %1018 = tpu.assume_multiple %1017, 16 : i32
      %1019 = arith.mulf %995, %1012 : vector<16x128xf32>
      %1020 = arith.addf %1019, %1016 : vector<16x128xf32>
      %1021 = arith.index_cast %1018 : i32 to index
      %c0_786 = arith.constant 0 : index
      %1022 = vector.load %arg5[%1021, %c0_786] : memref<512x128xf32, #tpu.memory_space<vmem>>, vector<16x128xf32>
      tpu.vector_store %arg5[%1021, %c0_786], %1020 {strides = array<i32>} : memref<512x128xf32, #tpu.memory_space<vmem>>, vector<16x128xf32>,
      %c4_i32_787 = arith.constant 4 : i32
      %1023 = arith.addi %773, %c4_i32_787 : i32
      %c32_i32_788 = arith.constant 32 : i32
      %1024 = arith.cmpi slt, %1023, %c32_i32_788 : i32
      %1025 = arith.extui %1024 : i1 to i32
      %c0_i32_789 = arith.constant 0 : i32
      %1026 = arith.cmpi ne, %1025, %c0_i32_789 : i32
      scf.if %1026 {
        %c0_i32_790 = arith.constant 0 : i32
        %1027 = tpu.memref_slice %arg4[%792, %c0_i32_790] : memref<64x128xf32, #tpu.memory_space<any>> -> memref<1x128xf32, #tpu.memory_space<any>>
        %c0_i32_791 = arith.constant 0 : i32
        %c0_i32_792 = arith.constant 0 : i32
        %1028 = tpu.memref_slice %arg6[%783, %c0_i32_791, %c0_i32_792] : memref<4x16x128xf32, #tpu.memory_space<vmem>> -> memref<1x1x128xf32, #tpu.memory_space<vmem>>
        %1029 = tpu.memref_squeeze %1028 : memref<1x1x128xf32, #tpu.memory_space<vmem>> -> memref<1x128xf32, #tpu.memory_space<vmem>>
        %1030 = tpu.memref_slice %arg7[%783] : memref<4x!tpu.dma_semaphore, #tpu.memory_space<semaphore_mem>> -> memref<1x!tpu.dma_semaphore, #tpu.memory_space<semaphore_mem>>
        %1031 = tpu.memref_squeeze %1030 : memref<1x!tpu.dma_semaphore, #tpu.memory_space<semaphore_mem>> -> memref<!tpu.dma_semaphore, #tpu.memory_space<semaphore_mem>>
        tpu.enqueue_dma source(%1027 : memref<1x128xf32, #tpu.memory_space<any>>) target(%1029 : memref<1x128xf32, #tpu.memory_space<vmem>>) target_semaphore(%1031 : memref<!tpu.dma_semaphore, #tpu.memory_space<semaphore_mem>>)
        %c0_i32_793 = arith.constant 0 : i32
        %1032 = tpu.memref_slice %arg4[%800, %c0_i32_793] : memref<64x128xf32, #tpu.memory_space<any>> -> memref<1x128xf32, #tpu.memory_space<any>>
        %c1_i32_794 = arith.constant 1 : i32
        %c0_i32_795 = arith.constant 0 : i32
        %1033 = tpu.memref_slice %arg6[%783, %c1_i32_794, %c0_i32_795] : memref<4x16x128xf32, #tpu.memory_space<vmem>> -> memref<1x1x128xf32, #tpu.memory_space<vmem>>
        %1034 = tpu.memref_squeeze %1033 : memref<1x1x128xf32, #tpu.memory_space<vmem>> -> memref<1x128xf32, #tpu.memory_space<vmem>>
        %1035 = tpu.memref_slice %arg7[%783] : memref<4x!tpu.dma_semaphore, #tpu.memory_space<semaphore_mem>> -> memref<1x!tpu.dma_semaphore, #tpu.memory_space<semaphore_mem>>
        %1036 = tpu.memref_squeeze %1035 : memref<1x!tpu.dma_semaphore, #tpu.memory_space<semaphore_mem>> -> memref<!tpu.dma_semaphore, #tpu.memory_space<semaphore_mem>>
        tpu.enqueue_dma source(%1032 : memref<1x128xf32, #tpu.memory_space<any>>) target(%1034 : memref<1x128xf32, #tpu.memory_space<vmem>>) target_semaphore(%1036 : memref<!tpu.dma_semaphore, #tpu.memory_space<semaphore_mem>>)
        %c0_i32_796 = arith.constant 0 : i32
        %1037 = tpu.memref_slice %arg4[%808, %c0_i32_796] : memref<64x128xf32, #tpu.memory_space<any>> -> memref<1x128xf32, #tpu.memory_space<any>>
        %c2_i32_797 = arith.constant 2 : i32
        %c0_i32_798 = arith.constant 0 : i32
        %1038 = tpu.memref_slice %arg6[%783, %c2_i32_797, %c0_i32_798] : memref<4x16x128xf32, #tpu.memory_space<vmem>> -> memref<1x1x128xf32, #tpu.memory_space<vmem>>
        %1039 = tpu.memref_squeeze %1038 : memref<1x1x128xf32, #tpu.memory_space<vmem>> -> memref<1x128xf32, #tpu.memory_space<vmem>>
        %1040 = tpu.memref_slice %arg7[%783] : memref<4x!tpu.dma_semaphore, #tpu.memory_space<semaphore_mem>> -> memref<1x!tpu.dma_semaphore, #tpu.memory_space<semaphore_mem>>
        %1041 = tpu.memref_squeeze %1040 : memref<1x!tpu.dma_semaphore, #tpu.memory_space<semaphore_mem>> -> memref<!tpu.dma_semaphore, #tpu.memory_space<semaphore_mem>>
        tpu.enqueue_dma source(%1037 : memref<1x128xf32, #tpu.memory_space<any>>) target(%1039 : memref<1x128xf32, #tpu.memory_space<vmem>>) target_semaphore(%1041 : memref<!tpu.dma_semaphore, #tpu.memory_space<semaphore_mem>>)
        %c0_i32_799 = arith.constant 0 : i32
        %1042 = tpu.memref_slice %arg4[%816, %c0_i32_799] : memref<64x128xf32, #tpu.memory_space<any>> -> memref<1x128xf32, #tpu.memory_space<any>>
        %c3_i32_800 = arith.constant 3 : i32
        %c0_i32_801 = arith.constant 0 : i32
        %1043 = tpu.memref_slice %arg6[%783, %c3_i32_800, %c0_i32_801] : memref<4x16x128xf32, #tpu.memory_space<vmem>> -> memref<1x1x128xf32, #tpu.memory_space<vmem>>
        %1044 = tpu.memref_squeeze %1043 : memref<1x1x128xf32, #tpu.memory_space<vmem>> -> memref<1x128xf32, #tpu.memory_space<vmem>>
        %1045 = tpu.memref_slice %arg7[%783] : memref<4x!tpu.dma_semaphore, #tpu.memory_space<semaphore_mem>> -> memref<1x!tpu.dma_semaphore, #tpu.memory_space<semaphore_mem>>
        %1046 = tpu.memref_squeeze %1045 : memref<1x!tpu.dma_semaphore, #tpu.memory_space<semaphore_mem>> -> memref<!tpu.dma_semaphore, #tpu.memory_space<semaphore_mem>>
        tpu.enqueue_dma source(%1042 : memref<1x128xf32, #tpu.memory_space<any>>) target(%1044 : memref<1x128xf32, #tpu.memory_space<vmem>>) target_semaphore(%1046 : memref<!tpu.dma_semaphore, #tpu.memory_space<semaphore_mem>>)
        %c0_i32_802 = arith.constant 0 : i32
        %1047 = tpu.memref_slice %arg4[%824, %c0_i32_802] : memref<64x128xf32, #tpu.memory_space<any>> -> memref<1x128xf32, #tpu.memory_space<any>>
        %c4_i32_803 = arith.constant 4 : i32
        %c0_i32_804 = arith.constant 0 : i32
        %1048 = tpu.memref_slice %arg6[%783, %c4_i32_803, %c0_i32_804] : memref<4x16x128xf32, #tpu.memory_space<vmem>> -> memref<1x1x128xf32, #tpu.memory_space<vmem>>
        %1049 = tpu.memref_squeeze %1048 : memref<1x1x128xf32, #tpu.memory_space<vmem>> -> memref<1x128xf32, #tpu.memory_space<vmem>>
        %1050 = tpu.memref_slice %arg7[%783] : memref<4x!tpu.dma_semaphore, #tpu.memory_space<semaphore_mem>> -> memref<1x!tpu.dma_semaphore, #tpu.memory_space<semaphore_mem>>
        %1051 = tpu.memref_squeeze %1050 : memref<1x!tpu.dma_semaphore, #tpu.memory_space<semaphore_mem>> -> memref<!tpu.dma_semaphore, #tpu.memory_space<semaphore_mem>>
        tpu.enqueue_dma source(%1047 : memref<1x128xf32, #tpu.memory_space<any>>) target(%1049 : memref<1x128xf32, #tpu.memory_space<vmem>>) target_semaphore(%1051 : memref<!tpu.dma_semaphore, #tpu.memory_space<semaphore_mem>>)
        %c0_i32_805 = arith.constant 0 : i32
        %1052 = tpu.memref_slice %arg4[%832, %c0_i32_805] : memref<64x128xf32, #tpu.memory_space<any>> -> memref<1x128xf32, #tpu.memory_space<any>>
        %c5_i32_806 = arith.constant 5 : i32
        %c0_i32_807 = arith.constant 0 : i32
        %1053 = tpu.memref_slice %arg6[%783, %c5_i32_806, %c0_i32_807] : memref<4x16x128xf32, #tpu.memory_space<vmem>> -> memref<1x1x128xf32, #tpu.memory_space<vmem>>
        %1054 = tpu.memref_squeeze %1053 : memref<1x1x128xf32, #tpu.memory_space<vmem>> -> memref<1x128xf32, #tpu.memory_space<vmem>>
        %1055 = tpu.memref_slice %arg7[%783] : memref<4x!tpu.dma_semaphore, #tpu.memory_space<semaphore_mem>> -> memref<1x!tpu.dma_semaphore, #tpu.memory_space<semaphore_mem>>
        %1056 = tpu.memref_squeeze %1055 : memref<1x!tpu.dma_semaphore, #tpu.memory_space<semaphore_mem>> -> memref<!tpu.dma_semaphore, #tpu.memory_space<semaphore_mem>>
        tpu.enqueue_dma source(%1052 : memref<1x128xf32, #tpu.memory_space<any>>) target(%1054 : memref<1x128xf32, #tpu.memory_space<vmem>>) target_semaphore(%1056 : memref<!tpu.dma_semaphore, #tpu.memory_space<semaphore_mem>>)
        %c0_i32_808 = arith.constant 0 : i32
        %1057 = tpu.memref_slice %arg4[%840, %c0_i32_808] : memref<64x128xf32, #tpu.memory_space<any>> -> memref<1x128xf32, #tpu.memory_space<any>>
        %c6_i32_809 = arith.constant 6 : i32
        %c0_i32_810 = arith.constant 0 : i32
        %1058 = tpu.memref_slice %arg6[%783, %c6_i32_809, %c0_i32_810] : memref<4x16x128xf32, #tpu.memory_space<vmem>> -> memref<1x1x128xf32, #tpu.memory_space<vmem>>
        %1059 = tpu.memref_squeeze %1058 : memref<1x1x128xf32, #tpu.memory_space<vmem>> -> memref<1x128xf32, #tpu.memory_space<vmem>>
        %1060 = tpu.memref_slice %arg7[%783] : memref<4x!tpu.dma_semaphore, #tpu.memory_space<semaphore_mem>> -> memref<1x!tpu.dma_semaphore, #tpu.memory_space<semaphore_mem>>
        %1061 = tpu.memref_squeeze %1060 : memref<1x!tpu.dma_semaphore, #tpu.memory_space<semaphore_mem>> -> memref<!tpu.dma_semaphore, #tpu.memory_space<semaphore_mem>>
        tpu.enqueue_dma source(%1057 : memref<1x128xf32, #tpu.memory_space<any>>) target(%1059 : memref<1x128xf32, #tpu.memory_space<vmem>>) target_semaphore(%1061 : memref<!tpu.dma_semaphore, #tpu.memory_space<semaphore_mem>>)
        %c0_i32_811 = arith.constant 0 : i32
        %1062 = tpu.memref_slice %arg4[%848, %c0_i32_811] : memref<64x128xf32, #tpu.memory_space<any>> -> memref<1x128xf32, #tpu.memory_space<any>>
        %c7_i32_812 = arith.constant 7 : i32
        %c0_i32_813 = arith.constant 0 : i32
        %1063 = tpu.memref_slice %arg6[%783, %c7_i32_812, %c0_i32_813] : memref<4x16x128xf32, #tpu.memory_space<vmem>> -> memref<1x1x128xf32, #tpu.memory_space<vmem>>
        %1064 = tpu.memref_squeeze %1063 : memref<1x1x128xf32, #tpu.memory_space<vmem>> -> memref<1x128xf32, #tpu.memory_space<vmem>>
        %1065 = tpu.memref_slice %arg7[%783] : memref<4x!tpu.dma_semaphore, #tpu.memory_space<semaphore_mem>> -> memref<1x!tpu.dma_semaphore, #tpu.memory_space<semaphore_mem>>
        %1066 = tpu.memref_squeeze %1065 : memref<1x!tpu.dma_semaphore, #tpu.memory_space<semaphore_mem>> -> memref<!tpu.dma_semaphore, #tpu.memory_space<semaphore_mem>>
        tpu.enqueue_dma source(%1062 : memref<1x128xf32, #tpu.memory_space<any>>) target(%1064 : memref<1x128xf32, #tpu.memory_space<vmem>>) target_semaphore(%1066 : memref<!tpu.dma_semaphore, #tpu.memory_space<semaphore_mem>>)
        %c0_i32_814 = arith.constant 0 : i32
        %1067 = tpu.memref_slice %arg4[%856, %c0_i32_814] : memref<64x128xf32, #tpu.memory_space<any>> -> memref<1x128xf32, #tpu.memory_space<any>>
        %c8_i32_815 = arith.constant 8 : i32
        %c0_i32_816 = arith.constant 0 : i32
        %1068 = tpu.memref_slice %arg6[%783, %c8_i32_815, %c0_i32_816] : memref<4x16x128xf32, #tpu.memory_space<vmem>> -> memref<1x1x128xf32, #tpu.memory_space<vmem>>
        %1069 = tpu.memref_squeeze %1068 : memref<1x1x128xf32, #tpu.memory_space<vmem>> -> memref<1x128xf32, #tpu.memory_space<vmem>>
        %1070 = tpu.memref_slice %arg7[%783] : memref<4x!tpu.dma_semaphore, #tpu.memory_space<semaphore_mem>> -> memref<1x!tpu.dma_semaphore, #tpu.memory_space<semaphore_mem>>
        %1071 = tpu.memref_squeeze %1070 : memref<1x!tpu.dma_semaphore, #tpu.memory_space<semaphore_mem>> -> memref<!tpu.dma_semaphore, #tpu.memory_space<semaphore_mem>>
        tpu.enqueue_dma source(%1067 : memref<1x128xf32, #tpu.memory_space<any>>) target(%1069 : memref<1x128xf32, #tpu.memory_space<vmem>>) target_semaphore(%1071 : memref<!tpu.dma_semaphore, #tpu.memory_space<semaphore_mem>>)
        %c0_i32_817 = arith.constant 0 : i32
        %1072 = tpu.memref_slice %arg4[%864, %c0_i32_817] : memref<64x128xf32, #tpu.memory_space<any>> -> memref<1x128xf32, #tpu.memory_space<any>>
        %c9_i32_818 = arith.constant 9 : i32
        %c0_i32_819 = arith.constant 0 : i32
        %1073 = tpu.memref_slice %arg6[%783, %c9_i32_818, %c0_i32_819] : memref<4x16x128xf32, #tpu.memory_space<vmem>> -> memref<1x1x128xf32, #tpu.memory_space<vmem>>
        %1074 = tpu.memref_squeeze %1073 : memref<1x1x128xf32, #tpu.memory_space<vmem>> -> memref<1x128xf32, #tpu.memory_space<vmem>>
        %1075 = tpu.memref_slice %arg7[%783] : memref<4x!tpu.dma_semaphore, #tpu.memory_space<semaphore_mem>> -> memref<1x!tpu.dma_semaphore, #tpu.memory_space<semaphore_mem>>
        %1076 = tpu.memref_squeeze %1075 : memref<1x!tpu.dma_semaphore, #tpu.memory_space<semaphore_mem>> -> memref<!tpu.dma_semaphore, #tpu.memory_space<semaphore_mem>>
        tpu.enqueue_dma source(%1072 : memref<1x128xf32, #tpu.memory_space<any>>) target(%1074 : memref<1x128xf32, #tpu.memory_space<vmem>>) target_semaphore(%1076 : memref<!tpu.dma_semaphore, #tpu.memory_space<semaphore_mem>>)
        %c0_i32_820 = arith.constant 0 : i32
        %1077 = tpu.memref_slice %arg4[%872, %c0_i32_820] : memref<64x128xf32, #tpu.memory_space<any>> -> memref<1x128xf32, #tpu.memory_space<any>>
        %c10_i32_821 = arith.constant 10 : i32
        %c0_i32_822 = arith.constant 0 : i32
        %1078 = tpu.memref_slice %arg6[%783, %c10_i32_821, %c0_i32_822] : memref<4x16x128xf32, #tpu.memory_space<vmem>> -> memref<1x1x128xf32, #tpu.memory_space<vmem>>
        %1079 = tpu.memref_squeeze %1078 : memref<1x1x128xf32, #tpu.memory_space<vmem>> -> memref<1x128xf32, #tpu.memory_space<vmem>>
        %1080 = tpu.memref_slice %arg7[%783] : memref<4x!tpu.dma_semaphore, #tpu.memory_space<semaphore_mem>> -> memref<1x!tpu.dma_semaphore, #tpu.memory_space<semaphore_mem>>
        %1081 = tpu.memref_squeeze %1080 : memref<1x!tpu.dma_semaphore, #tpu.memory_space<semaphore_mem>> -> memref<!tpu.dma_semaphore, #tpu.memory_space<semaphore_mem>>
        tpu.enqueue_dma source(%1077 : memref<1x128xf32, #tpu.memory_space<any>>) target(%1079 : memref<1x128xf32, #tpu.memory_space<vmem>>) target_semaphore(%1081 : memref<!tpu.dma_semaphore, #tpu.memory_space<semaphore_mem>>)
        %c0_i32_823 = arith.constant 0 : i32
        %1082 = tpu.memref_slice %arg4[%880, %c0_i32_823] : memref<64x128xf32, #tpu.memory_space<any>> -> memref<1x128xf32, #tpu.memory_space<any>>
        %c11_i32_824 = arith.constant 11 : i32
        %c0_i32_825 = arith.constant 0 : i32
        %1083 = tpu.memref_slice %arg6[%783, %c11_i32_824, %c0_i32_825] : memref<4x16x128xf32, #tpu.memory_space<vmem>> -> memref<1x1x128xf32, #tpu.memory_space<vmem>>
        %1084 = tpu.memref_squeeze %1083 : memref<1x1x128xf32, #tpu.memory_space<vmem>> -> memref<1x128xf32, #tpu.memory_space<vmem>>
        %1085 = tpu.memref_slice %arg7[%783] : memref<4x!tpu.dma_semaphore, #tpu.memory_space<semaphore_mem>> -> memref<1x!tpu.dma_semaphore, #tpu.memory_space<semaphore_mem>>
        %1086 = tpu.memref_squeeze %1085 : memref<1x!tpu.dma_semaphore, #tpu.memory_space<semaphore_mem>> -> memref<!tpu.dma_semaphore, #tpu.memory_space<semaphore_mem>>
        tpu.enqueue_dma source(%1082 : memref<1x128xf32, #tpu.memory_space<any>>) target(%1084 : memref<1x128xf32, #tpu.memory_space<vmem>>) target_semaphore(%1086 : memref<!tpu.dma_semaphore, #tpu.memory_space<semaphore_mem>>)
        %c0_i32_826 = arith.constant 0 : i32
        %1087 = tpu.memref_slice %arg4[%888, %c0_i32_826] : memref<64x128xf32, #tpu.memory_space<any>> -> memref<1x128xf32, #tpu.memory_space<any>>
        %c12_i32_827 = arith.constant 12 : i32
        %c0_i32_828 = arith.constant 0 : i32
        %1088 = tpu.memref_slice %arg6[%783, %c12_i32_827, %c0_i32_828] : memref<4x16x128xf32, #tpu.memory_space<vmem>> -> memref<1x1x128xf32, #tpu.memory_space<vmem>>
        %1089 = tpu.memref_squeeze %1088 : memref<1x1x128xf32, #tpu.memory_space<vmem>> -> memref<1x128xf32, #tpu.memory_space<vmem>>
        %1090 = tpu.memref_slice %arg7[%783] : memref<4x!tpu.dma_semaphore, #tpu.memory_space<semaphore_mem>> -> memref<1x!tpu.dma_semaphore, #tpu.memory_space<semaphore_mem>>
        %1091 = tpu.memref_squeeze %1090 : memref<1x!tpu.dma_semaphore, #tpu.memory_space<semaphore_mem>> -> memref<!tpu.dma_semaphore, #tpu.memory_space<semaphore_mem>>
        tpu.enqueue_dma source(%1087 : memref<1x128xf32, #tpu.memory_space<any>>) target(%1089 : memref<1x128xf32, #tpu.memory_space<vmem>>) target_semaphore(%1091 : memref<!tpu.dma_semaphore, #tpu.memory_space<semaphore_mem>>)
        %c0_i32_829 = arith.constant 0 : i32
        %1092 = tpu.memref_slice %arg4[%896, %c0_i32_829] : memref<64x128xf32, #tpu.memory_space<any>> -> memref<1x128xf32, #tpu.memory_space<any>>
        %c13_i32_830 = arith.constant 13 : i32
        %c0_i32_831 = arith.constant 0 : i32
        %1093 = tpu.memref_slice %arg6[%783, %c13_i32_830, %c0_i32_831] : memref<4x16x128xf32, #tpu.memory_space<vmem>> -> memref<1x1x128xf32, #tpu.memory_space<vmem>>
        %1094 = tpu.memref_squeeze %1093 : memref<1x1x128xf32, #tpu.memory_space<vmem>> -> memref<1x128xf32, #tpu.memory_space<vmem>>
        %1095 = tpu.memref_slice %arg7[%783] : memref<4x!tpu.dma_semaphore, #tpu.memory_space<semaphore_mem>> -> memref<1x!tpu.dma_semaphore, #tpu.memory_space<semaphore_mem>>
        %1096 = tpu.memref_squeeze %1095 : memref<1x!tpu.dma_semaphore, #tpu.memory_space<semaphore_mem>> -> memref<!tpu.dma_semaphore, #tpu.memory_space<semaphore_mem>>
        tpu.enqueue_dma source(%1092 : memref<1x128xf32, #tpu.memory_space<any>>) target(%1094 : memref<1x128xf32, #tpu.memory_space<vmem>>) target_semaphore(%1096 : memref<!tpu.dma_semaphore, #tpu.memory_space<semaphore_mem>>)
        %c0_i32_832 = arith.constant 0 : i32
        %1097 = tpu.memref_slice %arg4[%904, %c0_i32_832] : memref<64x128xf32, #tpu.memory_space<any>> -> memref<1x128xf32, #tpu.memory_space<any>>
        %c14_i32_833 = arith.constant 14 : i32
        %c0_i32_834 = arith.constant 0 : i32
        %1098 = tpu.memref_slice %arg6[%783, %c14_i32_833, %c0_i32_834] : memref<4x16x128xf32, #tpu.memory_space<vmem>> -> memref<1x1x128xf32, #tpu.memory_space<vmem>>
        %1099 = tpu.memref_squeeze %1098 : memref<1x1x128xf32, #tpu.memory_space<vmem>> -> memref<1x128xf32, #tpu.memory_space<vmem>>
        %1100 = tpu.memref_slice %arg7[%783] : memref<4x!tpu.dma_semaphore, #tpu.memory_space<semaphore_mem>> -> memref<1x!tpu.dma_semaphore, #tpu.memory_space<semaphore_mem>>
        %1101 = tpu.memref_squeeze %1100 : memref<1x!tpu.dma_semaphore, #tpu.memory_space<semaphore_mem>> -> memref<!tpu.dma_semaphore, #tpu.memory_space<semaphore_mem>>
        tpu.enqueue_dma source(%1097 : memref<1x128xf32, #tpu.memory_space<any>>) target(%1099 : memref<1x128xf32, #tpu.memory_space<vmem>>) target_semaphore(%1101 : memref<!tpu.dma_semaphore, #tpu.memory_space<semaphore_mem>>)
        %c0_i32_835 = arith.constant 0 : i32
        %1102 = tpu.memref_slice %arg4[%912, %c0_i32_835] : memref<64x128xf32, #tpu.memory_space<any>> -> memref<1x128xf32, #tpu.memory_space<any>>
        %c15_i32_836 = arith.constant 15 : i32
        %c0_i32_837 = arith.constant 0 : i32
        %1103 = tpu.memref_slice %arg6[%783, %c15_i32_836, %c0_i32_837] : memref<4x16x128xf32, #tpu.memory_space<vmem>> -> memref<1x1x128xf32, #tpu.memory_space<vmem>>
        %1104 = tpu.memref_squeeze %1103 : memref<1x1x128xf32, #tpu.memory_space<vmem>> -> memref<1x128xf32, #tpu.memory_space<vmem>>
        %1105 = tpu.memref_slice %arg7[%783] : memref<4x!tpu.dma_semaphore, #tpu.memory_space<semaphore_mem>> -> memref<1x!tpu.dma_semaphore, #tpu.memory_space<semaphore_mem>>
        %1106 = tpu.memref_squeeze %1105 : memref<1x!tpu.dma_semaphore, #tpu.memory_space<semaphore_mem>> -> memref<!tpu.dma_semaphore, #tpu.memory_space<semaphore_mem>>
        tpu.enqueue_dma source(%1102 : memref<1x128xf32, #tpu.memory_space<any>>) target(%1104 : memref<1x128xf32, #tpu.memory_space<vmem>>) target_semaphore(%1106 : memref<!tpu.dma_semaphore, #tpu.memory_space<semaphore_mem>>)
      } else {
      }
    }
    %c32_i32_625 = arith.constant 32 : i32
    return
  }
  func.func @transform_0(%arg0: i32, %arg1: memref<512xi32, #tpu.memory_space<smem>>) -> (i32, i32) {
    %c0_i32 = arith.constant 0 : i32
    %c0_i32_0 = arith.constant 0 : i32
    %c0_i32_1 = arith.constant 0 : i32
    return %c0_i32, %c0_i32_0 : i32, i32
  }
  func.func @transform_1(%arg0: i32, %arg1: memref<512xi32, #tpu.memory_space<smem>>) -> (i32, i32) {
    %c0_i32 = arith.constant 0 : i32
    %c0_i32_0 = arith.constant 0 : i32
    %c0_i32_1 = arith.constant 0 : i32
    return %c0_i32, %c0_i32_0 : i32, i32
  }
  func.func @transform_3(%arg0: i32, %arg1: memref<512xi32, #tpu.memory_space<smem>>) -> (i32, i32) {
    %c0_i32 = arith.constant 0 : i32
    %c0_i32_0 = arith.constant 0 : i32
    return %arg0, %c0_i32 : i32, i32
  }
}

</mosaic_0001>

<bundles_post_ra>
// kernel: tpu_custom_call.1
= control target key start
LH: loop header
LB: loop body
LE: loop exit
PB: predicated region body
PF: predicated region fallthrough
CT: control target
= control target key end

     0   :  { %s6902_s0 = inlined_call_operand.hbm [shape: s32[512], index: 0, kind: input, shape index: {}]   ;;  %s6903_s1 = inlined_call_operand.vmem [shape: f32[1,128], index: 1, kind: input, shape index: {}]   ;;  %s6904_s2 = inlined_call_operand.vmem [shape: f32[1,128], index: 2, kind: input, shape index: {}]   ;;  %s6905_s3 = inlined_call_operand.hbm [shape: f32[64,128], index: 3, kind: input, shape index: {}]   ;;  %s6906_s4 = inlined_call_operand.hbm [shape: f32[512,128], index: 4, kind: output, shape index: {}]  }
   0x1   :  { %6911 = sst [smem:[#allocation176_spill]] %s6906_s4  ;;  %s2995_s17 = scalar_lea.hbm %s6902_s0, 64 }
   0x2   :  { %p2996_p0 = scmp.ne.s32.totalorder %s6902_s0, %s2995_s17  ;;  %p2999_p1 = scmp.lt.u32.totalorder %s2995_s17, %s6902_s0 }
   0x4   :  { %p3001_p2 = pnand %p2999_p1, %p2996_p0 }
   0x6   :  { %3004 = shalt.err (!%p3001_p2)  }
   0x7   :  { %s5025_s22 = smov [#allocation5]  }
   0x8   :  { %10 = dma.hbm_to_smem %s6902_s0, 64, %s5025_s22, [#allocation4] }
   0x9   :  { %5015 = dma.done.wait [#allocation4], 64 }
   0xa   :  { %5016 = vsyncadd [#allocation4], 4294967232 }
   0xb   :  { %12 = sfence }
   0xc   :  { %13 = vsyncpa [#allocation7], 0  ;;  %s21_s25 = sld [smem:[#allocation5]]  ;;  %s5026_s26 = smov [#allocation2]  }
   0xd   :  { %s155_s27 = sshll.u32 %s5026_s26, 4  ;;  %s2169_s28 = sld [smem:[#allocation5 + $0x1]]  ;;  %s5130_s27 = int_to_ptr.vmem [resolvable:$true] %s155_s27 }
   0xe   :  { %s5027_s29 = smov [#allocation2 + $0x1]   ;;  %s5132_s5 = sld [smem:[#allocation5 + $0x2]] }
   0xf   :  { %s169_s30 = sshll.u32 %s5027_s29, 4  ;;  %s5028_s6 = smov [#allocation2 + $0x2]   ;;  %s5134_s30 = int_to_ptr.vmem [resolvable:$true] %s169_s30 }
  0x10   :  { %s5136_s7 = sshll.u32 %s5028_s6, 4  ;;  %s5138_s0 = sld [smem:[#allocation5 + $0x3]]  ;;  %s184_s7 = int_to_ptr.vmem [resolvable:$true] %s5136_s7 }
  0x11   :  { %s5147_s16 = scalar_lea.hbm %s6905_s3, 1024 }
  0x12   :  { %p22_p3 = scmp.gt.s32.totalorder %s21_s25, 0  ;;  %p2164_p4 = scmp.lt.s32.totalorder %s21_s25, 63 }
  0x13   :  { %p30_p5 = scmp.gt.s32.totalorder %s2169_s28, 0  ;;  %p2170_p6 = scmp.lt.s32.totalorder %s2169_s28, 63 }
  0x14   :  { %s6935_s25 = smov (!%p22_p3, %s21_s25), 0  ;;  %p38_p7 = scmp.gt.s32.totalorder %s5132_s5, 0 }
  0x15   :  { %s6937_s28 = smov (!%p30_p5, %s2169_s28), 0  ;;  %s6939_s25 = smov (!%p2164_p4, %s6935_s25), 63 }
  0x16   :  { %s6941_s28 = smov (!%p2170_p6, %s6937_s28), 63  ;;  %s2259_s8 = sshll.u32 %s6939_s25, 4 }
  0x17   :  { %s147_s11 = scalar_lea.hbm %s6905_s3, %s2259_s8  ;;  %s2260_s12 = sshll.u32 %s6941_s28, 4 }
  0x18   :  { %s3005_s13 = scalar_lea.hbm %s147_s11, 16  ;;  %p3008_p9 = scmp.lt.u32.totalorder %s147_s11, %s6905_s3 }
  0x19   :  { %p3006_p8 = scmp.ne.s32.totalorder %s147_s11, %s3005_s13  ;;  %p3009_p10 = scmp.lt.u32.totalorder %s5147_s16, %s3005_s13 }
  0x1a   :  { %p3011_p12 = scmp.lt.u32.totalorder %s3005_s13, %s147_s11 }
  0x1b   :  { %p3010_p11 = por %p3009_p10, %p3008_p9 }
  0x1d   :  { %p3012_p13 = por %p3011_p12, %p3010_p11 }
  0x1f   :  { %p3013_p0 = pnand %p3012_p13, %p3006_p8 }
  0x21   :  { %3016 = shalt.err (!%p3013_p0)  }
  0x22   :  { %s3017_s19 = scalar_lea.vmem %s5130_s27, 16  ;;  %s5156_s20 = scalar_lea.vmem %s5130_s27, 1024 }
  0x23   :  { %p3018_p1 = scmp.ne.s32.totalorder %s5130_s27, %s3017_s19  ;;  %p3022_p2 = scmp.lt.s32.totalorder %s5130_s27, %s5130_s27 }
  0x24   :  { %p3023_p3 = scmp.lt.s32.totalorder %s5156_s20, %s3017_s19 }
  0x26   :  { %p3024_p4 = por %p3023_p3, %p3022_p2 }
  0x28   :  { %p3025_p5 = pnand %p3024_p4, %p3018_p1 }
  0x2a   :  { %3028 = shalt.err (!%p3025_p5)  }
  0x2b   :  { %158 = dma.hbm_to_vmem [thread:$0]  %s147_s11, 16, %s5130_s27, [#allocation3] }
  0x2c   :  { %s160_s23 = scalar_lea.hbm %s6905_s3, %s2260_s12  ;;  %p2176_p6 = scmp.lt.s32.totalorder %s5132_s5, 63 }
  0x2d   :  { %s3029_s24 = scalar_lea.hbm %s160_s23, 16  ;;  %p3032_p9 = scmp.lt.u32.totalorder %s160_s23, %s6905_s3 }
  0x2e   :  { %p3030_p8 = scmp.ne.s32.totalorder %s160_s23, %s3029_s24  ;;  %p3033_p10 = scmp.lt.u32.totalorder %s5147_s16, %s3029_s24 }
  0x2f   :  { %p3035_p12 = scmp.lt.u32.totalorder %s3029_s24, %s160_s23 }
  0x30   :  { %p3034_p11 = por %p3033_p10, %p3032_p9 }
  0x32   :  { %p3036_p13 = por %p3035_p12, %p3034_p11 }
  0x34   :  { %p3037_p0 = pnand %p3036_p13, %p3030_p8 }
  0x36   :  { %3040 = shalt.err (!%p3037_p0)  }
  0x37   :  { %s3041_s28 = scalar_lea.vmem %s5134_s30, 16  ;;  %p3046_p2 = scmp.lt.s32.totalorder %s5134_s30, %s5130_s27 }
  0x38   :  { %p3042_p1 = scmp.ne.s32.totalorder %s5134_s30, %s3041_s28  ;;  %p3047_p3 = scmp.lt.s32.totalorder %s5156_s20, %s3041_s28 }
  0x3a   :  { %p3048_p4 = por %p3047_p3, %p3046_p2 }
  0x3c   :  { %p3049_p5 = pnand %p3048_p4, %p3042_p1 }
  0x3e   :  { %3052 = shalt.err (!%p3049_p5)  }
  0x3f   :  { %172 = dma.hbm_to_vmem [thread:$0]  %s160_s23, 16, %s5134_s30, [#allocation3] }
  0x40   :  { %s39_s29 = scalar_select %p38_p7, %s5132_s5, 0 }
  0x41   :  { %p46_p8 = scmp.gt.s32.totalorder %s5138_s0, 0  ;;  %p2182_p9 = scmp.lt.s32.totalorder %s5138_s0, 63 }
  0x42   :  { %s6943_s29 = smov (!%p2176_p6, %s39_s29), 63 }
  0x43   :  { %s47_s6 = scalar_select %p46_p8, %s5138_s0, 0 }
  0x44   :  { %s2261_s8 = sshll.u32 %s6943_s29, 4 }
  0x45   :  { %s174_s11 = scalar_lea.hbm %s6905_s3, %s2261_s8 }
  0x46   :  { %s3053_s12 = scalar_lea.hbm %s174_s11, 16  ;;  %p3056_p11 = scmp.lt.u32.totalorder %s174_s11, %s6905_s3 }
  0x47   :  { %p3054_p10 = scmp.ne.s32.totalorder %s174_s11, %s3053_s12  ;;  %p3057_p12 = scmp.lt.u32.totalorder %s5147_s16, %s3053_s12 }
  0x48   :  { %p3059_p7 = scmp.lt.u32.totalorder %s3053_s12, %s174_s11 }
  0x49   :  { %p3058_p13 = por %p3057_p12, %p3056_p11 }
  0x4b   :  { %p3060_p0 = por %p3059_p7, %p3058_p13 }
  0x4d   :  { %p3061_p1 = pnand %p3060_p0, %p3054_p10 }
  0x4f   :  { %3064 = shalt.err (!%p3061_p1)  }
  0x50   :  { %s3065_s30 = scalar_lea.vmem %s184_s7, 16  ;;  %p3070_p2 = scmp.lt.s32.totalorder %s184_s7, %s5130_s27 }
  0x51   :  { %p3066_p6 = scmp.ne.s32.totalorder %s184_s7, %s3065_s30  ;;  %p3071_p3 = scmp.lt.s32.totalorder %s5156_s20, %s3065_s30 }
  0x53   :  { %p3072_p4 = por %p3071_p3, %p3070_p2 }
  0x55   :  { %p3073_p5 = pnand %p3072_p4, %p3066_p6 }
  0x57   :  { %3076 = shalt.err (!%p3073_p5)  }
  0x58   :  { %186 = dma.hbm_to_vmem [thread:$0]  %s174_s11, 16, %s184_s7, [#allocation3] }
  0x59   :  { %s6945_s6 = smov (!%p2182_p9, %s47_s6), 63  ;;  %s5029_s5 = smov [#allocation2 + $0x3]  }
  0x5a   :  { %s197_s15 = sshll.u32 %s5029_s5, 4  ;;  %s5196_s17 = sld [smem:[#allocation5 + $0x4]]  ;;  %s198_s15 = int_to_ptr.vmem [resolvable:$true] %s197_s15 }
  0x5b   :  { %s2262_s18 = sshll.u32 %s6945_s6, 4 }
  0x5c   :  { %s188_s22 = scalar_lea.hbm %s6905_s3, %s2262_s18 }
  0x5d   :  { %s3077_s23 = scalar_lea.hbm %s188_s22, 16  ;;  %p3080_p10 = scmp.lt.u32.totalorder %s188_s22, %s6905_s3 }
  0x5e   :  { %p3078_p8 = scmp.ne.s32.totalorder %s188_s22, %s3077_s23  ;;  %p3081_p11 = scmp.lt.u32.totalorder %s5147_s16, %s3077_s23 }
  0x5f   :  { %p3083_p13 = scmp.lt.u32.totalorder %s3077_s23, %s188_s22 }
  0x60   :  { %p3082_p12 = por %p3081_p11, %p3080_p10 }
  0x62   :  { %p3084_p9 = por %p3083_p13, %p3082_p12 }
  0x64   :  { %p3085_p7 = pnand %p3084_p9, %p3078_p8 }
  0x66   :  { %3088 = shalt.err (!%p3085_p7)  }
  0x67   :  { %s3089_s7 = scalar_lea.vmem %s198_s15, 16  ;;  %p3094_p1 = scmp.lt.s32.totalorder %s198_s15, %s5130_s27 }
  0x68   :  { %p3090_p0 = scmp.ne.s32.totalorder %s198_s15, %s3089_s7  ;;  %p3095_p6 = scmp.lt.s32.totalorder %s5156_s20, %s3089_s7 }
  0x6a   :  { %p3096_p2 = por %p3095_p6, %p3094_p1 }
  0x6c   :  { %p3097_p3 = pnand %p3096_p2, %p3090_p0 }
  0x6e   :  { %3100 = shalt.err (!%p3097_p3)  }
  0x6f   :  { %200 = dma.hbm_to_vmem [thread:$0]  %s188_s22, 16, %s198_s15, [#allocation3] }
  0x70   :  { %s5030_s0 = smov [#allocation2 + $0x4]   ;;  %s5207_s28 = sld [smem:[#allocation5 + $0x5]] }
  0x71   :  { %s211_s26 = sshll.u32 %s5030_s0, 4  ;;  %p54_p4 = scmp.gt.s32.totalorder %s5196_s17, 0  ;;  %s5209_s26 = int_to_ptr.vmem [resolvable:$true] %s211_s26 }
  0x72   :  { %p2188_p5 = scmp.lt.s32.totalorder %s5196_s17, 63  ;;  %s5031_s29 = smov [#allocation2 + $0x5]  }
  0x73   :  { %s225_s6 = sshll.u32 %s5031_s29, 4  ;;  %s5213_s8 = sld [smem:[#allocation5 + $0x6]]  ;;  %s5216_s6 = int_to_ptr.vmem [resolvable:$true] %s225_s6 }
  0x74   :  { %s6947_s17 = smov (!%p54_p4, %s5196_s17), 0  ;;  %s5032_s10 = smov [#allocation2 + $0x6]  }
  0x75   :  { %s6949_s17 = smov (!%p2188_p5, %s6947_s17), 63  ;;  %s239_s11 = sshll.u32 %s5032_s10, 4  ;;  %s5243_s11 = int_to_ptr.vmem [resolvable:$true] %s239_s11 }
  0x76   :  { %p62_p8 = scmp.gt.s32.totalorder %s5207_s28, 0  ;;  %s2263_s9 = sshll.u32 %s6949_s17, 4 }
  0x77   :  { %s202_s14 = scalar_lea.hbm %s6905_s3, %s2263_s9 }
  0x78   :  { %s3101_s30 = scalar_lea.hbm %s202_s14, 16  ;;  %p3104_p13 = scmp.lt.u32.totalorder %s202_s14, %s6905_s3 }
  0x79   :  { %p70_p11 = scmp.gt.s32.totalorder %s5213_s8, 0  ;;  %p3102_p12 = scmp.ne.s32.totalorder %s202_s14, %s3101_s30 }
  0x7a   :  { %p3105_p9 = scmp.lt.u32.totalorder %s5147_s16, %s3101_s30  ;;  %p3107_p0 = scmp.lt.u32.totalorder %s3101_s30, %s202_s14 }
  0x7c   :  { %p3106_p7 = por %p3105_p9, %p3104_p13 }
  0x7e   :  { %p3108_p1 = por %p3107_p0, %p3106_p7 }
  0x80   :  { %p3109_p6 = pnand %p3108_p1, %p3102_p12 }
  0x82   :  { %3112 = shalt.err (!%p3109_p6)  }
  0x83   :  { %s3113_s17 = scalar_lea.vmem %s5209_s26, 16  ;;  %p3118_p3 = scmp.lt.s32.totalorder %s5209_s26, %s5130_s27 }
  0x84   :  { %p3114_p2 = scmp.ne.s32.totalorder %s5209_s26, %s3113_s17  ;;  %p3119_p4 = scmp.lt.s32.totalorder %s5156_s20, %s3113_s17 }
  0x86   :  { %p3120_p5 = por %p3119_p4, %p3118_p3 }
  0x88   :  { %p3121_p10 = pnand %p3120_p5, %p3114_p2 }
  0x8a   :  { %3124 = shalt.err (!%p3121_p10)  }
  0x8b   :  { %214 = dma.hbm_to_vmem [thread:$0]  %s202_s14, 16, %s5209_s26, [#allocation3] }
  0x8c   :  { %s63_s18 = scalar_select %p62_p8, %s5207_s28, 0 }
  0x8d   :  { %s71_s19 = scalar_select %p70_p11, %s5213_s8, 0 }
  0x8e   :  { %p6912_p12 = scmp.lt.s32.totalorder %s5207_s28, 63  ;;  %p2200_p13 = scmp.lt.s32.totalorder %s5213_s8, 63 }
  0x8f   :  { %s5245_s22 = sld [smem:[#allocation5 + $0x7]] }
  0x90   :  { %s6951_s18 = smov (!%p6912_p12, %s63_s18), 63 }
  0x91   :  { %s2264_s21 = sshll.u32 %s6951_s18, 4 }
  0x92   :  { %s216_s25 = scalar_lea.hbm %s6905_s3, %s2264_s21 }
  0x93   :  { %s3125_s7 = scalar_lea.hbm %s216_s25, 16  ;;  %p3128_p8 = scmp.lt.u32.totalorder %s216_s25, %s6905_s3 }
  0x94   :  { %p3126_p10 = scmp.ne.s32.totalorder %s216_s25, %s3125_s7  ;;  %p3129_p9 = scmp.lt.u32.totalorder %s5147_s16, %s3125_s7 }
  0x95   :  { %p3131_p7 = scmp.lt.u32.totalorder %s3125_s7, %s216_s25 }
  0x96   :  { %p3130_p11 = por %p3129_p9, %p3128_p8 }
  0x98   :  { %p3132_p0 = por %p3131_p7, %p3130_p11 }
  0x9a   :  { %p3133_p1 = pnand %p3132_p0, %p3126_p10 }
  0x9c   :  { %3136 = shalt.err (!%p3133_p1)  }
  0x9d   :  { %s3137_s28 = scalar_lea.vmem %s5216_s6, 16  ;;  %p3142_p2 = scmp.lt.s32.totalorder %s5216_s6, %s5130_s27 }
  0x9e   :  { %p3138_p6 = scmp.ne.s32.totalorder %s5216_s6, %s3137_s28  ;;  %p3143_p3 = scmp.lt.s32.totalorder %s5156_s20, %s3137_s28 }
  0xa0   :  { %p3144_p4 = por %p3143_p3, %p3142_p2 }
  0xa2   :  { %p3145_p5 = pnand %p3144_p4, %p3138_p6 }
  0xa4   :  { %3148 = shalt.err (!%p3145_p5)  }
  0xa5   :  { %228 = dma.hbm_to_vmem [thread:$0]  %s216_s25, 16, %s5216_s6, [#allocation3] }
  0xa6   :  { %s6953_s19 = smov (!%p2200_p13, %s71_s19), 63  ;;  %s5033_s29 = smov [#allocation2 + $0x7]  }
  0xa7   :  { %s253_s9 = sshll.u32 %s5033_s29, 4  ;;  %s5262_s10 = sld [smem:[#allocation5 + $0x8]]  ;;  %s5264_s9 = int_to_ptr.vmem [resolvable:$true] %s253_s9 }
  0xa8   :  { %s2265_s12 = sshll.u32 %s6953_s19, 4  ;;  %p78_p12 = scmp.gt.s32.totalorder %s5245_s22, 0 }
  0xa9   :  { %s230_s30 = scalar_lea.hbm %s6905_s3, %s2265_s12 }
  0xaa   :  { %s3149_s5 = scalar_lea.hbm %s230_s30, 16  ;;  %p3152_p8 = scmp.lt.u32.totalorder %s230_s30, %s6905_s3 }
  0xab   :  { %p3150_p10 = scmp.ne.s32.totalorder %s230_s30, %s3149_s5  ;;  %p3153_p9 = scmp.lt.u32.totalorder %s5147_s16, %s3149_s5 }
  0xac   :  { %p3155_p11 = scmp.lt.u32.totalorder %s3149_s5, %s230_s30 }
  0xad   :  { %p3154_p13 = por %p3153_p9, %p3152_p8 }
  0xaf   :  { %p3156_p7 = por %p3155_p11, %p3154_p13 }
  0xb1   :  { %p3157_p0 = pnand %p3156_p7, %p3150_p10 }
  0xb3   :  { %3160 = shalt.err (!%p3157_p0)  }
  0xb4   :  { %s3161_s6 = scalar_lea.vmem %s5243_s11, 16  ;;  %p3166_p6 = scmp.lt.s32.totalorder %s5243_s11, %s5130_s27 }
  0xb5   :  { %p3162_p1 = scmp.ne.s32.totalorder %s5243_s11, %s3161_s6  ;;  %p3167_p2 = scmp.lt.s32.totalorder %s5156_s20, %s3161_s6 }
  0xb7   :  { %p3168_p3 = por %p3167_p2, %p3166_p6 }
  0xb9   :  { %p3169_p4 = pnand %p3168_p3, %p3162_p1 }
  0xbb   :  { %3172 = shalt.err (!%p3169_p4)  }
  0xbc   :  { %242 = dma.hbm_to_vmem [thread:$0]  %s230_s30, 16, %s5243_s11, [#allocation3] }
  0xbd   :  { %s79_s8 = scalar_select %p78_p12, %s5245_s22, 0 }
  0xbe   :  { %p2206_p5 = scmp.lt.s32.totalorder %s5245_s22, 63  ;;  %p86_p10 = scmp.gt.s32.totalorder %s5262_s10, 0 }
  0xbf   :  { %p2212_p8 = scmp.lt.s32.totalorder %s5262_s10, 63  ;;  %s5034_s21 = smov [#allocation2 + $0x8]  }
  0xc0   :  { %s6955_s8 = smov (!%p2206_p5, %s79_s8), 63  ;;  %s267_s23 = sshll.u32 %s5034_s21, 4  ;;  %s5290_s23 = int_to_ptr.vmem [resolvable:$true] %s267_s23 }
  0xc1   :  { %s87_s18 = scalar_select %p86_p10, %s5262_s10, 0 }
  0xc2   :  { %s2266_s19 = sshll.u32 %s6955_s8, 4 }
  0xc3   :  { %s244_s7 = scalar_lea.hbm %s6905_s3, %s2266_s19 }
  0xc4   :  { %s3173_s0 = scalar_lea.hbm %s244_s7, 16  ;;  %p3176_p12 = scmp.lt.u32.totalorder %s244_s7, %s6905_s3 }
  0xc5   :  { %p3174_p9 = scmp.ne.s32.totalorder %s244_s7, %s3173_s0  ;;  %p3177_p13 = scmp.lt.u32.totalorder %s5147_s16, %s3173_s0 }
  0xc6   :  { %p3179_p7 = scmp.lt.u32.totalorder %s3173_s0, %s244_s7 }
  0xc7   :  { %p3178_p11 = por %p3177_p13, %p3176_p12 }
  0xc9   :  { %p3180_p0 = por %p3179_p7, %p3178_p11 }
  0xcb   :  { %p3181_p1 = pnand %p3180_p0, %p3174_p9 }
  0xcd   :  { %3184 = shalt.err (!%p3181_p1)  }
  0xce   :  { %s3185_s22 = scalar_lea.vmem %s5264_s9, 16  ;;  %p3190_p2 = scmp.lt.s32.totalorder %s5264_s9, %s5130_s27 }
  0xcf   :  { %p3186_p6 = scmp.ne.s32.totalorder %s5264_s9, %s3185_s22  ;;  %p3191_p3 = scmp.lt.s32.totalorder %s5156_s20, %s3185_s22 }
  0xd1   :  { %p3192_p4 = por %p3191_p3, %p3190_p2 }
  0xd3   :  { %p3193_p5 = pnand %p3192_p4, %p3186_p6 }
  0xd5   :  { %3196 = shalt.err (!%p3193_p5)  }
  0xd6   :  { %256 = dma.hbm_to_vmem [thread:$0]  %s244_s7, 16, %s5264_s9, [#allocation3] }
  0xd7   :  { %s6957_s18 = smov (!%p2212_p8, %s87_s18), 63  ;;  %s5304_s28 = sld [smem:[#allocation5 + $0x9]] }
  0xd8   :  { %s2267_s29 = sshll.u32 %s6957_s18, 4  ;;  %s5035_s12 = smov [#allocation2 + $0x9]  }
  0xd9   :  { %s281_s13 = sshll.u32 %s5035_s12, 4  ;;  %s258_s5 = scalar_lea.hbm %s6905_s3, %s2267_s29  ;;  %s5309_s13 = int_to_ptr.vmem [resolvable:$true] %s281_s13 }
  0xda   :  { %s3197_s15 = scalar_lea.hbm %s258_s5, 16  ;;  %p3200_p9 = scmp.lt.u32.totalorder %s258_s5, %s6905_s3 }
  0xdb   :  { %p3198_p10 = scmp.ne.s32.totalorder %s258_s5, %s3197_s15  ;;  %p3201_p12 = scmp.lt.u32.totalorder %s5147_s16, %s3197_s15 }
  0xdc   :  { %p3203_p8 = scmp.lt.u32.totalorder %s3197_s15, %s258_s5 }
  0xdd   :  { %p3202_p13 = por %p3201_p12, %p3200_p9 }
  0xdf   :  { %p3204_p11 = por %p3203_p8, %p3202_p13 }
  0xe1   :  { %p3205_p7 = pnand %p3204_p11, %p3198_p10 }
  0xe3   :  { %3208 = shalt.err (!%p3205_p7)  }
  0xe4   :  { %s3209_s9 = scalar_lea.vmem %s5290_s23, 16  ;;  %p3214_p1 = scmp.lt.s32.totalorder %s5290_s23, %s5130_s27 }
  0xe5   :  { %p3210_p0 = scmp.ne.s32.totalorder %s5290_s23, %s3209_s9  ;;  %p3215_p6 = scmp.lt.s32.totalorder %s5156_s20, %s3209_s9 }
  0xe7   :  { %p3216_p2 = por %p3215_p6, %p3214_p1 }
  0xe9   :  { %p3217_p3 = pnand %p3216_p2, %p3210_p0 }
  0xeb   :  { %3220 = shalt.err (!%p3217_p3)  }
  0xec   :  { %270 = dma.hbm_to_vmem [thread:$0]  %s258_s5, 16, %s5290_s23, [#allocation3] }
  0xed   :  { %s5321_s10 = sld [smem:[#allocation5 + $0xa]]  ;;  %s5036_s8 = smov [#allocation2 + $0xa]  }
  0xee   :  { %s295_s18 = sshll.u32 %s5036_s8, 4  ;;  %s5323_s19 = sld [smem:[#allocation5 + $0xb]]  ;;  %s5327_s18 = int_to_ptr.vmem [resolvable:$true] %s295_s18 }
  0xef   :  { %p94_p4 = scmp.gt.s32.totalorder %s5304_s28, 0  ;;  %p2218_p5 = scmp.lt.s32.totalorder %s5304_s28, 63 }
  0xf0   :  { %s5037_s21 = smov [#allocation2 + $0xb]   ;;  %s5332_s23 = sld [smem:[#allocation5 + $0xc]] }
  0xf1   :  { %s6959_s28 = smov (!%p94_p4, %s5304_s28), 0  ;;  %s5330_s24 = sshll.u32 %s5037_s21, 4  ;;  %s5362_s24 = int_to_ptr.vmem [resolvable:$true] %s5330_s24 }
  0xf2   :  { %s6961_s28 = smov (!%p2218_p5, %s6959_s28), 63 }
  0xf3   :  { %p102_p10 = scmp.gt.s32.totalorder %s5321_s10, 0  ;;  %s2268_s25 = sshll.u32 %s6961_s28, 4 }
  0xf4   :  { %p110_p12 = scmp.gt.s32.totalorder %s5323_s19, 0  ;;  %s272_s26 = scalar_lea.hbm %s6905_s3, %s2268_s25 }
  0xf5   :  { %s3221_s11 = scalar_lea.hbm %s272_s26, 16  ;;  %p3224_p11 = scmp.lt.u32.totalorder %s272_s26, %s6905_s3 }
  0xf6   :  { %p3222_p8 = scmp.ne.s32.totalorder %s272_s26, %s3221_s11  ;;  %p3225_p7 = scmp.lt.u32.totalorder %s5147_s16, %s3221_s11 }
  0xf7   :  { %p3227_p1 = scmp.lt.u32.totalorder %s3221_s11, %s272_s26 }
  0xf8   :  { %p3226_p0 = por %p3225_p7, %p3224_p11 }
  0xfa   :  { %p3228_p6 = por %p3227_p1, %p3226_p0 }
  0xfc   :  { %p3229_p2 = pnand %p3228_p6, %p3222_p8 }
  0xfe   :  { %3232 = shalt.err (!%p3229_p2)  }
  0xff   :  { %s3233_s28 = scalar_lea.vmem %s5309_s13, 16  ;;  %p3238_p4 = scmp.lt.s32.totalorder %s5309_s13, %s5130_s27 }
 0x100   :  { %p3234_p3 = scmp.ne.s32.totalorder %s5309_s13, %s3233_s28  ;;  %p3239_p5 = scmp.lt.s32.totalorder %s5156_s20, %s3233_s28 }
 0x102   :  { %p3240_p13 = por %p3239_p5, %p3238_p4 }
 0x104   :  { %p3241_p9 = pnand %p3240_p13, %p3234_p3 }
 0x106   :  { %3244 = shalt.err (!%p3241_p9)  }
 0x107   :  { %284 = dma.hbm_to_vmem [thread:$0]  %s272_s26, 16, %s5309_s13, [#allocation3] }
 0x108   :  { %s103_s12 = scalar_select %p102_p10, %s5321_s10, 0 }
 0x109   :  { %s111_s14 = scalar_select %p110_p12, %s5323_s19, 0 }
 0x10a   :  { %p6913_p8 = scmp.lt.s32.totalorder %s5321_s10, 63  ;;  %p6914_p11 = scmp.lt.s32.totalorder %s5323_s19, 63 }
 0x10c   :  { %s6963_s12 = smov (!%p6913_p8, %s103_s12), 63  ;;  %s6965_s14 = smov (!%p6914_p11, %s111_s14), 63 }
 0x10d   :  { %s2269_s30 = sshll.u32 %s6963_s12, 4  ;;  %s2270_s6 = sshll.u32 %s6965_s14, 4 }
 0x10e   :  { %s286_s17 = scalar_lea.hbm %s6905_s3, %s2269_s30 }
 0x10f   :  { %s3245_s9 = scalar_lea.hbm %s286_s17, 16  ;;  %p3248_p10 = scmp.lt.u32.totalorder %s286_s17, %s6905_s3 }
 0x110   :  { %p3246_p9 = scmp.ne.s32.totalorder %s286_s17, %s3245_s9  ;;  %p3249_p13 = scmp.lt.u32.totalorder %s5147_s16, %s3245_s9 }
 0x111   :  { %p3251_p7 = scmp.lt.u32.totalorder %s3245_s9, %s286_s17 }
 0x112   :  { %p3250_p12 = por %p3249_p13, %p3248_p10 }
 0x114   :  { %p3252_p0 = por %p3251_p7, %p3250_p12 }
 0x116   :  { %p3253_p1 = pnand %p3252_p0, %p3246_p9 }
 0x118   :  { %3256 = shalt.err (!%p3253_p1)  }
 0x119   :  { %s3257_s10 = scalar_lea.vmem %s5327_s18, 16  ;;  %p3262_p2 = scmp.lt.s32.totalorder %s5327_s18, %s5130_s27 }
 0x11a   :  { %p3258_p6 = scmp.ne.s32.totalorder %s5327_s18, %s3257_s10  ;;  %p3263_p3 = scmp.lt.s32.totalorder %s5156_s20, %s3257_s10 }
 0x11c   :  { %p3264_p4 = por %p3263_p3, %p3262_p2 }
 0x11e   :  { %p3265_p5 = pnand %p3264_p4, %p3258_p6 }
 0x120   :  { %3268 = shalt.err (!%p3265_p5)  }
 0x121   :  { %298 = dma.hbm_to_vmem [thread:$0]  %s286_s17, 16, %s5327_s18, [#allocation3] }
 0x122   :  { %s300_s25 = scalar_lea.hbm %s6905_s3, %s2270_s6  ;;  %p118_p8 = scmp.gt.s32.totalorder %s5332_s23, 0 }
 0x123   :  { %s3269_s7 = scalar_lea.hbm %s300_s25, 16  ;;  %p3272_p9 = scmp.lt.u32.totalorder %s300_s25, %s6905_s3 }
 0x124   :  { %p3270_p11 = scmp.ne.s32.totalorder %s300_s25, %s3269_s7  ;;  %p3273_p10 = scmp.lt.u32.totalorder %s5147_s16, %s3269_s7 }
 0x125   :  { %p3275_p12 = scmp.lt.u32.totalorder %s3269_s7, %s300_s25 }
 0x126   :  { %p3274_p13 = por %p3273_p10, %p3272_p9 }
 0x128   :  { %p3276_p7 = por %p3275_p12, %p3274_p13 }
 0x12a   :  { %p3277_p0 = pnand %p3276_p7, %p3270_p11 }
 0x12c   :  { %3280 = shalt.err (!%p3277_p0)  }
 0x12d   :  { %s3281_s18 = scalar_lea.vmem %s5362_s24, 16  ;;  %p3286_p6 = scmp.lt.s32.totalorder %s5362_s24, %s5130_s27 }
 0x12e   :  { %p3282_p1 = scmp.ne.s32.totalorder %s5362_s24, %s3281_s18  ;;  %p3287_p2 = scmp.lt.s32.totalorder %s5156_s20, %s3281_s18 }
 0x130   :  { %p3288_p3 = por %p3287_p2, %p3286_p6 }
 0x132   :  { %p3289_p4 = pnand %p3288_p3, %p3282_p1 }
 0x134   :  { %3292 = shalt.err (!%p3289_p4)  }
 0x135   :  { %312 = dma.hbm_to_vmem [thread:$0]  %s300_s25, 16, %s5362_s24, [#allocation3] }
 0x136   :  { %s119_s11 = scalar_select %p118_p8, %s5332_s23, 0 }
 0x137   :  { %p2236_p5 = scmp.lt.s32.totalorder %s5332_s23, 63  ;;  %s5038_s22 = smov [#allocation2 + $0xc]  }
 0x138   :  { %s323_s29 = sshll.u32 %s5038_s22, 4  ;;  %s5395_s28 = sld [smem:[#allocation5 + $0xd]]  ;;  %s324_s29 = int_to_ptr.vmem [resolvable:$true] %s323_s29 }
 0x139   :  { %s6967_s11 = smov (!%p2236_p5, %s119_s11), 63  ;;  %s5039_s14 = smov [#allocation2 + $0xd]  }
 0x13a   :  { %s2271_s12 = sshll.u32 %s6967_s11, 4  ;;  %s337_s30 = sshll.u32 %s5039_s14, 4  ;;  %s5400_s30 = int_to_ptr.vmem [resolvable:$true] %s337_s30 }
 0x13b   :  { %s314_s17 = scalar_lea.hbm %s6905_s3, %s2271_s12 }
 0x13c   :  { %s3293_s24 = scalar_lea.hbm %s314_s17, 16  ;;  %p3296_p8 = scmp.lt.u32.totalorder %s314_s17, %s6905_s3 }
 0x13d   :  { %p3294_p11 = scmp.ne.s32.totalorder %s314_s17, %s3293_s24  ;;  %p3297_p9 = scmp.lt.u32.totalorder %s5147_s16, %s3293_s24 }
 0x13e   :  { %p3299_p13 = scmp.lt.u32.totalorder %s3293_s24, %s314_s17 }
 0x13f   :  { %p3298_p10 = por %p3297_p9, %p3296_p8 }
 0x141   :  { %p3300_p12 = por %p3299_p13, %p3298_p10 }
 0x143   :  { %p3301_p7 = pnand %p3300_p12, %p3294_p11 }
 0x145   :  { %3304 = shalt.err (!%p3301_p7)  }
 0x146   :  { %s3305_s23 = scalar_lea.vmem %s324_s29, 16  ;;  %p3310_p1 = scmp.lt.s32.totalorder %s324_s29, %s5130_s27 }
 0x147   :  { %p3306_p0 = scmp.ne.s32.totalorder %s324_s29, %s3305_s23  ;;  %p3311_p6 = scmp.lt.s32.totalorder %s5156_s20, %s3305_s23 }
 0x149   :  { %p3312_p2 = por %p3311_p6, %p3310_p1 }
 0x14b   :  { %p3313_p3 = pnand %p3312_p2, %p3306_p0 }
 0x14d   :  { %3316 = shalt.err (!%p3313_p3)  }
 0x14e   :  { %326 = dma.hbm_to_vmem [thread:$0]  %s314_s17, 16, %s324_s29, [#allocation3] }
 0x14f   :  { %p126_p4 = scmp.gt.s32.totalorder %s5395_s28, 0  ;;  %p2242_p5 = scmp.lt.s32.totalorder %s5395_s28, 63 }
 0x150   :  { %s5410_s8 = sld [smem:[#allocation5 + $0xe]]  ;;  %s5040_s13 = smov [#allocation2 + $0xe]  }
 0x151   :  { %s6969_s28 = smov (!%p126_p4, %s5395_s28), 0  ;;  %s351_s10 = sshll.u32 %s5040_s13, 4  ;;  %s5415_s10 = int_to_ptr.vmem [resolvable:$true] %s351_s10 }
 0x152   :  { %s5413_s19 = sld [smem:[#allocation5 + $0xf]]  ;;  %s6971_s28 = smov (!%p2242_p5, %s6969_s28), 63 }
 0x153   :  { %s2272_s21 = sshll.u32 %s6971_s28, 4  ;;  %s5041_s25 = smov [#allocation2 + $0xf]  }
 0x154   :  { %s365_s7 = sshll.u32 %s5041_s25, 4  ;;  %s328_s18 = scalar_lea.hbm %s6905_s3, %s2272_s21  ;;  %s5437_s7 = int_to_ptr.vmem [resolvable:$true] %s365_s7 }
 0x155   :  { %s3317_s11 = scalar_lea.hbm %s328_s18, 16  ;;  %p3320_p9 = scmp.lt.u32.totalorder %s328_s18, %s6905_s3 }
 0x156   :  { %p134_p11 = scmp.gt.s32.totalorder %s5410_s8, 0  ;;  %p3318_p8 = scmp.ne.s32.totalorder %s328_s18, %s3317_s11 }
 0x157   :  { %p3321_p10 = scmp.lt.u32.totalorder %s5147_s16, %s3317_s11  ;;  %p3323_p12 = scmp.lt.u32.totalorder %s3317_s11, %s328_s18 }
 0x159   :  { %p3322_p13 = por %p3321_p10, %p3320_p9 }
 0x15b   :  { %p3324_p7 = por %p3323_p12, %p3322_p13 }
 0x15d   :  { %p3325_p0 = pnand %p3324_p7, %p3318_p8 }
 0x15f   :  { %3328 = shalt.err (!%p3325_p0)  }
 0x160   :  { %s3329_s28 = scalar_lea.vmem %s5400_s30, 16  ;;  %p3334_p6 = scmp.lt.s32.totalorder %s5400_s30, %s5130_s27 }
 0x161   :  { %p3330_p1 = scmp.ne.s32.totalorder %s5400_s30, %s3329_s28  ;;  %p3335_p2 = scmp.lt.s32.totalorder %s5156_s20, %s3329_s28 }
 0x163   :  { %p3336_p3 = por %p3335_p2, %p3334_p6 }
 0x165   :  { %p3337_p4 = pnand %p3336_p3, %p3330_p1 }
 0x167   :  { %3340 = shalt.err (!%p3337_p4)  }
 0x168   :  { %340 = dma.hbm_to_vmem [thread:$0]  %s328_s18, 16, %s5400_s30, [#allocation3] }
 0x169   :  { %s135_s12 = scalar_select %p134_p11, %s5410_s8, 0 }
 0x16a   :  { %p2248_p5 = scmp.lt.s32.totalorder %s5410_s8, 63  ;;  %p142_p8 = scmp.gt.s32.totalorder %s5413_s19, 0 }
 0x16b   :  { %p2254_p9 = scmp.lt.s32.totalorder %s5413_s19, 63  ;;  %s5440_s15 = sld [smem:[#allocation5 + $0x10]] }
 0x16c   :  { %s6973_s12 = smov (!%p2248_p5, %s135_s12), 63 }
 0x16d   :  { %s143_s14 = scalar_select %p142_p8, %s5413_s19, 0 }
 0x16e   :  { %s2273_s5 = sshll.u32 %s6973_s12, 4 }
 0x16f   :  { %s342_s6 = scalar_lea.hbm %s6905_s3, %s2273_s5 }
 0x170   :  { %s3341_s9 = scalar_lea.hbm %s342_s6, 16  ;;  %p3344_p11 = scmp.lt.u32.totalorder %s342_s6, %s6905_s3 }
 0x171   :  { %p3342_p10 = scmp.ne.s32.totalorder %s342_s6, %s3341_s9  ;;  %p3345_p13 = scmp.lt.u32.totalorder %s5147_s16, %s3341_s9 }
 0x172   :  { %p3347_p7 = scmp.lt.u32.totalorder %s3341_s9, %s342_s6 }
 0x173   :  { %p3346_p12 = por %p3345_p13, %p3344_p11 }
 0x175   :  { %p3348_p0 = por %p3347_p7, %p3346_p12 }
 0x177   :  { %p3349_p1 = pnand %p3348_p0, %p3342_p10 }
 0x179   :  { %3352 = shalt.err (!%p3349_p1)  }
 0x17a   :  { %s3353_s8 = scalar_lea.vmem %s5415_s10, 16  ;;  %p3358_p2 = scmp.lt.s32.totalorder %s5415_s10, %s5130_s27 }
 0x17b   :  { %p3354_p6 = scmp.ne.s32.totalorder %s5415_s10, %s3353_s8  ;;  %p3359_p3 = scmp.lt.s32.totalorder %s5156_s20, %s3353_s8 }
 0x17d   :  { %p3360_p4 = por %p3359_p3, %p3358_p2 }
 0x17f   :  { %p3361_p5 = pnand %p3360_p4, %p3354_p6 }
 0x181   :  { %3364 = shalt.err (!%p3361_p5)  }
 0x182   :  { %354 = dma.hbm_to_vmem [thread:$0]  %s342_s6, 16, %s5415_s10, [#allocation3] }
 0x183   :  { %s6975_s14 = smov (!%p2254_p9, %s143_s14), 63  ;;  %s5042_s13 = smov [#allocation2 + $0x10]  }
 0x184   :  { %s508_s21 = sshll.u32 %s5042_s13, 4  ;;  %s5457_s25 = sld [smem:[#allocation5 + $0x11]]  ;;  %s5459_s21 = int_to_ptr.vmem [resolvable:$true] %s508_s21 }
 0x185   :  { %s2274_s0 = sshll.u32 %s6975_s14, 4  ;;  %p373_p8 = scmp.gt.s32.totalorder %s5440_s15, 0 }
 0x186   :  { %s356_s11 = scalar_lea.hbm %s6905_s3, %s2274_s0 }
 0x187   :  { %s3365_s22 = scalar_lea.hbm %s356_s11, 16  ;;  %p3368_p11 = scmp.lt.u32.totalorder %s356_s11, %s6905_s3 }
 0x188   :  { %p3366_p10 = scmp.ne.s32.totalorder %s356_s11, %s3365_s22  ;;  %p3369_p13 = scmp.lt.u32.totalorder %s5147_s16, %s3365_s22 }
 0x189   :  { %p3371_p12 = scmp.lt.u32.totalorder %s3365_s22, %s356_s11 }
 0x18a   :  { %p3370_p9 = por %p3369_p13, %p3368_p11 }
 0x18c   :  { %p3372_p7 = por %p3371_p12, %p3370_p9 }
 0x18e   :  { %p3373_p0 = pnand %p3372_p7, %p3366_p10 }
 0x190   :  { %3376 = shalt.err (!%p3373_p0)  }
 0x191   :  { %s3377_s10 = scalar_lea.vmem %s5437_s7, 16  ;;  %p3382_p6 = scmp.lt.s32.totalorder %s5437_s7, %s5130_s27 }
 0x192   :  { %p3378_p1 = scmp.ne.s32.totalorder %s5437_s7, %s3377_s10  ;;  %p3383_p2 = scmp.lt.s32.totalorder %s5156_s20, %s3377_s10 }
 0x194   :  { %p3384_p3 = por %p3383_p2, %p3382_p6 }
 0x196   :  { %p3385_p4 = pnand %p3384_p3, %p3378_p1 }
 0x198   :  { %3388 = shalt.err (!%p3385_p4)  }
 0x199   :  { %368 = dma.hbm_to_vmem [thread:$0]  %s356_s11, 16, %s5437_s7, [#allocation3] }
 0x19a   :  { %s374_s19 = scalar_select %p373_p8, %s5440_s15, 0 }
 0x19b   :  { %p2276_p5 = scmp.lt.s32.totalorder %s5440_s15, 63  ;;  %p381_p10 = scmp.gt.s32.totalorder %s5457_s25, 0 }
 0x19c   :  { %p2282_p11 = scmp.lt.s32.totalorder %s5457_s25, 63  ;;  %s5043_s5 = smov [#allocation2 + $0x11]  }
 0x19d   :  { %s6977_s19 = smov (!%p2276_p5, %s374_s19), 63  ;;  %s522_s17 = sshll.u32 %s5043_s5, 4  ;;  %s5485_s17 = int_to_ptr.vmem [resolvable:$true] %s522_s17 }
 0x19e   :  { %s382_s12 = scalar_select %p381_p10, %s5457_s25, 0 }
 0x19f   :  { %s2371_s14 = sshll.u32 %s6977_s19, 4 }
 0x1a0   :  { %s498_s9 = scalar_lea.hbm %s6905_s3, %s2371_s14 }
 0x1a1   :  { %s3389_s23 = scalar_lea.hbm %s498_s9, 16  ;;  %p3392_p8 = scmp.lt.u32.totalorder %s498_s9, %s6905_s3 }
 0x1a2   :  { %p3390_p13 = scmp.ne.s32.totalorder %s498_s9, %s3389_s23  ;;  %p3393_p9 = scmp.lt.u32.totalorder %s5147_s16, %s3389_s23 }
 0x1a3   :  { %p3395_p7 = scmp.lt.u32.totalorder %s3389_s23, %s498_s9 }
 0x1a4   :  { %p3394_p12 = por %p3393_p9, %p3392_p8 }
 0x1a6   :  { %p3396_p0 = por %p3395_p7, %p3394_p12 }
 0x1a8   :  { %p3397_p1 = pnand %p3396_p0, %p3390_p13 }
 0x1aa   :  { %3400 = shalt.err (!%p3397_p1)  }
 0x1ab   :  { %s3401_s15 = scalar_lea.vmem %s5459_s21, 16  ;;  %p3406_p2 = scmp.lt.s32.totalorder %s5459_s21, %s5130_s27 }
 0x1ac   :  { %p3402_p6 = scmp.ne.s32.totalorder %s5459_s21, %s3401_s15  ;;  %p3407_p3 = scmp.lt.s32.totalorder %s5156_s20, %s3401_s15 }
 0x1ae   :  { %p3408_p4 = por %p3407_p3, %p3406_p2 }
 0x1b0   :  { %p3409_p5 = pnand %p3408_p4, %p3402_p6 }
 0x1b2   :  { %3412 = shalt.err (!%p3409_p5)  }
 0x1b3   :  { %511 = dma.hbm_to_vmem [thread:$0]  %s498_s9, 16, %s5459_s21, [#allocation3 + $0x1] }
 0x1b4   :  { %s6979_s12 = smov (!%p2282_p11, %s382_s12), 63  ;;  %s5499_s8 = sld [smem:[#allocation5 + $0x12]] }
 0x1b5   :  { %s2372_s13 = sshll.u32 %s6979_s12, 4  ;;  %s5044_s0 = smov [#allocation2 + $0x12]  }
 0x1b6   :  { %s536_s26 = sshll.u32 %s5044_s0, 4  ;;  %s513_s22 = scalar_lea.hbm %s6905_s3, %s2372_s13  ;;  %s5504_s26 = int_to_ptr.vmem [resolvable:$true] %s536_s26 }
 0x1b7   :  { %s3413_s29 = scalar_lea.hbm %s513_s22, 16  ;;  %p3416_p13 = scmp.lt.u32.totalorder %s513_s22, %s6905_s3 }
 0x1b8   :  { %p3414_p10 = scmp.ne.s32.totalorder %s513_s22, %s3413_s29  ;;  %p3417_p8 = scmp.lt.u32.totalorder %s5147_s16, %s3413_s29 }
 0x1b9   :  { %p3419_p11 = scmp.lt.u32.totalorder %s3413_s29, %s513_s22 }
 0x1ba   :  { %p3418_p9 = por %p3417_p8, %p3416_p13 }
 0x1bc   :  { %p3420_p12 = por %p3419_p11, %p3418_p9 }
 0x1be   :  { %p3421_p7 = pnand %p3420_p12, %p3414_p10 }
 0x1c0   :  { %3424 = shalt.err (!%p3421_p7)  }
 0x1c1   :  { %s3425_s21 = scalar_lea.vmem %s5485_s17, 16  ;;  %p3430_p1 = scmp.lt.s32.totalorder %s5485_s17, %s5130_s27 }
 0x1c2   :  { %p3426_p0 = scmp.ne.s32.totalorder %s5485_s17, %s3425_s21  ;;  %p3431_p6 = scmp.lt.s32.totalorder %s5156_s20, %s3425_s21 }
 0x1c4   :  { %p3432_p2 = por %p3431_p6, %p3430_p1 }
 0x1c6   :  { %p3433_p3 = pnand %p3432_p2, %p3426_p0 }
 0x1c8   :  { %3436 = shalt.err (!%p3433_p3)  }
 0x1c9   :  { %525 = dma.hbm_to_vmem [thread:$0]  %s513_s22, 16, %s5485_s17, [#allocation3 + $0x1] }
 0x1ca   :  { %s5516_s25 = sld [smem:[#allocation5 + $0x13]]  ;;  %s5045_s19 = smov [#allocation2 + $0x13]  }
 0x1cb   :  { %s550_s12 = sshll.u32 %s5045_s19, 4  ;;  %s5518_s14 = sld [smem:[#allocation5 + $0x14]]  ;;  %s5522_s12 = int_to_ptr.vmem [resolvable:$true] %s550_s12 }
 0x1cc   :  { %p389_p4 = scmp.gt.s32.totalorder %s5499_s8, 0  ;;  %p2288_p5 = scmp.lt.s32.totalorder %s5499_s8, 63 }
 0x1cd   :  { %s5046_s5 = smov [#allocation2 + $0x14]   ;;  %s5527_s17 = sld [smem:[#allocation5 + $0x15]] }
 0x1ce   :  { %s6981_s8 = smov (!%p389_p4, %s5499_s8), 0  ;;  %s5525_s24 = sshll.u32 %s5046_s5, 4  ;;  %s5557_s24 = int_to_ptr.vmem [resolvable:$true] %s5525_s24 }
 0x1cf   :  { %s6983_s8 = smov (!%p2288_p5, %s6981_s8), 63 }
 0x1d0   :  { %p397_p10 = scmp.gt.s32.totalorder %s5516_s25, 0  ;;  %s2373_s6 = sshll.u32 %s6983_s8, 4 }
 0x1d1   :  { %p405_p8 = scmp.gt.s32.totalorder %s5518_s14, 0  ;;  %s527_s30 = scalar_lea.hbm %s6905_s3, %s2373_s6 }
 0x1d2   :  { %s3437_s7 = scalar_lea.hbm %s527_s30, 16  ;;  %p3440_p12 = scmp.lt.u32.totalorder %s527_s30, %s6905_s3 }
 0x1d3   :  { %p3438_p11 = scmp.ne.s32.totalorder %s527_s30, %s3437_s7  ;;  %p3441_p7 = scmp.lt.u32.totalorder %s5147_s16, %s3437_s7 }
 0x1d4   :  { %p3443_p1 = scmp.lt.u32.totalorder %s3437_s7, %s527_s30 }
 0x1d5   :  { %p3442_p0 = por %p3441_p7, %p3440_p12 }
 0x1d7   :  { %p3444_p6 = por %p3443_p1, %p3442_p0 }
 0x1d9   :  { %p3445_p2 = pnand %p3444_p6, %p3438_p11 }
 0x1db   :  { %3448 = shalt.err (!%p3445_p2)  }
 0x1dc   :  { %s3449_s8 = scalar_lea.vmem %s5504_s26, 16  ;;  %p3454_p4 = scmp.lt.s32.totalorder %s5504_s26, %s5130_s27 }
 0x1dd   :  { %p3450_p3 = scmp.ne.s32.totalorder %s5504_s26, %s3449_s8  ;;  %p3455_p5 = scmp.lt.s32.totalorder %s5156_s20, %s3449_s8 }
 0x1df   :  { %p3456_p9 = por %p3455_p5, %p3454_p4 }
 0x1e1   :  { %p3457_p13 = pnand %p3456_p9, %p3450_p3 }
 0x1e3   :  { %3460 = shalt.err (!%p3457_p13)  }
 0x1e4   :  { %539 = dma.hbm_to_vmem [thread:$0]  %s527_s30, 16, %s5504_s26, [#allocation3 + $0x1] }
 0x1e5   :  { %s398_s0 = scalar_select %p397_p10, %s5516_s25, 0 }
 0x1e6   :  { %s406_s18 = scalar_select %p405_p8, %s5518_s14, 0 }
 0x1e7   :  { %p6915_p11 = scmp.lt.s32.totalorder %s5516_s25, 63  ;;  %p6916_p12 = scmp.lt.s32.totalorder %s5518_s14, 63 }
 0x1e9   :  { %s6985_s0 = smov (!%p6915_p11, %s398_s0), 63  ;;  %s6987_s18 = smov (!%p6916_p12, %s406_s18), 63 }
 0x1ea   :  { %s2374_s11 = sshll.u32 %s6985_s0, 4  ;;  %s2375_s10 = sshll.u32 %s6987_s18, 4 }
 0x1eb   :  { %s541_s28 = scalar_lea.hbm %s6905_s3, %s2374_s11 }
 0x1ec   :  { %s3461_s21 = scalar_lea.hbm %s541_s28, 16  ;;  %p3464_p10 = scmp.lt.u32.totalorder %s541_s28, %s6905_s3 }
 0x1ed   :  { %p3462_p13 = scmp.ne.s32.totalorder %s541_s28, %s3461_s21  ;;  %p3465_p9 = scmp.lt.u32.totalorder %s5147_s16, %s3461_s21 }
 0x1ee   :  { %p3467_p7 = scmp.lt.u32.totalorder %s3461_s21, %s541_s28 }
 0x1ef   :  { %p3466_p8 = por %p3465_p9, %p3464_p10 }
 0x1f1   :  { %p3468_p0 = por %p3467_p7, %p3466_p8 }
 0x1f3   :  { %p3469_p1 = pnand %p3468_p0, %p3462_p13 }
 0x1f5   :  { %3472 = shalt.err (!%p3469_p1)  }
 0x1f6   :  { %s3473_s25 = scalar_lea.vmem %s5522_s12, 16  ;;  %p3478_p2 = scmp.lt.s32.totalorder %s5522_s12, %s5130_s27 }
 0x1f7   :  { %p3474_p6 = scmp.ne.s32.totalorder %s5522_s12, %s3473_s25  ;;  %p3479_p3 = scmp.lt.s32.totalorder %s5156_s20, %s3473_s25 }
 0x1f9   :  { %p3480_p4 = por %p3479_p3, %p3478_p2 }
 0x1fb   :  { %p3481_p5 = pnand %p3480_p4, %p3474_p6 }
 0x1fd   :  { %3484 = shalt.err (!%p3481_p5)  }
 0x1fe   :  { %553 = dma.hbm_to_vmem [thread:$0]  %s541_s28, 16, %s5522_s12, [#allocation3 + $0x1] }
 0x1ff   :  { %s555_s6 = scalar_lea.hbm %s6905_s3, %s2375_s10  ;;  %p413_p11 = scmp.gt.s32.totalorder %s5527_s17, 0 }
 0x200   :  { %s3485_s9 = scalar_lea.hbm %s555_s6, 16  ;;  %p3488_p13 = scmp.lt.u32.totalorder %s555_s6, %s6905_s3 }
 0x201   :  { %p3486_p12 = scmp.ne.s32.totalorder %s555_s6, %s3485_s9  ;;  %p3489_p10 = scmp.lt.u32.totalorder %s5147_s16, %s3485_s9 }
 0x202   :  { %p3491_p8 = scmp.lt.u32.totalorder %s3485_s9, %s555_s6 }
 0x203   :  { %p3490_p9 = por %p3489_p10, %p3488_p13 }
 0x205   :  { %p3492_p7 = por %p3491_p8, %p3490_p9 }
 0x207   :  { %p3493_p0 = pnand %p3492_p7, %p3486_p12 }
 0x209   :  { %3496 = shalt.err (!%p3493_p0)  }
 0x20a   :  { %s3497_s12 = scalar_lea.vmem %s5557_s24, 16  ;;  %p3502_p6 = scmp.lt.s32.totalorder %s5557_s24, %s5130_s27 }
 0x20b   :  { %p3498_p1 = scmp.ne.s32.totalorder %s5557_s24, %s3497_s12  ;;  %p3503_p2 = scmp.lt.s32.totalorder %s5156_s20, %s3497_s12 }
 0x20d   :  { %p3504_p3 = por %p3503_p2, %p3502_p6 }
 0x20f   :  { %p3505_p4 = pnand %p3504_p3, %p3498_p1 }
 0x211   :  { %3508 = shalt.err (!%p3505_p4)  }
 0x212   :  { %567 = dma.hbm_to_vmem [thread:$0]  %s555_s6, 16, %s5557_s24, [#allocation3 + $0x1] }
 0x213   :  { %s414_s7 = scalar_select %p413_p11, %s5527_s17, 0 }
 0x214   :  { %p2306_p5 = scmp.lt.s32.totalorder %s5527_s17, 63  ;;  %s5047_s15 = smov [#allocation2 + $0x15]  }
 0x215   :  { %s578_s13 = sshll.u32 %s5047_s15, 4  ;;  %s5590_s8 = sld [smem:[#allocation5 + $0x16]]  ;;  %s579_s13 = int_to_ptr.vmem [resolvable:$true] %s578_s13 }
 0x216   :  { %s6989_s7 = smov (!%p2306_p5, %s414_s7), 63  ;;  %s5048_s18 = smov [#allocation2 + $0x16]  }
 0x217   :  { %s2376_s0 = sshll.u32 %s6989_s7, 4  ;;  %s592_s11 = sshll.u32 %s5048_s18, 4  ;;  %s5595_s11 = int_to_ptr.vmem [resolvable:$true] %s592_s11 }
 0x218   :  { %s569_s28 = scalar_lea.hbm %s6905_s3, %s2376_s0 }
 0x219   :  { %s3509_s24 = scalar_lea.hbm %s569_s28, 16  ;;  %p3512_p11 = scmp.lt.u32.totalorder %s569_s28, %s6905_s3 }
 0x21a   :  { %p3510_p12 = scmp.ne.s32.totalorder %s569_s28, %s3509_s24  ;;  %p3513_p13 = scmp.lt.u32.totalorder %s5147_s16, %s3509_s24 }
 0x21b   :  { %p3515_p9 = scmp.lt.u32.totalorder %s3509_s24, %s569_s28 }
 0x21c   :  { %p3514_p10 = por %p3513_p13, %p3512_p11 }
 0x21e   :  { %p3516_p8 = por %p3515_p9, %p3514_p10 }
 0x220   :  { %p3517_p7 = pnand %p3516_p8, %p3510_p12 }
 0x222   :  { %3520 = shalt.err (!%p3517_p7)  }
 0x223   :  { %s3521_s17 = scalar_lea.vmem %s579_s13, 16  ;;  %p3526_p1 = scmp.lt.s32.totalorder %s579_s13, %s5130_s27 }
 0x224   :  { %p3522_p0 = scmp.ne.s32.totalorder %s579_s13, %s3521_s17  ;;  %p3527_p6 = scmp.lt.s32.totalorder %s5156_s20, %s3521_s17 }
 0x226   :  { %p3528_p2 = por %p3527_p6, %p3526_p1 }
 0x228   :  { %p3529_p3 = pnand %p3528_p2, %p3522_p0 }
 0x22a   :  { %3532 = shalt.err (!%p3529_p3)  }
 0x22b   :  { %581 = dma.hbm_to_vmem [thread:$0]  %s569_s28, 16, %s579_s13, [#allocation3 + $0x1] }
 0x22c   :  { %p421_p4 = scmp.gt.s32.totalorder %s5590_s8, 0  ;;  %p2312_p5 = scmp.lt.s32.totalorder %s5590_s8, 63 }
 0x22d   :  { %s5605_s19 = sld [smem:[#allocation5 + $0x17]]  ;;  %s5049_s26 = smov [#allocation2 + $0x17]  }
 0x22e   :  { %s6991_s8 = smov (!%p421_p4, %s5590_s8), 0  ;;  %s606_s25 = sshll.u32 %s5049_s26, 4  ;;  %s5610_s25 = int_to_ptr.vmem [resolvable:$true] %s606_s25 }
 0x22f   :  { %s5608_s14 = sld [smem:[#allocation5 + $0x18]]  ;;  %s6993_s8 = smov (!%p2312_p5, %s6991_s8), 63 }
 0x230   :  { %s2377_s5 = sshll.u32 %s6993_s8, 4  ;;  %s5050_s6 = smov [#allocation2 + $0x18]  }
 0x231   :  { %s620_s9 = sshll.u32 %s5050_s6, 4  ;;  %s583_s12 = scalar_lea.hbm %s6905_s3, %s2377_s5  ;;  %s5632_s9 = int_to_ptr.vmem [resolvable:$true] %s620_s9 }
 0x232   :  { %s3533_s7 = scalar_lea.hbm %s583_s12, 16  ;;  %p3536_p13 = scmp.lt.u32.totalorder %s583_s12, %s6905_s3 }
 0x233   :  { %p429_p12 = scmp.gt.s32.totalorder %s5605_s19, 0  ;;  %p3534_p11 = scmp.ne.s32.totalorder %s583_s12, %s3533_s7 }
 0x234   :  { %p3537_p10 = scmp.lt.u32.totalorder %s5147_s16, %s3533_s7  ;;  %p3539_p8 = scmp.lt.u32.totalorder %s3533_s7, %s583_s12 }
 0x236   :  { %p3538_p9 = por %p3537_p10, %p3536_p13 }
 0x238   :  { %p3540_p7 = por %p3539_p8, %p3538_p9 }
 0x23a   :  { %p3541_p0 = pnand %p3540_p7, %p3534_p11 }
 0x23c   :  { %3544 = shalt.err (!%p3541_p0)  }
 0x23d   :  { %s3545_s8 = scalar_lea.vmem %s5595_s11, 16  ;;  %p3550_p6 = scmp.lt.s32.totalorder %s5595_s11, %s5130_s27 }
 0x23e   :  { %p3546_p1 = scmp.ne.s32.totalorder %s5595_s11, %s3545_s8  ;;  %p3551_p2 = scmp.lt.s32.totalorder %s5156_s20, %s3545_s8 }
 0x240   :  { %p3552_p3 = por %p3551_p2, %p3550_p6 }
 0x242   :  { %p3553_p4 = pnand %p3552_p3, %p3546_p1 }
 0x244   :  { %3556 = shalt.err (!%p3553_p4)  }
 0x245   :  { %595 = dma.hbm_to_vmem [thread:$0]  %s583_s12, 16, %s5595_s11, [#allocation3 + $0x1] }
 0x246   :  { %s430_s0 = scalar_select %p429_p12, %s5605_s19, 0 }
 0x247   :  { %p2318_p5 = scmp.lt.s32.totalorder %s5605_s19, 63  ;;  %p437_p11 = scmp.gt.s32.totalorder %s5608_s14, 0 }
 0x248   :  { %p2324_p13 = scmp.lt.s32.totalorder %s5608_s14, 63  ;;  %s5635_s29 = sld [smem:[#allocation5 + $0x19]] }
 0x249   :  { %s6995_s0 = smov (!%p2318_p5, %s430_s0), 63 }
 0x24a   :  { %s438_s18 = scalar_select %p437_p11, %s5608_s14, 0 }
 0x24b   :  { %s2378_s22 = sshll.u32 %s6995_s0, 4 }
 0x24c   :  { %s597_s10 = scalar_lea.hbm %s6905_s3, %s2378_s22 }
 0x24d   :  { %s3557_s21 = scalar_lea.hbm %s597_s10, 16  ;;  %p3560_p12 = scmp.lt.u32.totalorder %s597_s10, %s6905_s3 }
 0x24e   :  { %p3558_p10 = scmp.ne.s32.totalorder %s597_s10, %s3557_s21  ;;  %p3561_p9 = scmp.lt.u32.totalorder %s5147_s16, %s3557_s21 }
 0x24f   :  { %p3563_p7 = scmp.lt.u32.totalorder %s3557_s21, %s597_s10 }
 0x250   :  { %p3562_p8 = por %p3561_p9, %p3560_p12 }
 0x252   :  { %p3564_p0 = por %p3563_p7, %p3562_p8 }
 0x254   :  { %p3565_p1 = pnand %p3564_p0, %p3558_p10 }
 0x256   :  { %3568 = shalt.err (!%p3565_p1)  }
 0x257   :  { %s3569_s19 = scalar_lea.vmem %s5610_s25, 16  ;;  %p3574_p2 = scmp.lt.s32.totalorder %s5610_s25, %s5130_s27 }
 0x258   :  { %p3570_p6 = scmp.ne.s32.totalorder %s5610_s25, %s3569_s19  ;;  %p3575_p3 = scmp.lt.s32.totalorder %s5156_s20, %s3569_s19 }
 0x25a   :  { %p3576_p4 = por %p3575_p3, %p3574_p2 }
 0x25c   :  { %p3577_p5 = pnand %p3576_p4, %p3570_p6 }
 0x25e   :  { %3580 = shalt.err (!%p3577_p5)  }
 0x25f   :  { %609 = dma.hbm_to_vmem [thread:$0]  %s597_s10, 16, %s5610_s25, [#allocation3 + $0x1] }
 0x260   :  { %s6997_s18 = smov (!%p2324_p13, %s438_s18), 63  ;;  %s5051_s26 = smov [#allocation2 + $0x19]  }
 0x261   :  { %s634_s5 = sshll.u32 %s5051_s26, 4  ;;  %s5652_s6 = sld [smem:[#allocation5 + $0x1a]]  ;;  %s5654_s5 = int_to_ptr.vmem [resolvable:$true] %s634_s5 }
 0x262   :  { %s2379_s23 = sshll.u32 %s6997_s18, 4  ;;  %p445_p11 = scmp.gt.s32.totalorder %s5635_s29, 0 }
 0x263   :  { %s611_s7 = scalar_lea.hbm %s6905_s3, %s2379_s23 }
 0x264   :  { %s3581_s15 = scalar_lea.hbm %s611_s7, 16  ;;  %p3584_p12 = scmp.lt.u32.totalorder %s611_s7, %s6905_s3 }
 0x265   :  { %p3582_p10 = scmp.ne.s32.totalorder %s611_s7, %s3581_s15  ;;  %p3585_p9 = scmp.lt.u32.totalorder %s5147_s16, %s3581_s15 }
 0x266   :  { %p3587_p8 = scmp.lt.u32.totalorder %s3581_s15, %s611_s7 }
 0x267   :  { %p3586_p13 = por %p3585_p9, %p3584_p12 }
 0x269   :  { %p3588_p7 = por %p3587_p8, %p3586_p13 }
 0x26b   :  { %p3589_p0 = pnand %p3588_p7, %p3582_p10 }
 0x26d   :  { %3592 = shalt.err (!%p3589_p0)  }
 0x26e   :  { %s3593_s25 = scalar_lea.vmem %s5632_s9, 16  ;;  %p3598_p6 = scmp.lt.s32.totalorder %s5632_s9, %s5130_s27 }
 0x26f   :  { %p3594_p1 = scmp.ne.s32.totalorder %s5632_s9, %s3593_s25  ;;  %p3599_p2 = scmp.lt.s32.totalorder %s5156_s20, %s3593_s25 }
 0x271   :  { %p3600_p3 = por %p3599_p2, %p3598_p6 }
 0x273   :  { %p3601_p4 = pnand %p3600_p3, %p3594_p1 }
 0x275   :  { %3604 = shalt.err (!%p3601_p4)  }
 0x276   :  { %623 = dma.hbm_to_vmem [thread:$0]  %s611_s7, 16, %s5632_s9, [#allocation3 + $0x1] }
 0x277   :  { %s446_s14 = scalar_select %p445_p11, %s5635_s29, 0 }
 0x278   :  { %p2330_p5 = scmp.lt.s32.totalorder %s5635_s29, 63  ;;  %p453_p10 = scmp.gt.s32.totalorder %s5652_s6, 0 }
 0x279   :  { %p2336_p12 = scmp.lt.s32.totalorder %s5652_s6, 63  ;;  %s5052_s22 = smov [#allocation2 + $0x1a]  }
 0x27a   :  { %s6999_s14 = smov (!%p2330_p5, %s446_s14), 63  ;;  %s648_s28 = sshll.u32 %s5052_s22, 4  ;;  %s5680_s28 = int_to_ptr.vmem [resolvable:$true] %s648_s28 }
 0x27b   :  { %s454_s0 = scalar_select %p453_p10, %s5652_s6, 0 }
 0x27c   :  { %s2380_s18 = sshll.u32 %s6999_s14, 4 }
 0x27d   :  { %s625_s21 = scalar_lea.hbm %s6905_s3, %s2380_s18 }
 0x27e   :  { %s3605_s17 = scalar_lea.hbm %s625_s21, 16  ;;  %p3608_p11 = scmp.lt.u32.totalorder %s625_s21, %s6905_s3 }
 0x27f   :  { %p3606_p9 = scmp.ne.s32.totalorder %s625_s21, %s3605_s17  ;;  %p3609_p13 = scmp.lt.u32.totalorder %s5147_s16, %s3605_s17 }
 0x280   :  { %p3611_p7 = scmp.lt.u32.totalorder %s3605_s17, %s625_s21 }
 0x281   :  { %p3610_p8 = por %p3609_p13, %p3608_p11 }
 0x283   :  { %p3612_p0 = por %p3611_p7, %p3610_p8 }
 0x285   :  { %p3613_p1 = pnand %p3612_p0, %p3606_p9 }
 0x287   :  { %3616 = shalt.err (!%p3613_p1)  }
 0x288   :  { %s3617_s29 = scalar_lea.vmem %s5654_s5, 16  ;;  %p3622_p2 = scmp.lt.s32.totalorder %s5654_s5, %s5130_s27 }
 0x289   :  { %p3618_p6 = scmp.ne.s32.totalorder %s5654_s5, %s3617_s29  ;;  %p3623_p3 = scmp.lt.s32.totalorder %s5156_s20, %s3617_s29 }
 0x28b   :  { %p3624_p4 = por %p3623_p3, %p3622_p2 }
 0x28d   :  { %p3625_p5 = pnand %p3624_p4, %p3618_p6 }
 0x28f   :  { %3628 = shalt.err (!%p3625_p5)  }
 0x290   :  { %637 = dma.hbm_to_vmem [thread:$0]  %s625_s21, 16, %s5654_s5, [#allocation3 + $0x1] }
 0x291   :  { %s7001_s0 = smov (!%p2336_p12, %s454_s0), 63  ;;  %s5694_s19 = sld [smem:[#allocation5 + $0x1b]] }
 0x292   :  { %s2381_s26 = sshll.u32 %s7001_s0, 4  ;;  %s5053_s23 = smov [#allocation2 + $0x1b]  }
 0x293   :  { %s662_s30 = sshll.u32 %s5053_s23, 4  ;;  %s639_s15 = scalar_lea.hbm %s6905_s3, %s2381_s26  ;;  %s5699_s30 = int_to_ptr.vmem [resolvable:$true] %s662_s30 }
 0x294   :  { %s3629_s13 = scalar_lea.hbm %s639_s15, 16  ;;  %p3632_p9 = scmp.lt.u32.totalorder %s639_s15, %s6905_s3 }
 0x295   :  { %p3630_p10 = scmp.ne.s32.totalorder %s639_s15, %s3629_s13  ;;  %p3633_p11 = scmp.lt.u32.totalorder %s5147_s16, %s3629_s13 }
 0x296   :  { %p3635_p12 = scmp.lt.u32.totalorder %s3629_s13, %s639_s15 }
 0x297   :  { %p3634_p13 = por %p3633_p11, %p3632_p9 }
 0x299   :  { %p3636_p8 = por %p3635_p12, %p3634_p13 }
 0x29b   :  { %p3637_p7 = pnand %p3636_p8, %p3630_p10 }
 0x29d   :  { %3640 = shalt.err (!%p3637_p7)  }
 0x29e   :  { %s3641_s5 = scalar_lea.vmem %s5680_s28, 16  ;;  %p3646_p1 = scmp.lt.s32.totalorder %s5680_s28, %s5130_s27 }
 0x29f   :  { %p3642_p0 = scmp.ne.s32.totalorder %s5680_s28, %s3641_s5  ;;  %p3647_p6 = scmp.lt.s32.totalorder %s5156_s20, %s3641_s5 }
 0x2a1   :  { %p3648_p2 = por %p3647_p6, %p3646_p1 }
 0x2a3   :  { %p3649_p3 = pnand %p3648_p2, %p3642_p0 }
 0x2a5   :  { %3652 = shalt.err (!%p3649_p3)  }
 0x2a6   :  { %651 = dma.hbm_to_vmem [thread:$0]  %s639_s15, 16, %s5680_s28, [#allocation3 + $0x1] }
 0x2a7   :  { %s5711_s6 = sld [smem:[#allocation5 + $0x1c]]  ;;  %s5054_s14 = smov [#allocation2 + $0x1c]  }
 0x2a8   :  { %s676_s0 = sshll.u32 %s5054_s14, 4  ;;  %s5713_s18 = sld [smem:[#allocation5 + $0x1d]]  ;;  %s5717_s0 = int_to_ptr.vmem [resolvable:$true] %s676_s0 }
 0x2a9   :  { %p461_p4 = scmp.gt.s32.totalorder %s5694_s19, 0  ;;  %p2342_p5 = scmp.lt.s32.totalorder %s5694_s19, 63 }
 0x2aa   :  { %s5055_s22 = smov [#allocation2 + $0x1d]   ;;  %s5722_s28 = sld [smem:[#allocation5 + $0x1e]] }
 0x2ab   :  { %s7003_s19 = smov (!%p461_p4, %s5694_s19), 0  ;;  %s5720_s24 = sshll.u32 %s5055_s22, 4  ;;  %s5752_s24 = int_to_ptr.vmem [resolvable:$true] %s5720_s24 }
 0x2ac   :  { %s7005_s19 = smov (!%p2342_p5, %s7003_s19), 63 }
 0x2ad   :  { %p469_p10 = scmp.gt.s32.totalorder %s5711_s6, 0  ;;  %s2382_s10 = sshll.u32 %s7005_s19, 4 }
 0x2ae   :  { %p477_p11 = scmp.gt.s32.totalorder %s5713_s18, 0  ;;  %s653_s11 = scalar_lea.hbm %s6905_s3, %s2382_s10 }
 0x2af   :  { %s3653_s9 = scalar_lea.hbm %s653_s11, 16  ;;  %p3656_p8 = scmp.lt.u32.totalorder %s653_s11, %s6905_s3 }
 0x2b0   :  { %p3654_p12 = scmp.ne.s32.totalorder %s653_s11, %s3653_s9  ;;  %p3657_p7 = scmp.lt.u32.totalorder %s5147_s16, %s3653_s9 }
 0x2b1   :  { %p3659_p1 = scmp.lt.u32.totalorder %s3653_s9, %s653_s11 }
 0x2b2   :  { %p3658_p0 = por %p3657_p7, %p3656_p8 }
 0x2b4   :  { %p3660_p6 = por %p3659_p1, %p3658_p0 }
 0x2b6   :  { %p3661_p2 = pnand %p3660_p6, %p3654_p12 }
 0x2b8   :  { %3664 = shalt.err (!%p3661_p2)  }
 0x2b9   :  { %s3665_s19 = scalar_lea.vmem %s5699_s30, 16  ;;  %p3670_p4 = scmp.lt.s32.totalorder %s5699_s30, %s5130_s27 }
 0x2ba   :  { %p3666_p3 = scmp.ne.s32.totalorder %s5699_s30, %s3665_s19  ;;  %p3671_p5 = scmp.lt.s32.totalorder %s5156_s20, %s3665_s19 }
 0x2bc   :  { %p3672_p13 = por %p3671_p5, %p3670_p4 }
 0x2be   :  { %p3673_p9 = pnand %p3672_p13, %p3666_p3 }
 0x2c0   :  { %3676 = shalt.err (!%p3673_p9)  }
 0x2c1   :  { %665 = dma.hbm_to_vmem [thread:$0]  %s653_s11, 16, %s5699_s30, [#allocation3 + $0x1] }
 0x2c2   :  { %s470_s23 = scalar_select %p469_p10, %s5711_s6, 0 }
 0x2c3   :  { %s478_s12 = scalar_select %p477_p11, %s5713_s18, 0 }
 0x2c4   :  { %p6917_p12 = scmp.lt.s32.totalorder %s5711_s6, 63  ;;  %p6918_p8 = scmp.lt.s32.totalorder %s5713_s18, 63 }
 0x2c6   :  { %s7007_s23 = smov (!%p6917_p12, %s470_s23), 63  ;;  %s7009_s12 = smov (!%p6918_p8, %s478_s12), 63 }
 0x2c7   :  { %s2383_s7 = sshll.u32 %s7007_s23, 4  ;;  %s2384_s25 = sshll.u32 %s7009_s12, 4 }
 0x2c8   :  { %s667_s8 = scalar_lea.hbm %s6905_s3, %s2383_s7 }
 0x2c9   :  { %s3677_s5 = scalar_lea.hbm %s667_s8, 16  ;;  %p3680_p10 = scmp.lt.u32.totalorder %s667_s8, %s6905_s3 }
 0x2ca   :  { %p3678_p9 = scmp.ne.s32.totalorder %s667_s8, %s3677_s5  ;;  %p3681_p13 = scmp.lt.u32.totalorder %s5147_s16, %s3677_s5 }
 0x2cb   :  { %p3683_p7 = scmp.lt.u32.totalorder %s3677_s5, %s667_s8 }
 0x2cc   :  { %p3682_p11 = por %p3681_p13, %p3680_p10 }
 0x2ce   :  { %p3684_p0 = por %p3683_p7, %p3682_p11 }
 0x2d0   :  { %p3685_p1 = pnand %p3684_p0, %p3678_p9 }
 0x2d2   :  { %3688 = shalt.err (!%p3685_p1)  }
 0x2d3   :  { %s3689_s6 = scalar_lea.vmem %s5717_s0, 16  ;;  %p3694_p2 = scmp.lt.s32.totalorder %s5717_s0, %s5130_s27 }
 0x2d4   :  { %p3690_p6 = scmp.ne.s32.totalorder %s5717_s0, %s3689_s6  ;;  %p3695_p3 = scmp.lt.s32.totalorder %s5156_s20, %s3689_s6 }
 0x2d6   :  { %p3696_p4 = por %p3695_p3, %p3694_p2 }
 0x2d8   :  { %p3697_p5 = pnand %p3696_p4, %p3690_p6 }
 0x2da   :  { %3700 = shalt.err (!%p3697_p5)  }
 0x2db   :  { %679 = dma.hbm_to_vmem [thread:$0]  %s667_s8, 16, %s5717_s0, [#allocation3 + $0x1] }
 0x2dc   :  { %s681_s10 = scalar_lea.hbm %s6905_s3, %s2384_s25  ;;  %p485_p12 = scmp.gt.s32.totalorder %s5722_s28, 0 }
 0x2dd   :  { %s3701_s21 = scalar_lea.hbm %s681_s10, 16  ;;  %p3704_p9 = scmp.lt.u32.totalorder %s681_s10, %s6905_s3 }
 0x2de   :  { %p3702_p8 = scmp.ne.s32.totalorder %s681_s10, %s3701_s21  ;;  %p3705_p10 = scmp.lt.u32.totalorder %s5147_s16, %s3701_s21 }
 0x2df   :  { %p3707_p11 = scmp.lt.u32.totalorder %s3701_s21, %s681_s10 }
 0x2e0   :  { %p3706_p13 = por %p3705_p10, %p3704_p9 }
 0x2e2   :  { %p3708_p7 = por %p3707_p11, %p3706_p13 }
 0x2e4   :  { %p3709_p0 = pnand %p3708_p7, %p3702_p8 }
 0x2e6   :  { %3712 = shalt.err (!%p3709_p0)  }
 0x2e7   :  { %s3713_s0 = scalar_lea.vmem %s5752_s24, 16  ;;  %p3718_p6 = scmp.lt.s32.totalorder %s5752_s24, %s5130_s27 }
 0x2e8   :  { %p3714_p1 = scmp.ne.s32.totalorder %s5752_s24, %s3713_s0  ;;  %p3719_p2 = scmp.lt.s32.totalorder %s5156_s20, %s3713_s0 }
 0x2ea   :  { %p3720_p3 = por %p3719_p2, %p3718_p6 }
 0x2ec   :  { %p3721_p4 = pnand %p3720_p3, %p3714_p1 }
 0x2ee   :  { %3724 = shalt.err (!%p3721_p4)  }
 0x2ef   :  { %693 = dma.hbm_to_vmem [thread:$0]  %s681_s10, 16, %s5752_s24, [#allocation3 + $0x1] }
 0x2f0   :  { %s486_s9 = scalar_select %p485_p12, %s5722_s28, 0 }
 0x2f1   :  { %p2360_p5 = scmp.lt.s32.totalorder %s5722_s28, 63  ;;  %s5056_s29 = smov [#allocation2 + $0x1e]  }
 0x2f2   :  { %s704_s26 = sshll.u32 %s5056_s29, 4  ;;  %s5785_s19 = sld [smem:[#allocation5 + $0x1f]]  ;;  %s705_s26 = int_to_ptr.vmem [resolvable:$true] %s704_s26 }
 0x2f3   :  { %s7011_s9 = smov (!%p2360_p5, %s486_s9), 63  ;;  %s5057_s12 = smov [#allocation2 + $0x1f]  }
 0x2f4   :  { %s2385_s23 = sshll.u32 %s7011_s9, 4  ;;  %s718_s7 = sshll.u32 %s5057_s12, 4  ;;  %s5790_s7 = int_to_ptr.vmem [resolvable:$true] %s718_s7 }
 0x2f5   :  { %s695_s8 = scalar_lea.hbm %s6905_s3, %s2385_s23 }
 0x2f6   :  { %s3725_s24 = scalar_lea.hbm %s695_s8, 16  ;;  %p3728_p12 = scmp.lt.u32.totalorder %s695_s8, %s6905_s3 }
 0x2f7   :  { %p3726_p8 = scmp.ne.s32.totalorder %s695_s8, %s3725_s24  ;;  %p3729_p9 = scmp.lt.u32.totalorder %s5147_s16, %s3725_s24 }
 0x2f8   :  { %p3731_p13 = scmp.lt.u32.totalorder %s3725_s24, %s695_s8 }
 0x2f9   :  { %p3730_p10 = por %p3729_p9, %p3728_p12 }
 0x2fb   :  { %p3732_p11 = por %p3731_p13, %p3730_p10 }
 0x2fd   :  { %p3733_p7 = pnand %p3732_p11, %p3726_p8 }
 0x2ff   :  { %3736 = shalt.err (!%p3733_p7)  }
 0x300   :  { %s3737_s28 = scalar_lea.vmem %s705_s26, 16  ;;  %p3742_p1 = scmp.lt.s32.totalorder %s705_s26, %s5130_s27 }
 0x301   :  { %p3738_p0 = scmp.ne.s32.totalorder %s705_s26, %s3737_s28  ;;  %p3743_p6 = scmp.lt.s32.totalorder %s5156_s20, %s3737_s28 }
 0x303   :  { %p3744_p2 = por %p3743_p6, %p3742_p1 }
 0x305   :  { %p3745_p3 = pnand %p3744_p2, %p3738_p0 }
 0x307   :  { %3748 = shalt.err (!%p3745_p3)  }
 0x308   :  { %707 = dma.hbm_to_vmem [thread:$0]  %s695_s8, 16, %s705_s26, [#allocation3 + $0x1] }
 0x309   :  { %p493_p4 = scmp.gt.s32.totalorder %s5785_s19, 0  ;;  %p2366_p5 = scmp.lt.s32.totalorder %s5785_s19, 63 }
 0x30a   :  { %s5800_s14 = sld [smem:[#allocation5 + $0x20]]  ;;  %s5058_s30 = smov [#allocation2 + $0x20]  }
 0x30b   :  { %s7013_s19 = smov (!%p493_p4, %s5785_s19), 0  ;;  %s861_s6 = sshll.u32 %s5058_s30, 4  ;;  %s5805_s6 = int_to_ptr.vmem [resolvable:$true] %s861_s6 }
 0x30c   :  { %s5803_s18 = sld [smem:[#allocation5 + $0x21]]  ;;  %s7015_s19 = smov (!%p2366_p5, %s7013_s19), 63 }
 0x30d   :  { %s2386_s22 = sshll.u32 %s7015_s19, 4  ;;  %s5059_s10 = smov [#allocation2 + $0x21]  }
 0x30e   :  { %s875_s21 = sshll.u32 %s5059_s10, 4  ;;  %s709_s0 = scalar_lea.hbm %s6905_s3, %s2386_s22  ;;  %s5827_s21 = int_to_ptr.vmem [resolvable:$true] %s875_s21 }
 0x30f   :  { %s3749_s9 = scalar_lea.hbm %s709_s0, 16  ;;  %p3752_p9 = scmp.lt.u32.totalorder %s709_s0, %s6905_s3 }
 0x310   :  { %p726_p8 = scmp.gt.s32.totalorder %s5800_s14, 0  ;;  %p3750_p12 = scmp.ne.s32.totalorder %s709_s0, %s3749_s9 }
 0x311   :  { %p3753_p10 = scmp.lt.u32.totalorder %s5147_s16, %s3749_s9  ;;  %p3755_p11 = scmp.lt.u32.totalorder %s3749_s9, %s709_s0 }
 0x313   :  { %p3754_p13 = por %p3753_p10, %p3752_p9 }
 0x315   :  { %p3756_p7 = por %p3755_p11, %p3754_p13 }
 0x317   :  { %p3757_p0 = pnand %p3756_p7, %p3750_p12 }
 0x319   :  { %3760 = shalt.err (!%p3757_p0)  }
 0x31a   :  { %s3761_s19 = scalar_lea.vmem %s5790_s7, 16  ;;  %p3766_p6 = scmp.lt.s32.totalorder %s5790_s7, %s5130_s27 }
 0x31b   :  { %p3762_p1 = scmp.ne.s32.totalorder %s5790_s7, %s3761_s19  ;;  %p3767_p2 = scmp.lt.s32.totalorder %s5156_s20, %s3761_s19 }
 0x31d   :  { %p3768_p3 = por %p3767_p2, %p3766_p6 }
 0x31f   :  { %p3769_p4 = pnand %p3768_p3, %p3762_p1 }
 0x321   :  { %3772 = shalt.err (!%p3769_p4)  }
 0x322   :  { %721 = dma.hbm_to_vmem [thread:$0]  %s709_s0, 16, %s5790_s7, [#allocation3 + $0x1] }
 0x323   :  { %s727_s23 = scalar_select %p726_p8, %s5800_s14, 0 }
 0x324   :  { %p2388_p5 = scmp.lt.s32.totalorder %s5800_s14, 63  ;;  %p734_p12 = scmp.gt.s32.totalorder %s5803_s18, 0 }
 0x325   :  { %p2394_p9 = scmp.lt.s32.totalorder %s5803_s18, 63  ;;  %s5830_s13 = sld [smem:[#allocation5 + $0x22]] }
 0x326   :  { %s7017_s23 = smov (!%p2388_p5, %s727_s23), 63 }
 0x327   :  { %s735_s12 = scalar_select %p734_p12, %s5803_s18, 0 }
 0x328   :  { %s2483_s15 = sshll.u32 %s7017_s23, 4 }
 0x329   :  { %s851_s25 = scalar_lea.hbm %s6905_s3, %s2483_s15 }
 0x32a   :  { %s3773_s5 = scalar_lea.hbm %s851_s25, 16  ;;  %p3776_p8 = scmp.lt.u32.totalorder %s851_s25, %s6905_s3 }
 0x32b   :  { %p3774_p10 = scmp.ne.s32.totalorder %s851_s25, %s3773_s5  ;;  %p3777_p13 = scmp.lt.u32.totalorder %s5147_s16, %s3773_s5 }
 0x32c   :  { %p3779_p7 = scmp.lt.u32.totalorder %s3773_s5, %s851_s25 }
 0x32d   :  { %p3778_p11 = por %p3777_p13, %p3776_p8 }
 0x32f   :  { %p3780_p0 = por %p3779_p7, %p3778_p11 }
 0x331   :  { %p3781_p1 = pnand %p3780_p0, %p3774_p10 }
 0x333   :  { %3784 = shalt.err (!%p3781_p1)  }
 0x334   :  { %s3785_s14 = scalar_lea.vmem %s5805_s6, 16  ;;  %p3790_p2 = scmp.lt.s32.totalorder %s5805_s6, %s5130_s27 }
 0x335   :  { %p3786_p6 = scmp.ne.s32.totalorder %s5805_s6, %s3785_s14  ;;  %p3791_p3 = scmp.lt.s32.totalorder %s5156_s20, %s3785_s14 }
 0x337   :  { %p3792_p4 = por %p3791_p3, %p3790_p2 }
 0x339   :  { %p3793_p5 = pnand %p3792_p4, %p3786_p6 }
 0x33b   :  { %3796 = shalt.err (!%p3793_p5)  }
 0x33c   :  { %864 = dma.hbm_to_vmem [thread:$0]  %s851_s25, 16, %s5805_s6, [#allocation3 + $0x2] }
 0x33d   :  { %s7019_s12 = smov (!%p2394_p9, %s735_s12), 63  ;;  %s5060_s30 = smov [#allocation2 + $0x22]  }
 0x33e   :  { %s889_s22 = sshll.u32 %s5060_s30, 4  ;;  %s5847_s10 = sld [smem:[#allocation5 + $0x23]]  ;;  %s5849_s22 = int_to_ptr.vmem [resolvable:$true] %s889_s22 }
 0x33f   :  { %s2484_s17 = sshll.u32 %s7019_s12, 4  ;;  %p742_p12 = scmp.gt.s32.totalorder %s5830_s13, 0 }
 0x340   :  { %s866_s9 = scalar_lea.hbm %s6905_s3, %s2484_s17 }
 0x341   :  { %s3797_s29 = scalar_lea.hbm %s866_s9, 16  ;;  %p3800_p8 = scmp.lt.u32.totalorder %s866_s9, %s6905_s3 }
 0x342   :  { %p3798_p10 = scmp.ne.s32.totalorder %s866_s9, %s3797_s29  ;;  %p3801_p13 = scmp.lt.u32.totalorder %s5147_s16, %s3797_s29 }
 0x343   :  { %p3803_p11 = scmp.lt.u32.totalorder %s3797_s29, %s866_s9 }
 0x344   :  { %p3802_p9 = por %p3801_p13, %p3800_p8 }
 0x346   :  { %p3804_p7 = por %p3803_p11, %p3802_p9 }
 0x348   :  { %p3805_p0 = pnand %p3804_p7, %p3798_p10 }
 0x34a   :  { %3808 = shalt.err (!%p3805_p0)  }
 0x34b   :  { %s3809_s6 = scalar_lea.vmem %s5827_s21, 16  ;;  %p3814_p6 = scmp.lt.s32.totalorder %s5827_s21, %s5130_s27 }
 0x34c   :  { %p3810_p1 = scmp.ne.s32.totalorder %s5827_s21, %s3809_s6  ;;  %p3815_p2 = scmp.lt.s32.totalorder %s5156_s20, %s3809_s6 }
 0x34e   :  { %p3816_p3 = por %p3815_p2, %p3814_p6 }
 0x350   :  { %p3817_p4 = pnand %p3816_p3, %p3810_p1 }
 0x352   :  { %3820 = shalt.err (!%p3817_p4)  }
 0x353   :  { %878 = dma.hbm_to_vmem [thread:$0]  %s866_s9, 16, %s5827_s21, [#allocation3 + $0x2] }
 0x354   :  { %s743_s18 = scalar_select %p742_p12, %s5830_s13, 0 }
 0x355   :  { %p2400_p5 = scmp.lt.s32.totalorder %s5830_s13, 63  ;;  %p750_p10 = scmp.gt.s32.totalorder %s5847_s10, 0 }
 0x356   :  { %p2406_p8 = scmp.lt.s32.totalorder %s5847_s10, 63  ;;  %s5061_s15 = smov [#allocation2 + $0x23]  }
 0x357   :  { %s7021_s18 = smov (!%p2400_p5, %s743_s18), 63  ;;  %s903_s8 = sshll.u32 %s5061_s15, 4  ;;  %s5875_s8 = int_to_ptr.vmem [resolvable:$true] %s903_s8 }
 0x358   :  { %s751_s23 = scalar_select %p750_p10, %s5847_s10, 0 }
 0x359   :  { %s2485_s12 = sshll.u32 %s7021_s18, 4 }
 0x35a   :  { %s880_s5 = scalar_lea.hbm %s6905_s3, %s2485_s12 }
 0x35b   :  { %s3821_s28 = scalar_lea.hbm %s880_s5, 16  ;;  %p3824_p12 = scmp.lt.u32.totalorder %s880_s5, %s6905_s3 }
 0x35c   :  { %p3822_p13 = scmp.ne.s32.totalorder %s880_s5, %s3821_s28  ;;  %p3825_p9 = scmp.lt.u32.totalorder %s5147_s16, %s3821_s28 }
 0x35d   :  { %p3827_p7 = scmp.lt.u32.totalorder %s3821_s28, %s880_s5 }
 0x35e   :  { %p3826_p11 = por %p3825_p9, %p3824_p12 }
 0x360   :  { %p3828_p0 = por %p3827_p7, %p3826_p11 }
 0x362   :  { %p3829_p1 = pnand %p3828_p0, %p3822_p13 }
 0x364   :  { %3832 = shalt.err (!%p3829_p1)  }
 0x365   :  { %s3833_s13 = scalar_lea.vmem %s5849_s22, 16  ;;  %p3838_p2 = scmp.lt.s32.totalorder %s5849_s22, %s5130_s27 }
 0x366   :  { %p3834_p6 = scmp.ne.s32.totalorder %s5849_s22, %s3833_s13  ;;  %p3839_p3 = scmp.lt.s32.totalorder %s5156_s20, %s3833_s13 }
 0x368   :  { %p3840_p4 = por %p3839_p3, %p3838_p2 }
 0x36a   :  { %p3841_p5 = pnand %p3840_p4, %p3834_p6 }
 0x36c   :  { %3844 = shalt.err (!%p3841_p5)  }
 0x36d   :  { %892 = dma.hbm_to_vmem [thread:$0]  %s880_s5, 16, %s5849_s22, [#allocation3 + $0x2] }
 0x36e   :  { %s7023_s23 = smov (!%p2406_p8, %s751_s23), 63  ;;  %s5889_s14 = sld [smem:[#allocation5 + $0x24]] }
 0x36f   :  { %s2486_s30 = sshll.u32 %s7023_s23, 4  ;;  %s5062_s17 = smov [#allocation2 + $0x24]  }
 0x370   :  { %s917_s11 = sshll.u32 %s5062_s17, 4  ;;  %s894_s29 = scalar_lea.hbm %s6905_s3, %s2486_s30  ;;  %s5894_s11 = int_to_ptr.vmem [resolvable:$true] %s917_s11 }
 0x371   :  { %s3845_s26 = scalar_lea.hbm %s894_s29, 16  ;;  %p3848_p13 = scmp.lt.u32.totalorder %s894_s29, %s6905_s3 }
 0x372   :  { %p3846_p10 = scmp.ne.s32.totalorder %s894_s29, %s3845_s26  ;;  %p3849_p12 = scmp.lt.u32.totalorder %s5147_s16, %s3845_s26 }
 0x373   :  { %p3851_p8 = scmp.lt.u32.totalorder %s3845_s26, %s894_s29 }
 0x374   :  { %p3850_p9 = por %p3849_p12, %p3848_p13 }
 0x376   :  { %p3852_p11 = por %p3851_p8, %p3850_p9 }
 0x378   :  { %p3853_p7 = pnand %p3852_p11, %p3846_p10 }
 0x37a   :  { %3856 = shalt.err (!%p3853_p7)  }
 0x37b   :  { %s3857_s22 = scalar_lea.vmem %s5875_s8, 16  ;;  %p3862_p1 = scmp.lt.s32.totalorder %s5875_s8, %s5130_s27 }
 0x37c   :  { %p3858_p0 = scmp.ne.s32.totalorder %s5875_s8, %s3857_s22  ;;  %p3863_p6 = scmp.lt.s32.totalorder %s5156_s20, %s3857_s22 }
 0x37e   :  { %p3864_p2 = por %p3863_p6, %p3862_p1 }
 0x380   :  { %p3865_p3 = pnand %p3864_p2, %p3858_p0 }
 0x382   :  { %3868 = shalt.err (!%p3865_p3)  }
 0x383   :  { %906 = dma.hbm_to_vmem [thread:$0]  %s894_s29, 16, %s5875_s8, [#allocation3 + $0x2] }
 0x384   :  { %s5906_s10 = sld [smem:[#allocation5 + $0x25]]  ;;  %s5063_s18 = smov [#allocation2 + $0x25]  }
 0x385   :  { %s931_s23 = sshll.u32 %s5063_s18, 4  ;;  %s5908_s12 = sld [smem:[#allocation5 + $0x26]]  ;;  %s5912_s23 = int_to_ptr.vmem [resolvable:$true] %s931_s23 }
 0x386   :  { %p758_p4 = scmp.gt.s32.totalorder %s5889_s14, 0  ;;  %p2412_p5 = scmp.lt.s32.totalorder %s5889_s14, 63 }
 0x387   :  { %s5064_s15 = smov [#allocation2 + $0x26]   ;;  %s5917_s8 = sld [smem:[#allocation5 + $0x27]] }
 0x388   :  { %s7025_s14 = smov (!%p758_p4, %s5889_s14), 0  ;;  %s5915_s24 = sshll.u32 %s5064_s15, 4  ;;  %s5947_s24 = int_to_ptr.vmem [resolvable:$true] %s5915_s24 }
 0x389   :  { %s7027_s14 = smov (!%p2412_p5, %s7025_s14), 63 }
 0x38a   :  { %p766_p10 = scmp.gt.s32.totalorder %s5906_s10, 0  ;;  %s2487_s25 = sshll.u32 %s7027_s14, 4 }
 0x38b   :  { %p774_p12 = scmp.gt.s32.totalorder %s5908_s12, 0  ;;  %s908_s7 = scalar_lea.hbm %s6905_s3, %s2487_s25 }
 0x38c   :  { %s3869_s21 = scalar_lea.hbm %s908_s7, 16  ;;  %p3872_p11 = scmp.lt.u32.totalorder %s908_s7, %s6905_s3 }
 0x38d   :  { %p3870_p8 = scmp.ne.s32.totalorder %s908_s7, %s3869_s21  ;;  %p3873_p7 = scmp.lt.u32.totalorder %s5147_s16, %s3869_s21 }
 0x38e   :  { %p3875_p1 = scmp.lt.u32.totalorder %s3869_s21, %s908_s7 }
 0x38f   :  { %p3874_p0 = por %p3873_p7, %p3872_p11 }
 0x391   :  { %p3876_p6 = por %p3875_p1, %p3874_p0 }
 0x393   :  { %p3877_p2 = pnand %p3876_p6, %p3870_p8 }
 0x395   :  { %3880 = shalt.err (!%p3877_p2)  }
 0x396   :  { %s3881_s14 = scalar_lea.vmem %s5894_s11, 16  ;;  %p3886_p4 = scmp.lt.s32.totalorder %s5894_s11, %s5130_s27 }
 0x397   :  { %p3882_p3 = scmp.ne.s32.totalorder %s5894_s11, %s3881_s14  ;;  %p3887_p5 = scmp.lt.s32.totalorder %s5156_s20, %s3881_s14 }
 0x399   :  { %p3888_p9 = por %p3887_p5, %p3886_p4 }
 0x39b   :  { %p3889_p13 = pnand %p3888_p9, %p3882_p3 }
 0x39d   :  { %3892 = shalt.err (!%p3889_p13)  }
 0x39e   :  { %920 = dma.hbm_to_vmem [thread:$0]  %s908_s7, 16, %s5894_s11, [#allocation3 + $0x2] }
 0x39f   :  { %s767_s17 = scalar_select %p766_p10, %s5906_s10, 0 }
 0x3a0   :  { %s775_s0 = scalar_select %p774_p12, %s5908_s12, 0 }
 0x3a1   :  { %p6919_p8 = scmp.lt.s32.totalorder %s5906_s10, 63  ;;  %p6920_p11 = scmp.lt.s32.totalorder %s5908_s12, 63 }
 0x3a3   :  { %s7029_s17 = smov (!%p6919_p8, %s767_s17), 63  ;;  %s7031_s0 = smov (!%p6920_p11, %s775_s0), 63 }
 0x3a4   :  { %s2488_s9 = sshll.u32 %s7029_s17, 4  ;;  %s2489_s6 = sshll.u32 %s7031_s0, 4 }
 0x3a5   :  { %s922_s19 = scalar_lea.hbm %s6905_s3, %s2488_s9 }
 0x3a6   :  { %s3893_s22 = scalar_lea.hbm %s922_s19, 16  ;;  %p3896_p10 = scmp.lt.u32.totalorder %s922_s19, %s6905_s3 }
 0x3a7   :  { %p3894_p13 = scmp.ne.s32.totalorder %s922_s19, %s3893_s22  ;;  %p3897_p9 = scmp.lt.u32.totalorder %s5147_s16, %s3893_s22 }
 0x3a8   :  { %p3899_p7 = scmp.lt.u32.totalorder %s3893_s22, %s922_s19 }
 0x3a9   :  { %p3898_p12 = por %p3897_p9, %p3896_p10 }
 0x3ab   :  { %p3900_p0 = por %p3899_p7, %p3898_p12 }
 0x3ad   :  { %p3901_p1 = pnand %p3900_p0, %p3894_p13 }
 0x3af   :  { %3904 = shalt.err (!%p3901_p1)  }
 0x3b0   :  { %s3905_s10 = scalar_lea.vmem %s5912_s23, 16  ;;  %p3910_p2 = scmp.lt.s32.totalorder %s5912_s23, %s5130_s27 }
 0x3b1   :  { %p3906_p6 = scmp.ne.s32.totalorder %s5912_s23, %s3905_s10  ;;  %p3911_p3 = scmp.lt.s32.totalorder %s5156_s20, %s3905_s10 }
 0x3b3   :  { %p3912_p4 = por %p3911_p3, %p3910_p2 }
 0x3b5   :  { %p3913_p5 = pnand %p3912_p4, %p3906_p6 }
 0x3b7   :  { %3916 = shalt.err (!%p3913_p5)  }
 0x3b8   :  { %934 = dma.hbm_to_vmem [thread:$0]  %s922_s19, 16, %s5912_s23, [#allocation3 + $0x2] }
 0x3b9   :  { %s936_s25 = scalar_lea.hbm %s6905_s3, %s2489_s6  ;;  %p782_p8 = scmp.gt.s32.totalorder %s5917_s8, 0 }
 0x3ba   :  { %s3917_s5 = scalar_lea.hbm %s936_s25, 16  ;;  %p3920_p13 = scmp.lt.u32.totalorder %s936_s25, %s6905_s3 }
 0x3bb   :  { %p3918_p11 = scmp.ne.s32.totalorder %s936_s25, %s3917_s5  ;;  %p3921_p10 = scmp.lt.u32.totalorder %s5147_s16, %s3917_s5 }
 0x3bc   :  { %p3923_p12 = scmp.lt.u32.totalorder %s3917_s5, %s936_s25 }
 0x3bd   :  { %p3922_p9 = por %p3921_p10, %p3920_p13 }
 0x3bf   :  { %p3924_p7 = por %p3923_p12, %p3922_p9 }
 0x3c1   :  { %p3925_p0 = pnand %p3924_p7, %p3918_p11 }
 0x3c3   :  { %3928 = shalt.err (!%p3925_p0)  }
 0x3c4   :  { %s3929_s23 = scalar_lea.vmem %s5947_s24, 16  ;;  %p3934_p6 = scmp.lt.s32.totalorder %s5947_s24, %s5130_s27 }
 0x3c5   :  { %p3930_p1 = scmp.ne.s32.totalorder %s5947_s24, %s3929_s23  ;;  %p3935_p2 = scmp.lt.s32.totalorder %s5156_s20, %s3929_s23 }
 0x3c7   :  { %p3936_p3 = por %p3935_p2, %p3934_p6 }
 0x3c9   :  { %p3937_p4 = pnand %p3936_p3, %p3930_p1 }
 0x3cb   :  { %3940 = shalt.err (!%p3937_p4)  }
 0x3cc   :  { %948 = dma.hbm_to_vmem [thread:$0]  %s936_s25, 16, %s5947_s24, [#allocation3 + $0x2] }
 0x3cd   :  { %s783_s21 = scalar_select %p782_p8, %s5917_s8, 0 }
 0x3ce   :  { %p2430_p5 = scmp.lt.s32.totalorder %s5917_s8, 63  ;;  %s5065_s13 = smov [#allocation2 + $0x27]  }
 0x3cf   :  { %s959_s30 = sshll.u32 %s5065_s13, 4  ;;  %s5980_s14 = sld [smem:[#allocation5 + $0x28]]  ;;  %s960_s30 = int_to_ptr.vmem [resolvable:$true] %s959_s30 }
 0x3d0   :  { %s7033_s21 = smov (!%p2430_p5, %s783_s21), 63  ;;  %s5066_s0 = smov [#allocation2 + $0x28]  }
 0x3d1   :  { %s2490_s17 = sshll.u32 %s7033_s21, 4  ;;  %s973_s9 = sshll.u32 %s5066_s0, 4  ;;  %s5985_s9 = int_to_ptr.vmem [resolvable:$true] %s973_s9 }
 0x3d2   :  { %s950_s19 = scalar_lea.hbm %s6905_s3, %s2490_s17 }
 0x3d3   :  { %s3941_s24 = scalar_lea.hbm %s950_s19, 16  ;;  %p3944_p8 = scmp.lt.u32.totalorder %s950_s19, %s6905_s3 }
 0x3d4   :  { %p3942_p11 = scmp.ne.s32.totalorder %s950_s19, %s3941_s24  ;;  %p3945_p13 = scmp.lt.u32.totalorder %s5147_s16, %s3941_s24 }
 0x3d5   :  { %p3947_p9 = scmp.lt.u32.totalorder %s3941_s24, %s950_s19 }
 0x3d6   :  { %p3946_p10 = por %p3945_p13, %p3944_p8 }
 0x3d8   :  { %p3948_p12 = por %p3947_p9, %p3946_p10 }
 0x3da   :  { %p3949_p7 = pnand %p3948_p12, %p3942_p11 }
 0x3dc   :  { %3952 = shalt.err (!%p3949_p7)  }
 0x3dd   :  { %s3953_s8 = scalar_lea.vmem %s960_s30, 16  ;;  %p3958_p1 = scmp.lt.s32.totalorder %s960_s30, %s5130_s27 }
 0x3de   :  { %p3954_p0 = scmp.ne.s32.totalorder %s960_s30, %s3953_s8  ;;  %p3959_p6 = scmp.lt.s32.totalorder %s5156_s20, %s3953_s8 }
 0x3e0   :  { %p3960_p2 = por %p3959_p6, %p3958_p1 }
 0x3e2   :  { %p3961_p3 = pnand %p3960_p2, %p3954_p0 }
 0x3e4   :  { %3964 = shalt.err (!%p3961_p3)  }
 0x3e5   :  { %962 = dma.hbm_to_vmem [thread:$0]  %s950_s19, 16, %s960_s30, [#allocation3 + $0x2] }
 0x3e6   :  { %p790_p4 = scmp.gt.s32.totalorder %s5980_s14, 0  ;;  %p2436_p5 = scmp.lt.s32.totalorder %s5980_s14, 63 }
 0x3e7   :  { %s5995_s18 = sld [smem:[#allocation5 + $0x29]]  ;;  %s5067_s11 = smov [#allocation2 + $0x29]  }
 0x3e8   :  { %s7035_s14 = smov (!%p790_p4, %s5980_s14), 0  ;;  %s987_s10 = sshll.u32 %s5067_s11, 4  ;;  %s6000_s10 = int_to_ptr.vmem [resolvable:$true] %s987_s10 }
 0x3e9   :  { %s5998_s12 = sld [smem:[#allocation5 + $0x2a]]  ;;  %s7037_s14 = smov (!%p2436_p5, %s7035_s14), 63 }
 0x3ea   :  { %s2491_s15 = sshll.u32 %s7037_s14, 4  ;;  %s5068_s25 = smov [#allocation2 + $0x2a]  }
 0x3eb   :  { %s1001_s5 = sshll.u32 %s5068_s25, 4  ;;  %s964_s23 = scalar_lea.hbm %s6905_s3, %s2491_s15  ;;  %s6022_s5 = int_to_ptr.vmem [resolvable:$true] %s1001_s5 }
 0x3ec   :  { %s3965_s21 = scalar_lea.hbm %s964_s23, 16  ;;  %p3968_p13 = scmp.lt.u32.totalorder %s964_s23, %s6905_s3 }
 0x3ed   :  { %p798_p11 = scmp.gt.s32.totalorder %s5995_s18, 0  ;;  %p3966_p8 = scmp.ne.s32.totalorder %s964_s23, %s3965_s21 }
 0x3ee   :  { %p3969_p10 = scmp.lt.u32.totalorder %s5147_s16, %s3965_s21  ;;  %p3971_p12 = scmp.lt.u32.totalorder %s3965_s21, %s964_s23 }
 0x3f0   :  { %p3970_p9 = por %p3969_p10, %p3968_p13 }
 0x3f2   :  { %p3972_p7 = por %p3971_p12, %p3970_p9 }
 0x3f4   :  { %p3973_p0 = pnand %p3972_p7, %p3966_p8 }
 0x3f6   :  { %3976 = shalt.err (!%p3973_p0)  }
 0x3f7   :  { %s3977_s14 = scalar_lea.vmem %s5985_s9, 16  ;;  %p3982_p6 = scmp.lt.s32.totalorder %s5985_s9, %s5130_s27 }
 0x3f8   :  { %p3978_p1 = scmp.ne.s32.totalorder %s5985_s9, %s3977_s14  ;;  %p3983_p2 = scmp.lt.s32.totalorder %s5156_s20, %s3977_s14 }
 0x3fa   :  { %p3984_p3 = por %p3983_p2, %p3982_p6 }
 0x3fc   :  { %p3985_p4 = pnand %p3984_p3, %p3978_p1 }
 0x3fe   :  { %3988 = shalt.err (!%p3985_p4)  }
 0x3ff   :  { %976 = dma.hbm_to_vmem [thread:$0]  %s964_s23, 16, %s5985_s9, [#allocation3 + $0x2] }
 0x400   :  { %s799_s17 = scalar_select %p798_p11, %s5995_s18, 0 }
 0x401   :  { %p2442_p5 = scmp.lt.s32.totalorder %s5995_s18, 63  ;;  %p806_p8 = scmp.gt.s32.totalorder %s5998_s12, 0 }
 0x402   :  { %p2448_p13 = scmp.lt.s32.totalorder %s5998_s12, 63  ;;  %s6025_s26 = sld [smem:[#allocation5 + $0x2b]] }
 0x403   :  { %s7039_s17 = smov (!%p2442_p5, %s799_s17), 63 }
 0x404   :  { %s807_s0 = scalar_select %p806_p8, %s5998_s12, 0 }
 0x405   :  { %s2492_s29 = sshll.u32 %s7039_s17, 4 }
 0x406   :  { %s978_s6 = scalar_lea.hbm %s6905_s3, %s2492_s29 }
 0x407   :  { %s3989_s22 = scalar_lea.hbm %s978_s6, 16  ;;  %p3992_p11 = scmp.lt.u32.totalorder %s978_s6, %s6905_s3 }
 0x408   :  { %p3990_p10 = scmp.ne.s32.totalorder %s978_s6, %s3989_s22  ;;  %p3993_p9 = scmp.lt.u32.totalorder %s5147_s16, %s3989_s22 }
 0x409   :  { %p3995_p7 = scmp.lt.u32.totalorder %s3989_s22, %s978_s6 }
 0x40a   :  { %p3994_p12 = por %p3993_p9, %p3992_p11 }
 0x40c   :  { %p3996_p0 = por %p3995_p7, %p3994_p12 }
 0x40e   :  { %p3997_p1 = pnand %p3996_p0, %p3990_p10 }
 0x410   :  { %4000 = shalt.err (!%p3997_p1)  }
 0x411   :  { %s4001_s18 = scalar_lea.vmem %s6000_s10, 16  ;;  %p4006_p2 = scmp.lt.s32.totalorder %s6000_s10, %s5130_s27 }
 0x412   :  { %p4002_p6 = scmp.ne.s32.totalorder %s6000_s10, %s4001_s18  ;;  %p4007_p3 = scmp.lt.s32.totalorder %s5156_s20, %s4001_s18 }
 0x414   :  { %p4008_p4 = por %p4007_p3, %p4006_p2 }
 0x416   :  { %p4009_p5 = pnand %p4008_p4, %p4002_p6 }
 0x418   :  { %4012 = shalt.err (!%p4009_p5)  }
 0x419   :  { %990 = dma.hbm_to_vmem [thread:$0]  %s978_s6, 16, %s6000_s10, [#allocation3 + $0x2] }
 0x41a   :  { %s7041_s0 = smov (!%p2448_p13, %s807_s0), 63  ;;  %s5069_s11 = smov [#allocation2 + $0x2b]  }
 0x41b   :  { %s1015_s15 = sshll.u32 %s5069_s11, 4  ;;  %s6042_s25 = sld [smem:[#allocation5 + $0x2c]]  ;;  %s6044_s15 = int_to_ptr.vmem [resolvable:$true] %s1015_s15 }
 0x41c   :  { %s2493_s28 = sshll.u32 %s7041_s0, 4  ;;  %p814_p8 = scmp.gt.s32.totalorder %s6025_s26, 0 }
 0x41d   :  { %s992_s21 = scalar_lea.hbm %s6905_s3, %s2493_s28 }
 0x41e   :  { %s4013_s13 = scalar_lea.hbm %s992_s21, 16  ;;  %p4016_p11 = scmp.lt.u32.totalorder %s992_s21, %s6905_s3 }
 0x41f   :  { %p4014_p10 = scmp.ne.s32.totalorder %s992_s21, %s4013_s13  ;;  %p4017_p9 = scmp.lt.u32.totalorder %s5147_s16, %s4013_s13 }
 0x420   :  { %p4019_p12 = scmp.lt.u32.totalorder %s4013_s13, %s992_s21 }
 0x421   :  { %p4018_p13 = por %p4017_p9, %p4016_p11 }
 0x423   :  { %p4020_p7 = por %p4019_p12, %p4018_p13 }
 0x425   :  { %p4021_p0 = pnand %p4020_p7, %p4014_p10 }
 0x427   :  { %4024 = shalt.err (!%p4021_p0)  }
 0x428   :  { %s4025_s10 = scalar_lea.vmem %s6022_s5, 16  ;;  %p4030_p6 = scmp.lt.s32.totalorder %s6022_s5, %s5130_s27 }
 0x429   :  { %p4026_p1 = scmp.ne.s32.totalorder %s6022_s5, %s4025_s10  ;;  %p4031_p2 = scmp.lt.s32.totalorder %s5156_s20, %s4025_s10 }
 0x42b   :  { %p4032_p3 = por %p4031_p2, %p4030_p6 }
 0x42d   :  { %p4033_p4 = pnand %p4032_p3, %p4026_p1 }
 0x42f   :  { %4036 = shalt.err (!%p4033_p4)  }
 0x430   :  { %1004 = dma.hbm_to_vmem [thread:$0]  %s992_s21, 16, %s6022_s5, [#allocation3 + $0x2] }
 0x431   :  { %s815_s12 = scalar_select %p814_p8, %s6025_s26, 0 }
 0x432   :  { %p2454_p5 = scmp.lt.s32.totalorder %s6025_s26, 63  ;;  %p822_p10 = scmp.gt.s32.totalorder %s6042_s25, 0 }
 0x433   :  { %p2460_p11 = scmp.lt.s32.totalorder %s6042_s25, 63  ;;  %s5070_s29 = smov [#allocation2 + $0x2c]  }
 0x434   :  { %s7043_s12 = smov (!%p2454_p5, %s815_s12), 63  ;;  %s1029_s19 = sshll.u32 %s5070_s29, 4  ;;  %s6070_s19 = int_to_ptr.vmem [resolvable:$true] %s1029_s19 }
 0x435   :  { %s823_s17 = scalar_select %p822_p10, %s6042_s25, 0 }
 0x436   :  { %s2494_s0 = sshll.u32 %s7043_s12, 4 }
 0x437   :  { %s1006_s22 = scalar_lea.hbm %s6905_s3, %s2494_s0 }
 0x438   :  { %s4037_s8 = scalar_lea.hbm %s1006_s22, 16  ;;  %p4040_p8 = scmp.lt.u32.totalorder %s1006_s22, %s6905_s3 }
 0x439   :  { %p4038_p9 = scmp.ne.s32.totalorder %s1006_s22, %s4037_s8  ;;  %p4041_p13 = scmp.lt.u32.totalorder %s5147_s16, %s4037_s8 }
 0x43a   :  { %p4043_p7 = scmp.lt.u32.totalorder %s4037_s8, %s1006_s22 }
 0x43b   :  { %p4042_p12 = por %p4041_p13, %p4040_p8 }
 0x43d   :  { %p4044_p0 = por %p4043_p7, %p4042_p12 }
 0x43f   :  { %p4045_p1 = pnand %p4044_p0, %p4038_p9 }
 0x441   :  { %4048 = shalt.err (!%p4045_p1)  }
 0x442   :  { %s4049_s26 = scalar_lea.vmem %s6044_s15, 16  ;;  %p4054_p2 = scmp.lt.s32.totalorder %s6044_s15, %s5130_s27 }
 0x443   :  { %p4050_p6 = scmp.ne.s32.totalorder %s6044_s15, %s4049_s26  ;;  %p4055_p3 = scmp.lt.s32.totalorder %s5156_s20, %s4049_s26 }
 0x445   :  { %p4056_p4 = por %p4055_p3, %p4054_p2 }
 0x447   :  { %p4057_p5 = pnand %p4056_p4, %p4050_p6 }
 0x449   :  { %4060 = shalt.err (!%p4057_p5)  }
 0x44a   :  { %1018 = dma.hbm_to_vmem [thread:$0]  %s1006_s22, 16, %s6044_s15, [#allocation3 + $0x2] }
 0x44b   :  { %s7045_s17 = smov (!%p2460_p11, %s823_s17), 63  ;;  %s6084_s18 = sld [smem:[#allocation5 + $0x2d]] }
 0x44c   :  { %s2495_s11 = sshll.u32 %s7045_s17, 4  ;;  %s5071_s28 = smov [#allocation2 + $0x2d]  }
 0x44d   :  { %s1043_s7 = sshll.u32 %s5071_s28, 4  ;;  %s1020_s13 = scalar_lea.hbm %s6905_s3, %s2495_s11  ;;  %s6089_s7 = int_to_ptr.vmem [resolvable:$true] %s1043_s7 }
 0x44e   :  { %s4061_s30 = scalar_lea.hbm %s1020_s13, 16  ;;  %p4064_p9 = scmp.lt.u32.totalorder %s1020_s13, %s6905_s3 }
 0x44f   :  { %p4062_p10 = scmp.ne.s32.totalorder %s1020_s13, %s4061_s30  ;;  %p4065_p8 = scmp.lt.u32.totalorder %s5147_s16, %s4061_s30 }
 0x450   :  { %p4067_p11 = scmp.lt.u32.totalorder %s4061_s30, %s1020_s13 }
 0x451   :  { %p4066_p13 = por %p4065_p8, %p4064_p9 }
 0x453   :  { %p4068_p12 = por %p4067_p11, %p4066_p13 }
 0x455   :  { %p4069_p7 = pnand %p4068_p12, %p4062_p10 }
 0x457   :  { %4072 = shalt.err (!%p4069_p7)  }
 0x458   :  { %s4073_s15 = scalar_lea.vmem %s6070_s19, 16  ;;  %p4078_p1 = scmp.lt.s32.totalorder %s6070_s19, %s5130_s27 }
 0x459   :  { %p4074_p0 = scmp.ne.s32.totalorder %s6070_s19, %s4073_s15  ;;  %p4079_p6 = scmp.lt.s32.totalorder %s5156_s20, %s4073_s15 }
 0x45b   :  { %p4080_p2 = por %p4079_p6, %p4078_p1 }
 0x45d   :  { %p4081_p3 = pnand %p4080_p2, %p4074_p0 }
 0x45f   :  { %4084 = shalt.err (!%p4081_p3)  }
 0x460   :  { %1032 = dma.hbm_to_vmem [thread:$0]  %s1020_s13, 16, %s6070_s19, [#allocation3 + $0x2]  ;;  %v6120_v0 = vld [vmem:[%s6903_s1] ss:$0 sm:$0xff] }
 0x461   :  { %s6101_s25 = sld [smem:[#allocation5 + $0x2e]]  ;;  %s5072_s12 = smov [#allocation2 + $0x2e]   ;;  %v6125_v1 = vld [vmem:[%s6904_s2] ss:$0 sm:$0xff] }
 0x462   :  { %s1057_s17 = sshll.u32 %s5072_s12, 4  ;;  %s6103_s0 = sld [smem:[#allocation5 + $0x2f]]  ;;  %s6107_s17 = int_to_ptr.vmem [resolvable:$true] %s1057_s17 }
 0x463   :  { %p830_p4 = scmp.gt.s32.totalorder %s6084_s18, 0  ;;  %p2466_p5 = scmp.lt.s32.totalorder %s6084_s18, 63 }
 0x464   :  { %s5073_s29 = smov [#allocation2 + $0x2f]   ;;  %s6112_s19 = sld [smem:[#allocation5 + $0x30]] }
 0x465   :  { %s7047_s18 = smov (!%p830_p4, %s6084_s18), 0  ;;  %s6110_s24 = sshll.u32 %s5073_s29, 4  ;;  %s6152_s24 = int_to_ptr.vmem [resolvable:$true] %s6110_s24 }
 0x466   :  { %s7049_s18 = smov (!%p2466_p5, %s7047_s18), 63 }
 0x467   :  { %p838_p10 = scmp.gt.s32.totalorder %s6101_s25, 0  ;;  %s2496_s6 = sshll.u32 %s7049_s18, 4 }
 0x468   :  { %p846_p8 = scmp.gt.s32.totalorder %s6103_s0, 0  ;;  %s1034_s28 = scalar_lea.hbm %s6905_s3, %s2496_s6 }
 0x469   :  { %s4085_s23 = scalar_lea.hbm %s1034_s28, 16  ;;  %p4088_p12 = scmp.lt.u32.totalorder %s1034_s28, %s6905_s3 }
 0x46a   :  { %p4086_p11 = scmp.ne.s32.totalorder %s1034_s28, %s4085_s23  ;;  %p4089_p7 = scmp.lt.u32.totalorder %s5147_s16, %s4085_s23 }
 0x46b   :  { %p4091_p1 = scmp.lt.u32.totalorder %s4085_s23, %s1034_s28 }
 0x46c   :  { %p4090_p0 = por %p4089_p7, %p4088_p12 }
 0x46e   :  { %p4092_p6 = por %p4091_p1, %p4090_p0 }
 0x470   :  { %p4093_p2 = pnand %p4092_p6, %p4086_p11 }
 0x472   :  { %4096 = shalt.err (!%p4093_p2)  }
 0x473   :  { %s4097_s1 = scalar_lea.vmem %s6089_s7, 16  ;;  %p4102_p4 = scmp.lt.s32.totalorder %s6089_s7, %s5130_s27 }
 0x474   :  { %p4098_p3 = scmp.ne.s32.totalorder %s6089_s7, %s4097_s1  ;;  %p4103_p5 = scmp.lt.s32.totalorder %s5156_s20, %s4097_s1 }
 0x476   :  { %p4104_p13 = por %p4103_p5, %p4102_p4 }
 0x478   :  { %p4105_p9 = pnand %p4104_p13, %p4098_p3 }
 0x47a   :  { %4108 = shalt.err (!%p4105_p9)  }
 0x47b   :  { %1046 = dma.hbm_to_vmem [thread:$0]  %s1034_s28, 16, %s6089_s7, [#allocation3 + $0x2] }
 0x47c   :  { %s839_s2 = scalar_select %p838_p10, %s6101_s25, 0 }
 0x47d   :  { %s847_s13 = scalar_select %p846_p8, %s6103_s0, 0 }
 0x47e   :  { %p6921_p11 = scmp.lt.s32.totalorder %s6101_s25, 63  ;;  %p6922_p12 = scmp.lt.s32.totalorder %s6103_s0, 63 }
 0x480   :  { %s7051_s2 = smov (!%p6921_p11, %s839_s2), 63  ;;  %s7053_s13 = smov (!%p6922_p12, %s847_s13), 63 }
 0x481   :  { %s2497_s30 = sshll.u32 %s7051_s2, 4  ;;  %s2498_s12 = sshll.u32 %s7053_s13, 4 }
 0x482   :  { %s1048_s15 = scalar_lea.hbm %s6905_s3, %s2497_s30 }
 0x483   :  { %s4109_s29 = scalar_lea.hbm %s1048_s15, 16  ;;  %p4112_p10 = scmp.lt.u32.totalorder %s1048_s15, %s6905_s3 }
 0x484   :  { %p4110_p9 = scmp.ne.s32.totalorder %s1048_s15, %s4109_s29  ;;  %p4113_p13 = scmp.lt.u32.totalorder %s5147_s16, %s4109_s29 }
 0x485   :  { %p4115_p7 = scmp.lt.u32.totalorder %s4109_s29, %s1048_s15 }
 0x486   :  { %p4114_p8 = por %p4113_p13, %p4112_p10 }
 0x488   :  { %p4116_p0 = por %p4115_p7, %p4114_p8 }
 0x48a   :  { %p4117_p1 = pnand %p4116_p0, %p4110_p9 }
 0x48c   :  { %4120 = shalt.err (!%p4117_p1)  }
 0x48d   :  { %s4121_s25 = scalar_lea.vmem %s6107_s17, 16  ;;  %p4126_p2 = scmp.lt.s32.totalorder %s6107_s17, %s5130_s27 }
 0x48e   :  { %p4122_p6 = scmp.ne.s32.totalorder %s6107_s17, %s4121_s25  ;;  %p4127_p3 = scmp.lt.s32.totalorder %s5156_s20, %s4121_s25 }
 0x490   :  { %p4128_p4 = por %p4127_p3, %p4126_p2 }
 0x492   :  { %p4129_p5 = pnand %p4128_p4, %p4122_p6 }
 0x494   :  { %4132 = shalt.err (!%p4129_p5)  }
 0x495   :  { %1060 = dma.hbm_to_vmem [thread:$0]  %s1048_s15, 16, %s6107_s17, [#allocation3 + $0x2] }
 0x496   :  { %s1062_s8 = scalar_lea.hbm %s6905_s3, %s2498_s12  ;;  %p1079_p11 = scmp.gt.s32.totalorder %s6112_s19, 0 }
 0x497   :  { %s4133_s9 = scalar_lea.hbm %s1062_s8, 16  ;;  %p4136_p9 = scmp.lt.u32.totalorder %s1062_s8, %s6905_s3 }
 0x498   :  { %p4134_p12 = scmp.ne.s32.totalorder %s1062_s8, %s4133_s9  ;;  %p4137_p10 = scmp.lt.u32.totalorder %s5147_s16, %s4133_s9 }
 0x499   :  { %p4139_p8 = scmp.lt.u32.totalorder %s4133_s9, %s1062_s8 }
 0x49a   :  { %p4138_p13 = por %p4137_p10, %p4136_p9 }
 0x49c   :  { %p4140_p7 = por %p4139_p8, %p4138_p13 }
 0x49e   :  { %p4141_p0 = pnand %p4140_p7, %p4134_p12 }
 0x4a0   :  { %4144 = shalt.err (!%p4141_p0)  }
 0x4a1   :  { %s4145_s17 = scalar_lea.vmem %s6152_s24, 16  ;;  %p4150_p6 = scmp.lt.s32.totalorder %s6152_s24, %s5130_s27 }
 0x4a2   :  { %p4146_p1 = scmp.ne.s32.totalorder %s6152_s24, %s4145_s17  ;;  %p4151_p2 = scmp.lt.s32.totalorder %s5156_s20, %s4145_s17 }
 0x4a4   :  { %p4152_p3 = por %p4151_p2, %p4150_p6 }
 0x4a6   :  { %p4153_p4 = pnand %p4152_p3, %p4146_p1 }
 0x4a8   :  { %4156 = shalt.err (!%p4153_p4)  }
 0x4a9   :  { %1074 = dma.hbm_to_vmem [thread:$0]  %s1062_s8, 16, %s6152_s24, [#allocation3 + $0x2] }
 0x4aa   :  { %s1080_s11 = scalar_select %p1079_p11, %s6112_s19, 0 }
 0x4ab   :  { %p2500_p5 = scmp.lt.s32.totalorder %s6112_s19, 63  ;;  %s5074_s28 = smov [#allocation2 + $0x30]  }
 0x4ac   :  { %s1214_s23 = sshll.u32 %s5074_s28, 4  ;;  %s6185_s21 = sld [smem:[#allocation5 + $0x31]]  ;;  %s1215_s23 = int_to_ptr.vmem [resolvable:$true] %s1214_s23 }
 0x4ad   :  { %s7055_s11 = smov (!%p2500_p5, %s1080_s11), 63  ;;  %s5075_s1 = smov [#allocation2 + $0x31]  }
 0x4ae   :  { %s2595_s18 = sshll.u32 %s7055_s11, 4  ;;  %s1228_s2 = sshll.u32 %s5075_s1, 4  ;;  %s6190_s2 = int_to_ptr.vmem [resolvable:$true] %s1228_s2 }
 0x4af   :  { %s1204_s14 = scalar_lea.hbm %s6905_s3, %s2595_s18 }
 0x4b0   :  { %s4157_s24 = scalar_lea.hbm %s1204_s14, 16  ;;  %p4160_p11 = scmp.lt.u32.totalorder %s1204_s14, %s6905_s3 }
 0x4b1   :  { %p4158_p12 = scmp.ne.s32.totalorder %s1204_s14, %s4157_s24  ;;  %p4161_p9 = scmp.lt.u32.totalorder %s5147_s16, %s4157_s24 }
 0x4b2   :  { %p4163_p13 = scmp.lt.u32.totalorder %s4157_s24, %s1204_s14 }
 0x4b3   :  { %p4162_p10 = por %p4161_p9, %p4160_p11 }
 0x4b5   :  { %p4164_p8 = por %p4163_p13, %p4162_p10 }
 0x4b7   :  { %p4165_p7 = pnand %p4164_p8, %p4158_p12 }
 0x4b9   :  { %4168 = shalt.err (!%p4165_p7)  }
 0x4ba   :  { %s4169_s19 = scalar_lea.vmem %s1215_s23, 16  ;;  %p4174_p1 = scmp.lt.s32.totalorder %s1215_s23, %s5130_s27 }
 0x4bb   :  { %p4170_p0 = scmp.ne.s32.totalorder %s1215_s23, %s4169_s19  ;;  %p4175_p6 = scmp.lt.s32.totalorder %s5156_s20, %s4169_s19 }
 0x4bd   :  { %p4176_p2 = por %p4175_p6, %p4174_p1 }
 0x4bf   :  { %p4177_p3 = pnand %p4176_p2, %p4170_p0 }
 0x4c1   :  { %4180 = shalt.err (!%p4177_p3)  }
 0x4c2   :  { %1217 = dma.hbm_to_vmem [thread:$0]  %s1204_s14, 16, %s1215_s23, [#allocation3 + $0x3] }
 0x4c3   :  { %p1087_p4 = scmp.gt.s32.totalorder %s6185_s21, 0  ;;  %p2506_p5 = scmp.lt.s32.totalorder %s6185_s21, 63 }
 0x4c4   :  { %s6200_s12 = sld [smem:[#allocation5 + $0x32]]  ;;  %s5076_s29 = smov [#allocation2 + $0x32]  }
 0x4c5   :  { %s7057_s21 = smov (!%p1087_p4, %s6185_s21), 0  ;;  %s1242_s6 = sshll.u32 %s5076_s29, 4  ;;  %s6205_s6 = int_to_ptr.vmem [resolvable:$true] %s1242_s6 }
 0x4c6   :  { %s6203_s7 = sld [smem:[#allocation5 + $0x33]]  ;;  %s7059_s21 = smov (!%p2506_p5, %s7057_s21), 63 }
 0x4c7   :  { %s2596_s25 = sshll.u32 %s7059_s21, 4  ;;  %s5077_s0 = smov [#allocation2 + $0x33]  }
 0x4c8   :  { %s1256_s22 = sshll.u32 %s5077_s0, 4  ;;  %s1219_s5 = scalar_lea.hbm %s6905_s3, %s2596_s25  ;;  %s6227_s22 = int_to_ptr.vmem [resolvable:$true] %s1256_s22 }
 0x4c9   :  { %s4181_s26 = scalar_lea.hbm %s1219_s5, 16  ;;  %p4184_p9 = scmp.lt.u32.totalorder %s1219_s5, %s6905_s3 }
 0x4ca   :  { %p1095_p12 = scmp.gt.s32.totalorder %s6200_s12, 0  ;;  %p4182_p11 = scmp.ne.s32.totalorder %s1219_s5, %s4181_s26 }
 0x4cb   :  { %p4185_p10 = scmp.lt.u32.totalorder %s5147_s16, %s4181_s26  ;;  %p4187_p8 = scmp.lt.u32.totalorder %s4181_s26, %s1219_s5 }
 0x4cd   :  { %p4186_p13 = por %p4185_p10, %p4184_p9 }
 0x4cf   :  { %p4188_p7 = por %p4187_p8, %p4186_p13 }
 0x4d1   :  { %p4189_p0 = pnand %p4188_p7, %p4182_p11 }
 0x4d3   :  { %4192 = shalt.err (!%p4189_p0)  }
 0x4d4   :  { %s4193_s28 = scalar_lea.vmem %s6190_s2, 16  ;;  %p4198_p6 = scmp.lt.s32.totalorder %s6190_s2, %s5130_s27 }
 0x4d5   :  { %p4194_p1 = scmp.ne.s32.totalorder %s6190_s2, %s4193_s28  ;;  %p4199_p2 = scmp.lt.s32.totalorder %s5156_s20, %s4193_s28 }
 0x4d7   :  { %p4200_p3 = por %p4199_p2, %p4198_p6 }
 0x4d9   :  { %p4201_p4 = pnand %p4200_p3, %p4194_p1 }
 0x4db   :  { %4204 = shalt.err (!%p4201_p4)  }
 0x4dc   :  { %1231 = dma.hbm_to_vmem [thread:$0]  %s1219_s5, 16, %s6190_s2, [#allocation3 + $0x3] }
 0x4dd   :  { %s1096_s23 = scalar_select %p1095_p12, %s6200_s12, 0 }
 0x4de   :  { %p2512_p5 = scmp.lt.s32.totalorder %s6200_s12, 63  ;;  %p1103_p11 = scmp.gt.s32.totalorder %s6203_s7, 0 }
 0x4df   :  { %p2518_p9 = scmp.lt.s32.totalorder %s6203_s7, 63  ;;  %s6230_s1 = sld [smem:[#allocation5 + $0x34]] }
 0x4e0   :  { %s7061_s23 = smov (!%p2512_p5, %s1096_s23), 63 }
 0x4e1   :  { %s1104_s21 = scalar_select %p1103_p11, %s6203_s7, 0 }
 0x4e2   :  { %s2597_s18 = sshll.u32 %s7061_s23, 4 }
 0x4e3   :  { %s1233_s14 = scalar_lea.hbm %s6905_s3, %s2597_s18 }
 0x4e4   :  { %s4205_s24 = scalar_lea.hbm %s1233_s14, 16  ;;  %p4208_p12 = scmp.lt.u32.totalorder %s1233_s14, %s6905_s3 }
 0x4e5   :  { %p4206_p10 = scmp.ne.s32.totalorder %s1233_s14, %s4205_s24  ;;  %p4209_p13 = scmp.lt.u32.totalorder %s5147_s16, %s4205_s24 }
 0x4e6   :  { %p4211_p7 = scmp.lt.u32.totalorder %s4205_s24, %s1233_s14 }
 0x4e7   :  { %p4210_p8 = por %p4209_p13, %p4208_p12 }
 0x4e9   :  { %p4212_p0 = por %p4211_p7, %p4210_p8 }
 0x4eb   :  { %p4213_p1 = pnand %p4212_p0, %p4206_p10 }
 0x4ed   :  { %4216 = shalt.err (!%p4213_p1)  }
 0x4ee   :  { %s4217_s15 = scalar_lea.vmem %s6205_s6, 16  ;;  %p4222_p2 = scmp.lt.s32.totalorder %s6205_s6, %s5130_s27 }
 0x4ef   :  { %p4218_p6 = scmp.ne.s32.totalorder %s6205_s6, %s4217_s15  ;;  %p4223_p3 = scmp.lt.s32.totalorder %s5156_s20, %s4217_s15 }
 0x4f1   :  { %p4224_p4 = por %p4223_p3, %p4222_p2 }
 0x4f3   :  { %p4225_p5 = pnand %p4224_p4, %p4218_p6 }
 0x4f5   :  { %4228 = shalt.err (!%p4225_p5)  }
 0x4f6   :  { %1245 = dma.hbm_to_vmem [thread:$0]  %s1233_s14, 16, %s6205_s6, [#allocation3 + $0x3] }
 0x4f7   :  { %s7063_s21 = smov (!%p2518_p9, %s1104_s21), 63  ;;  %s5078_s19 = smov [#allocation2 + $0x34]  }
 0x4f8   :  { %s1270_s12 = sshll.u32 %s5078_s19, 4  ;;  %s6247_s29 = sld [smem:[#allocation5 + $0x35]]  ;;  %s6249_s12 = int_to_ptr.vmem [resolvable:$true] %s1270_s12 }
 0x4f9   :  { %s2598_s25 = sshll.u32 %s7063_s21, 4  ;;  %p1111_p11 = scmp.gt.s32.totalorder %s6230_s1, 0 }
 0x4fa   :  { %s1247_s9 = scalar_lea.hbm %s6905_s3, %s2598_s25 }
 0x4fb   :  { %s4229_s5 = scalar_lea.hbm %s1247_s9, 16  ;;  %p4232_p12 = scmp.lt.u32.totalorder %s1247_s9, %s6905_s3 }
 0x4fc   :  { %p4230_p10 = scmp.ne.s32.totalorder %s1247_s9, %s4229_s5  ;;  %p4233_p13 = scmp.lt.u32.totalorder %s5147_s16, %s4229_s5 }
 0x4fd   :  { %p4235_p8 = scmp.lt.u32.totalorder %s4229_s5, %s1247_s9 }
 0x4fe   :  { %p4234_p9 = por %p4233_p13, %p4232_p12 }
 0x500   :  { %p4236_p7 = por %p4235_p8, %p4234_p9 }
 0x502   :  { %p4237_p0 = pnand %p4236_p7, %p4230_p10 }
 0x504   :  { %4240 = shalt.err (!%p4237_p0)  }
 0x505   :  { %s4241_s6 = scalar_lea.vmem %s6227_s22, 16  ;;  %p4246_p6 = scmp.lt.s32.totalorder %s6227_s22, %s5130_s27 }
 0x506   :  { %p4242_p1 = scmp.ne.s32.totalorder %s6227_s22, %s4241_s6  ;;  %p4247_p2 = scmp.lt.s32.totalorder %s5156_s20, %s4241_s6 }
 0x508   :  { %p4248_p3 = por %p4247_p2, %p4246_p6 }
 0x50a   :  { %p4249_p4 = pnand %p4248_p3, %p4242_p1 }
 0x50c   :  { %4252 = shalt.err (!%p4249_p4)  }
 0x50d   :  { %1259 = dma.hbm_to_vmem [thread:$0]  %s1247_s9, 16, %s6227_s22, [#allocation3 + $0x3] }
 0x50e   :  { %s1112_s7 = scalar_select %p1111_p11, %s6230_s1, 0 }
 0x50f   :  { %p2524_p5 = scmp.lt.s32.totalorder %s6230_s1, 63  ;;  %p1119_p10 = scmp.gt.s32.totalorder %s6247_s29, 0 }
 0x510   :  { %p2530_p12 = scmp.lt.s32.totalorder %s6247_s29, 63  ;;  %s5079_s23 = smov [#allocation2 + $0x35]  }
 0x511   :  { %s7065_s7 = smov (!%p2524_p5, %s1112_s7), 63  ;;  %s1284_s21 = sshll.u32 %s5079_s23, 4  ;;  %s6275_s21 = int_to_ptr.vmem [resolvable:$true] %s1284_s21 }
 0x512   :  { %s1120_s11 = scalar_select %p1119_p10, %s6247_s29, 0 }
 0x513   :  { %s2599_s28 = sshll.u32 %s7065_s7, 4 }
 0x514   :  { %s1261_s30 = scalar_lea.hbm %s6905_s3, %s2599_s28 }
 0x515   :  { %s4253_s14 = scalar_lea.hbm %s1261_s30, 16  ;;  %p4256_p11 = scmp.lt.u32.totalorder %s1261_s30, %s6905_s3 }
 0x516   :  { %p4254_p13 = scmp.ne.s32.totalorder %s1261_s30, %s4253_s14  ;;  %p4257_p9 = scmp.lt.u32.totalorder %s5147_s16, %s4253_s14 }
 0x517   :  { %p4259_p7 = scmp.lt.u32.totalorder %s4253_s14, %s1261_s30 }
 0x518   :  { %p4258_p8 = por %p4257_p9, %p4256_p11 }
 0x51a   :  { %p4260_p0 = por %p4259_p7, %p4258_p8 }
 0x51c   :  { %p4261_p1 = pnand %p4260_p0, %p4254_p13 }
 0x51e   :  { %4264 = shalt.err (!%p4261_p1)  }
 0x51f   :  { %s4265_s1 = scalar_lea.vmem %s6249_s12, 16  ;;  %p4270_p2 = scmp.lt.s32.totalorder %s6249_s12, %s5130_s27 }
 0x520   :  { %p4266_p6 = scmp.ne.s32.totalorder %s6249_s12, %s4265_s1  ;;  %p4271_p3 = scmp.lt.s32.totalorder %s5156_s20, %s4265_s1 }
 0x522   :  { %p4272_p4 = por %p4271_p3, %p4270_p2 }
 0x524   :  { %p4273_p5 = pnand %p4272_p4, %p4266_p6 }
 0x526   :  { %4276 = shalt.err (!%p4273_p5)  }
 0x527   :  { %1273 = dma.hbm_to_vmem [thread:$0]  %s1261_s30, 16, %s6249_s12, [#allocation3 + $0x3] }
 0x528   :  { %s7067_s11 = smov (!%p2530_p12, %s1120_s11), 63  ;;  %s6289_s10 = sld [smem:[#allocation5 + $0x36]] }
 0x529   :  { %s2600_s2 = sshll.u32 %s7067_s11, 4  ;;  %s5080_s15 = smov [#allocation2 + $0x36]  }
 0x52a   :  { %s1298_s19 = sshll.u32 %s5080_s15, 4  ;;  %s1275_s8 = scalar_lea.hbm %s6905_s3, %s2600_s2  ;;  %s6294_s19 = int_to_ptr.vmem [resolvable:$true] %s1298_s19 }
 0x52b   :  { %s4277_s9 = scalar_lea.hbm %s1275_s8, 16  ;;  %p4280_p13 = scmp.lt.u32.totalorder %s1275_s8, %s6905_s3 }
 0x52c   :  { %p4278_p10 = scmp.ne.s32.totalorder %s1275_s8, %s4277_s9  ;;  %p4281_p11 = scmp.lt.u32.totalorder %s5147_s16, %s4277_s9 }
 0x52d   :  { %p4283_p12 = scmp.lt.u32.totalorder %s4277_s9, %s1275_s8 }
 0x52e   :  { %p4282_p9 = por %p4281_p11, %p4280_p13 }
 0x530   :  { %p4284_p8 = por %p4283_p12, %p4282_p9 }
 0x532   :  { %p4285_p7 = pnand %p4284_p8, %p4278_p10 }
 0x534   :  { %4288 = shalt.err (!%p4285_p7)  }
 0x535   :  { %s4289_s12 = scalar_lea.vmem %s6275_s21, 16  ;;  %p4294_p1 = scmp.lt.s32.totalorder %s6275_s21, %s5130_s27 }
 0x536   :  { %p4290_p0 = scmp.ne.s32.totalorder %s6275_s21, %s4289_s12  ;;  %p4295_p6 = scmp.lt.s32.totalorder %s5156_s20, %s4289_s12 }
 0x538   :  { %p4296_p2 = por %p4295_p6, %p4294_p1 }
 0x53a   :  { %p4297_p3 = pnand %p4296_p2, %p4290_p0 }
 0x53c   :  { %4300 = shalt.err (!%p4297_p3)  }
 0x53d   :  { %1287 = dma.hbm_to_vmem [thread:$0]  %s1275_s8, 16, %s6275_s21, [#allocation3 + $0x3] }
 0x53e   :  { %s6306_s29 = sld [smem:[#allocation5 + $0x37]]  ;;  %s5081_s17 = smov [#allocation2 + $0x37]  }
 0x53f   :  { %s1312_s6 = sshll.u32 %s5081_s17, 4  ;;  %s6308_s7 = sld [smem:[#allocation5 + $0x38]]  ;;  %s6312_s6 = int_to_ptr.vmem [resolvable:$true] %s1312_s6 }
 0x540   :  { %p1127_p4 = scmp.gt.s32.totalorder %s6289_s10, 0  ;;  %p2536_p5 = scmp.lt.s32.totalorder %s6289_s10, 63 }
 0x541   :  { %s5082_s11 = smov [#allocation2 + $0x38]   ;;  %s6317_s23 = sld [smem:[#allocation5 + $0x39]] }
 0x542   :  { %s7069_s10 = smov (!%p1127_p4, %s6289_s10), 0  ;;  %s6315_s28 = sshll.u32 %s5082_s11, 4  ;;  %s6347_s28 = int_to_ptr.vmem [resolvable:$true] %s6315_s28 }
 0x543   :  { %s7071_s10 = smov (!%p2536_p5, %s7069_s10), 63 }
 0x544   :  { %p1135_p10 = scmp.gt.s32.totalorder %s6306_s29, 0  ;;  %s2601_s21 = sshll.u32 %s7071_s10, 4 }
 0x545   :  { %p1143_p11 = scmp.gt.s32.totalorder %s6308_s7, 0  ;;  %s1289_s30 = scalar_lea.hbm %s6905_s3, %s2601_s21 }
 0x546   :  { %s4301_s14 = scalar_lea.hbm %s1289_s30, 16  ;;  %p4304_p8 = scmp.lt.u32.totalorder %s1289_s30, %s6905_s3 }
 0x547   :  { %p4302_p12 = scmp.ne.s32.totalorder %s1289_s30, %s4301_s14  ;;  %p4305_p7 = scmp.lt.u32.totalorder %s5147_s16, %s4301_s14 }
 0x548   :  { %p4307_p1 = scmp.lt.u32.totalorder %s4301_s14, %s1289_s30 }
 0x549   :  { %p4306_p0 = por %p4305_p7, %p4304_p8 }
 0x54b   :  { %p4308_p6 = por %p4307_p1, %p4306_p0 }
 0x54d   :  { %p4309_p2 = pnand %p4308_p6, %p4302_p12 }
 0x54f   :  { %4312 = shalt.err (!%p4309_p2)  }
 0x550   :  { %s4313_s1 = scalar_lea.vmem %s6294_s19, 16  ;;  %p4318_p4 = scmp.lt.s32.totalorder %s6294_s19, %s5130_s27 }
 0x551   :  { %p4314_p3 = scmp.ne.s32.totalorder %s6294_s19, %s4313_s1  ;;  %p4319_p5 = scmp.lt.s32.totalorder %s5156_s20, %s4313_s1 }
 0x553   :  { %p4320_p9 = por %p4319_p5, %p4318_p4 }
 0x555   :  { %p4321_p13 = pnand %p4320_p9, %p4314_p3 }
 0x557   :  { %4324 = shalt.err (!%p4321_p13)  }
 0x558   :  { %1301 = dma.hbm_to_vmem [thread:$0]  %s1289_s30, 16, %s6294_s19, [#allocation3 + $0x3] }
 0x559   :  { %s1136_s10 = scalar_select %p1135_p10, %s6306_s29, 0 }
 0x55a   :  { %s1144_s2 = scalar_select %p1143_p11, %s6308_s7, 0 }
 0x55b   :  { %p6923_p12 = scmp.lt.s32.totalorder %s6306_s29, 63  ;;  %p6924_p8 = scmp.lt.s32.totalorder %s6308_s7, 63 }
 0x55d   :  { %s7073_s10 = smov (!%p6923_p12, %s1136_s10), 63  ;;  %s7075_s2 = smov (!%p6924_p8, %s1144_s2), 63 }
 0x55e   :  { %s2602_s15 = sshll.u32 %s7073_s10, 4  ;;  %s2603_s9 = sshll.u32 %s7075_s2, 4 }
 0x55f   :  { %s1303_s8 = scalar_lea.hbm %s6905_s3, %s2602_s15 }
 0x560   :  { %s4325_s5 = scalar_lea.hbm %s1303_s8, 16  ;;  %p4328_p10 = scmp.lt.u32.totalorder %s1303_s8, %s6905_s3 }
 0x561   :  { %p4326_p13 = scmp.ne.s32.totalorder %s1303_s8, %s4325_s5  ;;  %p4329_p9 = scmp.lt.u32.totalorder %s5147_s16, %s4325_s5 }
 0x562   :  { %p4331_p7 = scmp.lt.u32.totalorder %s4325_s5, %s1303_s8 }
 0x563   :  { %p4330_p11 = por %p4329_p9, %p4328_p10 }
 0x565   :  { %p4332_p0 = por %p4331_p7, %p4330_p11 }
 0x567   :  { %p4333_p1 = pnand %p4332_p0, %p4326_p13 }
 0x569   :  { %4336 = shalt.err (!%p4333_p1)  }
 0x56a   :  { %s4337_s12 = scalar_lea.vmem %s6312_s6, 16  ;;  %p4342_p2 = scmp.lt.s32.totalorder %s6312_s6, %s5130_s27 }
 0x56b   :  { %p4338_p6 = scmp.ne.s32.totalorder %s6312_s6, %s4337_s12  ;;  %p4343_p3 = scmp.lt.s32.totalorder %s5156_s20, %s4337_s12 }
 0x56d   :  { %p4344_p4 = por %p4343_p3, %p4342_p2 }
 0x56f   :  { %p4345_p5 = pnand %p4344_p4, %p4338_p6 }
 0x571   :  { %4348 = shalt.err (!%p4345_p5)  }
 0x572   :  { %1315 = dma.hbm_to_vmem [thread:$0]  %s1303_s8, 16, %s6312_s6, [#allocation3 + $0x3] }
 0x573   :  { %s1317_s7 = scalar_lea.hbm %s6905_s3, %s2603_s9  ;;  %p1151_p12 = scmp.gt.s32.totalorder %s6317_s23, 0 }
 0x574   :  { %s4349_s11 = scalar_lea.hbm %s1317_s7, 16  ;;  %p4352_p13 = scmp.lt.u32.totalorder %s1317_s7, %s6905_s3 }
 0x575   :  { %p4350_p8 = scmp.ne.s32.totalorder %s1317_s7, %s4349_s11  ;;  %p4353_p10 = scmp.lt.u32.totalorder %s5147_s16, %s4349_s11 }
 0x576   :  { %p4355_p11 = scmp.lt.u32.totalorder %s4349_s11, %s1317_s7 }
 0x577   :  { %p4354_p9 = por %p4353_p10, %p4352_p13 }
 0x579   :  { %p4356_p7 = por %p4355_p11, %p4354_p9 }
 0x57b   :  { %p4357_p0 = pnand %p4356_p7, %p4350_p8 }
 0x57d   :  { %4360 = shalt.err (!%p4357_p0)  }
 0x57e   :  { %s4361_s6 = scalar_lea.vmem %s6347_s28, 16  ;;  %p4366_p6 = scmp.lt.s32.totalorder %s6347_s28, %s5130_s27 }
 0x57f   :  { %p4362_p1 = scmp.ne.s32.totalorder %s6347_s28, %s4361_s6  ;;  %p4367_p2 = scmp.lt.s32.totalorder %s5156_s20, %s4361_s6 }
 0x581   :  { %p4368_p3 = por %p4367_p2, %p4366_p6 }
 0x583   :  { %p4369_p4 = pnand %p4368_p3, %p4362_p1 }
 0x585   :  { %4372 = shalt.err (!%p4369_p4)  }
 0x586   :  { %1329 = dma.hbm_to_vmem [thread:$0]  %s1317_s7, 16, %s6347_s28, [#allocation3 + $0x3] }
 0x587   :  { %s1152_s13 = scalar_select %p1151_p12, %s6317_s23, 0 }
 0x588   :  { %p2554_p5 = scmp.lt.s32.totalorder %s6317_s23, 63  ;;  %s5083_s30 = smov [#allocation2 + $0x39]  }
 0x589   :  { %s1340_s14 = sshll.u32 %s5083_s30, 4  ;;  %s6380_s24 = sld [smem:[#allocation5 + $0x3a]]  ;;  %s1341_s14 = int_to_ptr.vmem [resolvable:$true] %s1340_s14 }
 0x58a   :  { %s7077_s13 = smov (!%p2554_p5, %s1152_s13), 63  ;;  %s5084_s1 = smov [#allocation2 + $0x3a]  }
 0x58b   :  { %s2604_s22 = sshll.u32 %s7077_s13, 4  ;;  %s1354_s10 = sshll.u32 %s5084_s1, 4  ;;  %s6385_s10 = int_to_ptr.vmem [resolvable:$true] %s1354_s10 }
 0x58c   :  { %s1331_s25 = scalar_lea.hbm %s6905_s3, %s2604_s22 }
 0x58d   :  { %s4373_s28 = scalar_lea.hbm %s1331_s25, 16  ;;  %p4376_p12 = scmp.lt.u32.totalorder %s1331_s25, %s6905_s3 }
 0x58e   :  { %p4374_p8 = scmp.ne.s32.totalorder %s1331_s25, %s4373_s28  ;;  %p4377_p13 = scmp.lt.u32.totalorder %s5147_s16, %s4373_s28 }
 0x58f   :  { %p4379_p9 = scmp.lt.u32.totalorder %s4373_s28, %s1331_s25 }
 0x590   :  { %p4378_p10 = por %p4377_p13, %p4376_p12 }
 0x592   :  { %p4380_p11 = por %p4379_p9, %p4378_p10 }
 0x594   :  { %p4381_p7 = pnand %p4380_p11, %p4374_p8 }
 0x596   :  { %4384 = shalt.err (!%p4381_p7)  }
 0x597   :  { %s4385_s23 = scalar_lea.vmem %s1341_s14, 16  ;;  %p4390_p1 = scmp.lt.s32.totalorder %s1341_s14, %s5130_s27 }
 0x598   :  { %p4386_p0 = scmp.ne.s32.totalorder %s1341_s14, %s4385_s23  ;;  %p4391_p6 = scmp.lt.s32.totalorder %s5156_s20, %s4385_s23 }
 0x59a   :  { %p4392_p2 = por %p4391_p6, %p4390_p1 }
 0x59c   :  { %p4393_p3 = pnand %p4392_p2, %p4386_p0 }
 0x59e   :  { %4396 = shalt.err (!%p4393_p3)  }
 0x59f   :  { %1343 = dma.hbm_to_vmem [thread:$0]  %s1331_s25, 16, %s1341_s14, [#allocation3 + $0x3] }
 0x5a0   :  { %p1159_p4 = scmp.gt.s32.totalorder %s6380_s24, 0  ;;  %p2560_p5 = scmp.lt.s32.totalorder %s6380_s24, 63 }
 0x5a1   :  { %s6395_s9 = sld [smem:[#allocation5 + $0x3b]]  ;;  %s5085_s5 = smov [#allocation2 + $0x3b]  }
 0x5a2   :  { %s7079_s24 = smov (!%p1159_p4, %s6380_s24), 0  ;;  %s1368_s26 = sshll.u32 %s5085_s5, 4  ;;  %s6400_s26 = int_to_ptr.vmem [resolvable:$true] %s1368_s26 }
 0x5a3   :  { %s6398_s19 = sld [smem:[#allocation5 + $0x3c]]  ;;  %s7081_s24 = smov (!%p2560_p5, %s7079_s24), 63 }
 0x5a4   :  { %s2605_s12 = sshll.u32 %s7081_s24, 4  ;;  %s5086_s29 = smov [#allocation2 + $0x3c]  }
 0x5a5   :  { %s1382_s17 = sshll.u32 %s5086_s29, 4  ;;  %s1345_s21 = scalar_lea.hbm %s6905_s3, %s2605_s12  ;;  %s6422_s17 = int_to_ptr.vmem [resolvable:$true] %s1382_s17 }
 0x5a6   :  { %s4397_s18 = scalar_lea.hbm %s1345_s21, 16  ;;  %p4400_p13 = scmp.lt.u32.totalorder %s1345_s21, %s6905_s3 }
 0x5a7   :  { %p1167_p8 = scmp.gt.s32.totalorder %s6395_s9, 0  ;;  %p4398_p12 = scmp.ne.s32.totalorder %s1345_s21, %s4397_s18 }
 0x5a8   :  { %p4401_p10 = scmp.lt.u32.totalorder %s5147_s16, %s4397_s18  ;;  %p4403_p11 = scmp.lt.u32.totalorder %s4397_s18, %s1345_s21 }
 0x5aa   :  { %p4402_p9 = por %p4401_p10, %p4400_p13 }
 0x5ac   :  { %p4404_p7 = por %p4403_p11, %p4402_p9 }
 0x5ae   :  { %p4405_p0 = pnand %p4404_p7, %p4398_p12 }
 0x5b0   :  { %4408 = shalt.err (!%p4405_p0)  }
 0x5b1   :  { %s4409_s30 = scalar_lea.vmem %s6385_s10, 16  ;;  %p4414_p6 = scmp.lt.s32.totalorder %s6385_s10, %s5130_s27 }
 0x5b2   :  { %p4410_p1 = scmp.ne.s32.totalorder %s6385_s10, %s4409_s30  ;;  %p4415_p2 = scmp.lt.s32.totalorder %s5156_s20, %s4409_s30 }
 0x5b4   :  { %p4416_p3 = por %p4415_p2, %p4414_p6 }
 0x5b6   :  { %p4417_p4 = pnand %p4416_p3, %p4410_p1 }
 0x5b8   :  { %4420 = shalt.err (!%p4417_p4)  }
 0x5b9   :  { %1357 = dma.hbm_to_vmem [thread:$0]  %s1345_s21, 16, %s6385_s10, [#allocation3 + $0x3] }
 0x5ba   :  { %s1168_s14 = scalar_select %p1167_p8, %s6395_s9, 0 }
 0x5bb   :  { %p2566_p5 = scmp.lt.s32.totalorder %s6395_s9, 63  ;;  %p1175_p12 = scmp.gt.s32.totalorder %s6398_s19, 0 }
 0x5bc   :  { %p2572_p13 = scmp.lt.s32.totalorder %s6398_s19, 63  ;;  %s6425_s1 = sld [smem:[#allocation5 + $0x3d]] }
 0x5bd   :  { %s7083_s14 = smov (!%p2566_p5, %s1168_s14), 63 }
 0x5be   :  { %s1176_s24 = scalar_select %p1175_p12, %s6398_s19, 0 }
 0x5bf   :  { %s2606_s22 = sshll.u32 %s7083_s14, 4 }
 0x5c0   :  { %s1359_s25 = scalar_lea.hbm %s6905_s3, %s2606_s22 }
 0x5c1   :  { %s4421_s28 = scalar_lea.hbm %s1359_s25, 16  ;;  %p4424_p8 = scmp.lt.u32.totalorder %s1359_s25, %s6905_s3 }
 0x5c2   :  { %p4422_p10 = scmp.ne.s32.totalorder %s1359_s25, %s4421_s28  ;;  %p4425_p9 = scmp.lt.u32.totalorder %s5147_s16, %s4421_s28 }
 0x5c3   :  { %p4427_p7 = scmp.lt.u32.totalorder %s4421_s28, %s1359_s25 }
 0x5c4   :  { %p4426_p11 = por %p4425_p9, %p4424_p8 }
 0x5c6   :  { %p4428_p0 = por %p4427_p7, %p4426_p11 }
 0x5c8   :  { %p4429_p1 = pnand %p4428_p0, %p4422_p10 }
 0x5ca   :  { %4432 = shalt.err (!%p4429_p1)  }
 0x5cb   :  { %s4433_s8 = scalar_lea.vmem %s6400_s26, 16  ;;  %p4438_p2 = scmp.lt.s32.totalorder %s6400_s26, %s5130_s27 }
 0x5cc   :  { %p4434_p6 = scmp.ne.s32.totalorder %s6400_s26, %s4433_s8  ;;  %p4439_p3 = scmp.lt.s32.totalorder %s5156_s20, %s4433_s8 }
 0x5ce   :  { %p4440_p4 = por %p4439_p3, %p4438_p2 }
 0x5d0   :  { %p4441_p5 = pnand %p4440_p4, %p4434_p6 }
 0x5d2   :  { %4444 = shalt.err (!%p4441_p5)  }
 0x5d3   :  { %1371 = dma.hbm_to_vmem [thread:$0]  %s1359_s25, 16, %s6400_s26, [#allocation3 + $0x3] }
 0x5d4   :  { %s7085_s24 = smov (!%p2572_p13, %s1176_s24), 63  ;;  %s5087_s23 = smov [#allocation2 + $0x3d]  }
 0x5d5   :  { %s1396_s9 = sshll.u32 %s5087_s23, 4  ;;  %s6442_s5 = sld [smem:[#allocation5 + $0x3e]]  ;;  %s6444_s9 = int_to_ptr.vmem [resolvable:$true] %s1396_s9 }
 0x5d6   :  { %s2607_s12 = sshll.u32 %s7085_s24, 4  ;;  %p1183_p12 = scmp.gt.s32.totalorder %s6425_s1, 0 }
 0x5d7   :  { %s1373_s11 = scalar_lea.hbm %s6905_s3, %s2607_s12 }
 0x5d8   :  { %s4445_s21 = scalar_lea.hbm %s1373_s11, 16  ;;  %p4448_p8 = scmp.lt.u32.totalorder %s1373_s11, %s6905_s3 }
 0x5d9   :  { %p4446_p10 = scmp.ne.s32.totalorder %s1373_s11, %s4445_s21  ;;  %p4449_p9 = scmp.lt.u32.totalorder %s5147_s16, %s4445_s21 }
 0x5da   :  { %p4451_p11 = scmp.lt.u32.totalorder %s4445_s21, %s1373_s11 }
 0x5db   :  { %p4450_p13 = por %p4449_p9, %p4448_p8 }
 0x5dd   :  { %p4452_p7 = por %p4451_p11, %p4450_p13 }
 0x5df   :  { %p4453_p0 = pnand %p4452_p7, %p4446_p10 }
 0x5e1   :  { %4456 = shalt.err (!%p4453_p0)  }
 0x5e2   :  { %s4457_s26 = scalar_lea.vmem %s6422_s17, 16  ;;  %p4462_p6 = scmp.lt.s32.totalorder %s6422_s17, %s5130_s27 }
 0x5e3   :  { %p4458_p1 = scmp.ne.s32.totalorder %s6422_s17, %s4457_s26  ;;  %p4463_p2 = scmp.lt.s32.totalorder %s5156_s20, %s4457_s26 }
 0x5e5   :  { %p4464_p3 = por %p4463_p2, %p4462_p6 }
 0x5e7   :  { %p4465_p4 = pnand %p4464_p3, %p4458_p1 }
 0x5e9   :  { %4468 = shalt.err (!%p4465_p4)  }
 0x5ea   :  { %1385 = dma.hbm_to_vmem [thread:$0]  %s1373_s11, 16, %s6422_s17, [#allocation3 + $0x3] }
 0x5eb   :  { %s1184_s19 = scalar_select %p1183_p12, %s6425_s1, 0 }
 0x5ec   :  { %p2578_p5 = scmp.lt.s32.totalorder %s6425_s1, 63  ;;  %p1191_p10 = scmp.gt.s32.totalorder %s6442_s5, 0 }
 0x5ed   :  { %p2584_p8 = scmp.lt.s32.totalorder %s6442_s5, 63  ;;  %s5088_s2 = smov [#allocation2 + $0x3e]  }
 0x5ee   :  { %s7087_s19 = smov (!%p2578_p5, %s1184_s19), 63  ;;  %s1410_s15 = sshll.u32 %s5088_s2, 4  ;;  %s1411_s15 = int_to_ptr.vmem [resolvable:$true] %s1410_s15 }
 0x5ef   :  { %s1192_s13 = scalar_select %p1191_p10, %s6442_s5, 0 }
 0x5f0   :  { %s2608_s30 = sshll.u32 %s7087_s19, 4 }
 0x5f1   :  { %s1387_s22 = scalar_lea.hbm %s6905_s3, %s2608_s30 }
 0x5f2   :  { %s4469_s25 = scalar_lea.hbm %s1387_s22, 16  ;;  %p4472_p13 = scmp.lt.u32.totalorder %s1387_s22, %s6905_s3 }
 0x5f3   :  { %p4470_p9 = scmp.ne.s32.totalorder %s1387_s22, %s4469_s25  ;;  %p4473_p11 = scmp.lt.u32.totalorder %s5147_s16, %s4469_s25 }
 0x5f4   :  { %p4475_p7 = scmp.lt.u32.totalorder %s4469_s25, %s1387_s22 }
 0x5f5   :  { %p4474_p12 = por %p4473_p11, %p4472_p13 }
 0x5f7   :  { %p4476_p0 = por %p4475_p7, %p4474_p12 }
 0x5f9   :  { %p4477_p1 = pnand %p4476_p0, %p4470_p9 }
 0x5fb   :  { %4480 = shalt.err (!%p4477_p1)  }
 0x5fc   :  { %s4481_s17 = scalar_lea.vmem %s6444_s9, 16  ;;  %p4486_p2 = scmp.lt.s32.totalorder %s6444_s9, %s5130_s27 }
 0x5fd   :  { %p4482_p6 = scmp.ne.s32.totalorder %s6444_s9, %s4481_s17  ;;  %p4487_p3 = scmp.lt.s32.totalorder %s5156_s20, %s4481_s17 }
 0x5ff   :  { %p4488_p4 = por %p4487_p3, %p4486_p2 }
 0x601   :  { %p4489_p5 = pnand %p4488_p4, %p4482_p6 }
 0x603   :  { %4492 = shalt.err (!%p4489_p5)  }
 0x604   :  { %1399 = dma.hbm_to_vmem [thread:$0]  %s1387_s22, 16, %s6444_s9, [#allocation3 + $0x3] }
 0x605   :  { %s7089_s13 = smov (!%p2584_p8, %s1192_s13), 63  ;;  %s2589_s1 = sld [smem:[#allocation5 + $0x3f]] }
 0x606   :  { %s2609_s10 = sshll.u32 %s7089_s13, 4 }
 0x607   :  { %s1401_s12 = scalar_lea.hbm %s6905_s3, %s2609_s10 }
 0x608   :  { %s4493_s29 = scalar_lea.hbm %s1401_s12, 16  ;;  %p4496_p9 = scmp.lt.u32.totalorder %s1401_s12, %s6905_s3 }
 0x609   :  { %p4494_p10 = scmp.ne.s32.totalorder %s1401_s12, %s4493_s29  ;;  %p4497_p13 = scmp.lt.u32.totalorder %s5147_s16, %s4493_s29 }
 0x60a   :  { %p4499_p12 = scmp.lt.u32.totalorder %s4493_s29, %s1401_s12 }
 0x60b   :  { %p4498_p11 = por %p4497_p13, %p4496_p9 }
 0x60d   :  { %p4500_p7 = por %p4499_p12, %p4498_p11 }
 0x60f   :  { %p4501_p0 = pnand %p4500_p7, %p4494_p10 }
 0x611   :  { %4504 = shalt.err (!%p4501_p0)  }
 0x612   :  { %s4505_s9 = scalar_lea.vmem %s1411_s15, 16  ;;  %p4510_p1 = scmp.lt.s32.totalorder %s1411_s15, %s5130_s27 }
 0x613   :  { %p4506_p8 = scmp.ne.s32.totalorder %s1411_s15, %s4505_s9  ;;  %p4511_p6 = scmp.lt.s32.totalorder %s5156_s20, %s4505_s9 }
 0x615   :  { %p4512_p2 = por %p4511_p6, %p4510_p1 }
 0x617   :  { %p4513_p3 = pnand %p4512_p2, %p4506_p8 }
 0x619   :  { %4516 = shalt.err (!%p4513_p3)  }
 0x61a   :  { %1413 = dma.hbm_to_vmem [thread:$0]  %s1401_s12, 16, %s1411_s15, [#allocation3 + $0x3] }
 0x61b   :  { %p1199_p4 = scmp.gt.s32.totalorder %s2589_s1, 0  ;;  %p2590_p5 = scmp.lt.s32.totalorder %s2589_s1, 63 }
 0x61c   :  { %s5089_s5 = smov [#allocation2 + $0x3f]  }
 0x61d   :  { %s1424_s21 = sshll.u32 %s5089_s5, 4  ;;  %s7091_s1 = smov (!%p1199_p4, %s2589_s1), 0  ;;  %s1425_s21 = int_to_ptr.vmem [resolvable:$true] %s1424_s21 }
 0x61e   :  { %s7093_s1 = smov (!%p2590_p5, %s7091_s1), 63 }
 0x61f   :  { %s2610_s18 = sshll.u32 %s7093_s1, 4 }
 0x620   :  { %s1415_s19 = scalar_lea.hbm %s6905_s3, %s2610_s18 }
 0x621   :  { %s4517_s13 = scalar_lea.hbm %s1415_s19, 16  ;;  %p4520_p9 = scmp.lt.u32.totalorder %s1415_s19, %s6905_s3 }
 0x622   :  { %p4518_p10 = scmp.ne.s32.totalorder %s1415_s19, %s4517_s13  ;;  %p4521_p13 = scmp.lt.u32.totalorder %s5147_s16, %s4517_s13 }
 0x623   :  { %p4523_p12 = scmp.lt.u32.totalorder %s4517_s13, %s1415_s19 }
 0x624   :  { %p4522_p11 = por %p4521_p13, %p4520_p9 }
 0x626   :  { %p4524_p7 = por %p4523_p12, %p4522_p11 }
 0x628   :  { %p4525_p0 = pnand %p4524_p7, %p4518_p10 }
 0x62a   :  { %4528 = shalt.err (!%p4525_p0)  }
 0x62b   :  { %s4529_s24 = scalar_lea.vmem %s1425_s21, 16  ;;  %p4534_p1 = scmp.lt.s32.totalorder %s1425_s21, %s5130_s27 }
 0x62c   :  { %p4530_p8 = scmp.ne.s32.totalorder %s1425_s21, %s4529_s24  ;;  %p4535_p6 = scmp.lt.s32.totalorder %s5156_s20, %s4529_s24 }
 0x62e   :  { %p4536_p2 = por %p4535_p6, %p4534_p1 }
 0x630   :  { %p4537_p3 = pnand %p4536_p2, %p4530_p8 }
 0x632   :  { %4540 = shalt.err (!%p4537_p3)  }
 0x633   :  { %1427 = dma.hbm_to_vmem [thread:$0]  %s1415_s19, 16, %s1425_s21, [#allocation3 + $0x3] }
 0x634   :  { %s6500_s22 = smov 0  }
 0x635 LB: > { %6925 = sst [smem:[#allocation173_spill]] %s5023_s22  ;;  %p1436_p4 = scmp.lt.s32.totalorder %s5023_s22, 0  ;;  %s5023_s22 = sphi %s6500_s22, %s1435_s22  }
 0x636   : > { %s1437_s2 = ssub.s32 0, %s5023_s22  ;;  %s1448_s25 = sadd.s32 4, %s5023_s22 }
 0x637   : > { %s2611_s15 = smin.u32 %s5023_s22, %s1437_s2  ;;  %s6907_s0 = sshll.u32 %s5023_s22, 4 }
 0x638   : > { %s1439_s28 = sand.u32 3, %s2611_s15   ;;  %s6512_s1 = sadd.s32 64, %s6907_s0 }
 0x639   : > { %s1440_s17 = ssub.s32 0, %s1439_s28  ;;  %p1451_p5 = scmp.lt.s32.totalorder %s6512_s1, 511 }
 0x63a   : > { %s7095_s17 = smov (!%p1436_p4, %s1440_s17), %s1439_s28  ;;  %s1458_s10 = sadd.s32 1, %s6512_s1 }
 0x63b   : > { %p2613_p10 = scmp.lt.s32.totalorder %s7095_s17, 0  ;;  %s1446_s8 = sadd.s32 4, %s7095_s17 }
 0x63c   : > { %s1452_s23 = scalar_select %p1451_p5, %s6512_s1, 511 }
 0x63d   : > { %s7097_s8 = smov (!%p2613_p10, %s1446_s8), %s7095_s17  ;;  %p1459_p9 = scmp.lt.s32.totalorder %s1458_s10, 511 }
 0x63e   : > { %s1453_s12 = sld [smem:[#allocation5 + %s1452_s23]]  ;;  %s1466_s29 = sadd.s32 2, %s6512_s1 }
 0x63f   : > { %s1474_s7 = sadd.s32 3, %s6512_s1  ;;  %s7099_s10 = smov (!%p1459_p9, %s1458_s10), 511 }
 0x640   : > { %p1467_p13 = scmp.lt.s32.totalorder %s1466_s29, 511  ;;  %p1475_p11 = scmp.lt.s32.totalorder %s1474_s7, 511 }
 0x641   : > { %s1461_s11 = sld [smem:[#allocation5 + %s7099_s10]]  ;;  %s1482_s9 = sadd.s32 4, %s6512_s1 }
 0x642   : > { %s7101_s29 = smov (!%p1467_p13, %s1466_s29), 511  ;;  %p1483_p0 = scmp.lt.s32.totalorder %s1482_s9, 511 }
 0x643   : > { %s1469_s5 = sld [smem:[#allocation5 + %s7101_s29]]  ;;  %s7105_s7 = smov (!%p1475_p11, %s1474_s7), 511 }
 0x644   : > { %p1454_p12 = scmp.gt.s32.totalorder %s1453_s12, 0  ;;  %p2615_p7 = scmp.lt.s32.totalorder %s1453_s12, 63 }
 0x645   : > { %s1477_s21 = sld [smem:[#allocation5 + %s7105_s7]]  ;;  %s1490_s18 = sadd.s32 5, %s6512_s1 }
 0x646   : > { %s7103_s12 = smov (!%p1454_p12, %s1453_s12), 0  ;;  %s7115_s9 = smov (!%p1483_p0, %s1482_s9), 511 }
 0x647   : > { %s7107_s12 = smov (!%p2615_p7, %s7103_s12), 63  ;;  %p1462_p8 = scmp.gt.s32.totalorder %s1461_s11, 0 }
 0x648   : > { %p2620_p1 = scmp.lt.s32.totalorder %s1461_s11, 63  ;;  %s1485_s6 = sld [smem:[#allocation5 + %s7115_s9]] }
 0x649   : > { %s7109_s11 = smov (!%p1462_p8, %s1461_s11), 0  ;;  %p1470_p6 = scmp.gt.s32.totalorder %s1469_s5, 0 }
 0x64a   : > { %p2625_p2 = scmp.lt.s32.totalorder %s1469_s5, 63  ;;  %s7111_s11 = smov (!%p2620_p1, %s7109_s11), 63 }
 0x64b   : > { %s7113_s5 = smov (!%p1470_p6, %s1469_s5), 0  ;;  %p1478_p3 = scmp.gt.s32.totalorder %s1477_s21, 0 }
 0x64c   : > { %s7117_s5 = smov (!%p2625_p2, %s7113_s5), 63  ;;  %p2630_p4 = scmp.lt.s32.totalorder %s1477_s21, 63 }
 0x64d   : > { %p1491_p5 = scmp.lt.s32.totalorder %s1490_s18, 511  ;;  %s7119_s21 = smov (!%p1478_p3, %s1477_s21), 0 }
 0x64e   : > { %s7123_s21 = smov (!%p2630_p4, %s7119_s21), 63  ;;  %s1498_s19 = sadd.s32 6, %s6512_s1 }
 0x64f   : > { %s7121_s18 = smov (!%p1491_p5, %s1490_s18), 511  ;;  %p1499_p10 = scmp.lt.s32.totalorder %s1498_s19, 511 }
 0x650   : > { %s1493_s26 = sld [smem:[#allocation5 + %s7121_s18]]  ;;  %s1506_s13 = sadd.s32 7, %s6512_s1 }
 0x651   : > { %p1486_p9 = scmp.gt.s32.totalorder %s1485_s6, 0  ;;  %p2635_p13 = scmp.lt.s32.totalorder %s1485_s6, 63 }
 0x652   : > { %s7125_s19 = smov (!%p1499_p10, %s1498_s19), 511  ;;  %p1507_p11 = scmp.lt.s32.totalorder %s1506_s13, 511 }
 0x653   : > { %s7127_s6 = smov (!%p1486_p9, %s1485_s6), 0  ;;  %s1501_s30 = sld [smem:[#allocation5 + %s7125_s19]] }
 0x654   : > { %s7129_s6 = smov (!%p2635_p13, %s7127_s6), 63  ;;  %s7131_s13 = smov (!%p1507_p11, %s1506_s13), 511 }
 0x655   : > { %s1509_s14 = sld [smem:[#allocation5 + %s7131_s13]]  ;;  %s1514_s24 = sadd.s32 8, %s6512_s1 }
 0x656   : > { %p1494_p12 = scmp.gt.s32.totalorder %s1493_s26, 0  ;;  %p2640_p7 = scmp.lt.s32.totalorder %s1493_s26, 63 }
 0x657   : > { %p1515_p1 = scmp.lt.s32.totalorder %s1514_s24, 511  ;;  %s1522_s2 = sadd.s32 9, %s6512_s1 }
 0x658   : > { %s7133_s26 = smov (!%p1494_p12, %s1493_s26), 0  ;;  %p1523_p3 = scmp.lt.s32.totalorder %s1522_s2, 511 }
 0x659   : > { %s7135_s26 = smov (!%p2640_p7, %s7133_s26), 63  ;;  %p1502_p0 = scmp.gt.s32.totalorder %s1501_s30, 0 }
 0x65a   : > { %p2645_p8 = scmp.lt.s32.totalorder %s1501_s30, 63  ;;  %s7139_s24 = smov (!%p1515_p1, %s1514_s24), 511 }
 0x65b   : > { %s7137_s30 = smov (!%p1502_p0, %s1501_s30), 0  ;;  %p1510_p6 = scmp.gt.s32.totalorder %s1509_s14, 0 }
 0x65c   : > { %s7141_s30 = smov (!%p2645_p8, %s7137_s30), 63  ;;  %p2650_p2 = scmp.lt.s32.totalorder %s1509_s14, 63 }
 0x65d   : > { %s1517_s15 = sld [smem:[#allocation5 + %s7139_s24]]  ;;  %s7143_s14 = smov (!%p1510_p6, %s1509_s14), 0 }
 0x65e   : > { %s7145_s2 = smov (!%p1523_p3, %s1522_s2), 511  ;;  %s7147_s14 = smov (!%p2650_p2, %s7143_s14), 63 }
 0x65f   : > { %s1525_s28 = sld [smem:[#allocation5 + %s7145_s2]]  ;;  %s1530_s17 = sadd.s32 10, %s6512_s1 }
 0x660   : > { %p1531_p4 = scmp.lt.s32.totalorder %s1530_s17, 511  ;;  %s1538_s10 = sadd.s32 11, %s6512_s1 }
 0x661   : > { %p1539_p9 = scmp.lt.s32.totalorder %s1538_s10, 511  ;;  %s1546_s7 = sadd.s32 12, %s6512_s1 }
 0x662   : > { %s7149_s17 = smov (!%p1531_p4, %s1530_s17), 511  ;;  %p1547_p0 = scmp.lt.s32.totalorder %s1546_s7, 511 }
 0x663   : > { %p1518_p5 = scmp.gt.s32.totalorder %s1517_s15, 0  ;;  %p2655_p10 = scmp.lt.s32.totalorder %s1517_s15, 63 }
 0x664   : > { %s1533_s23 = sld [smem:[#allocation5 + %s7149_s17]]  ;;  %s7155_s10 = smov (!%p1539_p9, %s1538_s10), 511 }
 0x665   : > { %s7151_s15 = smov (!%p1518_p5, %s1517_s15), 0  ;;  %p1526_p13 = scmp.gt.s32.totalorder %s1525_s28, 0 }
 0x666   : > { %s7153_s15 = smov (!%p2655_p10, %s7151_s15), 63  ;;  %p2660_p11 = scmp.lt.s32.totalorder %s1525_s28, 63 }
 0x667   : > { %s7157_s28 = smov (!%p1526_p13, %s1525_s28), 0  ;;  %s1541_s29 = sld [smem:[#allocation5 + %s7155_s10]] }
 0x668   : > { %s7159_s28 = smov (!%p2660_p11, %s7157_s28), 63  ;;  %s1554_s9 = sadd.s32 13, %s6512_s1 }
 0x669   : > { %s7163_s7 = smov (!%p1547_p0, %s1546_s7), 511  ;;  %p1555_p6 = scmp.lt.s32.totalorder %s1554_s9, 511 }
 0x66a   : > { %p1534_p12 = scmp.gt.s32.totalorder %s1533_s23, 0  ;;  %p2665_p7 = scmp.lt.s32.totalorder %s1533_s23, 63 }
 0x66b   : > { %s1549_s18 = sld [smem:[#allocation5 + %s7163_s7]]  ;;  %s7169_s9 = smov (!%p1555_p6, %s1554_s9), 511 }
 0x66c   : > { %s7161_s23 = smov (!%p1534_p12, %s1533_s23), 0  ;;  %s1557_s19 = sld [smem:[#allocation5 + %s7169_s9]] }
 0x66d   : > { %s7165_s23 = smov (!%p2665_p7, %s7161_s23), 63  ;;  %p1542_p8 = scmp.gt.s32.totalorder %s1541_s29, 0 }
 0x66e   : > { %p2670_p1 = scmp.lt.s32.totalorder %s1541_s29, 63  ;;  %s1562_s13 = sadd.s32 14, %s6512_s1 }
 0x66f   : > { %s7167_s29 = smov (!%p1542_p8, %s1541_s29), 0  ;;  %p1563_p2 = scmp.lt.s32.totalorder %s1562_s13, 511 }
 0x670   : > { %s7171_s29 = smov (!%p2670_p1, %s7167_s29), 63  ;;  %s1570_s24 = sadd.s32 15, %s6512_s1 }
 0x671   : > { %p1550_p3 = scmp.gt.s32.totalorder %s1549_s18, 0  ;;  %p2675_p4 = scmp.lt.s32.totalorder %s1549_s18, 63 }
 0x672   : > { %s7173_s13 = smov (!%p1563_p2, %s1562_s13), 511  ;;  %p1571_p5 = scmp.lt.s32.totalorder %s1570_s24, 511 }
 0x673   : > { %s7175_s18 = smov (!%p1550_p3, %s1549_s18), 0  ;;  %s1565_s2 = sld [smem:[#allocation5 + %s7173_s13]] }
 0x674   : > { %s7177_s18 = smov (!%p2675_p4, %s7175_s18), 63  ;;  %p1558_p10 = scmp.gt.s32.totalorder %s1557_s19, 0 }
 0x675   : > { %p2680_p9 = scmp.lt.s32.totalorder %s1557_s19, 63  ;;  %s7179_s24 = smov (!%p1571_p5, %s1570_s24), 511 }
 0x676   : > { %s7181_s19 = smov (!%p1558_p10, %s1557_s19), 0  ;;  %s1573_s17 = sld [smem:[#allocation5 + %s7179_s24]] }
 0x677   : > { %s2695_s10 = sshll.u32 %s7097_s8, 4  ;;  %s7183_s19 = smov (!%p2680_p9, %s7181_s19), 63 }
 0x678   : > { %s6566_s1 = scalar_lea.vmem [#allocation2], %s2695_s10  ;;  %s6569_s7 = scalar_lea.sflag [#allocation3], %s7097_s8 }
 0x679   : > { %p1566_p13 = scmp.gt.s32.totalorder %s1565_s2, 0  ;;  %p2685_p11 = scmp.lt.s32.totalorder %s1565_s2, 63 }
 0x67b   : > { %s7185_s2 = smov (!%p1566_p13, %s1565_s2), 0 }
 0x67c   : > { %s7187_s2 = smov (!%p2685_p11, %s7185_s2), 63  ;;  %p1574_p12 = scmp.gt.s32.totalorder %s1573_s17, 0 }
 0x67d   : > { %6926 = sst [smem:[#allocation174_spill]] %s7187_s2  ;;  %p2690_p7 = scmp.lt.s32.totalorder %s1573_s17, 63 }
 0x67e   : > { %s7189_s17 = smov (!%p1574_p12, %s1573_s17), 0 }
 0x67f   : > { %s7191_s17 = smov (!%p2690_p7, %s7189_s17), 63 }
 0x680   : > { %6927 = sst [smem:[#allocation175_spill]] %s7191_s17 }
 0x681   : > { %5017 = dma.done.wait %s6569_s7, 256 }
 0x682   : > { %5018 = vsyncadd %s6569_s7, 4294967040  ;;  %v6574_v2 = vld [vmem:[%s6566_s1] sm:$0xff]  ;;  %v6577_v3 = vld [vmem:[%s6566_s1 + $0x8] sm:$0xff]  ;;  %p6587_p0 = scmp.lt.s32.totalorder %s1448_s25, 32  ;;  %s2715_s9 = sshll.u32 %s7107_s12, 4 }
 0x683   : > { %1646 = vadd.xlane.f32.xlu0 %v6574_v2  ;;  %v1650_v4 = vmul.f32 %v6574_v2, %v6574_v2  ;;  %v1651_v5 = vmul.f32 %v6577_v3, %v6577_v3  ;;  %s1699_s10 = scalar_lea.hbm %s6905_s3, %s2715_s9  ;;  %s1707_s0 = sshll.u32 %s6566_s1, 4  ;;  %s1708_s0 = int_to_ptr.vmem [resolvable:$true] %s1707_s0 }
 0x684   : > { %s2082_s4 = scalar_lea.vmem %s6566_s1, 1 [#allocation2]  ;;  %s4541_s17 = scalar_lea.hbm %s1699_s10, 16 }
 0x685   : > { %1652 = vadd.xlane.f32.xlu1 %v1650_v4  ;;  %p4542_p8 = scmp.ne.s32.totalorder %s1699_s10, %s4541_s17  ;;  %p4546_p2 = scmp.lt.u32.totalorder %s1699_s10, %s6905_s3 }
 0x686   : > { %p4547_p3 = scmp.lt.u32.totalorder %s5147_s16, %s4541_s17  ;;  %p4549_p5 = scmp.lt.u32.totalorder %s4541_s17, %s1699_s10 }
 0x687   : > { %1648 = vadd.xlane.f32.xlu0 %v6577_v3  ;;  %p4543_p1 = pnand %p4542_p8, %p6587_p0 }
 0x688   : > { %p4548_p4 = por %p4547_p3, %p4546_p2 }
 0x689   : > { %1654 = vadd.xlane.f32.xlu1 %v1651_v5  ;;  %p4544_p6 = pneg %p4543_p1 }
 0x68a   : > { %p4550_p10 = por %p4549_p5, %p4548_p4 }
 0x68c   : > { %p4551_p9 = pnand %p4550_p10, %p4544_p6 }
 0x68e   : > { %4554 = shalt.err (!%p4551_p9)  }
 0x68f   : > { %s4555_s25 = scalar_lea.vmem %s1708_s0, 16  ;;  %p4562_p7 = scmp.lt.s32.totalorder %s1708_s0, %s5130_s27 }
 0x690   : > { %p4556_p13 = scmp.ne.s32.totalorder %s1708_s0, %s4555_s25  ;;  %p4563_p8 = scmp.lt.s32.totalorder %s5156_s20, %s4555_s25 }
 0x692   : > { %p4557_p11 = pnand %p4556_p13, %p6587_p0  ;;  %p4564_p1 = por %p4563_p8, %p4562_p7 }
 0x694   : > { %p4558_p12 = pneg %p4557_p11 }
 0x696   : > { %p4565_p2 = pnand %p4564_p1, %p4558_p12 }
 0x698   : > { %4568 = shalt.err (!%p4565_p2)  }
 0x699   : > { %2898 = dma.hbm_to_vmem [thread:$0]  (%p6587_p0), %s1699_s10, 16, %s1708_s0, %s6569_s7 }
 0x69a   : > { %s2716_s22 = sshll.u32 %s7111_s11, 4  ;;  %s1720_s12 = sshll.u32 %s2082_s4, 4  ;;  %s1721_s12 = int_to_ptr.vmem [resolvable:$true] %s1720_s12 }
 0x69b   : > { %s1712_s9 = scalar_lea.hbm %s6905_s3, %s2716_s22 }
 0x69c   : > { %s4569_s13 = scalar_lea.hbm %s1712_s9, 16  ;;  %p4574_p5 = scmp.lt.u32.totalorder %s1712_s9, %s6905_s3 }
 0x69d   : > { %p4570_p6 = scmp.ne.s32.totalorder %s1712_s9, %s4569_s13  ;;  %p4575_p10 = scmp.lt.u32.totalorder %s5147_s16, %s4569_s13 }
 0x69e   : > { %p4577_p13 = scmp.lt.u32.totalorder %s4569_s13, %s1712_s9 }
 0x69f   : > { %p4571_p3 = pnand %p4570_p6, %p6587_p0  ;;  %p4576_p9 = por %p4575_p10, %p4574_p5 }
 0x6a1   : > { %p4572_p4 = pneg %p4571_p3  ;;  %p4578_p11 = por %p4577_p13, %p4576_p9 }
 0x6a3   : > { %p4579_p12 = pnand %p4578_p11, %p4572_p4 }
 0x6a5   : > { %4582 = shalt.err (!%p4579_p12)  }
 0x6a6   : > { %s4583_s4 = scalar_lea.vmem %s1721_s12, 16  ;;  %p4590_p2 = scmp.lt.s32.totalorder %s1721_s12, %s5130_s27 }
 0x6a7   : > { %p4584_p7 = scmp.ne.s32.totalorder %s1721_s12, %s4583_s4  ;;  %p4591_p6 = scmp.lt.s32.totalorder %s5156_s20, %s4583_s4 }
 0x6a9   : > { %p4585_p8 = pnand %p4584_p7, %p6587_p0  ;;  %p4592_p3 = por %p4591_p6, %p4590_p2 }
 0x6ab   : > { %p4586_p1 = pneg %p4585_p8 }
 0x6ad   : > { %p4593_p5 = pnand %p4592_p3, %p4586_p1 }
 0x6af   : > { %4596 = shalt.err (!%p4593_p5)  }
 0x6b0   : > { %2899 = dma.hbm_to_vmem [thread:$0]  (%p6587_p0), %s1712_s9, 16, %s1721_s12, %s6569_s7 }
 0x6b1   : > { %s2085_s0 = scalar_lea.vmem %s6566_s1, 2 [#allocation2]  ;;  %s2717_s11 = sshll.u32 %s7117_s5, 4 }
 0x6b2   : > { %s1725_s2 = scalar_lea.hbm %s6905_s3, %s2717_s11  ;;  %s1733_s17 = sshll.u32 %s2085_s0, 4  ;;  %s1734_s17 = int_to_ptr.vmem [resolvable:$true] %s1733_s17 }
 0x6b3   : > { %s2088_s13 = scalar_lea.vmem %s6566_s1, 3 [#allocation2]  ;;  %s4597_s24 = scalar_lea.hbm %s1725_s2, 16 }
 0x6b4   : > { %p4598_p4 = scmp.ne.s32.totalorder %s1725_s2, %s4597_s24  ;;  %p4602_p13 = scmp.lt.u32.totalorder %s1725_s2, %s6905_s3 }
 0x6b5   : > { %p4603_p11 = scmp.lt.u32.totalorder %s5147_s16, %s4597_s24  ;;  %p4605_p7 = scmp.lt.u32.totalorder %s4597_s24, %s1725_s2 }
 0x6b6   : > { %p4599_p10 = pnand %p4598_p4, %p6587_p0 }
 0x6b7   : > { %p4604_p12 = por %p4603_p11, %p4602_p13 }
 0x6b8   : > { %p4600_p9 = pneg %p4599_p10 }
 0x6b9   : > { %p4606_p8 = por %p4605_p7, %p4604_p12 }
 0x6bb   : > { %p4607_p1 = pnand %p4606_p8, %p4600_p9 }
 0x6bd   : > { %4610 = shalt.err (!%p4607_p1)  }
 0x6be   : > { %s4611_s5 = scalar_lea.vmem %s1734_s17, 16  ;;  %p4618_p5 = scmp.lt.s32.totalorder %s1734_s17, %s5130_s27 }
 0x6bf   : > { %p4612_p2 = scmp.ne.s32.totalorder %s1734_s17, %s4611_s5  ;;  %p4619_p4 = scmp.lt.s32.totalorder %s5156_s20, %s4611_s5 }
 0x6c1   : > { %p4613_p6 = pnand %p4612_p2, %p6587_p0  ;;  %p4620_p10 = por %p4619_p4, %p4618_p5 }
 0x6c3   : > { %p4614_p3 = pneg %p4613_p6 }
 0x6c5   : > { %p4621_p11 = pnand %p4620_p10, %p4614_p3 }
 0x6c7   : > { %4624 = shalt.err (!%p4621_p11)  }
 0x6c8   : > { %2900 = dma.hbm_to_vmem [thread:$0]  (%p6587_p0), %s1725_s2, 16, %s1734_s17, %s6569_s7 }
 0x6c9   : > { %s2718_s12 = sshll.u32 %s7123_s21, 4  ;;  %s1746_s9 = sshll.u32 %s2088_s13, 4  ;;  %s1747_s9 = int_to_ptr.vmem [resolvable:$true] %s1746_s9 }
 0x6ca   : > { %s1738_s10 = scalar_lea.hbm %s6905_s3, %s2718_s12 }
 0x6cb   : > { %s4625_s22 = scalar_lea.hbm %s1738_s10, 16  ;;  %p4630_p7 = scmp.lt.u32.totalorder %s1738_s10, %s6905_s3 }
 0x6cc   : > { %p4626_p9 = scmp.ne.s32.totalorder %s1738_s10, %s4625_s22  ;;  %p4631_p8 = scmp.lt.u32.totalorder %s5147_s16, %s4625_s22 }
 0x6cd   : > { %p4633_p2 = scmp.lt.u32.totalorder %s4625_s22, %s1738_s10 }
 0x6ce   : > { %p4627_p13 = pnand %p4626_p9, %p6587_p0  ;;  %p4632_p1 = por %p4631_p8, %p4630_p7 }
 0x6d0   : > { %p4628_p12 = pneg %p4627_p13  ;;  %p4634_p6 = por %p4633_p2, %p4632_p1 }
 0x6d2   : > { %p4635_p3 = pnand %p4634_p6, %p4628_p12 }
 0x6d4   : > { %4638 = shalt.err (!%p4635_p3)  }
 0x6d5   : > { %s4639_s21 = scalar_lea.vmem %s1747_s9, 16  ;;  %p4646_p11 = scmp.lt.s32.totalorder %s1747_s9, %s5130_s27 }
 0x6d6   : > { %p4640_p5 = scmp.ne.s32.totalorder %s1747_s9, %s4639_s21  ;;  %p4647_p9 = scmp.lt.s32.totalorder %s5156_s20, %s4639_s21 }
 0x6d8   : > { %p4641_p4 = pnand %p4640_p5, %p6587_p0  ;;  %p4648_p13 = por %p4647_p9, %p4646_p11 }
 0x6da   : > { %p4642_p10 = pneg %p4641_p4 }
 0x6dc   : > { %p4649_p7 = pnand %p4648_p13, %p4642_p10 }
 0x6de   : > { %4652 = shalt.err (!%p4649_p7)  }
 0x6df   : > { %2901 = dma.hbm_to_vmem [thread:$0]  (%p6587_p0), %s1738_s10, 16, %s1747_s9, %s6569_s7 }
 0x6e0   : > { %s2091_s2 = scalar_lea.vmem %s6566_s1, 4 [#allocation2]  ;;  %s2719_s17 = sshll.u32 %s7129_s6, 4 }
 0x6e1   : > { %s1751_s5 = scalar_lea.hbm %s6905_s3, %s2719_s17  ;;  %s1759_s12 = sshll.u32 %s2091_s2, 4  ;;  %s1760_s12 = int_to_ptr.vmem [resolvable:$true] %s1759_s12 }
 0x6e2   : > { %s2094_s0 = scalar_lea.vmem %s6566_s1, 5 [#allocation2]  ;;  %s4653_s11 = scalar_lea.hbm %s1751_s5, 16 }
 0x6e3   : > { %p4654_p12 = scmp.ne.s32.totalorder %s1751_s5, %s4653_s11  ;;  %p4658_p2 = scmp.lt.u32.totalorder %s1751_s5, %s6905_s3 }
 0x6e4   : > { %p4659_p6 = scmp.lt.u32.totalorder %s5147_s16, %s4653_s11  ;;  %p4661_p5 = scmp.lt.u32.totalorder %s4653_s11, %s1751_s5 }
 0x6e5   : > { %p4655_p8 = pnand %p4654_p12, %p6587_p0 }
 0x6e6   : > { %p4660_p3 = por %p4659_p6, %p4658_p2 }
 0x6e7   : > { %p4656_p1 = pneg %p4655_p8 }
 0x6e8   : > { %p4662_p4 = por %p4661_p5, %p4660_p3 }
 0x6ea   : > { %p4663_p10 = pnand %p4662_p4, %p4656_p1 }
 0x6ec   : > { %4666 = shalt.err (!%p4663_p10)  }
 0x6ed   : > { %s4667_s6 = scalar_lea.vmem %s1760_s12, 16  ;;  %p4674_p7 = scmp.lt.s32.totalorder %s1760_s12, %s5130_s27 }
 0x6ee   : > { %p4668_p11 = scmp.ne.s32.totalorder %s1760_s12, %s4667_s6  ;;  %p4675_p12 = scmp.lt.s32.totalorder %s5156_s20, %s4667_s6 }
 0x6f0   : > { %p4669_p9 = pnand %p4668_p11, %p6587_p0  ;;  %p4676_p8 = por %p4675_p12, %p4674_p7 }
 0x6f2   : > { %p4670_p13 = pneg %p4669_p9 }
 0x6f4   : > { %p4677_p2 = pnand %p4676_p8, %p4670_p13 }
 0x6f6   : > { %4680 = shalt.err (!%p4677_p2)  }
 0x6f7   : > { %2902 = dma.hbm_to_vmem [thread:$0]  (%p6587_p0), %s1751_s5, 16, %s1760_s12, %s6569_s7 }
 0x6f8   : > { %s2720_s9 = sshll.u32 %s7135_s26, 4  ;;  %s1772_s10 = sshll.u32 %s2094_s0, 4  ;;  %s1773_s10 = int_to_ptr.vmem [resolvable:$true] %s1772_s10 }
 0x6f9   : > { %s1764_s2 = scalar_lea.hbm %s6905_s3, %s2720_s9 }
 0x6fa   : > { %s4681_s17 = scalar_lea.hbm %s1764_s2, 16  ;;  %p4686_p5 = scmp.lt.u32.totalorder %s1764_s2, %s6905_s3 }
 0x6fb   : > { %p4682_p1 = scmp.ne.s32.totalorder %s1764_s2, %s4681_s17  ;;  %p4687_p4 = scmp.lt.u32.totalorder %s5147_s16, %s4681_s17 }
 0x6fc   : > { %p4689_p11 = scmp.lt.u32.totalorder %s4681_s17, %s1764_s2 }
 0x6fd   : > { %p4683_p6 = pnand %p4682_p1, %p6587_p0  ;;  %p4688_p10 = por %p4687_p4, %p4686_p5 }
 0x6ff   : > { %p4684_p3 = pneg %p4683_p6  ;;  %p4690_p9 = por %p4689_p11, %p4688_p10 }
 0x701   : > { %p4691_p13 = pnand %p4690_p9, %p4684_p3 }
 0x703   : > { %4694 = shalt.err (!%p4691_p13)  }
 0x704   : > { %s4695_s26 = scalar_lea.vmem %s1773_s10, 16  ;;  %p4702_p2 = scmp.lt.s32.totalorder %s1773_s10, %s5130_s27 }
 0x705   : > { %p4696_p7 = scmp.ne.s32.totalorder %s1773_s10, %s4695_s26  ;;  %p4703_p1 = scmp.lt.s32.totalorder %s5156_s20, %s4695_s26 }
 0x707   : > { %p4697_p12 = pnand %p4696_p7, %p6587_p0  ;;  %p4704_p6 = por %p4703_p1, %p4702_p2 }
 0x709   : > { %p4698_p8 = pneg %p4697_p12 }
 0x70b   : > { %p4705_p4 = pnand %p4704_p6, %p4698_p8 }
 0x70d   : > { %4708 = shalt.err (!%p4705_p4)  }
 0x70e   : > { %2903 = dma.hbm_to_vmem [thread:$0]  (%p6587_p0), %s1764_s2, 16, %s1773_s10, %s6569_s7 }
 0x70f   : > { %s2097_s5 = scalar_lea.vmem %s6566_s1, 6 [#allocation2]  ;;  %s2721_s12 = sshll.u32 %s7141_s30, 4 }
 0x710   : > { %s1777_s22 = scalar_lea.hbm %s6905_s3, %s2721_s12  ;;  %s1785_s24 = sshll.u32 %s2097_s5, 4  ;;  %s1786_s24 = int_to_ptr.vmem [resolvable:$true] %s1785_s24 }
 0x711   : > { %s2100_s6 = scalar_lea.vmem %s6566_s1, 7 [#allocation2]  ;;  %s4709_s9 = scalar_lea.hbm %s1777_s22, 16 }
 0x712   : > { %p4710_p3 = scmp.ne.s32.totalorder %s1777_s22, %s4709_s9  ;;  %p4714_p11 = scmp.lt.u32.totalorder %s1777_s22, %s6905_s3 }
 0x713   : > { %p4715_p9 = scmp.lt.u32.totalorder %s5147_s16, %s4709_s9  ;;  %p4717_p7 = scmp.lt.u32.totalorder %s4709_s9, %s1777_s22 }
 0x714   : > { %p4711_p5 = pnand %p4710_p3, %p6587_p0 }
 0x715   : > { %p4716_p13 = por %p4715_p9, %p4714_p11 }
 0x716   : > { %p4712_p10 = pneg %p4711_p5 }
 0x717   : > { %p4718_p12 = por %p4717_p7, %p4716_p13 }
 0x719   : > { %p4719_p8 = pnand %p4718_p12, %p4712_p10 }
 0x71b   : > { %4722 = shalt.err (!%p4719_p8)  }
 0x71c   : > { %s4723_s30 = scalar_lea.vmem %s1786_s24, 16  ;;  %p4730_p4 = scmp.lt.s32.totalorder %s1786_s24, %s5130_s27 }
 0x71d   : > { %p4724_p2 = scmp.ne.s32.totalorder %s1786_s24, %s4723_s30  ;;  %p4731_p3 = scmp.lt.s32.totalorder %s5156_s20, %s4723_s30 }
 0x71f   : > { %p4725_p1 = pnand %p4724_p2, %p6587_p0  ;;  %p4732_p5 = por %p4731_p3, %p4730_p4 }
 0x721   : > { %p4726_p6 = pneg %p4725_p1 }
 0x723   : > { %p4733_p9 = pnand %p4732_p5, %p4726_p6 }
 0x725   : > { %4736 = shalt.err (!%p4733_p9)  }
 0x726   : > { %2904 = dma.hbm_to_vmem [thread:$0]  (%p6587_p0), %s1777_s22, 16, %s1786_s24, %s6569_s7 }
 0x727   : > { %s2722_s10 = sshll.u32 %s7147_s14, 4  ;;  %s1798_s2 = sshll.u32 %s2100_s6, 4  ;;  %s1799_s2 = int_to_ptr.vmem [resolvable:$true] %s1798_s2 }
 0x728   : > { %s1790_s4 = scalar_lea.hbm %s6905_s3, %s2722_s10 }
 0x729   : > { %s4737_s26 = scalar_lea.hbm %s1790_s4, 16  ;;  %p4742_p7 = scmp.lt.u32.totalorder %s1790_s4, %s6905_s3 }
 0x72a   : > { %p4738_p10 = scmp.ne.s32.totalorder %s1790_s4, %s4737_s26  ;;  %p4743_p12 = scmp.lt.u32.totalorder %s5147_s16, %s4737_s26 }
 0x72b   : > { %p4745_p2 = scmp.lt.u32.totalorder %s4737_s26, %s1790_s4 }
 0x72c   : > { %p4739_p11 = pnand %p4738_p10, %p6587_p0  ;;  %p4744_p8 = por %p4743_p12, %p4742_p7 }
 0x72e   : > { %p4740_p13 = pneg %p4739_p11  ;;  %p4746_p1 = por %p4745_p2, %p4744_p8 }
 0x730   : > { %p4747_p6 = pnand %p4746_p1, %p4740_p13 }
 0x732   : > { %4750 = shalt.err (!%p4747_p6)  }
 0x733   : > { %s4751_s14 = scalar_lea.vmem %s1799_s2, 16  ;;  %p4758_p9 = scmp.lt.s32.totalorder %s1799_s2, %s5130_s27 }
 0x734   : > { %p4752_p4 = scmp.ne.s32.totalorder %s1799_s2, %s4751_s14  ;;  %p4759_p10 = scmp.lt.s32.totalorder %s5156_s20, %s4751_s14 }
 0x736   : > { %p4753_p3 = pnand %p4752_p4, %p6587_p0  ;;  %p4760_p11 = por %p4759_p10, %p4758_p9 }
 0x738   : > { %p4754_p5 = pneg %p4753_p3 }
 0x73a   : > { %p4761_p7 = pnand %p4760_p11, %p4754_p5 }
 0x73c   : > { %4764 = shalt.err (!%p4761_p7)  }
 0x73d   : > { %2905 = dma.hbm_to_vmem [thread:$0]  (%p6587_p0), %s1790_s4, 16, %s1799_s2, %s6569_s7 }
 0x73e   : > { %s2103_s0 = scalar_lea.vmem %s6566_s1, 8 [#allocation2]  ;;  %s2723_s11 = sshll.u32 %s7153_s15, 4 }
 0x73f   : > { %s1803_s6 = scalar_lea.hbm %s6905_s3, %s2723_s11  ;;  %s1811_s9 = sshll.u32 %s2103_s0, 4  ;;  %s1812_s9 = int_to_ptr.vmem [resolvable:$true] %s1811_s9 }
 0x740   : > { %s2106_s25 = scalar_lea.vmem %s6566_s1, 9 [#allocation2]  ;;  %s4765_s21 = scalar_lea.hbm %s1803_s6, 16 }
 0x741   : > { %p4766_p13 = scmp.ne.s32.totalorder %s1803_s6, %s4765_s21  ;;  %p4770_p2 = scmp.lt.u32.totalorder %s1803_s6, %s6905_s3 }
 0x742   : > { %p4771_p1 = scmp.lt.u32.totalorder %s5147_s16, %s4765_s21  ;;  %p4773_p4 = scmp.lt.u32.totalorder %s4765_s21, %s1803_s6 }
 0x743   : > { %p4767_p12 = pnand %p4766_p13, %p6587_p0 }
 0x744   : > { %p4772_p6 = por %p4771_p1, %p4770_p2 }
 0x745   : > { %p4768_p8 = pneg %p4767_p12 }
 0x746   : > { %p4774_p3 = por %p4773_p4, %p4772_p6 }
 0x748   : > { %p4775_p5 = pnand %p4774_p3, %p4768_p8 }
 0x74a   : > { %4778 = shalt.err (!%p4775_p5)  }
 0x74b   : > { %s4779_s15 = scalar_lea.vmem %s1812_s9, 16  ;;  %p4786_p7 = scmp.lt.s32.totalorder %s1812_s9, %s5130_s27 }
 0x74c   : > { %p4780_p9 = scmp.ne.s32.totalorder %s1812_s9, %s4779_s15  ;;  %p4787_p13 = scmp.lt.s32.totalorder %s5156_s20, %s4779_s15 }
 0x74e   : > { %p4781_p10 = pnand %p4780_p9, %p6587_p0  ;;  %p4788_p12 = por %p4787_p13, %p4786_p7 }
 0x750   : > { %p4782_p11 = pneg %p4781_p10 }
 0x752   : > { %p4789_p1 = pnand %p4788_p12, %p4782_p11 }
 0x754   : > { %4792 = shalt.err (!%p4789_p1)  }
 0x755   : > { %2906 = dma.hbm_to_vmem [thread:$0]  (%p6587_p0), %s1803_s6, 16, %s1812_s9, %s6569_s7 }
 0x756   : > { %s2724_s2 = sshll.u32 %s7159_s28, 4  ;;  %s1824_s17 = sshll.u32 %s2106_s25, 4  ;;  %s1825_s17 = int_to_ptr.vmem [resolvable:$true] %s1824_s17 }
 0x757   : > { %s1816_s26 = scalar_lea.hbm %s6905_s3, %s2724_s2 }
 0x758   : > { %s4793_s5 = scalar_lea.hbm %s1816_s26, 16  ;;  %p4798_p4 = scmp.lt.u32.totalorder %s1816_s26, %s6905_s3 }
 0x759   : > { %p4794_p8 = scmp.ne.s32.totalorder %s1816_s26, %s4793_s5  ;;  %p4799_p3 = scmp.lt.u32.totalorder %s5147_s16, %s4793_s5 }
 0x75a   : > { %p4801_p9 = scmp.lt.u32.totalorder %s4793_s5, %s1816_s26 }
 0x75b   : > { %p4795_p2 = pnand %p4794_p8, %p6587_p0  ;;  %p4800_p5 = por %p4799_p3, %p4798_p4 }
 0x75d   : > { %p4796_p6 = pneg %p4795_p2  ;;  %p4802_p10 = por %p4801_p9, %p4800_p5 }
 0x75f   : > { %p4803_p11 = pnand %p4802_p10, %p4796_p6 }
 0x761   : > { %4806 = shalt.err (!%p4803_p11)  }
 0x762   : > { %s4807_s28 = scalar_lea.vmem %s1825_s17, 16  ;;  %p4814_p1 = scmp.lt.s32.totalorder %s1825_s17, %s5130_s27 }
 0x763   : > { %p4808_p7 = scmp.ne.s32.totalorder %s1825_s17, %s4807_s28  ;;  %p4815_p8 = scmp.lt.s32.totalorder %s5156_s20, %s4807_s28 }
 0x765   : > { %p4809_p13 = pnand %p4808_p7, %p6587_p0  ;;  %p4816_p2 = por %p4815_p8, %p4814_p1 }
 0x767   : > { %p4810_p12 = pneg %p4809_p13 }
 0x769   : > { %p4817_p3 = pnand %p4816_p2, %p4810_p12 }
 0x76b   : > { %4820 = shalt.err (!%p4817_p3)  }
 0x76c   : > { %2907 = dma.hbm_to_vmem [thread:$0]  (%p6587_p0), %s1816_s26, 16, %s1825_s17, %s6569_s7 }
 0x76d   : > { %s2109_s0 = scalar_lea.vmem %s6566_s1, 10 [#allocation2]  ;;  %s2725_s11 = sshll.u32 %s7165_s23, 4 }
 0x76e   : > { %s1829_s6 = scalar_lea.hbm %s6905_s3, %s2725_s11  ;;  %s1837_s9 = sshll.u32 %s2109_s0, 4  ;;  %s1838_s9 = int_to_ptr.vmem [resolvable:$true] %s1837_s9 }
 0x76f   : > { %s2112_s25 = scalar_lea.vmem %s6566_s1, 11 [#allocation2]  ;;  %s4821_s21 = scalar_lea.hbm %s1829_s6, 16 }
 0x770   : > { %p4822_p6 = scmp.ne.s32.totalorder %s1829_s6, %s4821_s21  ;;  %p4826_p9 = scmp.lt.u32.totalorder %s1829_s6, %s6905_s3 }
 0x771   : > { %p4827_p10 = scmp.lt.u32.totalorder %s5147_s16, %s4821_s21  ;;  %p4829_p7 = scmp.lt.u32.totalorder %s4821_s21, %s1829_s6 }
 0x772   : > { %p4823_p4 = pnand %p4822_p6, %p6587_p0 }
 0x773   : > { %p4828_p11 = por %p4827_p10, %p4826_p9 }
 0x774   : > { %p4824_p5 = pneg %p4823_p4 }
 0x775   : > { %p4830_p13 = por %p4829_p7, %p4828_p11 }
 0x777   : > { %p4831_p12 = pnand %p4830_p13, %p4824_p5 }
 0x779   : > { %4834 = shalt.err (!%p4831_p12)  }
 0x77a   : > { %s4835_s23 = scalar_lea.vmem %s1838_s9, 16  ;;  %p4842_p3 = scmp.lt.s32.totalorder %s1838_s9, %s5130_s27 }
 0x77b   : > { %p4836_p1 = scmp.ne.s32.totalorder %s1838_s9, %s4835_s23  ;;  %p4843_p6 = scmp.lt.s32.totalorder %s5156_s20, %s4835_s23 }
 0x77d   : > { %p4837_p8 = pnand %p4836_p1, %p6587_p0  ;;  %p4844_p4 = por %p4843_p6, %p4842_p3 }
 0x77f   : > { %p4838_p2 = pneg %p4837_p8 }
 0x781   : > { %p4845_p9 = pnand %p4844_p4, %p4838_p2 }
 0x783   : > { %4848 = shalt.err (!%p4845_p9)  }
 0x784   : > { %2908 = dma.hbm_to_vmem [thread:$0]  (%p6587_p0), %s1829_s6, 16, %s1838_s9, %s6569_s7 }
 0x785   : > { %s2726_s15 = sshll.u32 %s7171_s29, 4  ;;  %s1850_s2 = sshll.u32 %s2112_s25, 4  ;;  %s1851_s2 = int_to_ptr.vmem [resolvable:$true] %s1850_s2 }
 0x786   : > { %s1842_s4 = scalar_lea.hbm %s6905_s3, %s2726_s15 }
 0x787   : > { %s4849_s26 = scalar_lea.hbm %s1842_s4, 16  ;;  %p4854_p7 = scmp.lt.u32.totalorder %s1842_s4, %s6905_s3 }
 0x788   : > { %p4850_p5 = scmp.ne.s32.totalorder %s1842_s4, %s4849_s26  ;;  %p4855_p13 = scmp.lt.u32.totalorder %s5147_s16, %s4849_s26 }
 0x789   : > { %p4857_p1 = scmp.lt.u32.totalorder %s4849_s26, %s1842_s4 }
 0x78a   : > { %p4851_p10 = pnand %p4850_p5, %p6587_p0  ;;  %p4856_p12 = por %p4855_p13, %p4854_p7 }
 0x78c   : > { %p4852_p11 = pneg %p4851_p10  ;;  %p4858_p8 = por %p4857_p1, %p4856_p12 }
 0x78e   : > { %p4859_p2 = pnand %p4858_p8, %p4852_p11 }
 0x790   : > { %4862 = shalt.err (!%p4859_p2)  }
 0x791   : > { %s4863_s29 = scalar_lea.vmem %s1851_s2, 16  ;;  %p4870_p9 = scmp.lt.s32.totalorder %s1851_s2, %s5130_s27 }
 0x792   : > { %p4864_p3 = scmp.ne.s32.totalorder %s1851_s2, %s4863_s29  ;;  %p4871_p5 = scmp.lt.s32.totalorder %s5156_s20, %s4863_s29 }
 0x794   : > { %p4865_p6 = pnand %p4864_p3, %p6587_p0  ;;  %p4872_p10 = por %p4871_p5, %p4870_p9 }
 0x796   : > { %p4866_p4 = pneg %p4865_p6 }
 0x798   : > { %p4873_p7 = pnand %p4872_p10, %p4866_p4 }
 0x79a   : > { %4876 = shalt.err (!%p4873_p7)  }
 0x79b   : > { %2909 = dma.hbm_to_vmem [thread:$0]  (%p6587_p0), %s1842_s4, 16, %s1851_s2, %s6569_s7 }
 0x79c   : > { %s2115_s14 = scalar_lea.vmem %s6566_s1, 12 [#allocation2]  ;;  %s2727_s28 = sshll.u32 %s7177_s18, 4 }
 0x79d   : > { %s1855_s22 = scalar_lea.hbm %s6905_s3, %s2727_s28  ;;  %s1863_s24 = sshll.u32 %s2115_s14, 4  ;;  %s1864_s24 = int_to_ptr.vmem [resolvable:$true] %s1863_s24 }
 0x79e   : > { %s2118_s6 = scalar_lea.vmem %s6566_s1, 13 [#allocation2]  ;;  %s4877_s9 = scalar_lea.hbm %s1855_s22, 16 }
 0x79f   : > { %p4878_p11 = scmp.ne.s32.totalorder %s1855_s22, %s4877_s9  ;;  %p4882_p1 = scmp.lt.u32.totalorder %s1855_s22, %s6905_s3 }
 0x7a0   : > { %p4883_p8 = scmp.lt.u32.totalorder %s5147_s16, %s4877_s9  ;;  %p4885_p3 = scmp.lt.u32.totalorder %s4877_s9, %s1855_s22 }
 0x7a1   : > { %p4879_p13 = pnand %p4878_p11, %p6587_p0 }
 0x7a2   : > { %p4884_p2 = por %p4883_p8, %p4882_p1 }
 0x7a3   : > { %p4880_p12 = pneg %p4879_p13 }
 0x7a4   : > { %p4886_p6 = por %p4885_p3, %p4884_p2 }
 0x7a6   : > { %p4887_p4 = pnand %p4886_p6, %p4880_p12 }
 0x7a8   : > { %4890 = shalt.err (!%p4887_p4)  }
 0x7a9   : > { %s4891_s18 = scalar_lea.vmem %s1864_s24, 16  ;;  %p4898_p7 = scmp.lt.s32.totalorder %s1864_s24, %s5130_s27 }
 0x7aa   : > { %p4892_p9 = scmp.ne.s32.totalorder %s1864_s24, %s4891_s18  ;;  %p4899_p11 = scmp.lt.s32.totalorder %s5156_s20, %s4891_s18 }
 0x7ac   : > { %p4893_p5 = pnand %p4892_p9, %p6587_p0  ;;  %p4900_p13 = por %p4899_p11, %p4898_p7 }
 0x7ae   : > { %p4894_p10 = pneg %p4893_p5 }
 0x7b0   : > { %p4901_p1 = pnand %p4900_p13, %p4894_p10 }
 0x7b2   : > { %4904 = shalt.err (!%p4901_p1)  }
 0x7b3   : > { %2910 = dma.hbm_to_vmem [thread:$0]  (%p6587_p0), %s1855_s22, 16, %s1864_s24, %s6569_s7 }
 0x7b4   : > { %s2728_s30 = sshll.u32 %s7183_s19, 4  ;;  %s1876_s10 = sshll.u32 %s2118_s6, 4  ;;  %s1877_s10 = int_to_ptr.vmem [resolvable:$true] %s1876_s10 }
 0x7b5   : > { %s1868_s2 = scalar_lea.hbm %s6905_s3, %s2728_s30 }
 0x7b6   : > { %s4905_s17 = scalar_lea.hbm %s1868_s2, 16  ;;  %p4910_p3 = scmp.lt.u32.totalorder %s1868_s2, %s6905_s3 }
 0x7b7   : > { %p4906_p12 = scmp.ne.s32.totalorder %s1868_s2, %s4905_s17  ;;  %p4911_p6 = scmp.lt.u32.totalorder %s5147_s16, %s4905_s17 }
 0x7b8   : > { %p4913_p9 = scmp.lt.u32.totalorder %s4905_s17, %s1868_s2 }
 0x7b9   : > { %p4907_p8 = pnand %p4906_p12, %p6587_p0  ;;  %p4912_p4 = por %p4911_p6, %p4910_p3 }
 0x7bb   : > { %p4908_p2 = pneg %p4907_p8  ;;  %p4914_p5 = por %p4913_p9, %p4912_p4 }
 0x7bd   : > { %p4915_p10 = pnand %p4914_p5, %p4908_p2 }
 0x7bf   : > { %4918 = shalt.err (!%p4915_p10)  }
 0x7c0   : > { %s4919_s19 = scalar_lea.vmem %s1877_s10, 16  ;;  %p4926_p1 = scmp.lt.s32.totalorder %s1877_s10, %s5130_s27 }
 0x7c1   : > { %p4920_p7 = scmp.ne.s32.totalorder %s1877_s10, %s4919_s19  ;;  %p4927_p12 = scmp.lt.s32.totalorder %s5156_s20, %s4919_s19 }
 0x7c3   : > { %p4921_p11 = pnand %p4920_p7, %p6587_p0  ;;  %p4928_p8 = por %p4927_p12, %p4926_p1 }
 0x7c5   : > { %p4922_p13 = pneg %p4921_p11 }
 0x7c7   : > { %p4929_p3 = pnand %p4928_p8, %p4922_p13 }
 0x7c9   : > { %4932 = shalt.err (!%p4929_p3)  }
 0x7ca   : > { %s6929_s26 = sld [smem:[#allocation174_spill]]  ;;  %s2121_s5 = scalar_lea.vmem %s6566_s1, 14 [#allocation2] }
 0x7cb   : > { %2911 = dma.hbm_to_vmem [thread:$0]  (%p6587_p0), %s1868_s2, 16, %s1877_s10, %s6569_s7 }
 0x7cc   : > { %s1889_s0 = sshll.u32 %s2121_s5, 4  ;;  %s2124_s11 = scalar_lea.vmem %s6566_s1, 15 [#allocation2]  ;;  %s1890_s0 = int_to_ptr.vmem [resolvable:$true] %s1889_s0 }
 0x7d0   : > { %s2729_s12 = sshll.u32 %s6929_s26, 4 }
 0x7d1   : > { %s1881_s28 = scalar_lea.hbm %s6905_s3, %s2729_s12 }
 0x7d2   : > { %s4933_s22 = scalar_lea.hbm %s1881_s28, 16  ;;  %p4938_p9 = scmp.lt.u32.totalorder %s1881_s28, %s6905_s3 }
 0x7d3   : > { %p4934_p2 = scmp.ne.s32.totalorder %s1881_s28, %s4933_s22  ;;  %p4939_p5 = scmp.lt.u32.totalorder %s5147_s16, %s4933_s22 }
 0x7d4   : > { %p4941_p7 = scmp.lt.u32.totalorder %s4933_s22, %s1881_s28 }
 0x7d5   : > { %p4935_p6 = pnand %p4934_p2, %p6587_p0  ;;  %p4940_p10 = por %p4939_p5, %p4938_p9 }
 0x7d7   : > { %p4936_p4 = pneg %p4935_p6  ;;  %p4942_p11 = por %p4941_p7, %p4940_p10 }
 0x7d9   : > { %p4943_p13 = pnand %p4942_p11, %p4936_p4 }
 0x7db   : > { %4946 = shalt.err (!%p4943_p13)  }
 0x7dc   : > { %s4947_s9 = scalar_lea.vmem %s1890_s0, 16  ;;  %p4954_p3 = scmp.lt.s32.totalorder %s1890_s0, %s5130_s27 }
 0x7dd   : > { %p4948_p1 = scmp.ne.s32.totalorder %s1890_s0, %s4947_s9  ;;  %p4955_p2 = scmp.lt.s32.totalorder %s5156_s20, %s4947_s9 }
 0x7df   : > { %p4949_p12 = pnand %p4948_p1, %p6587_p0  ;;  %p4956_p6 = por %p4955_p2, %p4954_p3 }
 0x7e1   : > { %p4950_p8 = pneg %p4949_p12 }
 0x7e3   : > { %p4957_p5 = pnand %p4956_p6, %p4950_p8 }
 0x7e5   : > { %4960 = shalt.err (!%p4957_p5)  }
 0x7e6   : > { %s6930_s1 = sld [smem:[#allocation175_spill]]  ;;  %s1902_s21 = sshll.u32 %s2124_s11, 4  ;;  %s1903_s21 = int_to_ptr.vmem [resolvable:$true] %s1902_s21 }
 0x7e7   : > { %2912 = dma.hbm_to_vmem [thread:$0]  (%p6587_p0), %s1881_s28, 16, %s1890_s0, %s6569_s7 }
 0x7ec   : > { %s2730_s25 = sshll.u32 %s6930_s1, 4 }
 0x7ed   : > { %s1894_s10 = scalar_lea.hbm %s6905_s3, %s2730_s25 }
 0x7ee   : > { %s4961_s23 = scalar_lea.hbm %s1894_s10, 16  ;;  %p4966_p7 = scmp.lt.u32.totalorder %s1894_s10, %s6905_s3 }
 0x7ef   : > { %p4962_p4 = scmp.ne.s32.totalorder %s1894_s10, %s4961_s23  ;;  %p4967_p11 = scmp.lt.u32.totalorder %s5147_s16, %s4961_s23 }
 0x7f0   : > { %p4969_p1 = scmp.lt.u32.totalorder %s4961_s23, %s1894_s10 }
 0x7f1   : > { %p4963_p9 = pnand %p4962_p4, %p6587_p0  ;;  %p4968_p13 = por %p4967_p11, %p4966_p7 }
 0x7f3   : > { %p4964_p10 = pneg %p4963_p9  ;;  %p4970_p12 = por %p4969_p1, %p4968_p13 }
 0x7f5   : > { %p4971_p8 = pnand %p4970_p12, %p4964_p10 }
 0x7f7   : > { %4974 = shalt.err (!%p4971_p8)  }
 0x7f8   : > { %s4975_s17 = scalar_lea.vmem %s1903_s21, 16  ;;  %p4982_p5 = scmp.lt.s32.totalorder %s1903_s21, %s5130_s27 }
 0x7f9   : > { %p4976_p3 = scmp.ne.s32.totalorder %s1903_s21, %s4975_s17  ;;  %p4983_p4 = scmp.lt.s32.totalorder %s5156_s20, %s4975_s17 }
 0x7fb   : > { %p4977_p2 = pnand %p4976_p3, %p6587_p0  ;;  %p4984_p9 = por %p4983_p4, %p4982_p5 }
 0x7fd   : > { %p4978_p6 = pneg %p4977_p2 }
 0x7ff   : > { %p4985_p7 = pnand %p4984_p9, %p4978_p6 }
 0x801   : > { %4988 = shalt.err (!%p4985_p7)  }
 0x802   : > { %2913 = dma.hbm_to_vmem [thread:$0]  (%p6587_p0), %s1894_s10, 16, %s1903_s21, %s6569_s7  ;;  %v1647_v6 = vpop.xlane.xlu0 %1646  ;;  %v1653_v8 = vpop.xlane.xlu1 %1652 }
 0x803   : > { %v1656_v7 = vmul.f32 0.0078125, %v1647_v6  ;;  %v1658_v10 = vmul.f32 0.0078125, %v1653_v8  ;;  %s6931_s13 = sld [smem:[#allocation173_spill]] }
 0x805   : > { %v1660_v9 = vmul.f32 %v1656_v7, %v1656_v7 }
 0x806   : > { %v1649_v11 = vpop.xlane.xlu0 %1648  ;;  %v1655_v14 = vpop.xlane.xlu1 %1654 }
 0x807   : > { %v1662_v12 = vsub.f32 %v1658_v10, %v1660_v9  ;;  %v1657_v13 = vmul.f32 0.0078125, %v1649_v11  ;;  %v1659_v17 = vmul.f32 0.0078125, %v1655_v14 }
 0x809   : > { %v1664_v15 = vadd.f32 1e-06, %v1662_v12  ;;  %v1661_v16 = vmul.f32 %v1657_v13, %v1657_v13  ;;  %s6932_s7 = sshll.u32 %s6931_s13, 4  ;;  %s1435_s22 = sadd.s32 1, %s6931_s13  }
 0x80a   : > { %s1691_s8 = scalar_lea.vmem [#allocation6], %s6932_s7  ;;  %p1432_p0 = scmp.ge.s32.totalorder %s1435_s22, 32  }
 0x80b   : > { %2991 = vrsqrt.f32 %v1664_v15  ;;  %v1663_v18 = vsub.f32 %v1659_v17, %v1661_v16  ;;  %s5090_s4 = smov (%p1432_p0), [#allocation6]  }
 0x80c   :  { %s1911_s19 = sshll.u32 (%p1432_p0), %s5090_s4, 4  ;;  %s1912_s19 = int_to_ptr.vmem [resolvable:$true] %s1911_s19 }
 0x80d   : > { %v1665_v19 = vadd.f32 1e-06, %v1663_v18  ;;  %s4989_s26 = scalar_lea.vmem (%p1432_p0), %s1912_s19, 8192  ;;  %p4994_p11 = scmp.lt.s32.totalorder (%p1432_p0), %s1912_s19, %s1912_s19 }
 0x80e   :  { %p4990_p10 = scmp.ne.s32.totalorder (%p1432_p0), %s1912_s19, %s4989_s26  ;;  %p4995_p13 = scmp.lt.s32.totalorder (%p1432_p0), %s4989_s26, %s4989_s26 }
 0x80f   : > { %2993 = vrsqrt.f32 %v1665_v19 }
 0x810   :  { %p4996_p1 = por (%p1432_p0), %p4995_p13, %p4994_p11 }
 0x812   :  { %p4997_p12 = pnand (%p1432_p0), %p4996_p1, %p4990_p10 }
 0x815   : > { %v2992_v20 = vpop.eup %2991 }
 0x816   : > { %v1674_v21 = vmul.f32 %v2992_v20, %v6120_v0 }
 0x818   : > { %v1676_v22 = vmul.f32 %v1674_v21, %v1656_v7  ;;  %v1687_v25 = vmul.f32 %v1674_v21, %v6574_v2 }
 0x819   : > { %v2994_v23 = vpop.eup %2993 }
 0x81a   : > { %v1684_v24 = vsub.f32 %v6125_v1, %v1676_v22  ;;  %v1675_v26 = vmul.f32 %v2994_v23, %v6120_v0 }
 0x81c   : > { %v1689_v27 = vadd.f32 %v1687_v25, %v1684_v24  ;;  %v1677_v28 = vmul.f32 %v1675_v26, %v1657_v13  ;;  %v1688_v30 = vmul.f32 %v1675_v26, %v6577_v3  ;;  %1434 = sbr.rel (!%p1432_p0) target bundleno = 1589 (0x635), region = 526 }
 0x81e   : > { %1692 = vst [vmem:[%s1691_s8] sm:$0xff] %v1689_v27  ;;  %v1685_v29 = vsub.f32 %v6125_v1, %v1677_v28 }
 0x820   : > { %v1690_v31 = vadd.f32 %v1688_v30, %v1685_v29 }
 0x822   : > { %1693 = vst [vmem:[%s1691_s8 + $0x8] sm:$0xff] %v1690_v31 }
 0x823   :  { %5000 = shalt.err (!%p4997_p12)
}
 0x824   :  { %s6933_s29 = sld [smem:[#allocation176_spill]] }
 0x82a   :  { %s5001_s14 = scalar_lea.hbm %s6933_s29, 8192 }
 0x82b   :  { %p5002_p8 = scmp.ne.s32.totalorder %s6933_s29, %s5001_s14  ;;  %p5005_p3 = scmp.lt.u32.totalorder %s5001_s14, %s6933_s29 }
 0x82d   :  { %p5007_p2 = pnand %p5005_p3, %p5002_p8 }
 0x82f   :  { %5010 = shalt.err (!%p5007_p2)
}
 0x830   :  { %s5091_s3 = smov 128   ;;  %s5092_s27 = smov 8  }
 0x831   :  { %1917 = dma.vmem_to_hbm [thread:$0]  %s1912_s19, 8192, %s6933_s29, [#allocation7], %s5091_s3, %s5091_s3, %s5092_s27  }
 0x832   :  { %5019 = dma.done.wait [#allocation7], 8192  }
 0x833   :  { %5020 = vsyncadd [#allocation7], 4294959104 }
 0x834   :  { %1921 = vsyncpa [#allocation7], 1 }
 0x835   :  { %1922 = vsyncmov [#allocation3] }
 0x838   :  { %s1923_s24 = vpop.sfrf %1922 }
 0x839   :  { %p2731_p6 = scmp.ne.s32.totalorder %s1923_s24, 0 }
 0x83b   :  { %1927 = shalt.err (%p2731_p6)  }
 0x83c   :  { %1929 = vsyncmov [#allocation3 + $0x1] }
 0x83f   :  { %s1930_s6 = vpop.sfrf %1929 }
 0x840   :  { %p2732_p5 = scmp.ne.s32.totalorder %s1930_s6, 0 }
 0x842   :  { %1934 = shalt.err (%p2732_p5)  }
 0x843   :  { %1936 = vsyncmov [#allocation3 + $0x2] }
 0x846   :  { %s1937_s9 = vpop.sfrf %1936 }
 0x847   :  { %p2733_p4 = scmp.ne.s32.totalorder %s1937_s9, 0 }
 0x849   :  { %1941 = shalt.err (%p2733_p4)  }
 0x84a   :  { %1943 = vsyncmov [#allocation3 + $0x3] }
 0x84d   :  { %s1944_s1 = vpop.sfrf %1943 }
 0x84e   :  { %p2734_p9 = scmp.ne.s32.totalorder %s1944_s1, 0 }
 0x850   :  { %1948 = shalt.err (%p2734_p9)  }

</bundles_post_ra>
